<compile_context>
chip_gen: v7x
topology: tpu7x:2x2x1
jax: 0.10.0
libtpu: 0.0.40
codegen_flags: <defaults>
</compile_context>

<pallas_src>
import math

import jax
import jax.numpy as jnp
import numpy as np
from jax import lax
from jax.experimental import pallas as pl
from jax.experimental.pallas import tpu as pltpu


# -----------------------------------------------------------------------------
# Kernel 1: conv1 as a single full-K GEMM (BN folded into weights) + bias + ReLU
# -----------------------------------------------------------------------------
def _gemm_bias_relu_kernel(x_ref, w_ref, b_ref, o_ref):
    """x_ref: (M, 9*Cin) bf16; w_ref: (9*Cin, tn) bf16; b_ref: (1, tn) f32."""
    y = jnp.dot(x_ref[...], w_ref[...], preferred_element_type=jnp.float32)
    o_ref[...] = jnp.maximum(y + b_ref[...], 0.0).astype(o_ref.dtype)


# -----------------------------------------------------------------------------
# Kernel 2: fused conv2 + conv3 (dense-expanded) + global-avg-pool + FC head
# -----------------------------------------------------------------------------
def _head_kernel(t2_ref, w2_ref, b2_ref, w3_ref, b3_ref, wfc_ref, bfc_ref,
                 logits_ref, pooled_ref):
    # conv2: single full-K GEMM (+ folded-BN bias + ReLU) -> (N*16, 128)
    y2 = jnp.dot(t2_ref[...], w2_ref[...], preferred_element_type=jnp.float32)
    y2 = jnp.maximum(y2 + b2_ref[...], 0.0)
    n = pooled_ref.shape[0]
    sp = y2.shape[0] // n                      # conv2 spatial positions / image
    y2b = y2.astype(jnp.bfloat16)

    # Flatten to (N, sp*C2) with safe row-slice + lane-concat
    # (avoids a sublane->lane value reshape whose lowering is uncertain).
    slabs = []
    for q in range(sp):
        rows = [y2b[i * sp + q:i * sp + q + 1, :] for i in range(n)]
        slabs.append(jnp.concatenate(rows, axis=0))            # (N, C2)
    x2 = jnp.concatenate(slabs, axis=1)                        # (N, sp*C2)

    # conv3 (3x3 / stride-2 / pad-1 on the tiny map) as one dense GEMM whose
    # weight matrix was expanded at param-prep time -> (N, npos*C3)
    y3 = jnp.dot(x2, w3_ref[...], preferred_element_type=jnp.float32)
    y3 = jnp.maximum(y3 + b3_ref[...], 0.0)

    # global average pool over the conv3 output positions (lane-block adds)
    c3 = pooled_ref.shape[1]
    npos = y3.shape[1] // c3
    pooled = y3[:, 0:c3]
    for i in range(1, npos):
        pooled = pooled + y3[:, i * c3:(i + 1) * c3]
    pooled = pooled * (1.0 / npos)
    pooled_ref[...] = pooled.astype(pooled_ref.dtype)

    # Linear(128, 2)
    logits = jnp.dot(pooled, wfc_ref[...], preferred_element_type=jnp.float32)
    logits_ref[...] = (logits + bfc_ref[...]).astype(logits_ref.dtype)


# -----------------------------------------------------------------------------
# Wrapper-side im2col (single fused XLA producer per layer input, bf16)
# -----------------------------------------------------------------------------
def _im2col_3x3_s2(x_nhwc):
    """3x3 / stride-2 / pad-1 im2col -> (N*OH*OW, 9*C); cols are tap-major."""
    n, h, w, c = x_nhwc.shape
    assert h % 2 == 0 and w % 2 == 0, "stride-2 pattern assumes even H/W"
    oh, ow = h // 2, w // 2
    xp = jnp.pad(x_nhwc, ((0, 0), (1, 1), (1, 1), (0, 0)))
    cols = []
    for kh in range(3):
        for kw in range(3):
            t = xp[:, kh:kh + 2 * oh:2, kw:kw + 2 * ow:2, :]
            cols.append(t.reshape(n * oh * ow, c))
    return jnp.concatenate(cols, axis=1), (n, oh, ow)


def _conv1_tile_cols(cout):
    """2-way output-channel split only pays on dual-TensorCore v7x (megacore)."""
    try:
        kind = jax.devices()[0].device_kind.lower()
    except Exception:
        kind = ""
    if ("v7" in kind or "7x" in kind) and cout > 256 and cout % 256 == 0:
        return 256
    return cout


def _conv1_call(t1, w1k, b1):
    m, k = t1.shape
    cout = w1k.shape[1]
    tn = _conv1_tile_cols(cout)
    assert cout % tn == 0
    return pl.pallas_call(
        _gemm_bias_relu_kernel,
        out_shape=jax.ShapeDtypeStruct((m, cout), jnp.bfloat16),
        grid_spec=pltpu.PrefetchScalarGridSpec(
            num_scalar_prefetch=0,
            grid=(cout // tn,),
            in_specs=[
                pl.BlockSpec((m, k), lambda j: (0, 0)),
                pl.BlockSpec((k, tn), lambda j: (0, j)),
                pl.BlockSpec((1, tn), lambda j: (0, j)),
            ],
            out_specs=pl.BlockSpec((m, tn), lambda j: (0, j)),
        ),
        compiler_params=pltpu.CompilerParams(
            dimension_semantics=("parallel",),
            vmem_limit_bytes=32 << 20),
    )(t1, w1k, b1)


def _head_call(t2, w2k, b2, w3d, b3t, w_fc, b_fc, *, n):
    vmem = pl.BlockSpec(memory_space=pltpu.MemorySpace.VMEM)
    c3 = w_fc.shape[0]
    return pl.pallas_call(
        _head_kernel,
        out_shape=(jax.ShapeDtypeStruct((n, 2), jnp.float32),
                   jax.ShapeDtypeStruct((n, c3), jnp.float32)),
        in_specs=[vmem] * 7,
        out_specs=(vmem, vmem),
        compiler_params=pltpu.CompilerParams(vmem_limit_bytes=32 << 20),
    )(t2, w2k, b2, w3d, b3t, w_fc, b_fc)


# -----------------------------------------------------------------------------
# Parameter prep: fold BN(eval) scale into bf16 weights; expand conv3 densely
# -----------------------------------------------------------------------------
def _expand_conv3_dense(w3s, ih, iw):
    """(3,3,Cin,Cout) with BN scale folded -> dense (ih*iw*Cin, oh*ow*Cout)."""
    w3s = np.asarray(w3s, dtype=np.float32)
    cin, cout = w3s.shape[2], w3s.shape[3]
    oh, ow = ih // 2, iw // 2
    big = np.zeros((ih * iw * cin, oh * ow * cout), np.float32)
    for ph in range(oh):
        for pw in range(ow):
            p = ph * ow + pw
            for kh in range(3):
                for kw in range(3):
                    r, c = 2 * ph + kh - 1, 2 * pw + kw - 1
                    if 0 <= r < ih and 0 <= c < iw:
                        q = r * iw + c
                        big[q * cin:(q + 1) * cin, p * cout:(p + 1) * cout] = w3s[kh, kw]
    return jnp.asarray(big).astype(jnp.bfloat16)


def make_params(key, in_hw=16):
    ks = jax.random.split(key, 8)

    def conv_w(k, cin, cout):           # HWIO = (3, 3, Cin, Cout), f32
        return jax.random.normal(k, (3, 3, cin, cout), jnp.float32) * (
            1.0 / math.sqrt(9 * cin))

    def bn(k, c, eps=1e-5):             # eval-mode BN folded into scale/bias
        k1, k2, k3, k4 = jax.random.split(k, 4)
        gamma = 1.0 + 0.1 * jax.random.normal(k1, (c,), jnp.float32)
        beta = 0.1 * jax.random.normal(k2, (c,), jnp.float32)
        mean = 0.1 * jax.random.normal(k3, (c,), jnp.float32)
        var = jnp.abs(jax.random.normal(k4, (c,), jnp.float32)) + 0.5
        scale = gamma / jnp.sqrt(var + eps)
        bias = beta - mean * scale
        return scale, bias

    w1 = conv_w(ks[0], 512, 512); s1, b1 = bn(ks[1], 512)
    w2 = conv_w(ks[2], 512, 128); s2, b2 = bn(ks[3], 128)
    w3 = conv_w(ks[4], 128, 128); s3, b3 = bn(ks[5], 128)
    w_fc = jax.random.normal(ks[6], (128, 2), jnp.float32) / math.sqrt(128.0)
    b_fc = 0.01 * jax.random.normal(ks[7], (2,), jnp.float32)

    def fold(w, s):   # fold BN scale; (3,3,Cin,Cout) -> (9*Cin, Cout) bf16
        return (w * s).reshape(9 * w.shape[2], w.shape[3]).astype(jnp.bfloat16)

    m2 = in_hw // 4                      # conv2 output spatial (conv3 input)
    m3 = in_hw // 8                      # conv3 output spatial

    return dict(
        # plain-JAX reference weights
        w1_hwio=w1, bn1=(s1, b1), w2_hwio=w2, bn2=(s2, b2),
        w3_hwio=w3, bn3=(s3, b3), w_fc=w_fc, b_fc=b_fc,
        # kernel-side, BN-scale-folded bf16 weights + biases
        k_w1=fold(w1, s1), k_b1=b1.reshape(1, -1),
        k_w2=fold(w2, s2), k_b2=b2.reshape(1, -1),
        k_w3=_expand_conv3_dense(w3 * s3, m2, m2),
        k_b3=jnp.tile(b3, m3 * m3).reshape(1, -1),
        k_bfc=b_fc.reshape(1, -1),
    )


# -----------------------------------------------------------------------------
# Forward pass (2 pallas_calls total) and plain-JAX reference
# -----------------------------------------------------------------------------
def image_layer3_forward(x_nchw, p):
    n, c, h, w = x_nchw.shape
    assert h % 2 == 0 and w % 2 == 0
    # bf16 before the transpose: halves the bytes moved by the XLA prologue.
    x = jnp.transpose(x_nchw.astype(jnp.bfloat16), (0, 2, 3, 1))     # NHWC bf16
    assert 9 * c == p["k_w1"].shape[0]

    # conv1 + BN + ReLU
    t1, (_, oh1, ow1) = _im2col_3x3_s2(x)
    y1 = _conv1_call(t1, p["k_w1"], p["k_b1"])                       # (N*OH*OW, 512)
    y1 = y1.reshape(n, oh1, ow1, p["k_w1"].shape[1])

    # fused conv2 + conv3 + global-avg-pool + fc
    t2, (_, oh2, ow2) = _im2col_3x3_s2(y1)
    assert oh2 * ow2 * p["k_w2"].shape[1] == p["k_w3"].shape[0], (
        "conv3 dense matrix was built for a different input size")
    logits, pooled = _head_call(t2, p["k_w2"], p["k_b2"], p["k_w3"], p["k_b3"],
                                p["w_fc"], p["k_bfc"], n=n)
    return logits, pooled                                            # (fc(x), x)


def reference_forward(x_nchw, p):
    """Plain-JAX f32 reference (lax conv) for a numerical sanity check."""
    x = jnp.transpose(x_nchw, (0, 2, 3, 1)).astype(jnp.float32)
    for wk, bnk in (("w1_hwio", "bn1"), ("w2_hwio", "bn2"), ("w3_hwio", "bn3")):
        scale, bias = p[bnk]
        x = lax.conv_general_dilated(
            x, p[wk], window_strides=(2, 2), padding=((1, 1), (1, 1)),
            dimension_numbers=("NHWC", "HWIO", "NHWC"))
        x = jnp.maximum(x * scale + bias, 0.0)
    pooled = jnp.mean(x, axis=(1, 2))
    logits = pooled @ p["w_fc"] + p["b_fc"]
    return logits, pooled


if __name__ == "__main__":
    key = jax.random.PRNGKey(0)
    kx, kp = jax.random.split(key)
    # conv1 requires 512 input channels; spatial 16 -> 8 -> 4 -> 2 -> pooled.
    x = jax.random.normal(kx, (2, 512, 16, 16), jnp.float32)          # NCHW input
    params = make_params(kp, in_hw=16)

    logits, pooled = jax.jit(image_layer3_forward)(x, params)
    jax.block_until_ready((logits, pooled))
    assert logits.shape == (2, 2) and pooled.shape == (2, 128)

    ref_logits, ref_pooled = jax.jit(reference_forward)(x, params)
    jax.block_until_ready((ref_logits, ref_pooled))
    # loose tolerance: kernel path runs bf16 activations/weights, reference is f32
    np.testing.assert_allclose(np.asarray(logits), np.asarray(ref_logits),
                               rtol=0.1, atol=0.1)
    np.testing.assert_allclose(np.asarray(pooled), np.asarray(ref_pooled),
                               rtol=0.1, atol=0.1)
    print("KERNEL_OK")
</pallas_src>

<mosaic_0001>
module attributes {stable_mosaic.version = 11 : i64} {
  func.func @_gemm_bias_relu_kernel(%arg0: i32, %arg1: memref<128x4608xbf16, #tpu.memory_space<vmem>>, %arg2: memref<4608x512xbf16, #tpu.memory_space<vmem>>, %arg3: memref<1x512xf32, #tpu.memory_space<vmem>>, %arg4: memref<128x512xbf16, #tpu.memory_space<vmem>>) attributes {dimension_semantics = [#tpu.dimension_semantics<parallel>], iteration_bounds = array<i64: 1>, scalar_prefetch = 0 : i64, scratch_operands = 0 : i64, tpu.core_type = #tpu.core_type<tc>, window_params = [{pipeline_mode = #tpu.pipeline_mode<synchronous>, transform_indices = @transform_0, window_bounds = array<i64: 128, 4608>}, {transform_indices = @transform_1, window_bounds = array<i64: 4608, 512>}, {transform_indices = @transform_2, window_bounds = array<i64: 1, 512>}, {transform_indices = @transform_3, window_bounds = array<i64: 128, 512>}]} {
    %c0 = arith.constant 0 : index
    %c0_0 = arith.constant 0 : index
    %0 = vector.load %arg1[%c0, %c0_0] : memref<128x4608xbf16, #tpu.memory_space<vmem>>, vector<128x4608xbf16>
    %c0_1 = arith.constant 0 : index
    %c0_2 = arith.constant 0 : index
    %1 = vector.load %arg2[%c0_1, %c0_2] : memref<4608x512xbf16, #tpu.memory_space<vmem>>, vector<4608x512xbf16>
    %cst = arith.constant dense<0.000000e+00> : vector<128x512xf32>
    %2 = tpu.matmul %0, %1, %cst {dimension_numbers = #tpu.dot_dimension_numbers<[1], [0], [0], [1], [0, 0, 1, 1], [], []>} : vector<128x4608xbf16>, vector<4608x512xbf16>, vector<128x512xf32> -> vector<128x512xf32>
    %c0_3 = arith.constant 0 : index
    %c0_4 = arith.constant 0 : index
    %3 = vector.load %arg3[%c0_3, %c0_4] : memref<1x512xf32, #tpu.memory_space<vmem>>, vector<1x512xf32>
    %4 = vector.broadcast %3 : vector<1x512xf32> to vector<128x512xf32>
    %5 = arith.addf %2, %4 : vector<128x512xf32>
    %cst_5 = arith.constant 0.000000e+00 : f32
    %6 = vector.broadcast %cst_5 : f32 to vector<128x512xf32>
    %7 = arith.maximumf %5, %6 : vector<128x512xf32>
    %8 = arith.truncf %7 : vector<128x512xf32> to vector<128x512xbf16>
    %c0_6 = arith.constant 0 : index
    %c0_7 = arith.constant 0 : index
    %9 = vector.load %arg4[%c0_6, %c0_7] : memref<128x512xbf16, #tpu.memory_space<vmem>>, vector<128x512xbf16>
    tpu.vector_store %arg4[%c0_6, %c0_7], %8 {strides = array<i32>} : memref<128x512xbf16, #tpu.memory_space<vmem>>, vector<128x512xbf16>,
    return
  }
  func.func @transform_0(%arg0: i32) -> (i32, i32) {
    %c0_i32 = arith.constant 0 : i32
    %c0_i32_0 = arith.constant 0 : i32
    %c0_i32_1 = arith.constant 0 : i32
    return %c0_i32, %c0_i32_0 : i32, i32
  }
  func.func @transform_1(%arg0: i32) -> (i32, i32) {
    %c0_i32 = arith.constant 0 : i32
    %c0_i32_0 = arith.constant 0 : i32
    return %c0_i32, %arg0 : i32, i32
  }
  func.func @transform_2(%arg0: i32) -> (i32, i32) {
    %c0_i32 = arith.constant 0 : i32
    %c0_i32_0 = arith.constant 0 : i32
    return %c0_i32, %arg0 : i32, i32
  }
  func.func @transform_3(%arg0: i32) -> (i32, i32) {
    %c0_i32 = arith.constant 0 : i32
    %c0_i32_0 = arith.constant 0 : i32
    return %c0_i32, %arg0 : i32, i32
  }
}

module attributes {stable_mosaic.version = 11 : i64} {
  func.func @_head_kernel(%arg0: memref<32x4608xbf16, #tpu.memory_space<vmem>>, %arg1: memref<4608x128xbf16, #tpu.memory_space<vmem>>, %arg2: memref<1x128xf32, #tpu.memory_space<vmem>>, %arg3: memref<2048x512xbf16, #tpu.memory_space<vmem>>, %arg4: memref<1x512xf32, #tpu.memory_space<vmem>>, %arg5: memref<128x2xf32, #tpu.memory_space<vmem>>, %arg6: memref<1x2xf32, #tpu.memory_space<vmem>>, %arg7: memref<2x2xf32, #tpu.memory_space<vmem>>, %arg8: memref<2x128xf32, #tpu.memory_space<vmem>>) attributes {dimension_semantics = [], scalar_prefetch = 0 : i64, scratch_operands = 0 : i64, tpu.core_type = #tpu.core_type<tc>} {
    %c0 = arith.constant 0 : index
    %c0_0 = arith.constant 0 : index
    %0 = vector.load %arg0[%c0, %c0_0] : memref<32x4608xbf16, #tpu.memory_space<vmem>>, vector<32x4608xbf16>
    %c0_1 = arith.constant 0 : index
    %c0_2 = arith.constant 0 : index
    %1 = vector.load %arg1[%c0_1, %c0_2] : memref<4608x128xbf16, #tpu.memory_space<vmem>>, vector<4608x128xbf16>
    %cst = arith.constant dense<0.000000e+00> : vector<32x128xf32>
    %2 = tpu.matmul %0, %1, %cst {dimension_numbers = #tpu.dot_dimension_numbers<[1], [0], [0], [1], [0, 0, 1, 1], [], []>} : vector<32x4608xbf16>, vector<4608x128xbf16>, vector<32x128xf32> -> vector<32x128xf32>
    %c0_3 = arith.constant 0 : index
    %c0_4 = arith.constant 0 : index
    %3 = vector.load %arg2[%c0_3, %c0_4] : memref<1x128xf32, #tpu.memory_space<vmem>>, vector<1x128xf32>
    %4 = vector.broadcast %3 : vector<1x128xf32> to vector<32x128xf32>
    %5 = arith.addf %2, %4 : vector<32x128xf32>
    %cst_5 = arith.constant 0.000000e+00 : f32
    %6 = vector.broadcast %cst_5 : f32 to vector<32x128xf32>
    %7 = arith.maximumf %5, %6 : vector<32x128xf32>
    %8 = arith.truncf %7 : vector<32x128xf32> to vector<32x128xbf16>
    %9 = vector.extract_strided_slice %8 {offsets = [0, 0], sizes = [1, 128], strides = [1, 1]} : vector<32x128xbf16> to vector<1x128xbf16>
    %10 = vector.extract_strided_slice %8 {offsets = [16, 0], sizes = [1, 128], strides = [1, 1]} : vector<32x128xbf16> to vector<1x128xbf16>
    %11 = tpu.concatenate %9, %10 in 0 : vector<1x128xbf16>, vector<1x128xbf16> -> vector<2x128xbf16>
    %12 = vector.extract_strided_slice %8 {offsets = [1, 0], sizes = [1, 128], strides = [1, 1]} : vector<32x128xbf16> to vector<1x128xbf16>
    %13 = vector.extract_strided_slice %8 {offsets = [17, 0], sizes = [1, 128], strides = [1, 1]} : vector<32x128xbf16> to vector<1x128xbf16>
    %14 = tpu.concatenate %12, %13 in 0 : vector<1x128xbf16>, vector<1x128xbf16> -> vector<2x128xbf16>
    %15 = vector.extract_strided_slice %8 {offsets = [2, 0], sizes = [1, 128], strides = [1, 1]} : vector<32x128xbf16> to vector<1x128xbf16>
    %16 = vector.extract_strided_slice %8 {offsets = [18, 0], sizes = [1, 128], strides = [1, 1]} : vector<32x128xbf16> to vector<1x128xbf16>
    %17 = tpu.concatenate %15, %16 in 0 : vector<1x128xbf16>, vector<1x128xbf16> -> vector<2x128xbf16>
    %18 = vector.extract_strided_slice %8 {offsets = [3, 0], sizes = [1, 128], strides = [1, 1]} : vector<32x128xbf16> to vector<1x128xbf16>
    %19 = vector.extract_strided_slice %8 {offsets = [19, 0], sizes = [1, 128], strides = [1, 1]} : vector<32x128xbf16> to vector<1x128xbf16>
    %20 = tpu.concatenate %18, %19 in 0 : vector<1x128xbf16>, vector<1x128xbf16> -> vector<2x128xbf16>
    %21 = vector.extract_strided_slice %8 {offsets = [4, 0], sizes = [1, 128], strides = [1, 1]} : vector<32x128xbf16> to vector<1x128xbf16>
    %22 = vector.extract_strided_slice %8 {offsets = [20, 0], sizes = [1, 128], strides = [1, 1]} : vector<32x128xbf16> to vector<1x128xbf16>
    %23 = tpu.concatenate %21, %22 in 0 : vector<1x128xbf16>, vector<1x128xbf16> -> vector<2x128xbf16>
    %24 = vector.extract_strided_slice %8 {offsets = [5, 0], sizes = [1, 128], strides = [1, 1]} : vector<32x128xbf16> to vector<1x128xbf16>
    %25 = vector.extract_strided_slice %8 {offsets = [21, 0], sizes = [1, 128], strides = [1, 1]} : vector<32x128xbf16> to vector<1x128xbf16>
    %26 = tpu.concatenate %24, %25 in 0 : vector<1x128xbf16>, vector<1x128xbf16> -> vector<2x128xbf16>
    %27 = vector.extract_strided_slice %8 {offsets = [6, 0], sizes = [1, 128], strides = [1, 1]} : vector<32x128xbf16> to vector<1x128xbf16>
    %28 = vector.extract_strided_slice %8 {offsets = [22, 0], sizes = [1, 128], strides = [1, 1]} : vector<32x128xbf16> to vector<1x128xbf16>
    %29 = tpu.concatenate %27, %28 in 0 : vector<1x128xbf16>, vector<1x128xbf16> -> vector<2x128xbf16>
    %30 = vector.extract_strided_slice %8 {offsets = [7, 0], sizes = [1, 128], strides = [1, 1]} : vector<32x128xbf16> to vector<1x128xbf16>
    %31 = vector.extract_strided_slice %8 {offsets = [23, 0], sizes = [1, 128], strides = [1, 1]} : vector<32x128xbf16> to vector<1x128xbf16>
    %32 = tpu.concatenate %30, %31 in 0 : vector<1x128xbf16>, vector<1x128xbf16> -> vector<2x128xbf16>
    %33 = vector.extract_strided_slice %8 {offsets = [8, 0], sizes = [1, 128], strides = [1, 1]} : vector<32x128xbf16> to vector<1x128xbf16>
    %34 = vector.extract_strided_slice %8 {offsets = [24, 0], sizes = [1, 128], strides = [1, 1]} : vector<32x128xbf16> to vector<1x128xbf16>
    %35 = tpu.concatenate %33, %34 in 0 : vector<1x128xbf16>, vector<1x128xbf16> -> vector<2x128xbf16>
    %36 = vector.extract_strided_slice %8 {offsets = [9, 0], sizes = [1, 128], strides = [1, 1]} : vector<32x128xbf16> to vector<1x128xbf16>
    %37 = vector.extract_strided_slice %8 {offsets = [25, 0], sizes = [1, 128], strides = [1, 1]} : vector<32x128xbf16> to vector<1x128xbf16>
    %38 = tpu.concatenate %36, %37 in 0 : vector<1x128xbf16>, vector<1x128xbf16> -> vector<2x128xbf16>
    %39 = vector.extract_strided_slice %8 {offsets = [10, 0], sizes = [1, 128], strides = [1, 1]} : vector<32x128xbf16> to vector<1x128xbf16>
    %40 = vector.extract_strided_slice %8 {offsets = [26, 0], sizes = [1, 128], strides = [1, 1]} : vector<32x128xbf16> to vector<1x128xbf16>
    %41 = tpu.concatenate %39, %40 in 0 : vector<1x128xbf16>, vector<1x128xbf16> -> vector<2x128xbf16>
    %42 = vector.extract_strided_slice %8 {offsets = [11, 0], sizes = [1, 128], strides = [1, 1]} : vector<32x128xbf16> to vector<1x128xbf16>
    %43 = vector.extract_strided_slice %8 {offsets = [27, 0], sizes = [1, 128], strides = [1, 1]} : vector<32x128xbf16> to vector<1x128xbf16>
    %44 = tpu.concatenate %42, %43 in 0 : vector<1x128xbf16>, vector<1x128xbf16> -> vector<2x128xbf16>
    %45 = vector.extract_strided_slice %8 {offsets = [12, 0], sizes = [1, 128], strides = [1, 1]} : vector<32x128xbf16> to vector<1x128xbf16>
    %46 = vector.extract_strided_slice %8 {offsets = [28, 0], sizes = [1, 128], strides = [1, 1]} : vector<32x128xbf16> to vector<1x128xbf16>
    %47 = tpu.concatenate %45, %46 in 0 : vector<1x128xbf16>, vector<1x128xbf16> -> vector<2x128xbf16>
    %48 = vector.extract_strided_slice %8 {offsets = [13, 0], sizes = [1, 128], strides = [1, 1]} : vector<32x128xbf16> to vector<1x128xbf16>
    %49 = vector.extract_strided_slice %8 {offsets = [29, 0], sizes = [1, 128], strides = [1, 1]} : vector<32x128xbf16> to vector<1x128xbf16>
    %50 = tpu.concatenate %48, %49 in 0 : vector<1x128xbf16>, vector<1x128xbf16> -> vector<2x128xbf16>
    %51 = vector.extract_strided_slice %8 {offsets = [14, 0], sizes = [1, 128], strides = [1, 1]} : vector<32x128xbf16> to vector<1x128xbf16>
    %52 = vector.extract_strided_slice %8 {offsets = [30, 0], sizes = [1, 128], strides = [1, 1]} : vector<32x128xbf16> to vector<1x128xbf16>
    %53 = tpu.concatenate %51, %52 in 0 : vector<1x128xbf16>, vector<1x128xbf16> -> vector<2x128xbf16>
    %54 = vector.extract_strided_slice %8 {offsets = [15, 0], sizes = [1, 128], strides = [1, 1]} : vector<32x128xbf16> to vector<1x128xbf16>
    %55 = vector.extract_strided_slice %8 {offsets = [31, 0], sizes = [1, 128], strides = [1, 1]} : vector<32x128xbf16> to vector<1x128xbf16>
    %56 = tpu.concatenate %54, %55 in 0 : vector<1x128xbf16>, vector<1x128xbf16> -> vector<2x128xbf16>
    %57 = tpu.concatenate %11, %14, %17, %20, %23, %26, %29, %32, %35, %38, %41, %44, %47, %50, %53, %56 in 1 : vector<2x128xbf16>, vector<2x128xbf16>, vector<2x128xbf16>, vector<2x128xbf16>, vector<2x128xbf16>, vector<2x128xbf16>, vector<2x128xbf16>, vector<2x128xbf16>, vector<2x128xbf16>, vector<2x128xbf16>, vector<2x128xbf16>, vector<2x128xbf16>, vector<2x128xbf16>, vector<2x128xbf16>, vector<2x128xbf16>, vector<2x128xbf16> -> vector<2x2048xbf16>
    %c0_6 = arith.constant 0 : index
    %c0_7 = arith.constant 0 : index
    %58 = vector.load %arg3[%c0_6, %c0_7] : memref<2048x512xbf16, #tpu.memory_space<vmem>>, vector<2048x512xbf16>
    %cst_8 = arith.constant dense<0.000000e+00> : vector<2x512xf32>
    %59 = tpu.matmul %57, %58, %cst_8 {dimension_numbers = #tpu.dot_dimension_numbers<[1], [0], [0], [1], [0, 0, 1, 1], [], []>} : vector<2x2048xbf16>, vector<2048x512xbf16>, vector<2x512xf32> -> vector<2x512xf32>
    %c0_9 = arith.constant 0 : index
    %c0_10 = arith.constant 0 : index
    %60 = vector.load %arg4[%c0_9, %c0_10] : memref<1x512xf32, #tpu.memory_space<vmem>>, vector<1x512xf32>
    %61 = vector.broadcast %60 : vector<1x512xf32> to vector<2x512xf32>
    %62 = arith.addf %59, %61 : vector<2x512xf32>
    %cst_11 = arith.constant 0.000000e+00 : f32
    %63 = vector.broadcast %cst_11 : f32 to vector<2x512xf32>
    %64 = arith.maximumf %62, %63 : vector<2x512xf32>
    %65 = vector.extract_strided_slice %64 {offsets = [0, 0], sizes = [2, 128], strides = [1, 1]} : vector<2x512xf32> to vector<2x128xf32>
    %66 = vector.extract_strided_slice %64 {offsets = [0, 128], sizes = [2, 128], strides = [1, 1]} : vector<2x512xf32> to vector<2x128xf32>
    %67 = arith.addf %65, %66 : vector<2x128xf32>
    %68 = vector.extract_strided_slice %64 {offsets = [0, 256], sizes = [2, 128], strides = [1, 1]} : vector<2x512xf32> to vector<2x128xf32>
    %69 = arith.addf %67, %68 : vector<2x128xf32>
    %70 = vector.extract_strided_slice %64 {offsets = [0, 384], sizes = [2, 128], strides = [1, 1]} : vector<2x512xf32> to vector<2x128xf32>
    %71 = arith.addf %69, %70 : vector<2x128xf32>
    %cst_12 = arith.constant 2.500000e-01 : f32
    %72 = vector.broadcast %cst_12 : f32 to vector<2x128xf32>
    %73 = arith.mulf %71, %72 : vector<2x128xf32>
    %c0_13 = arith.constant 0 : index
    %c0_14 = arith.constant 0 : index
    %74 = vector.load %arg8[%c0_13, %c0_14] : memref<2x128xf32, #tpu.memory_space<vmem>>, vector<2x128xf32>
    tpu.vector_store %arg8[%c0_13, %c0_14], %73 {strides = array<i32>} : memref<2x128xf32, #tpu.memory_space<vmem>>, vector<2x128xf32>,
    %c0_15 = arith.constant 0 : index
    %c0_16 = arith.constant 0 : index
    %75 = vector.load %arg5[%c0_15, %c0_16] : memref<128x2xf32, #tpu.memory_space<vmem>>, vector<128x2xf32>
    %cst_17 = arith.constant dense<0.000000e+00> : vector<2x2xf32>
    %76 = tpu.matmul %73, %75, %cst_17 {dimension_numbers = #tpu.dot_dimension_numbers<[1], [0], [0], [1], [0, 0, 1, 1], [], []>} : vector<2x128xf32>, vector<128x2xf32>, vector<2x2xf32> -> vector<2x2xf32>
    %c0_18 = arith.constant 0 : index
    %c0_19 = arith.constant 0 : index
    %77 = vector.load %arg6[%c0_18, %c0_19] : memref<1x2xf32, #tpu.memory_space<vmem>>, vector<1x2xf32>
    %78 = vector.broadcast %77 : vector<1x2xf32> to vector<2x2xf32>
    %79 = arith.addf %76, %78 : vector<2x2xf32>
    %c0_20 = arith.constant 0 : index
    %c0_21 = arith.constant 0 : index
    %80 = vector.load %arg7[%c0_20, %c0_21] : memref<2x2xf32, #tpu.memory_space<vmem>>, vector<2x2xf32>
    tpu.vector_store %arg7[%c0_20, %c0_21], %79 {strides = array<i32>} : memref<2x2xf32, #tpu.memory_space<vmem>>, vector<2x2xf32>,
    return
  }
}

</mosaic_0001>

<bundles_post_ra>
// kernel: image_layer3_forward.3
= control target key start
LH: loop header
LB: loop body
LE: loop exit
PB: predicated region body
PF: predicated region fallthrough
CT: control target
= control target key end

     0   :  { %14 = vsyncpa [#allocation3], 0  ;;  %vm3666_vm0 = vcmask 1040384   ;;  %vm3667_vm1 = vsmask.f32 256  ;;  %s13275_s0 = inlined_call_operand.vmem [shape: bf16[32,4608], index: 0, kind: input, shape index: {}]   ;;  %s13276_s1 = inlined_call_operand.vmem [shape: bf16[4608,128], index: 1, kind: input, shape index: {}]   ;;  %s13277_s2 = inlined_call_operand.vmem [shape: f32[1,128], index: 2, kind: input, shape index: {}]   ;;  %s13278_s3 = inlined_call_operand.vmem [shape: bf16[2048,512], index: 3, kind: input, shape index: {}]   ;;  %s13279_s4 = inlined_call_operand.vmem [shape: f32[1,512], index: 4, kind: input, shape index: {}]   ;;  %s13280_s5 = inlined_call_operand.vmem [shape: f32[128,2], index: 5, kind: input, shape index: {}]   ;;  %s13281_s6 = inlined_call_operand.vmem [shape: f32[1,2], index: 6, kind: input, shape index: {}]   ;;  %s13282_s7 = inlined_call_operand.hbm [shape: f32[2,2], index: 7, kind: output, shape index: {0}]   ;;  %s13283_s8 = inlined_call_operand.hbm [shape: f32[2,128], index: 8, kind: output, shape index: {1}]  }
   0x1   :  { %v9148_v0 = vld [vmem:[%s13276_s1 + $0x40] sm:$0xff]   ;;  %v9152_v4 = vld [vmem:[%s13276_s1 + $0x48] sm:$0xff]   ;;  %v9156_v8 = vld [vmem:[%s13276_s1 + $0x50] sm:$0xff]  }
   0x2   :  { %v9149_v1 = vld [vmem:[%s13276_s1 + $0xc0] sm:$0xff]   ;;  %8503 = vmatprep.subr.bf16.mxu0 %v9148_v0  ;;  %v9153_v5 = vld [vmem:[%s13276_s1 + $0xc8] sm:$0xff]   ;;  %v9157_v9 = vld [vmem:[%s13276_s1 + $0xd0] sm:$0xff]  }
   0x3   :  { %v9150_v2 = vld [vmem:[%s13276_s1] sm:$0xff]   ;;  %8531 = vmatprep.subr.bf16.mxu1 %v9149_v1  ;;  %v9154_v6 = vld [vmem:[%s13276_s1 + $0x8] sm:$0xff]   ;;  %v9158_v10 = vld [vmem:[%s13276_s1 + $0x10] sm:$0xff]  }
   0x4   :  { %v9151_v3 = vld [vmem:[%s13276_s1 + $0x80] sm:$0xff]   ;;  %8504 = vmatpush3.bf16.msra.mxu0 %v9150_v2  ;;  %v9155_v7 = vld [vmem:[%s13276_s1 + $0x88] sm:$0xff]   ;;  %v9159_v11 = vld [vmem:[%s13276_s1 + $0x90] sm:$0xff]  }
   0x5   :  { %8532 = vmatpush3.bf16.msra.mxu1 %v9151_v3  ;;  %8505 = vmatprep.subr.bf16.mxu0 %v9152_v4  ;;  %v9160_v12 = vld [vmem:[%s13276_s1 + $0x58] sm:$0xff]   ;;  %v9164_v16 = vld [vmem:[%s13276_s1 + $0x60] sm:$0xff]   ;;  %v9168_v20 = vld [vmem:[%s13276_s1 + $0x68] sm:$0xff]  }
   0x6   :  { %8533 = vmatprep.subr.bf16.mxu1 %v9153_v5  ;;  %v9161_v13 = vld [vmem:[%s13276_s1 + $0xd8] sm:$0xff]   ;;  %v9165_v17 = vld [vmem:[%s13276_s1 + $0xe0] sm:$0xff]   ;;  %v9169_v21 = vld [vmem:[%s13276_s1 + $0xe8] sm:$0xff]  }
   0x7   :  { %v9162_v14 = vld [vmem:[%s13276_s1 + $0x18] sm:$0xff]   ;;  %v9166_v18 = vld [vmem:[%s13276_s1 + $0x20] sm:$0xff]   ;;  %v9170_v22 = vld [vmem:[%s13276_s1 + $0x28] sm:$0xff]  }
   0x8   :  { %8506 = vmatpush3.bf16.msra.mxu0 %v9154_v6  ;;  %v9163_v15 = vld [vmem:[%s13276_s1 + $0x98] sm:$0xff]   ;;  %v9167_v19 = vld [vmem:[%s13276_s1 + $0xa0] sm:$0xff]   ;;  %v9171_v23 = vld [vmem:[%s13276_s1 + $0xa8] sm:$0xff]  }
   0x9   :  { %8534 = vmatpush3.bf16.msra.mxu1 %v9155_v7  ;;  %8507 = vmatprep.subr.bf16.mxu0 %v9156_v8  ;;  %v9172_v24 = vld [vmem:[%s13276_s1 + $0x70] sm:$0xff]   ;;  %v9176_v28 = vld [vmem:[%s13276_s1 + $0x78] sm:$0xff]   ;;  %v9186_v36 = vld [vmem:[%s13276_s1 + $0x140] sm:$0xff]  }
   0xa   :  { %8535 = vmatprep.subr.bf16.mxu1 %v9157_v9  ;;  %v9173_v25 = vld [vmem:[%s13276_s1 + $0xf0] sm:$0xff]   ;;  %v9177_v29 = vld [vmem:[%s13276_s1 + $0xf8] sm:$0xff]   ;;  %v9187_v37 = vld [vmem:[%s13276_s1 + $0x1c0] sm:$0xff]  }
   0xb   :  { %v9174_v26 = vld [vmem:[%s13276_s1 + $0x30] sm:$0xff]   ;;  %v9178_v30 = vld [vmem:[%s13276_s1 + $0x38] sm:$0xff]   ;;  %v9188_v38 = vld [vmem:[%s13276_s1 + $0x100] sm:$0xff]  }
   0xc   :  { %8508 = vmatpush3.bf16.msra.mxu0 %v9158_v10  ;;  %v9175_v27 = vld [vmem:[%s13276_s1 + $0xb0] sm:$0xff]   ;;  %v9179_v31 = vld [vmem:[%s13276_s1 + $0xb8] sm:$0xff]   ;;  %v9189_v39 = vld [vmem:[%s13276_s1 + $0x180] sm:$0xff]  }
   0xd   :  { %8536 = vmatpush3.bf16.msra.mxu1 %v9159_v11  ;;  %8509 = vmatprep.subr.bf16.mxu0 %v9160_v12  ;;  %v9180_v32 = vld [vmem:[%s13275_s0] ss:$144 sps:$4 sm:$0xff]   ;;  %v9182_v33 = vld [vmem:[%s13275_s0 + $0x4] ss:$144 sps:$4 sm:$0xff]   ;;  %v9183_v34 = vld [vmem:[%s13275_s0 + $0x8] ss:$144 sps:$4 sm:$0xff]  }
   0xe   :  { %8537 = vmatprep.subr.bf16.mxu1 %v9161_v13  ;;  %v9185_v35 = vld [vmem:[%s13275_s0 + $0xc] ss:$144 sps:$4 sm:$0xff]   ;;  %2806 = vmatprep.mubr.bf16.mxu0 %v9182_v33  ;;  %v9194_v44 = vld [vmem:[%s13276_s1 + $0x150] sm:$0xff]   ;;  %v9202_v52 = vld [vmem:[%s13276_s1 + $0x160] sm:$0xff]  }
   0xf   :  { %2855 = vmatprep.mubr.bf16.mxu1 %v9185_v35  ;;  %v9190_v40 = vld [vmem:[%s13276_s1 + $0x148] sm:$0xff]   ;;  %v9195_v45 = vld [vmem:[%s13276_s1 + $0x1d0] sm:$0xff]   ;;  %v9198_v48 = vld [vmem:[%s13276_s1 + $0x158] sm:$0xff]  }
  0x10   :  { %8510 = vmatpush3.bf16.msra.mxu0 %v9162_v14  ;;  %v9191_v41 = vld [vmem:[%s13276_s1 + $0x1c8] sm:$0xff]   ;;  %v9196_v46 = vld [vmem:[%s13276_s1 + $0x110] sm:$0xff]   ;;  %v9199_v49 = vld [vmem:[%s13276_s1 + $0x1d8] sm:$0xff]  }
  0x11   :  { %8538 = vmatpush3.bf16.msra.mxu1 %v9163_v15  ;;  %8511 = vmatprep.subr.bf16.mxu0 %v9164_v16  ;;  %v9192_v42 = vld [vmem:[%s13276_s1 + $0x108] sm:$0xff]   ;;  %v9197_v47 = vld [vmem:[%s13276_s1 + $0x190] sm:$0xff]   ;;  %v9200_v50 = vld [vmem:[%s13276_s1 + $0x118] sm:$0xff]  }
  0x12   :  { %8539 = vmatprep.subr.bf16.mxu1 %v9165_v17  ;;  %v9193_v43 = vld [vmem:[%s13276_s1 + $0x188] sm:$0xff]   ;;  %v9201_v51 = vld [vmem:[%s13276_s1 + $0x198] sm:$0xff]   ;;  %v9203_v53 = vld [vmem:[%s13276_s1 + $0x1e0] sm:$0xff]  }
  0x13   :  { %v9204_v54 = vld [vmem:[%s13276_s1 + $0x120] sm:$0xff]   ;;  %v9206_v56 = vld [vmem:[%s13276_s1 + $0x168] sm:$0xff]   ;;  %v9216_v0 = vld [vmem:[%s13276_s1 + $0x170] sm:$0xff]  }
  0x14   :  { %8512 = vmatpush3.bf16.msra.mxu0 %v9166_v18  ;;  %v9205_v55 = vld [vmem:[%s13276_s1 + $0x1a0] sm:$0xff]   ;;  %v9207_v57 = vld [vmem:[%s13276_s1 + $0x1e8] sm:$0xff]   ;;  %v9217_v1 = vld [vmem:[%s13276_s1 + $0x1f0] sm:$0xff]  }
  0x15   :  { %8540 = vmatpush3.bf16.msra.mxu1 %v9167_v19  ;;  %8513 = vmatprep.subr.bf16.mxu0 %v9168_v20  ;;  %v9208_v58 = vld [vmem:[%s13275_s0 + $0x124] ss:$144 sps:$4 sm:$0xff]   ;;  %v9210_v59 = vld [vmem:[%s13276_s1 + $0x128] sm:$0xff]   ;;  %v9212_v61 = vld [vmem:[%s13275_s0 + $0x120] ss:$144 sps:$4 sm:$0xff]  }
  0x16   :  { %8541 = vmatprep.subr.bf16.mxu1 %v9169_v21  ;;  %v9211_v60 = vld [vmem:[%s13276_s1 + $0x1a8] sm:$0xff]   ;;  %v9218_v2 = vld [vmem:[%s13276_s1 + $0x130] sm:$0xff]   ;;  %v9220_v4 = vld [vmem:[%s13276_s1 + $0x178] sm:$0xff]  }
  0x17   :  { %v9213_v62 = vld [vmem:[%s13275_s0 + $0x12c] ss:$144 sps:$4 sm:$0xff]   ;;  %v9215_v63 = vld [vmem:[%s13275_s0 + $0x128] ss:$144 sps:$4 sm:$0xff]   ;;  %v9219_v3 = vld [vmem:[%s13276_s1 + $0x1b0] sm:$0xff]  }
  0x18   :  { %8514 = vmatpush3.bf16.msra.mxu0 %v9170_v22  ;;  %v9221_v5 = vld [vmem:[%s13276_s1 + $0x1f8] sm:$0xff]   ;;  %v9224_v8 = vld [vmem:[%s13275_s0 + $0x10] ss:$144 sps:$4 sm:$0xff]   ;;  %v9226_v9 = vld [vmem:[%s13275_s0 + $0x14] ss:$144 sps:$4 sm:$0xff]  }
  0x19   :  { %8542 = vmatpush3.bf16.msra.mxu1 %v9171_v23  ;;  %8515 = vmatprep.subr.bf16.mxu0 %v9172_v24  ;;  %v9222_v6 = vld [vmem:[%s13276_s1 + $0x138] sm:$0xff]   ;;  %v9230_v12 = vld [vmem:[%s13276_s1 + $0x240] sm:$0xff]   ;;  %v9234_v16 = vld [vmem:[%s13276_s1 + $0x248] sm:$0xff]  }
  0x1a   :  { %8543 = vmatprep.subr.bf16.mxu1 %v9173_v25  ;;  %v9223_v7 = vld [vmem:[%s13276_s1 + $0x1b8] sm:$0xff]   ;;  %v9231_v13 = vld [vmem:[%s13276_s1 + $0x2c0] sm:$0xff]   ;;  %v9235_v17 = vld [vmem:[%s13276_s1 + $0x2c8] sm:$0xff]  }
  0x1b   :  { %v9227_v10 = vld [vmem:[%s13275_s0 + $0x18] ss:$144 sps:$4 sm:$0xff]   ;;  %v9229_v11 = vld [vmem:[%s13275_s0 + $0x1c] ss:$144 sps:$4 sm:$0xff]   ;;  %v9232_v14 = vld [vmem:[%s13276_s1 + $0x200] sm:$0xff]  }
  0x1c   :  { %8516 = vmatpush3.bf16.msra.mxu0 %v9174_v26  ;;  %v9233_v15 = vld [vmem:[%s13276_s1 + $0x280] sm:$0xff]   ;;  %v9236_v18 = vld [vmem:[%s13276_s1 + $0x208] sm:$0xff]   ;;  %v9241_v22 = vld [vmem:[%s13276_s1 + $0x250] sm:$0xff]  }
  0x1d   :  { %8544 = vmatpush3.bf16.msra.mxu1 %v9175_v27  ;;  %8517 = vmatprep.subr.bf16.mxu0 %v9176_v28  ;;  %v9237_v19 = vld [vmem:[%s13276_s1 + $0x288] sm:$0xff]   ;;  %v9238_v20 = vld [vmem:[%s13275_s0 + $0x134] ss:$144 sps:$4 sm:$0xff]   ;;  %v9240_v21 = vld [vmem:[%s13275_s0 + $0x130] ss:$144 sps:$4 sm:$0xff]  }
  0x1e   :  { %8545 = vmatprep.subr.bf16.mxu1 %v9177_v29  ;;  %v9242_v23 = vld [vmem:[%s13276_s1 + $0x2d0] sm:$0xff]   ;;  %v9243_v24 = vld [vmem:[%s13275_s0 + $0x13c] ss:$144 sps:$4 sm:$0xff]   ;;  %v9247_v27 = vld [vmem:[%s13275_s0 + $0x138] ss:$144 sps:$4 sm:$0xff]  }
  0x1f   :  { %v9245_v25 = vld [vmem:[%s13276_s1 + $0x210] sm:$0xff]   ;;  %v9248_v28 = vld [vmem:[%s13276_s1 + $0x258] sm:$0xff]   ;;  %v9253_v33 = vld [vmem:[%s13276_s1 + $0x2e0] sm:$0xff]  }
  0x20   :  { %8518 = vmatpush3.bf16.msra.mxu0 %v9178_v30  ;;  %v9246_v26 = vld [vmem:[%s13276_s1 + $0x290] sm:$0xff]   ;;  %v9249_v29 = vld [vmem:[%s13276_s1 + $0x2d8] sm:$0xff]   ;;  %v9255_v35 = vld [vmem:[%s13276_s1 + $0x2a0] sm:$0xff]  }
  0x21   :  { %8546 = vmatpush3.bf16.msra.mxu1 %v9179_v31  ;;  %8559 = vmatprep.subr.bf16.mxu0 %v9186_v36  ;;  %v9250_v30 = vld [vmem:[%s13276_s1 + $0x218] sm:$0xff]   ;;  %v9256_v36 = vld [vmem:[%s13276_s1 + $0x268] sm:$0xff]   ;;  %vm11746_vm2 = vmand %vm3666_vm0, %vm3667_vm1 }
  0x22   :  { %8587 = vmatprep.subr.bf16.mxu1 %v9187_v37  ;;  %v9251_v31 = vld [vmem:[%s13276_s1 + $0x298] sm:$0xff]   ;;  %v9257_v37 = vld [vmem:[%s13276_s1 + $0x2e8] sm:$0xff]  }
  0x23   :  { %2807 = vmatmul.mubr.bf16.vlgmr.msra.gmra.mrb[0].mxu0 %v9180_v32  ;;  %v9252_v32 = vld [vmem:[%s13276_s1 + $0x260] sm:$0xff]  }
  0x24   :  { %2856 = vmatmul.mubr.bf16.vlgmr.msra.gmra.mrb[0].mxu1 %v9183_v34  ;;  %8560 = vmatpush3.bf16.msra.mxu0 %v9188_v38  ;;  %v9254_v34 = vld [vmem:[%s13276_s1 + $0x220] sm:$0xff]   ;;  %v9258_v38 = vld [vmem:[%s13276_s1 + $0x228] sm:$0xff]  }
  0x25   :  { %8588 = vmatpush3.bf16.msra.mxu1 %v9189_v39  ;;  %8561 = vmatprep.subr.bf16.mxu0 %v9190_v40  ;;  %v9259_v39 = vld [vmem:[%s13276_s1 + $0x2a8] sm:$0xff]   ;;  %v9260_v40 = vld [vmem:[%s13276_s1 + $0x270] sm:$0xff]  }
  0x26   :  { %8589 = vmatprep.subr.bf16.mxu1 %v9191_v41  ;;  %2814 = vmatprep.mubr.bf16.mxu0 %v9208_v58  ;;  %v9261_v41 = vld [vmem:[%s13276_s1 + $0x2f0] sm:$0xff]   ;;  %v9280_v58 = vld [vmem:[%s13276_s1 + $0x308] sm:$0xff]  }
  0x27   :  { %2863 = vmatprep.mubr.bf16.mxu1 %v9213_v62  ;;  %v9285_v62 = vld [vmem:[%s13276_s1 + $0x350] sm:$0xff]  }
  0x28   :  { %8562 = vmatpush3.bf16.msra.mxu0 %v9192_v42  ;;  %v9262_v42 = vld [vmem:[%s13276_s1 + $0x230] sm:$0xff]  }
  0x29   :  { %8590 = vmatpush3.bf16.msra.mxu1 %v9193_v43  ;;  %8563 = vmatprep.subr.bf16.mxu0 %v9194_v44  ;;  %v9263_v43 = vld [vmem:[%s13276_s1 + $0x2b0] sm:$0xff]   ;;  %v9264_v44 = vld [vmem:[%s13276_s1 + $0x278] sm:$0xff]  }
  0x2a   :  { %8591 = vmatprep.subr.bf16.mxu1 %v9195_v45  ;;  %v9265_v45 = vld [vmem:[%s13276_s1 + $0x2f8] sm:$0xff]  }
  0x2b   :  { %2815 = vmatmul.mubr.bf16.gmra.mrb[4].mxu0 %v9212_v61  ;;  %v9284_v61 = vld [vmem:[%s13275_s0 + $0x140] ss:$144 sps:$4 sm:$0xff]  }
  0x2c   :  { %8564 = vmatpush3.bf16.msra.mxu0 %v9196_v46  ;;  %2864 = vmatmul.mubr.bf16.gmra.mrb[4].mxu1 %v9215_v63  ;;  %v9266_v46 = vld [vmem:[%s13276_s1 + $0x238] sm:$0xff]   ;;  %v9286_v63 = vld [vmem:[%s13276_s1 + $0x3d0] sm:$0xff]  }
  0x2d   :  { %8592 = vmatpush3.bf16.msra.mxu1 %v9197_v47  ;;  %8565 = vmatprep.subr.bf16.mxu0 %v9198_v48  ;;  %v9267_v47 = vld [vmem:[%s13276_s1 + $0x2b8] sm:$0xff]   ;;  %v9268_v48 = vld [vmem:[%s13275_s0 + $0x20] ss:$144 sps:$4 sm:$0xff]  }
  0x2e   :  { %8593 = vmatprep.subr.bf16.mxu1 %v9199_v49  ;;  %2904 = vmatprep.mubr.bf16.mxu0 %v9226_v9  ;;  %v9270_v49 = vld [vmem:[%s13275_s0 + $0x24] ss:$144 sps:$4 sm:$0xff]  }
  0x2f   :  { %2953 = vmatprep.mubr.bf16.mxu1 %v9229_v11  ;;  %v9297_v9 = vld [vmem:[%s13276_s1 + $0x3e0] sm:$0xff]  }
  0x30   :  { %8566 = vmatpush3.bf16.msra.mxu0 %v9200_v50  ;;  %v9271_v50 = vld [vmem:[%s13275_s0 + $0x28] ss:$144 sps:$4 sm:$0xff]   ;;  %v9299_v11 = vld [vmem:[%s13276_s1 + $0x3a0] sm:$0xff]  }
  0x31   :  { %8594 = vmatpush3.bf16.msra.mxu1 %v9201_v51  ;;  %8567 = vmatprep.subr.bf16.mxu0 %v9202_v52  ;;  %v9273_v51 = vld [vmem:[%s13275_s0 + $0x2c] ss:$144 sps:$4 sm:$0xff]   ;;  %v9274_v52 = vld [vmem:[%s13276_s1 + $0x340] sm:$0xff]  }
  0x32   :  { %8595 = vmatprep.subr.bf16.mxu1 %v9203_v53  ;;  %v9275_v53 = vld [vmem:[%s13276_s1 + $0x3c0] sm:$0xff]  }
  0x34   :  { %8568 = vmatpush3.bf16.msra.mxu0 %v9204_v54  ;;  %v9276_v54 = vld [vmem:[%s13276_s1 + $0x300] sm:$0xff]  }
  0x35   :  { %8596 = vmatpush3.bf16.msra.mxu1 %v9205_v55  ;;  %8569 = vmatprep.subr.bf16.mxu0 %v9206_v56  ;;  %v9277_v55 = vld [vmem:[%s13276_s1 + $0x380] sm:$0xff]   ;;  %v9278_v56 = vld [vmem:[%s13276_s1 + $0x348] sm:$0xff]  }
  0x36   :  { %8597 = vmatprep.subr.bf16.mxu1 %v9207_v57  ;;  %v9279_v57 = vld [vmem:[%s13276_s1 + $0x3c8] sm:$0xff]  }
  0x38   :  { %8570 = vmatpush3.bf16.msra.mxu0 %v9210_v59  ;;  %v9281_v59 = vld [vmem:[%s13276_s1 + $0x388] sm:$0xff]  }
  0x39   :  { %8598 = vmatpush3.bf16.msra.mxu1 %v9211_v60  ;;  %8571 = vmatprep.subr.bf16.mxu0 %v9216_v0  ;;  %v9282_v60 = vld [vmem:[%s13275_s0 + $0x144] ss:$144 sps:$4 sm:$0xff]   ;;  %v9287_v0 = vld [vmem:[%s13275_s0 + $0x14c] ss:$144 sps:$4 sm:$0xff]  }
  0x3a   :  { %8599 = vmatprep.subr.bf16.mxu1 %v9217_v1  ;;  %v9289_v1 = vld [vmem:[%s13276_s1 + $0x310] sm:$0xff]  }
  0x3c   :  { %8572 = vmatpush3.bf16.msra.mxu0 %v9218_v2  ;;  %v9290_v2 = vld [vmem:[%s13276_s1 + $0x390] sm:$0xff]  }
  0x3d   :  { %8600 = vmatpush3.bf16.msra.mxu1 %v9219_v3  ;;  %8573 = vmatprep.subr.bf16.mxu0 %v9220_v4  ;;  %v9291_v3 = vld [vmem:[%s13275_s0 + $0x148] ss:$144 sps:$4 sm:$0xff]  }
  0x3e   :  { %8601 = vmatprep.subr.bf16.mxu1 %v9221_v5  ;;  %v9292_v4 = vld [vmem:[%s13276_s1 + $0x358] sm:$0xff]  }
  0x3f   :  { %v9293_v5 = vld [vmem:[%s13276_s1 + $0x3d8] sm:$0xff]  }
  0x40   :  { %8574 = vmatpush3.bf16.msra.mxu0 %v9222_v6  ;;  %v9294_v6 = vld [vmem:[%s13276_s1 + $0x318] sm:$0xff]  }
  0x41   :  { %8602 = vmatpush3.bf16.msra.mxu1 %v9223_v7  ;;  %8615 = vmatprep.subr.bf16.mxu0 %v9230_v12  ;;  %v9295_v7 = vld [vmem:[%s13276_s1 + $0x398] sm:$0xff]   ;;  %v9300_v12 = vld [vmem:[%s13276_s1 + $0x368] sm:$0xff]  }
  0x42   :  { %8643 = vmatprep.subr.bf16.mxu1 %v9231_v13  ;;  %v9301_v13 = vld [vmem:[%s13276_s1 + $0x3e8] sm:$0xff]  }
  0x43   :  { %2905 = vmatmul.mubr.bf16.vlgmr.msra.gmra.mrb[8].mxu0 %v9224_v8  ;;  %v9296_v8 = vld [vmem:[%s13276_s1 + $0x360] sm:$0xff]  }
  0x44   :  { %2954 = vmatmul.mubr.bf16.vlgmr.msra.gmra.mrb[8].mxu1 %v9227_v10  ;;  %8616 = vmatpush3.bf16.msra.mxu0 %v9232_v14  ;;  %v9298_v10 = vld [vmem:[%s13276_s1 + $0x320] sm:$0xff]   ;;  %v9302_v14 = vld [vmem:[%s13276_s1 + $0x328] sm:$0xff]  }
  0x45   :  { %8644 = vmatpush3.bf16.msra.mxu1 %v9233_v15  ;;  %8617 = vmatprep.subr.bf16.mxu0 %v9234_v16  ;;  %v9303_v15 = vld [vmem:[%s13276_s1 + $0x3a8] sm:$0xff]   ;;  %v9304_v16 = vld [vmem:[%s13276_s1 + $0x370] sm:$0xff]  }
  0x46   :  { %8645 = vmatprep.subr.bf16.mxu1 %v9235_v17  ;;  %2912 = vmatprep.mubr.bf16.mxu0 %v9238_v20  ;;  %v9305_v17 = vld [vmem:[%s13276_s1 + $0x3f0] sm:$0xff]   ;;  %v9308_v20 = vld [vmem:[%s13276_s1 + $0x378] sm:$0xff]  }
  0x47   :  { %2961 = vmatprep.mubr.bf16.mxu1 %v9243_v24  ;;  %v9312_v24 = vld [vmem:[%s13275_s0 + $0x30] ss:$144 sps:$4 sm:$0xff]  }
  0x48   :  { %8618 = vmatpush3.bf16.msra.mxu0 %v9236_v18  ;;  %v9306_v18 = vld [vmem:[%s13276_s1 + $0x330] sm:$0xff]  }
  0x49   :  { %8646 = vmatpush3.bf16.msra.mxu1 %v9237_v19  ;;  %8619 = vmatprep.subr.bf16.mxu0 %v9241_v22  ;;  %v9307_v19 = vld [vmem:[%s13276_s1 + $0x3b0] sm:$0xff]   ;;  %v9310_v22 = vld [vmem:[%s13276_s1 + $0x338] sm:$0xff]  }
  0x4a   :  { %8647 = vmatprep.subr.bf16.mxu1 %v9242_v23  ;;  %v9311_v23 = vld [vmem:[%s13276_s1 + $0x3b8] sm:$0xff]  }
  0x4b   :  { %2913 = vmatmul.mubr.bf16.gmra.mrb[12].mxu0 %v9240_v21  ;;  %v9309_v21 = vld [vmem:[%s13276_s1 + $0x3f8] sm:$0xff]  }
  0x4c   :  { %8620 = vmatpush3.bf16.msra.mxu0 %v9245_v25  ;;  %2962 = vmatmul.mubr.bf16.gmra.mrb[12].mxu1 %v9247_v27  ;;  %v9314_v25 = vld [vmem:[%s13275_s0 + $0x34] ss:$144 sps:$4 sm:$0xff]   ;;  %v9317_v27 = vld [vmem:[%s13275_s0 + $0x3c] ss:$144 sps:$4 sm:$0xff]  }
  0x4d   :  { %8648 = vmatpush3.bf16.msra.mxu1 %v9246_v26  ;;  %8621 = vmatprep.subr.bf16.mxu0 %v9248_v28  ;;  %v9315_v26 = vld [vmem:[%s13275_s0 + $0x38] ss:$144 sps:$4 sm:$0xff]   ;;  %v9318_v28 = vld [vmem:[%s13276_s1 + $0x440] sm:$0xff]  }
  0x4e   :  { %8649 = vmatprep.subr.bf16.mxu1 %v9249_v29  ;;  %3002 = vmatprep.mubr.bf16.mxu0 %v9270_v49  ;;  %v9319_v29 = vld [vmem:[%s13276_s1 + $0x4c0] sm:$0xff]  }
  0x4f   :  { %3051 = vmatprep.mubr.bf16.mxu1 %v9273_v51  ;;  %v9341_v49 = vld [vmem:[%s13276_s1 + $0x4e0] sm:$0xff]  }
  0x50   :  { %8622 = vmatpush3.bf16.msra.mxu0 %v9250_v30  ;;  %v9320_v30 = vld [vmem:[%s13276_s1 + $0x400] sm:$0xff]  }
  0x51   :  { %8650 = vmatpush3.bf16.msra.mxu1 %v9251_v31  ;;  %8623 = vmatprep.subr.bf16.mxu0 %v9252_v32  ;;  %v9321_v31 = vld [vmem:[%s13276_s1 + $0x480] sm:$0xff]   ;;  %v9322_v32 = vld [vmem:[%s13276_s1 + $0x448] sm:$0xff]  }
  0x52   :  { %8651 = vmatprep.subr.bf16.mxu1 %v9253_v33  ;;  %v9323_v33 = vld [vmem:[%s13276_s1 + $0x4c8] sm:$0xff]   ;;  %v9343_v51 = vld [vmem:[%s13276_s1 + $0x4a0] sm:$0xff]  }
  0x54   :  { %8624 = vmatpush3.bf16.msra.mxu0 %v9254_v34  ;;  %v9324_v34 = vld [vmem:[%s13276_s1 + $0x408] sm:$0xff]  }
  0x55   :  { %8652 = vmatpush3.bf16.msra.mxu1 %v9255_v35  ;;  %8625 = vmatprep.subr.bf16.mxu0 %v9256_v36  ;;  %v9325_v35 = vld [vmem:[%s13276_s1 + $0x488] sm:$0xff]   ;;  %v9326_v36 = vld [vmem:[%s13275_s0 + $0x154] ss:$144 sps:$4 sm:$0xff]  }
  0x56   :  { %8653 = vmatprep.subr.bf16.mxu1 %v9257_v37  ;;  %v9328_v37 = vld [vmem:[%s13275_s0 + $0x150] ss:$144 sps:$4 sm:$0xff]  }
  0x58   :  { %8626 = vmatpush3.bf16.msra.mxu0 %v9258_v38  ;;  %v9329_v38 = vld [vmem:[%s13276_s1 + $0x450] sm:$0xff]  }
  0x59   :  { %8654 = vmatpush3.bf16.msra.mxu1 %v9259_v39  ;;  %8627 = vmatprep.subr.bf16.mxu0 %v9260_v40  ;;  %v9330_v39 = vld [vmem:[%s13276_s1 + $0x4d0] sm:$0xff]   ;;  %v9331_v40 = vld [vmem:[%s13275_s0 + $0x15c] ss:$144 sps:$4 sm:$0xff]  }
  0x5a   :  { %8655 = vmatprep.subr.bf16.mxu1 %v9261_v41  ;;  %v9333_v41 = vld [vmem:[%s13276_s1 + $0x410] sm:$0xff]  }
  0x5c   :  { %8628 = vmatpush3.bf16.msra.mxu0 %v9262_v42  ;;  %v9334_v42 = vld [vmem:[%s13276_s1 + $0x490] sm:$0xff]  }
  0x5d   :  { %8656 = vmatpush3.bf16.msra.mxu1 %v9263_v43  ;;  %8629 = vmatprep.subr.bf16.mxu0 %v9264_v44  ;;  %v9335_v43 = vld [vmem:[%s13275_s0 + $0x158] ss:$144 sps:$4 sm:$0xff]  }
  0x5e   :  { %8657 = vmatprep.subr.bf16.mxu1 %v9265_v45  ;;  %v9336_v44 = vld [vmem:[%s13276_s1 + $0x458] sm:$0xff]  }
  0x5f   :  { %v9337_v45 = vld [vmem:[%s13276_s1 + $0x4d8] sm:$0xff]  }
  0x60   :  { %8630 = vmatpush3.bf16.msra.mxu0 %v9266_v46  ;;  %v9338_v46 = vld [vmem:[%s13276_s1 + $0x418] sm:$0xff]  }
  0x61   :  { %8658 = vmatpush3.bf16.msra.mxu1 %v9267_v47  ;;  %8671 = vmatprep.subr.bf16.mxu0 %v9274_v52  ;;  %v9339_v47 = vld [vmem:[%s13276_s1 + $0x498] sm:$0xff]   ;;  %v9344_v52 = vld [vmem:[%s13276_s1 + $0x468] sm:$0xff]  }
  0x62   :  { %8699 = vmatprep.subr.bf16.mxu1 %v9275_v53  ;;  %v9345_v53 = vld [vmem:[%s13276_s1 + $0x4e8] sm:$0xff]  }
  0x63   :  { %3003 = vmatmul.mubr.bf16.vlgmr.msra.gmra.mrb[16].mxu0 %v9268_v48  ;;  %v9340_v48 = vld [vmem:[%s13276_s1 + $0x460] sm:$0xff]  }
  0x64   :  { %3052 = vmatmul.mubr.bf16.vlgmr.msra.gmra.mrb[16].mxu1 %v9271_v50  ;;  %8672 = vmatpush3.bf16.msra.mxu0 %v9276_v54  ;;  %v9342_v50 = vld [vmem:[%s13276_s1 + $0x420] sm:$0xff]   ;;  %v9346_v54 = vld [vmem:[%s13276_s1 + $0x428] sm:$0xff]  }
  0x65   :  { %8700 = vmatpush3.bf16.msra.mxu1 %v9277_v55  ;;  %8673 = vmatprep.subr.bf16.mxu0 %v9278_v56  ;;  %v9347_v55 = vld [vmem:[%s13276_s1 + $0x4a8] sm:$0xff]   ;;  %v9348_v56 = vld [vmem:[%s13276_s1 + $0x470] sm:$0xff]  }
  0x66   :  { %8701 = vmatprep.subr.bf16.mxu1 %v9279_v57  ;;  %3010 = vmatprep.mubr.bf16.mxu0 %v9282_v60  ;;  %v9349_v57 = vld [vmem:[%s13276_s1 + $0x4f0] sm:$0xff]   ;;  %v9352_v60 = vld [vmem:[%s13276_s1 + $0x478] sm:$0xff]  }
  0x67   :  { %3059 = vmatprep.mubr.bf16.mxu1 %v9287_v0  ;;  %v9356_v0 = vld [vmem:[%s13275_s0 + $0x40] ss:$144 sps:$4 sm:$0xff]  }
  0x68   :  { %8674 = vmatpush3.bf16.msra.mxu0 %v9280_v58  ;;  %v9350_v58 = vld [vmem:[%s13276_s1 + $0x430] sm:$0xff]  }
  0x69   :  { %8702 = vmatpush3.bf16.msra.mxu1 %v9281_v59  ;;  %8675 = vmatprep.subr.bf16.mxu0 %v9285_v62  ;;  %v9351_v59 = vld [vmem:[%s13276_s1 + $0x4b0] sm:$0xff]   ;;  %v9354_v62 = vld [vmem:[%s13276_s1 + $0x438] sm:$0xff]  }
  0x6a   :  { %8703 = vmatprep.subr.bf16.mxu1 %v9286_v63  ;;  %v9355_v63 = vld [vmem:[%s13276_s1 + $0x4b8] sm:$0xff]  }
  0x6b   :  { %3011 = vmatmul.mubr.bf16.gmra.mrb[20].mxu0 %v9284_v61  ;;  %v9353_v61 = vld [vmem:[%s13276_s1 + $0x4f8] sm:$0xff]  }
  0x6c   :  { %8676 = vmatpush3.bf16.msra.mxu0 %v9289_v1  ;;  %3060 = vmatmul.mubr.bf16.gmra.mrb[20].mxu1 %v9291_v3  ;;  %v9358_v1 = vld [vmem:[%s13275_s0 + $0x44] ss:$144 sps:$4 sm:$0xff]   ;;  %v9361_v3 = vld [vmem:[%s13275_s0 + $0x4c] ss:$144 sps:$4 sm:$0xff]  }
  0x6d   :  { %8704 = vmatpush3.bf16.msra.mxu1 %v9290_v2  ;;  %8677 = vmatprep.subr.bf16.mxu0 %v9292_v4  ;;  %v9359_v2 = vld [vmem:[%s13275_s0 + $0x48] ss:$144 sps:$4 sm:$0xff]   ;;  %v9362_v4 = vld [vmem:[%s13276_s1 + $0x540] sm:$0xff]  }
  0x6e   :  { %8705 = vmatprep.subr.bf16.mxu1 %v9293_v5  ;;  %3100 = vmatprep.mubr.bf16.mxu0 %v9314_v25  ;;  %v9363_v5 = vld [vmem:[%s13276_s1 + $0x5c0] sm:$0xff]  }
  0x6f   :  { %3149 = vmatprep.mubr.bf16.mxu1 %v9317_v27  ;;  %v9385_v25 = vld [vmem:[%s13276_s1 + $0x5e0] sm:$0xff]  }
  0x70   :  { %8678 = vmatpush3.bf16.msra.mxu0 %v9294_v6  ;;  %v9364_v6 = vld [vmem:[%s13276_s1 + $0x500] sm:$0xff]  }
  0x71   :  { %8706 = vmatpush3.bf16.msra.mxu1 %v9295_v7  ;;  %8679 = vmatprep.subr.bf16.mxu0 %v9296_v8  ;;  %v9365_v7 = vld [vmem:[%s13276_s1 + $0x580] sm:$0xff]   ;;  %v9366_v8 = vld [vmem:[%s13276_s1 + $0x548] sm:$0xff]  }
  0x72   :  { %8707 = vmatprep.subr.bf16.mxu1 %v9297_v9  ;;  %v9367_v9 = vld [vmem:[%s13276_s1 + $0x5c8] sm:$0xff]   ;;  %v9387_v27 = vld [vmem:[%s13276_s1 + $0x5a0] sm:$0xff]  }
  0x74   :  { %8680 = vmatpush3.bf16.msra.mxu0 %v9298_v10  ;;  %v9368_v10 = vld [vmem:[%s13276_s1 + $0x508] sm:$0xff]  }
  0x75   :  { %8708 = vmatpush3.bf16.msra.mxu1 %v9299_v11  ;;  %8681 = vmatprep.subr.bf16.mxu0 %v9300_v12  ;;  %v9369_v11 = vld [vmem:[%s13276_s1 + $0x588] sm:$0xff]   ;;  %v9370_v12 = vld [vmem:[%s13275_s0 + $0x164] ss:$144 sps:$4 sm:$0xff]  }
  0x76   :  { %8709 = vmatprep.subr.bf16.mxu1 %v9301_v13  ;;  %v9372_v13 = vld [vmem:[%s13275_s0 + $0x160] ss:$144 sps:$4 sm:$0xff]  }
  0x78   :  { %8682 = vmatpush3.bf16.msra.mxu0 %v9302_v14  ;;  %v9373_v14 = vld [vmem:[%s13276_s1 + $0x550] sm:$0xff]  }
  0x79   :  { %8710 = vmatpush3.bf16.msra.mxu1 %v9303_v15  ;;  %8683 = vmatprep.subr.bf16.mxu0 %v9304_v16  ;;  %v9374_v15 = vld [vmem:[%s13276_s1 + $0x5d0] sm:$0xff]   ;;  %v9375_v16 = vld [vmem:[%s13275_s0 + $0x16c] ss:$144 sps:$4 sm:$0xff]  }
  0x7a   :  { %8711 = vmatprep.subr.bf16.mxu1 %v9305_v17  ;;  %v9377_v17 = vld [vmem:[%s13276_s1 + $0x510] sm:$0xff]  }
  0x7c   :  { %8684 = vmatpush3.bf16.msra.mxu0 %v9306_v18  ;;  %v9378_v18 = vld [vmem:[%s13276_s1 + $0x590] sm:$0xff]  }
  0x7d   :  { %8712 = vmatpush3.bf16.msra.mxu1 %v9307_v19  ;;  %8685 = vmatprep.subr.bf16.mxu0 %v9308_v20  ;;  %v9379_v19 = vld [vmem:[%s13275_s0 + $0x168] ss:$144 sps:$4 sm:$0xff]  }
  0x7e   :  { %8713 = vmatprep.subr.bf16.mxu1 %v9309_v21  ;;  %v9380_v20 = vld [vmem:[%s13276_s1 + $0x558] sm:$0xff]  }
  0x7f   :  { %v9381_v21 = vld [vmem:[%s13276_s1 + $0x5d8] sm:$0xff]  }
  0x80   :  { %8686 = vmatpush3.bf16.msra.mxu0 %v9310_v22  ;;  %v9382_v22 = vld [vmem:[%s13276_s1 + $0x518] sm:$0xff]  }
  0x81   :  { %8714 = vmatpush3.bf16.msra.mxu1 %v9311_v23  ;;  %8727 = vmatprep.subr.bf16.mxu0 %v9318_v28  ;;  %v9383_v23 = vld [vmem:[%s13276_s1 + $0x598] sm:$0xff]   ;;  %v9388_v28 = vld [vmem:[%s13276_s1 + $0x568] sm:$0xff]  }
  0x82   :  { %8755 = vmatprep.subr.bf16.mxu1 %v9319_v29  ;;  %v9389_v29 = vld [vmem:[%s13276_s1 + $0x5e8] sm:$0xff]  }
  0x83   :  { %3101 = vmatmul.mubr.bf16.vlgmr.msra.gmra.mrb[24].mxu0 %v9312_v24  ;;  %v9384_v24 = vld [vmem:[%s13276_s1 + $0x560] sm:$0xff]  }
  0x84   :  { %3150 = vmatmul.mubr.bf16.vlgmr.msra.gmra.mrb[24].mxu1 %v9315_v26  ;;  %8728 = vmatpush3.bf16.msra.mxu0 %v9320_v30  ;;  %v9386_v26 = vld [vmem:[%s13276_s1 + $0x520] sm:$0xff]   ;;  %v9390_v30 = vld [vmem:[%s13276_s1 + $0x528] sm:$0xff]  }
  0x85   :  { %8756 = vmatpush3.bf16.msra.mxu1 %v9321_v31  ;;  %8729 = vmatprep.subr.bf16.mxu0 %v9322_v32  ;;  %v9391_v31 = vld [vmem:[%s13276_s1 + $0x5a8] sm:$0xff]   ;;  %v9392_v32 = vld [vmem:[%s13276_s1 + $0x570] sm:$0xff]  }
  0x86   :  { %8757 = vmatprep.subr.bf16.mxu1 %v9323_v33  ;;  %3108 = vmatprep.mubr.bf16.mxu0 %v9326_v36  ;;  %v9393_v33 = vld [vmem:[%s13276_s1 + $0x5f0] sm:$0xff]   ;;  %v9396_v36 = vld [vmem:[%s13276_s1 + $0x578] sm:$0xff]  }
  0x87   :  { %3157 = vmatprep.mubr.bf16.mxu1 %v9331_v40  ;;  %v9400_v40 = vld [vmem:[%s13275_s0 + $0x50] ss:$144 sps:$4 sm:$0xff]  }
  0x88   :  { %8730 = vmatpush3.bf16.msra.mxu0 %v9324_v34  ;;  %v9394_v34 = vld [vmem:[%s13276_s1 + $0x530] sm:$0xff]  }
  0x89   :  { %8758 = vmatpush3.bf16.msra.mxu1 %v9325_v35  ;;  %8731 = vmatprep.subr.bf16.mxu0 %v9329_v38  ;;  %v9395_v35 = vld [vmem:[%s13276_s1 + $0x5b0] sm:$0xff]   ;;  %v9398_v38 = vld [vmem:[%s13276_s1 + $0x538] sm:$0xff]  }
  0x8a   :  { %8759 = vmatprep.subr.bf16.mxu1 %v9330_v39  ;;  %v9399_v39 = vld [vmem:[%s13276_s1 + $0x5b8] sm:$0xff]  }
  0x8b   :  { %3109 = vmatmul.mubr.bf16.gmra.mrb[28].mxu0 %v9328_v37  ;;  %v9397_v37 = vld [vmem:[%s13276_s1 + $0x5f8] sm:$0xff]  }
  0x8c   :  { %8732 = vmatpush3.bf16.msra.mxu0 %v9333_v41  ;;  %3158 = vmatmul.mubr.bf16.gmra.mrb[28].mxu1 %v9335_v43  ;;  %v9402_v41 = vld [vmem:[%s13275_s0 + $0x54] ss:$144 sps:$4 sm:$0xff]   ;;  %v9405_v43 = vld [vmem:[%s13275_s0 + $0x5c] ss:$144 sps:$4 sm:$0xff]  }
  0x8d   :  { %8760 = vmatpush3.bf16.msra.mxu1 %v9334_v42  ;;  %8733 = vmatprep.subr.bf16.mxu0 %v9336_v44  ;;  %v9403_v42 = vld [vmem:[%s13275_s0 + $0x58] ss:$144 sps:$4 sm:$0xff]   ;;  %v9406_v44 = vld [vmem:[%s13276_s1 + $0x640] sm:$0xff]  }
  0x8e   :  { %8761 = vmatprep.subr.bf16.mxu1 %v9337_v45  ;;  %3198 = vmatprep.mubr.bf16.mxu0 %v9358_v1  ;;  %v9407_v45 = vld [vmem:[%s13276_s1 + $0x6c0] sm:$0xff]  }
  0x8f   :  { %3247 = vmatprep.mubr.bf16.mxu1 %v9361_v3  ;;  %v9429_v1 = vld [vmem:[%s13276_s1 + $0x6e0] sm:$0xff]  }
  0x90   :  { %8734 = vmatpush3.bf16.msra.mxu0 %v9338_v46  ;;  %v9408_v46 = vld [vmem:[%s13276_s1 + $0x600] sm:$0xff]  }
  0x91   :  { %8762 = vmatpush3.bf16.msra.mxu1 %v9339_v47  ;;  %8735 = vmatprep.subr.bf16.mxu0 %v9340_v48  ;;  %v9409_v47 = vld [vmem:[%s13276_s1 + $0x680] sm:$0xff]   ;;  %v9410_v48 = vld [vmem:[%s13276_s1 + $0x648] sm:$0xff]  }
  0x92   :  { %8763 = vmatprep.subr.bf16.mxu1 %v9341_v49  ;;  %v9411_v49 = vld [vmem:[%s13276_s1 + $0x6c8] sm:$0xff]   ;;  %v9431_v3 = vld [vmem:[%s13276_s1 + $0x6a0] sm:$0xff]  }
  0x94   :  { %8736 = vmatpush3.bf16.msra.mxu0 %v9342_v50  ;;  %v9412_v50 = vld [vmem:[%s13276_s1 + $0x608] sm:$0xff]  }
  0x95   :  { %8764 = vmatpush3.bf16.msra.mxu1 %v9343_v51  ;;  %8737 = vmatprep.subr.bf16.mxu0 %v9344_v52  ;;  %v9413_v51 = vld [vmem:[%s13276_s1 + $0x688] sm:$0xff]   ;;  %v9414_v52 = vld [vmem:[%s13275_s0 + $0x174] ss:$144 sps:$4 sm:$0xff]  }
  0x96   :  { %8765 = vmatprep.subr.bf16.mxu1 %v9345_v53  ;;  %v9416_v53 = vld [vmem:[%s13275_s0 + $0x170] ss:$144 sps:$4 sm:$0xff]  }
  0x98   :  { %8738 = vmatpush3.bf16.msra.mxu0 %v9346_v54  ;;  %v9417_v54 = vld [vmem:[%s13276_s1 + $0x650] sm:$0xff]  }
  0x99   :  { %8766 = vmatpush3.bf16.msra.mxu1 %v9347_v55  ;;  %8739 = vmatprep.subr.bf16.mxu0 %v9348_v56  ;;  %v9418_v55 = vld [vmem:[%s13276_s1 + $0x6d0] sm:$0xff]   ;;  %v9419_v56 = vld [vmem:[%s13275_s0 + $0x17c] ss:$144 sps:$4 sm:$0xff]  }
  0x9a   :  { %8767 = vmatprep.subr.bf16.mxu1 %v9349_v57  ;;  %v9421_v57 = vld [vmem:[%s13276_s1 + $0x610] sm:$0xff]  }
  0x9c   :  { %8740 = vmatpush3.bf16.msra.mxu0 %v9350_v58  ;;  %v9422_v58 = vld [vmem:[%s13276_s1 + $0x690] sm:$0xff]  }
  0x9d   :  { %8768 = vmatpush3.bf16.msra.mxu1 %v9351_v59  ;;  %8741 = vmatprep.subr.bf16.mxu0 %v9352_v60  ;;  %v9423_v59 = vld [vmem:[%s13275_s0 + $0x178] ss:$144 sps:$4 sm:$0xff]  }
  0x9e   :  { %8769 = vmatprep.subr.bf16.mxu1 %v9353_v61  ;;  %v9424_v60 = vld [vmem:[%s13276_s1 + $0x658] sm:$0xff]  }
  0x9f   :  { %v9425_v61 = vld [vmem:[%s13276_s1 + $0x6d8] sm:$0xff]  }
  0xa0   :  { %8742 = vmatpush3.bf16.msra.mxu0 %v9354_v62  ;;  %v9426_v62 = vld [vmem:[%s13276_s1 + $0x618] sm:$0xff]  }
  0xa1   :  { %8770 = vmatpush3.bf16.msra.mxu1 %v9355_v63  ;;  %8783 = vmatprep.subr.bf16.mxu0 %v9362_v4  ;;  %v9427_v63 = vld [vmem:[%s13276_s1 + $0x698] sm:$0xff]   ;;  %v9432_v4 = vld [vmem:[%s13276_s1 + $0x668] sm:$0xff]  }
  0xa2   :  { %8811 = vmatprep.subr.bf16.mxu1 %v9363_v5  ;;  %v9433_v5 = vld [vmem:[%s13276_s1 + $0x6e8] sm:$0xff]  }
  0xa3   :  { %3199 = vmatmul.mubr.bf16.vlgmr.msra.gmra.mrb[32].mxu0 %v9356_v0  ;;  %v9428_v0 = vld [vmem:[%s13276_s1 + $0x660] sm:$0xff]  }
  0xa4   :  { %3248 = vmatmul.mubr.bf16.vlgmr.msra.gmra.mrb[32].mxu1 %v9359_v2  ;;  %8784 = vmatpush3.bf16.msra.mxu0 %v9364_v6  ;;  %v9430_v2 = vld [vmem:[%s13276_s1 + $0x620] sm:$0xff]   ;;  %v9434_v6 = vld [vmem:[%s13276_s1 + $0x628] sm:$0xff]  }
  0xa5   :  { %8812 = vmatpush3.bf16.msra.mxu1 %v9365_v7  ;;  %8785 = vmatprep.subr.bf16.mxu0 %v9366_v8  ;;  %v9435_v7 = vld [vmem:[%s13276_s1 + $0x6a8] sm:$0xff]  }
  0xa6   :  { %8813 = vmatprep.subr.bf16.mxu1 %v9367_v9  ;;  %3206 = vmatprep.mubr.bf16.mxu0 %v9370_v12  ;;  %v9436_v9 = vld [vmem:[%s13276_s1 + $0x670] sm:$0xff]  }
  0xa7   :  { %3255 = vmatprep.mubr.bf16.mxu1 %v9375_v16  ;;  %v9439_v16 = vld [vmem:[%s13276_s1 + $0x6b0] sm:$0xff]  }
  0xa8   :  { %8786 = vmatpush3.bf16.msra.mxu0 %v9368_v10 }
  0xa9   :  { %8814 = vmatpush3.bf16.msra.mxu1 %v9369_v11  ;;  %8787 = vmatprep.subr.bf16.mxu0 %v9373_v14  ;;  %v9437_v11 = vld [vmem:[%s13276_s1 + $0x6f0] sm:$0xff]  }
  0xaa   :  { %8815 = vmatprep.subr.bf16.mxu1 %v9374_v15 }
  0xab   :  { %3207 = vmatmul.mubr.bf16.gmra.mrb[36].mxu0 %v9372_v13  ;;  %v9438_v13 = vld [vmem:[%s13276_s1 + $0x630] sm:$0xff]  }
  0xac   :  { %8788 = vmatpush3.bf16.msra.mxu0 %v9377_v17  ;;  %3256 = vmatmul.mubr.bf16.gmra.mrb[36].mxu1 %v9379_v19  ;;  %v9440_v19 = vld [vmem:[%s13276_s1 + $0x678] sm:$0xff]  }
  0xad   :  { %8816 = vmatpush3.bf16.msra.mxu1 %v9378_v18  ;;  %8789 = vmatprep.subr.bf16.mxu0 %v9380_v20 }
  0xae   :  { %8817 = vmatprep.subr.bf16.mxu1 %v9381_v21  ;;  %3296 = vmatprep.mubr.bf16.mxu0 %v9402_v41  ;;  %v9441_v21 = vld [vmem:[%s13276_s1 + $0x6f8] sm:$0xff]   ;;  %v9460_v41 = vld [vmem:[%s13275_s0 + $0x180] ss:$144 sps:$4 sm:$0xff]  }
  0xaf   :  { %3345 = vmatprep.mubr.bf16.mxu1 %v9405_v43  ;;  %v9462_v43 = vld [vmem:[%s13276_s1 + $0x7d0] sm:$0xff]  }
  0xb0   :  { %8790 = vmatpush3.bf16.msra.mxu0 %v9382_v22 }
  0xb1   :  { %8818 = vmatpush3.bf16.msra.mxu1 %v9383_v23  ;;  %8791 = vmatprep.subr.bf16.mxu0 %v9384_v24  ;;  %v9442_v23 = vld [vmem:[%s13276_s1 + $0x638] sm:$0xff]  }
  0xb2   :  { %8819 = vmatprep.subr.bf16.mxu1 %v9385_v25 }
  0xb4   :  { %8792 = vmatpush3.bf16.msra.mxu0 %v9386_v26  ;;  %v9443_v26 = vld [vmem:[%s13276_s1 + $0x6b8] sm:$0xff]  }
  0xb5   :  { %8820 = vmatpush3.bf16.msra.mxu1 %v9387_v27  ;;  %8793 = vmatprep.subr.bf16.mxu0 %v9388_v28  ;;  %v9444_v28 = vld [vmem:[%s13275_s0 + $0x60] ss:$144 sps:$4 sm:$0xff]  }
  0xb6   :  { %8821 = vmatprep.subr.bf16.mxu1 %v9389_v29  ;;  %v9446_v29 = vld [vmem:[%s13275_s0 + $0x64] ss:$144 sps:$4 sm:$0xff]  }
  0xb8   :  { %8794 = vmatpush3.bf16.msra.mxu0 %v9390_v30  ;;  %v9447_v30 = vld [vmem:[%s13275_s0 + $0x68] ss:$144 sps:$4 sm:$0xff]  }
  0xb9   :  { %8822 = vmatpush3.bf16.msra.mxu1 %v9391_v31  ;;  %8795 = vmatprep.subr.bf16.mxu0 %v9392_v32  ;;  %v9449_v31 = vld [vmem:[%s13275_s0 + $0x6c] ss:$144 sps:$4 sm:$0xff]   ;;  %v9450_v32 = vld [vmem:[%s13276_s1 + $0x740] sm:$0xff]  }
  0xba   :  { %8823 = vmatprep.subr.bf16.mxu1 %v9393_v33  ;;  %v9451_v33 = vld [vmem:[%s13276_s1 + $0x7c0] sm:$0xff]  }
  0xbc   :  { %8796 = vmatpush3.bf16.msra.mxu0 %v9394_v34  ;;  %v9452_v34 = vld [vmem:[%s13276_s1 + $0x700] sm:$0xff]  }
  0xbd   :  { %8824 = vmatpush3.bf16.msra.mxu1 %v9395_v35  ;;  %8797 = vmatprep.subr.bf16.mxu0 %v9396_v36  ;;  %v9453_v35 = vld [vmem:[%s13276_s1 + $0x780] sm:$0xff]   ;;  %v9454_v36 = vld [vmem:[%s13276_s1 + $0x748] sm:$0xff]  }
  0xbe   :  { %8825 = vmatprep.subr.bf16.mxu1 %v9397_v37  ;;  %v9455_v37 = vld [vmem:[%s13276_s1 + $0x7c8] sm:$0xff]  }
  0xc0   :  { %8798 = vmatpush3.bf16.msra.mxu0 %v9398_v38  ;;  %v9456_v38 = vld [vmem:[%s13276_s1 + $0x708] sm:$0xff]  }
  0xc1   :  { %8826 = vmatpush3.bf16.msra.mxu1 %v9399_v39  ;;  %8839 = vmatprep.subr.bf16.mxu0 %v9406_v44  ;;  %v9457_v39 = vld [vmem:[%s13276_s1 + $0x788] sm:$0xff]  }
  0xc2   :  { %8867 = vmatprep.subr.bf16.mxu1 %v9407_v45  ;;  %v9463_v44 = vld [vmem:[%s13275_s0 + $0x18c] ss:$144 sps:$4 sm:$0xff]   ;;  %v9465_v45 = vld [vmem:[%s13276_s1 + $0x710] sm:$0xff]  }
  0xc3   :  { %3297 = vmatmul.mubr.bf16.vlgmr.msra.gmra.mrb[40].mxu0 %v9400_v40  ;;  %v9458_v40 = vld [vmem:[%s13275_s0 + $0x184] ss:$144 sps:$4 sm:$0xff]  }
  0xc4   :  { %3346 = vmatmul.mubr.bf16.vlgmr.msra.gmra.mrb[40].mxu1 %v9403_v42  ;;  %8840 = vmatpush3.bf16.msra.mxu0 %v9408_v46  ;;  %v9461_v42 = vld [vmem:[%s13276_s1 + $0x750] sm:$0xff]  }
  0xc5   :  { %8868 = vmatpush3.bf16.msra.mxu1 %v9409_v47  ;;  %8841 = vmatprep.subr.bf16.mxu0 %v9410_v48  ;;  %v9466_v46 = vld [vmem:[%s13276_s1 + $0x790] sm:$0xff]   ;;  %v9467_v48 = vld [vmem:[%s13275_s0 + $0x188] ss:$144 sps:$4 sm:$0xff]  }
  0xc6   :  { %8869 = vmatprep.subr.bf16.mxu1 %v9411_v49  ;;  %3304 = vmatprep.mubr.bf16.mxu0 %v9414_v52  ;;  %v9468_v49 = vld [vmem:[%s13276_s1 + $0x758] sm:$0xff]  }
  0xc7   :  { %3353 = vmatprep.mubr.bf16.mxu1 %v9419_v56  ;;  %v9471_v56 = vld [vmem:[%s13276_s1 + $0x798] sm:$0xff]  }
  0xc8   :  { %8842 = vmatpush3.bf16.msra.mxu0 %v9412_v50 }
  0xc9   :  { %8870 = vmatpush3.bf16.msra.mxu1 %v9413_v51  ;;  %8843 = vmatprep.subr.bf16.mxu0 %v9417_v54  ;;  %v9469_v51 = vld [vmem:[%s13276_s1 + $0x7d8] sm:$0xff]  }
  0xca   :  { %8871 = vmatprep.subr.bf16.mxu1 %v9418_v55  ;;  %v9470_v54 = vld [vmem:[%s13276_s1 + $0x718] sm:$0xff]  }
  0xcb   :  { %3305 = vmatmul.mubr.bf16.gmra.mrb[44].mxu0 %v9416_v53 }
  0xcc   :  { %8844 = vmatpush3.bf16.msra.mxu0 %v9421_v57  ;;  %3354 = vmatmul.mubr.bf16.gmra.mrb[44].mxu1 %v9423_v59 }
  0xcd   :  { %8872 = vmatpush3.bf16.msra.mxu1 %v9422_v58  ;;  %8845 = vmatprep.subr.bf16.mxu0 %v9424_v60  ;;  %v9472_v58 = vld [vmem:[%s13276_s1 + $0x760] sm:$0xff]  }
  0xce   :  { %8873 = vmatprep.subr.bf16.mxu1 %v9425_v61  ;;  %3394 = vmatprep.mubr.bf16.mxu0 %v9446_v29  ;;  %v9473_v61 = vld [vmem:[%s13276_s1 + $0x7e0] sm:$0xff]  }
  0xcf   :  { %3443 = vmatprep.mubr.bf16.mxu1 %v9449_v31 }
  0xd0   :  { %8846 = vmatpush3.bf16.msra.mxu0 %v9426_v62 }
  0xd1   :  { %8874 = vmatpush3.bf16.msra.mxu1 %v9427_v63  ;;  %8847 = vmatprep.subr.bf16.mxu0 %v9428_v0  ;;  %v9474_v0 = vld [vmem:[%s13276_s1 + $0x720] sm:$0xff]  }
  0xd2   :  { %8875 = vmatprep.subr.bf16.mxu1 %v9429_v1 }
  0xd4   :  { %8848 = vmatpush3.bf16.msra.mxu0 %v9430_v2  ;;  %v9475_v2 = vld [vmem:[%s13276_s1 + $0x7a0] sm:$0xff]  }
  0xd5   :  { %8876 = vmatpush3.bf16.msra.mxu1 %v9431_v3  ;;  %8849 = vmatprep.subr.bf16.mxu0 %v9432_v4  ;;  %v7629_v3 = vld [vmem:[%s13277_s2] ss:$0 sm:$0xff] }
  0xd6   :  { %8877 = vmatprep.subr.bf16.mxu1 %v9433_v5 }
  0xd8   :  { %8850 = vmatpush3.bf16.msra.mxu0 %v9434_v6  ;;  %v9476_v6 = vld [vmem:[%s13276_s1 + $0x768] sm:$0xff]  }
  0xd9   :  { %8878 = vmatpush3.bf16.msra.mxu1 %v9435_v7  ;;  %8851 = vmatprep.subr.bf16.mxu0 %v9436_v9 }
  0xda   :  { %8879 = vmatprep.subr.bf16.mxu1 %v9437_v11 }
  0xdc   :  { %8852 = vmatpush3.bf16.msra.mxu0 %v9438_v13 }
  0xdd   :  { %8880 = vmatpush3.bf16.msra.mxu1 %v9439_v16  ;;  %8853 = vmatprep.subr.bf16.mxu0 %v9440_v19 }
  0xde   :  { %8881 = vmatprep.subr.bf16.mxu1 %v9441_v21  ;;  %v9481_v21 = vld [vmem:[%s13276_s1 + $0x7f0] sm:$0xff]  }
  0xe0   :  { %8854 = vmatpush3.bf16.msra.mxu0 %v9442_v23 }
  0xe1   :  { %8882 = vmatpush3.bf16.msra.mxu1 %v9443_v26  ;;  %8895 = vmatprep.subr.bf16.mxu0 %v9450_v32  ;;  %v9485_v32 = vld [vmem:[%s13276_s1 + $0x7f8] sm:$0xff]  }
  0xe2   :  { %8923 = vmatprep.subr.bf16.mxu1 %v9451_v33 }
  0xe3   :  { %3395 = vmatmul.mubr.bf16.vlgmr.msra.gmra.mrb[48].mxu0 %v9444_v28 }
  0xe4   :  { %3444 = vmatmul.mubr.bf16.vlgmr.msra.gmra.mrb[48].mxu1 %v9447_v30  ;;  %8896 = vmatpush3.bf16.msra.mxu0 %v9452_v34  ;;  %v9484_v30 = vld [vmem:[%s13276_s1 + $0x778] sm:$0xff]  }
  0xe5   :  { %8924 = vmatpush3.bf16.msra.mxu1 %v9453_v35  ;;  %8897 = vmatprep.subr.bf16.mxu0 %v9454_v36  ;;  %v9486_v36 = vld [vmem:[%s13276_s1 + $0x738] sm:$0xff]  }
  0xe6   :  { %8925 = vmatprep.subr.bf16.mxu1 %v9455_v37  ;;  %3402 = vmatprep.mubr.bf16.mxu0 %v9458_v40  ;;  %v9488_v40 = vld [vmem:[%s13275_s0 + $0x70] ss:$144 sps:$4 sm:$0xff]  }
  0xe7   :  { %3451 = vmatprep.mubr.bf16.mxu1 %v9463_v44 }
  0xe8   :  { %8898 = vmatpush3.bf16.msra.mxu0 %v9456_v38  ;;  %v9487_v38 = vld [vmem:[%s13276_s1 + $0x7b8] sm:$0xff]  }
  0xe9   :  { %8926 = vmatpush3.bf16.msra.mxu1 %v9457_v39  ;;  %8899 = vmatprep.subr.bf16.mxu0 %v9461_v42 }
  0xea   :  { %8927 = vmatprep.subr.bf16.mxu1 %v9462_v43  ;;  %v9491_v43 = vld [vmem:[%s13275_s0 + $0x78] ss:$144 sps:$4 sm:$0xff]  }
  0xeb   :  { %3403 = vmatmul.mubr.bf16.gmra.mrb[52].mxu0 %v9460_v41  ;;  %v9490_v41 = vld [vmem:[%s13275_s0 + $0x74] ss:$144 sps:$4 sm:$0xff]  }
  0xec   :  { %8900 = vmatpush3.bf16.msra.mxu0 %v9465_v45  ;;  %3452 = vmatmul.mubr.bf16.gmra.mrb[52].mxu1 %v9467_v48  ;;  %v9494_v48 = vld [vmem:[%s13276_s1 + $0x840] sm:$0xff]  }
  0xed   :  { %8928 = vmatpush3.bf16.msra.mxu1 %v9466_v46  ;;  %8901 = vmatprep.subr.bf16.mxu0 %v9468_v49  ;;  %v9493_v46 = vld [vmem:[%s13275_s0 + $0x7c] ss:$144 sps:$4 sm:$0xff]  }
  0xee   :  { %8929 = vmatprep.subr.bf16.mxu1 %v9469_v51  ;;  %3492 = vmatprep.mubr.bf16.mxu0 %v9490_v41 }
  0xef   :  { %3541 = vmatprep.mubr.bf16.mxu1 %v9493_v46 }
  0xf0   :  { %8902 = vmatpush3.bf16.msra.mxu0 %v9470_v54 }
  0xf1   :  { %8930 = vmatpush3.bf16.msra.mxu1 %v9471_v56  ;;  %8903 = vmatprep.subr.bf16.mxu0 %v9472_v58 }
  0xf2   :  { %8931 = vmatprep.subr.bf16.mxu1 %v9473_v61 }
  0xf4   :  { %8904 = vmatpush3.bf16.msra.mxu0 %v9474_v0 }
  0xf5   :  { %8932 = vmatpush3.bf16.msra.mxu1 %v9475_v2  ;;  %8905 = vmatprep.subr.bf16.mxu0 %v9476_v6  ;;  %v9505_v6 = vld [vmem:[%s13276_s1 + $0x850] sm:$0xff]  }
  0xf6   :  { %v8519_v8 = vpop.f32.mrb[0].mxu0 }
  0xf7   :  { %v8547_v10 = vpop.f32.mrb[0].mxu1  ;;  %v8520_v12 = vpop.f32.mrb[1].mxu0 }
  0xf8   :  { %v11211_v14 = vadd.f32 %v8520_v12, %v8519_v8  ;;  %v8548_v15 = vpop.f32.mrb[1].mxu1  ;;  %v8522_v18 = vpop.f32.mrb[2].mxu0  ;;  %v9478_v12 = vld [vmem:[%s13276_s1 + $0x728] sm:$0xff]  }
  0xf9   :  { %v11216_v17 = vadd.f32 %v8548_v15, %v8547_v10  ;;  %v8550_v20 = vpop.f32.mrb[2].mxu1  ;;  %v8523_v22 = vpop.f32.mrb[3].mxu0  ;;  %v9477_v10 = vld [vmem:[%s13276_s1 + $0x7e8] sm:$0xff]   ;;  %8906 = vmatpush3.bf16.msra.mxu0 %v9478_v12 }
  0xfa   :  { %v11227_v24 = vadd.f32 %v8523_v22, %v8522_v18  ;;  %v8551_v25 = vpop.f32.mrb[3].mxu1  ;;  %v2809_v5 = vadd.f32 %v11211_v14, %v7629_v3  ;;  %8933 = vmatprep.subr.bf16.mxu1 %v9477_v10  ;;  %v9479_v18 = vld [vmem:[%s13276_s1 + $0x7a8] sm:$0xff]   ;;  %v9509_v10 = vld [vmem:[%s13276_s1 + $0x810] sm:$0xff]  }
  0xfb   :  { %v11232_v27 = vadd.f32 %v8551_v25, %v8550_v20  ;;  %8934 = vmatpush3.bf16.msra.mxu1 %v9479_v18  ;;  %v9511_v12 = vld [vmem:[%s13275_s0 + $0x198] ss:$144 sps:$4 sm:$0xff]   ;;  %v9516_v18 = vld [vmem:[%s13276_s1 + $0x860] sm:$0xff]  }
  0xfc   :  { %v2812_v7 = vadd.f32 %v11227_v24, %v7629_v3  ;;  %v2858_v11 = vadd.f32 %v11216_v17, %v2809_v5  ;;  %v9480_v17 = vld [vmem:[%s13276_s1 + $0x770] sm:$0xff]   ;;  %8935 = vmatprep.subr.bf16.mxu1 %v9481_v21  ;;  %v9520_v21 = vld [vmem:[%s13276_s1 + $0x868] sm:$0xff]  }
  0xfd   :  { %8907 = vmatprep.subr.bf16.mxu0 %v9480_v17  ;;  %v9482_v24 = vld [vmem:[%s13276_s1 + $0x730] sm:$0xff]   ;;  %v9518_v17 = vld [vmem:[%s13276_s1 + $0x820] sm:$0xff]  }
  0xfe   :  { %v8525_v47 = vpop.f32.mrb[4].mxu0  ;;  %v2861_v13 = vadd.f32 %v11232_v27, %v2812_v7  ;;  %v9483_v27 = vld [vmem:[%s13276_s1 + $0x7b0] sm:$0xff]   ;;  %8908 = vmatpush3.bf16.msra.mxu0 %v9482_v24 }
  0xff   :  { %v8526_v50 = vpop.f32.mrb[5].mxu0  ;;  %v8553_v55 = vpop.f32.mrb[4].mxu1  ;;  %8936 = vmatpush3.bf16.msra.mxu1 %v9483_v27  ;;  %8909 = vmatprep.subr.bf16.mxu0 %v9484_v30  ;;  %v9504_v5 = vld [vmem:[%s13275_s0 + $0x190] ss:$144 sps:$4 sm:$0xff]  }
 0x100   :  { %v8527_v52 = vadd.f32 %v8526_v50, %v8525_v47  ;;  %v8528_v53 = vpop.f32.mrb[6].mxu0  ;;  %v8554_v60 = vpop.f32.mrb[5].mxu1  ;;  %8937 = vmatprep.subr.bf16.mxu1 %v9485_v32  ;;  %v9495_v50 = vld [vmem:[%s13276_s1 + $0x8c0] sm:$0xff]   ;;  %v9524_v27 = vld [vmem:[%s13276_s1 + $0x870] sm:$0xff]  }
 0x101   :  { %v8529_v57 = vpop.f32.mrb[7].mxu0  ;;  %v8555_v62 = vadd.f32 %v8554_v60, %v8553_v55  ;;  %v8556_v63 = vpop.f32.mrb[6].mxu1  ;;  %v9497_v55 = vld [vmem:[%s13276_s1 + $0x880] sm:$0xff]   ;;  %v9499_v60 = vld [vmem:[%s13276_s1 + $0x8c8] sm:$0xff]   ;;  %v9525_v30 = vld [vmem:[%s13276_s1 + $0x8f0] sm:$0xff]  }
 0x102   :  { %v8530_v59 = vadd.f32 %v8529_v57, %v8528_v53  ;;  %v8557_v1 = vpop.f32.mrb[7].mxu1  ;;  %v2817_v8 = vadd.f32 %v8527_v52, %v7629_v3  ;;  %8910 = vmatpush3.bf16.msra.mxu0 %v9486_v36  ;;  %v9496_v53 = vld [vmem:[%s13276_s1 + $0x800] sm:$0xff]   ;;  %v9498_v57 = vld [vmem:[%s13276_s1 + $0x848] sm:$0xff]   ;;  %v9526_v32 = vld [vmem:[%s13276_s1 + $0x830] sm:$0xff]  }
 0x103   :  { %v8558_v4 = vadd.f32 %v8557_v1, %v8556_v63  ;;  %8938 = vmatpush3.bf16.msra.mxu1 %v9487_v38  ;;  %8951 = vmatprep.subr.bf16.mxu0 %v9494_v48  ;;  %v9500_v63 = vld [vmem:[%s13276_s1 + $0x808] sm:$0xff]  }
 0x104   :  { %v2820_v9 = vadd.f32 %v8530_v59, %v7629_v3  ;;  %v2866_v14 = vadd.f32 %v8555_v62, %v2817_v8  ;;  %8979 = vmatprep.subr.bf16.mxu1 %v9495_v50  ;;  %v9501_v1 = vld [vmem:[%s13276_s1 + $0x888] sm:$0xff]   ;;  %v9506_v8 = vld [vmem:[%s13276_s1 + $0x8d0] sm:$0xff]  }
 0x105   :  { %3493 = vmatmul.mubr.bf16.vlgmr.msra.gmra.mrb[56].mxu0 %v9488_v40  ;;  %v9534_v50 = vld [vmem:[%s13275_s0 + $0x84] ss:$144 sps:$4 sm:$0xff]  }
 0x106   :  { %v2869_v15 = vadd.f32 %v8558_v4, %v2820_v9  ;;  %3542 = vmatmul.mubr.bf16.vlgmr.msra.gmra.mrb[56].mxu1 %v9491_v43  ;;  %8952 = vmatpush3.bf16.msra.mxu0 %v9496_v53  ;;  %v9502_v4 = vld [vmem:[%s13275_s0 + $0x194] ss:$144 sps:$4 sm:$0xff]   ;;  %v9507_v9 = vld [vmem:[%s13275_s0 + $0x19c] ss:$144 sps:$4 sm:$0xff]   ;;  %v9535_v53 = vld [vmem:[%s13275_s0 + $0x88] ss:$144 sps:$4 sm:$0xff]  }
 0x107   :  { %8980 = vmatpush3.bf16.msra.mxu1 %v9497_v55  ;;  %8953 = vmatprep.subr.bf16.mxu0 %v9498_v57  ;;  %v9538_v55 = vld [vmem:[%s13275_s0 + $0x1a4] ss:$144 sps:$4 sm:$0xff]  }
 0x108   :  { %8981 = vmatprep.subr.bf16.mxu1 %v9499_v60  ;;  %3500 = vmatprep.mubr.bf16.mxu0 %v9502_v4 }
 0x109   :  { %3549 = vmatprep.mubr.bf16.mxu1 %v9507_v9 }
 0x10a   :  { %8954 = vmatpush3.bf16.msra.mxu0 %v9500_v63 }
 0x10b   :  { %8982 = vmatpush3.bf16.msra.mxu1 %v9501_v1  ;;  %8955 = vmatprep.subr.bf16.mxu0 %v9505_v6 }
 0x10c   :  { %8983 = vmatprep.subr.bf16.mxu1 %v9506_v8 }
 0x10d   :  { %3501 = vmatmul.mubr.bf16.gmra.mrb[60].mxu0 %v9504_v5 }
 0x10e   :  { %8956 = vmatpush3.bf16.msra.mxu0 %v9509_v10  ;;  %3550 = vmatmul.mubr.bf16.gmra.mrb[60].mxu1 %v9511_v12 }
 0x10f   :  { %3590 = vmatprep.mubr.bf16.mxu0 %v9534_v50  ;;  %v9556_v50 = vld [vmem:[%s13278_s3 + $0x40] ss:$16 sps:$4 sm:$0xff]  }
 0x116   :  { %v8575_v16 = vpop.f32.mrb[8].mxu0 }
 0x117   :  { %v8603_v19 = vpop.f32.mrb[8].mxu1  ;;  %v8576_v20 = vpop.f32.mrb[9].mxu0 }
 0x118   :  { %v8577_v22 = vadd.f32 %v8576_v20, %v8575_v16  ;;  %v8604_v23 = vpop.f32.mrb[9].mxu1  ;;  %v8578_v26 = vpop.f32.mrb[10].mxu0  ;;  %v9515_v16 = vld [vmem:[%s13276_s1 + $0x898] sm:$0xff]   ;;  %v9519_v20 = vld [vmem:[%s13276_s1 + $0x8a0] sm:$0xff]  }
 0x119   :  { %v8605_v25 = vadd.f32 %v8604_v23, %v8603_v19  ;;  %v8606_v29 = vpop.f32.mrb[10].mxu1  ;;  %v8579_v31 = vpop.f32.mrb[11].mxu0  ;;  %v9517_v19 = vld [vmem:[%s13276_s1 + $0x8e0] sm:$0xff]   ;;  %v9522_v23 = vld [vmem:[%s13276_s1 + $0x828] sm:$0xff]  }
 0x11a   :  { %v2907_v28 = vadd.f32 %v8577_v22, %v2858_v11  ;;  %v8580_v34 = vadd.f32 %v8579_v31, %v8578_v26  ;;  %v8607_v35 = vpop.f32.mrb[11].mxu1  ;;  %v9510_v11 = vld [vmem:[%s13276_s1 + $0x890] sm:$0xff]   ;;  %v9521_v22 = vld [vmem:[%s13276_s1 + $0x8e8] sm:$0xff]  }
 0x11b   :  { %v8608_v37 = vadd.f32 %v8607_v35, %v8606_v29  ;;  %8984 = vmatpush3.bf16.msra.mxu1 %v9510_v11 }
 0x11c   :  { %v11355_v33 = vadd.f32 %v8605_v25, %v2907_v28  ;;  %v2910_v39 = vadd.f32 %v8580_v34, %v2861_v13  ;;  %v9512_v13 = vld [vmem:[%s13276_s1 + $0x858] sm:$0xff]   ;;  %v9523_v25 = vld [vmem:[%s13276_s1 + $0x8a8] sm:$0xff]  }
 0x11d   :  { %8957 = vmatprep.subr.bf16.mxu0 %v9512_v13 }
 0x11e   :  { %v8581_v42 = vpop.f32.mrb[12].mxu0  ;;  %v11372_v44 = vadd.f32 %v8608_v37, %v2910_v39  ;;  %v9527_v37 = vld [vmem:[%s13276_s1 + $0x8b0] sm:$0xff]   ;;  %v9528_v39 = vld [vmem:[%s13276_s1 + $0x878] sm:$0xff]  }
 0x11f   :  { %v8582_v45 = vpop.f32.mrb[13].mxu0  ;;  %v8609_v56 = vpop.f32.mrb[12].mxu1 }
 0x120   :  { %v8583_v47 = vadd.f32 %v8582_v45, %v8581_v42  ;;  %v8584_v49 = vpop.f32.mrb[14].mxu0  ;;  %v8610_v59 = vpop.f32.mrb[13].mxu1  ;;  %v9530_v45 = vld [vmem:[%s13276_s1 + $0x838] sm:$0xff]  }
 0x121   :  { %v8585_v52 = vpop.f32.mrb[15].mxu0  ;;  %v8611_v61 = vadd.f32 %v8610_v59, %v8609_v56  ;;  %v8612_v62 = vpop.f32.mrb[14].mxu1 }
 0x122   :  { %v2915_v51 = vadd.f32 %v8583_v47, %v2866_v14  ;;  %v8586_v54 = vadd.f32 %v8585_v52, %v8584_v49  ;;  %v8613_v0 = vpop.f32.mrb[15].mxu1  ;;  %v9513_v14 = vld [vmem:[%s13276_s1 + $0x8d8] sm:$0xff]   ;;  %v9532_v49 = vld [vmem:[%s13275_s0 + $0x80] ss:$144 sps:$4 sm:$0xff]  }
 0x123   :  { %v8614_v3 = vadd.f32 %v8613_v0, %v8612_v62  ;;  %8985 = vmatprep.subr.bf16.mxu1 %v9513_v14  ;;  %v9531_v47 = vld [vmem:[%s13276_s1 + $0x8b8] sm:$0xff]   ;;  %v9542_v62 = vld [vmem:[%s13275_s0 + $0x1a0] ss:$144 sps:$4 sm:$0xff]  }
 0x124   :  { %v2918_v58 = vadd.f32 %v8586_v54, %v2869_v15  ;;  %v11401_v2 = vadd.f32 %v8611_v61, %v2915_v51  ;;  %v9514_v15 = vld [vmem:[%s13276_s1 + $0x818] sm:$0xff]   ;;  %8986 = vmatpush3.bf16.msra.mxu1 %v9515_v16 }
 0x125   :  { %8958 = vmatpush3.bf16.msra.mxu0 %v9514_v15  ;;  %8987 = vmatprep.subr.bf16.mxu1 %v9517_v19  ;;  %v9543_v0 = vld [vmem:[%s13275_s0 + $0x1a8] ss:$144 sps:$4 sm:$0xff]  }
 0x126   :  { %v11412_v7 = vadd.f32 %v8614_v3, %v2918_v58  ;;  %8959 = vmatprep.subr.bf16.mxu0 %v9516_v18  ;;  %v9540_v58 = vld [vmem:[%s13275_s0 + $0x1ac] ss:$144 sps:$4 sm:$0xff]  }
 0x128   :  { %8988 = vmatpush3.bf16.msra.mxu1 %v9519_v20 }
 0x129   :  { %8960 = vmatpush3.bf16.msra.mxu0 %v9518_v17  ;;  %8989 = vmatprep.subr.bf16.mxu1 %v9521_v22  ;;  %v9544_v22 = vld [vmem:[%s13278_s3] ss:$16 sps:$4 sm:$0xff]  }
 0x12a   :  { %8961 = vmatprep.subr.bf16.mxu0 %v9520_v21 }
 0x12c   :  { %8990 = vmatpush3.bf16.msra.mxu1 %v9523_v25 }
 0x12d   :  { %8962 = vmatpush3.bf16.msra.mxu0 %v9522_v23  ;;  %8991 = vmatprep.subr.bf16.mxu1 %v9525_v30  ;;  %v9546_v23 = vld [vmem:[%s13278_s3 + $0x4] ss:$16 sps:$4 sm:$0xff]   ;;  %v9553_v30 = vld [vmem:[%s13278_s3 + $0x28] ss:$16 sps:$4 sm:$0xff]  }
 0x12e   :  { %8963 = vmatprep.subr.bf16.mxu0 %v9524_v27  ;;  %v9549_v27 = vld [vmem:[%s13278_s3 + $0xc] ss:$16 sps:$4 sm:$0xff]  }
 0x130   :  { %8992 = vmatpush3.bf16.msra.mxu1 %v9527_v37 }
 0x131   :  { %8964 = vmatpush3.bf16.msra.mxu0 %v9526_v32 }
 0x132   :  { %8965 = vmatprep.subr.bf16.mxu0 %v9528_v39 }
 0x135   :  { %8966 = vmatpush3.bf16.msra.mxu0 %v9530_v45 }
 0x136   :  { %v8631_v24 = vpop.f32.mrb[16].mxu0  ;;  %6841 = vmatprep.subr.bf16.mxu0 %v9546_v23  ;;  %v9586_v23 = vld [vmem:[%s13278_s3 + $0xe0] ss:$16 sps:$4 sm:$0xff]  }
 0x137   :  { %v8632_v26 = vpop.f32.mrb[17].mxu0  ;;  %v8659_v28 = vpop.f32.mrb[16].mxu1 }
 0x138   :  { %v8633_v29 = vadd.f32 %v8632_v26, %v8631_v24  ;;  %v8660_v31 = vpop.f32.mrb[17].mxu1  ;;  %v8634_v36 = vpop.f32.mrb[18].mxu0  ;;  %3591 = vmatmul.mubr.bf16.vlgmr.msra.gmra.mrb[64].mxu0 %v9532_v49  ;;  %v9547_v24 = vld [vmem:[%s13278_s3 + $0x8] ss:$16 sps:$4 sm:$0xff]  }
 0x139   :  { %v8661_v35 = vadd.f32 %v8660_v31, %v8659_v28  ;;  %v8662_v38 = vpop.f32.mrb[18].mxu1  ;;  %v8635_v41 = vpop.f32.mrb[19].mxu0  ;;  %3598 = vmatprep.mubr.bf16.mxu0 %v9538_v55  ;;  %v9550_v28 = vld [vmem:[%s13278_s3 + $0x20] ss:$16 sps:$4 sm:$0xff]   ;;  %v9555_v31 = vld [vmem:[%s13278_s3 + $0x2c] ss:$16 sps:$4 sm:$0xff]   ;;  %6842 = vmatpush1.bf16.msra.mxu0 %v9544_v22 }
 0x13a   :  { %v3005_v34 = vadd.f32 %v8633_v29, %v11355_v33  ;;  %v9529_v33 = vld [vmem:[%s13276_s1 + $0x8f8] sm:$0xff]   ;;  %v8636_v42 = vadd.f32 %v8635_v41, %v8634_v36  ;;  %v8663_v43 = vpop.f32.mrb[19].mxu1  ;;  %v9552_v29 = vld [vmem:[%s13278_s3 + $0x24] ss:$16 sps:$4 sm:$0xff]  }
 0x13b   :  { %v8664_v46 = vadd.f32 %v8663_v43, %v8662_v38  ;;  %8993 = vmatprep.subr.bf16.mxu1 %v9529_v33  ;;  %6843 = vmatprep.subr.bf16.mxu0 %v9552_v29  ;;  %v9565_v55 = vld [vmem:[%s13278_s3 + $0x68] ss:$16 sps:$4 sm:$0xff]  }
 0x13c   :  { %v3054_v40 = vadd.f32 %v8661_v35, %v3005_v34  ;;  %v3008_v48 = vadd.f32 %v8636_v42, %v11372_v44  ;;  %8994 = vmatpush3.bf16.msra.mxu1 %v9531_v47  ;;  %v9537_v44 = vld [vmem:[%s13275_s0 + $0x8c] ss:$144 sps:$4 sm:$0xff]   ;;  %v9595_v29 = vld [vmem:[%s13278_s3 + $0x108] ss:$16 sps:$4 sm:$0xff]  }
 0x13d   :  { %3639 = vmatprep.mubr.bf16.mxu1 %v9537_v44  ;;  %7169 = vmatprep.subr.bf16.mxu1 %v9549_v27  ;;  %v9562_v44 = vld [vmem:[%s13278_s3 + $0x60] ss:$16 sps:$4 sm:$0xff]  }
 0x13e   :  { %v3057_v51 = vadd.f32 %v8664_v46, %v3008_v48  ;;  %v8637_v52 = vpop.f32.mrb[20].mxu0  ;;  %6844 = vmatpush1.bf16.msra.mxu0 %v9550_v28  ;;  %v9592_v28 = vld [vmem:[%s13278_s3 + $0x100] ss:$16 sps:$4 sm:$0xff]  }
 0x13f   :  { %v8638_v54 = vpop.f32.mrb[21].mxu0  ;;  %3640 = vmatmul.mubr.bf16.vlgmr.msra.gmra.mrb[64].mxu1 %v9535_v53  ;;  %v8665_v63 = vpop.f32.mrb[20].mxu1  ;;  %v9561_v53 = vld [vmem:[%s13278_s3 + $0x4c] ss:$16 sps:$4 sm:$0xff]  }
 0x140   :  { %v8639_v56 = vadd.f32 %v8638_v54, %v8637_v52  ;;  %v8640_v57 = vpop.f32.mrb[22].mxu0  ;;  %3647 = vmatprep.mubr.bf16.mxu1 %v9540_v58  ;;  %v8666_v3 = vpop.f32.mrb[21].mxu1  ;;  %3599 = vmatmul.mubr.bf16.gmra.mrb[68].mxu0 %v9542_v62  ;;  %v9559_v52 = vld [vmem:[%s13278_s3 + $0x48] ss:$16 sps:$4 sm:$0xff]   ;;  %v9564_v54 = vld [vmem:[%s13278_s3 + $0x64] ss:$16 sps:$4 sm:$0xff]  }
 0x141   :  { %v8641_v59 = vpop.f32.mrb[23].mxu0  ;;  %v8667_v4 = vadd.f32 %v8666_v3, %v8665_v63  ;;  %v8668_v5 = vpop.f32.mrb[22].mxu1  ;;  %7170 = vmatpush1.bf16.msra.mxu1 %v9547_v24  ;;  %v9570_v58 = vld [vmem:[%s13278_s3 + $0x84] ss:$16 sps:$4 sm:$0xff]   ;;  %v9589_v24 = vld [vmem:[%s13278_s3 + $0xe8] ss:$16 sps:$4 sm:$0xff]  }
 0x142   :  { %v3013_v60 = vadd.f32 %v8639_v56, %v11401_v2  ;;  %v8642_v61 = vadd.f32 %v8641_v59, %v8640_v57  ;;  %v8669_v6 = vpop.f32.mrb[23].mxu1  ;;  %7171 = vmatprep.subr.bf16.mxu1 %v9555_v31  ;;  %v9567_v56 = vld [vmem:[%s13278_s3 + $0x6c] ss:$16 sps:$4 sm:$0xff]   ;;  %v9568_v57 = vld [vmem:[%s13278_s3 + $0x80] ss:$16 sps:$4 sm:$0xff]  }
 0x143   :  { %v8670_v9 = vadd.f32 %v8669_v6, %v8668_v5  ;;  %v9571_v59 = vld [vmem:[%s13278_s3 + $0x88] ss:$16 sps:$4 sm:$0xff]   ;;  %v9574_v6 = vld [vmem:[%s13278_s3 + $0xa0] ss:$16 sps:$4 sm:$0xff]   ;;  %v9600_v31 = vld [vmem:[%s13278_s3 + $0x124] ss:$16 sps:$4 sm:$0xff]  }
 0x144   :  { %v3016_v1 = vadd.f32 %v8642_v61, %v11412_v7  ;;  %v3062_v8 = vadd.f32 %v8667_v4, %v3013_v60  ;;  %v9573_v60 = vld [vmem:[%s13278_s3 + $0x8c] ss:$16 sps:$4 sm:$0xff]  }
 0x145   :  { %7172 = vmatpush1.bf16.msra.mxu1 %v9553_v30 }
 0x146   :  { %v3065_v2 = vadd.f32 %v8670_v9, %v3016_v1  ;;  %7173 = vmatprep.subr.bf16.mxu1 %v9561_v53  ;;  %v9579_v1 = vld [vmem:[%s13278_s3 + $0xac] ss:$16 sps:$4 sm:$0xff]   ;;  %v9607_v53 = vld [vmem:[%s13278_s3 + $0x148] ss:$16 sps:$4 sm:$0xff]  }
 0x147   :  { %3648 = vmatmul.mubr.bf16.gmra.mrb[68].mxu1 %v9543_v0  ;;  %v9576_v0 = vld [vmem:[%s13278_s3 + $0xa4] ss:$16 sps:$4 sm:$0xff]  }
 0x149   :  { %7174 = vmatpush1.bf16.msra.mxu1 %v9559_v52  ;;  %v9604_v52 = vld [vmem:[%s13278_s3 + $0x140] ss:$16 sps:$4 sm:$0xff]  }
 0x14a   :  { %7175 = vmatprep.subr.bf16.mxu1 %v9567_v56  ;;  %v9613_v56 = vld [vmem:[%s13278_s3 + $0x168] ss:$16 sps:$4 sm:$0xff]  }
 0x14d   :  { %7176 = vmatpush1.bf16.msra.mxu1 %v9565_v55  ;;  %v9610_v55 = vld [vmem:[%s13278_s3 + $0x160] ss:$16 sps:$4 sm:$0xff]  }
 0x14e   :  { %7177 = vmatprep.subr.bf16.mxu1 %v9573_v60  ;;  %v9619_v60 = vld [vmem:[%s13278_s3 + $0x188] ss:$16 sps:$4 sm:$0xff]  }
 0x151   :  { %7178 = vmatpush1.bf16.msra.mxu1 %v9571_v59  ;;  %v9616_v59 = vld [vmem:[%s13278_s3 + $0x180] ss:$16 sps:$4 sm:$0xff]  }
 0x152   :  { %7179 = vmatprep.subr.bf16.mxu1 %v9579_v1 }
 0x156   :  { %v8687_v10 = vpop.f32.mrb[24].mxu0 }
 0x157   :  { %v8715_v11 = vpop.f32.mrb[24].mxu1  ;;  %v8688_v12 = vpop.f32.mrb[25].mxu0 }
 0x158   :  { %v8689_v13 = vadd.f32 %v8688_v12, %v8687_v10  ;;  %v8716_v14 = vpop.f32.mrb[25].mxu1  ;;  %v8690_v15 = vpop.f32.mrb[26].mxu0 }
 0x159   :  { %v8717_v16 = vadd.f32 %v8716_v14, %v8715_v11  ;;  %v8718_v18 = vpop.f32.mrb[26].mxu1  ;;  %v8691_v19 = vpop.f32.mrb[27].mxu0 }
 0x15a   :  { %v3103_v17 = vadd.f32 %v8689_v13, %v3054_v40  ;;  %v8692_v7 = vadd.f32 %v8691_v19, %v8690_v15  ;;  %v8719_v20 = vpop.f32.mrb[27].mxu1  ;;  %v9582_v15 = vld [vmem:[%s13278_s3 + $0xc4] ss:$16 sps:$4 sm:$0xff]  }
 0x15b   :  { %v8720_v21 = vadd.f32 %v8719_v20, %v8718_v18  ;;  %v9588_v20 = vld [vmem:[%s13278_s3 + $0xe4] ss:$16 sps:$4 sm:$0xff]  }
 0x15c   :  { %v11526_v25 = vadd.f32 %v8717_v16, %v3103_v17  ;;  %v3106_v26 = vadd.f32 %v8692_v7, %v3057_v51  ;;  %v9558_v51 = vld [vmem:[%s13278_s3 + $0x44] ss:$16 sps:$4 sm:$0xff]   ;;  %v9585_v16 = vld [vmem:[%s13278_s3 + $0xcc] ss:$16 sps:$4 sm:$0xff]   ;;  %v9580_v17 = vld [vmem:[%s13278_s3 + $0xc0] ss:$16 sps:$4 sm:$0xff]  }
 0x15d   :  { %6845 = vmatprep.subr.bf16.mxu0 %v9558_v51  ;;  %v9583_v7 = vld [vmem:[%s13278_s3 + $0xc8] ss:$16 sps:$4 sm:$0xff]  }
 0x15e   :  { %v11543_v32 = vadd.f32 %v8720_v21, %v3106_v26  ;;  %v8693_v34 = vpop.f32.mrb[28].mxu0  ;;  %6846 = vmatpush1.bf16.msra.mxu0 %v9556_v50  ;;  %v9591_v21 = vld [vmem:[%s13278_s3 + $0xec] ss:$16 sps:$4 sm:$0xff]   ;;  %v9606_v50 = vld [vmem:[%s13278_s3 + $0x144] ss:$16 sps:$4 sm:$0xff]  }
 0x15f   :  { %v8694_v35 = vpop.f32.mrb[29].mxu0  ;;  %v8721_v41 = vpop.f32.mrb[28].mxu1  ;;  %6847 = vmatprep.subr.bf16.mxu0 %v9564_v54  ;;  %v9597_v26 = vld [vmem:[%s13278_s3 + $0x10c] ss:$16 sps:$4 sm:$0xff]  }
 0x160   :  { %v8695_v36 = vadd.f32 %v8694_v35, %v8693_v34  ;;  %v8696_v37 = vpop.f32.mrb[30].mxu0  ;;  %v8722_v42 = vpop.f32.mrb[29].mxu1  ;;  %v9615_v54 = vld [vmem:[%s13278_s3 + $0x16c] ss:$16 sps:$4 sm:$0xff]  }
 0x161   :  { %v8697_v38 = vpop.f32.mrb[31].mxu0  ;;  %v8723_v43 = vadd.f32 %v8722_v42, %v8721_v41  ;;  %v8724_v45 = vpop.f32.mrb[30].mxu1 }
 0x162   :  { %v3111_v39 = vadd.f32 %v8695_v36, %v3062_v8  ;;  %v8698_v40 = vadd.f32 %v8697_v38, %v8696_v37  ;;  %v8725_v46 = vpop.f32.mrb[31].mxu1  ;;  %6848 = vmatpush1.bf16.msra.mxu0 %v9562_v44  ;;  %v9577_v8 = vld [vmem:[%s13278_s3 + $0xa8] ss:$16 sps:$4 sm:$0xff]   ;;  %v9612_v44 = vld [vmem:[%s13278_s3 + $0x164] ss:$16 sps:$4 sm:$0xff]  }
 0x163   :  { %v8726_v48 = vadd.f32 %v8725_v46, %v8724_v45  ;;  %6849 = vmatprep.subr.bf16.mxu0 %v9570_v58  ;;  %7180 = vmatpush1.bf16.msra.mxu1 %v9577_v8  ;;  %v9621_v58 = vld [vmem:[%s13278_s3 + $0x18c] ss:$16 sps:$4 sm:$0xff]   ;;  %v9631_v8 = vld [vmem:[%s13278_s3 + $0x1c8] ss:$16 sps:$4 sm:$0xff]  }
 0x164   :  { %v3114_v33 = vadd.f32 %v8698_v40, %v3065_v2  ;;  %v11545_v47 = vadd.f32 %v8723_v43, %v3111_v39  ;;  %7181 = vmatprep.subr.bf16.mxu1 %v9585_v16  ;;  %v9598_v39 = vld [vmem:[%s13278_s3 + $0x120] ss:$16 sps:$4 sm:$0xff]   ;;  %v9601_v40 = vld [vmem:[%s13278_s3 + $0x128] ss:$16 sps:$4 sm:$0xff]  }
 0x166   :  { %v11547_v49 = vadd.f32 %v8726_v48, %v3114_v33  ;;  %6850 = vmatpush1.bf16.msra.mxu0 %v9568_v57  ;;  %v9618_v57 = vld [vmem:[%s13278_s3 + $0x184] ss:$16 sps:$4 sm:$0xff]  }
 0x167   :  { %6851 = vmatprep.subr.bf16.mxu0 %v9576_v0  ;;  %7182 = vmatpush1.bf16.msra.mxu1 %v9583_v7  ;;  %v9625_v0 = vld [vmem:[%s13278_s3 + $0x1a8] ss:$16 sps:$4 sm:$0xff]  }
 0x168   :  { %7183 = vmatprep.subr.bf16.mxu1 %v9591_v21 }
 0x16a   :  { %6852 = vmatpush1.bf16.msra.mxu0 %v9574_v6  ;;  %v9628_v6 = vld [vmem:[%s13278_s3 + $0x1c0] ss:$16 sps:$4 sm:$0xff]  }
 0x16b   :  { %6853 = vmatprep.subr.bf16.mxu0 %v9582_v15  ;;  %7184 = vmatpush1.bf16.msra.mxu1 %v9589_v24 }
 0x16c   :  { %7185 = vmatprep.subr.bf16.mxu1 %v9597_v26  ;;  %v9642_v26 = vld [vmem:[%s13278_s3 + $0x204] ss:$16 sps:$4 sm:$0xff]  }
 0x16e   :  { %6854 = vmatpush1.bf16.msra.mxu0 %v9580_v17  ;;  %v9639_v17 = vld [vmem:[%s13278_s3 + $0x1ec] ss:$16 sps:$4 sm:$0xff]  }
 0x16f   :  { %6855 = vmatprep.subr.bf16.mxu0 %v9588_v20  ;;  %7186 = vmatpush1.bf16.msra.mxu1 %v9595_v29  ;;  %v9634_v20 = vld [vmem:[%s13278_s3 + $0x1e0] ss:$16 sps:$4 sm:$0xff]  }
 0x172   :  { %6856 = vmatpush1.bf16.msra.mxu0 %v9586_v23 }
 0x176   :  { %v8743_v61 = vpop.f32.mrb[32].mxu0 }
 0x177   :  { %v8771_v62 = vpop.f32.mrb[32].mxu1  ;;  %v8744_v63 = vpop.f32.mrb[33].mxu0 }
 0x178   :  { %v8745_v3 = vadd.f32 %v8744_v63, %v8743_v61  ;;  %v8772_v4 = vpop.f32.mrb[33].mxu1  ;;  %v8746_v5 = vpop.f32.mrb[34].mxu0  ;;  %v9624_v61 = vld [vmem:[%s13278_s3 + $0x1a4] ss:$16 sps:$4 sm:$0xff]   ;;  %v9622_v63 = vld [vmem:[%s13278_s3 + $0x1a0] ss:$16 sps:$4 sm:$0xff]  }
 0x179   :  { %v8773_v9 = vadd.f32 %v8772_v4, %v8771_v62  ;;  %v8774_v2 = vpop.f32.mrb[34].mxu1  ;;  %v8747_v10 = vpop.f32.mrb[35].mxu0  ;;  %v9627_v62 = vld [vmem:[%s13278_s3 + $0x1ac] ss:$16 sps:$4 sm:$0xff]  }
 0x17a   :  { %v3201_v11 = vadd.f32 %v8745_v3, %v11526_v25  ;;  %v8748_v12 = vadd.f32 %v8747_v10, %v8746_v5  ;;  %v8775_v13 = vpop.f32.mrb[35].mxu1  ;;  %v9594_v25 = vld [vmem:[%s13278_s3 + $0x104] ss:$16 sps:$4 sm:$0xff]   ;;  %v9633_v4 = vld [vmem:[%s13278_s3 + $0x1cc] ss:$16 sps:$4 sm:$0xff]  }
 0x17b   :  { %v8776_v14 = vadd.f32 %v8775_v13, %v8774_v2  ;;  %6857 = vmatprep.subr.bf16.mxu0 %v9594_v25  ;;  %v9630_v3 = vld [vmem:[%s13278_s3 + $0x1c4] ss:$16 sps:$4 sm:$0xff]  }
 0x17c   :  { %v11604_v18 = vadd.f32 %v8773_v9, %v3201_v11  ;;  %v3204_v19 = vadd.f32 %v8748_v12, %v11543_v32  ;;  %v9603_v32 = vld [vmem:[%s13278_s3 + $0x12c] ss:$16 sps:$4 sm:$0xff]   ;;  %6858 = vmatpush1.bf16.msra.mxu0 %v9592_v28 }
 0x17d   :  { %6859 = vmatprep.subr.bf16.mxu0 %v9600_v31  ;;  %7187 = vmatprep.subr.bf16.mxu1 %v9603_v32 }
 0x17e   :  { %v11619_v22 = vadd.f32 %v8776_v14, %v3204_v19  ;;  %v8749_v27 = vpop.f32.mrb[36].mxu0  ;;  %7188 = vmatpush1.bf16.msra.mxu1 %v9601_v40  ;;  %v9636_v19 = vld [vmem:[%s13278_s3 + $0x1e4] ss:$16 sps:$4 sm:$0xff]  }
 0x17f   :  { %v8750_v30 = vpop.f32.mrb[37].mxu0  ;;  %v8777_v41 = vpop.f32.mrb[36].mxu1 }
 0x180   :  { %v8751_v34 = vadd.f32 %v8750_v30, %v8749_v27  ;;  %v8752_v35 = vpop.f32.mrb[38].mxu0  ;;  %v8778_v42 = vpop.f32.mrb[37].mxu1  ;;  %6860 = vmatpush1.bf16.msra.mxu0 %v9598_v39  ;;  %v9645_v27 = vld [vmem:[%s13278_s3 + $0x20c] ss:$16 sps:$4 sm:$0xff]  }
 0x181   :  { %v8753_v36 = vpop.f32.mrb[39].mxu0  ;;  %v8779_v43 = vadd.f32 %v8778_v42, %v8777_v41  ;;  %v8780_v45 = vpop.f32.mrb[38].mxu1  ;;  %6861 = vmatprep.subr.bf16.mxu0 %v9606_v50 }
 0x182   :  { %v3209_v37 = vadd.f32 %v8751_v34, %v11545_v47  ;;  %v8754_v38 = vadd.f32 %v8753_v36, %v8752_v35  ;;  %v8781_v46 = vpop.f32.mrb[39].mxu1 }
 0x183   :  { %v8782_v48 = vadd.f32 %v8781_v46, %v8780_v45 }
 0x184   :  { %v3212_v33 = vadd.f32 %v8754_v38, %v11547_v49  ;;  %v11653_v47 = vadd.f32 %v8779_v43, %v3209_v37  ;;  %v9609_v49 = vld [vmem:[%s13278_s3 + $0x14c] ss:$16 sps:$4 sm:$0xff]   ;;  %6862 = vmatpush1.bf16.msra.mxu0 %v9604_v52 }
 0x185   :  { %7189 = vmatprep.subr.bf16.mxu1 %v9609_v49  ;;  %6863 = vmatprep.subr.bf16.mxu0 %v9612_v44 }
 0x186   :  { %v11661_v51 = vadd.f32 %v8782_v48, %v3212_v33  ;;  %7190 = vmatpush1.bf16.msra.mxu1 %v9607_v53 }
 0x187   :  { %7191 = vmatprep.subr.bf16.mxu1 %v9615_v54 }
 0x188   :  { %6864 = vmatpush1.bf16.msra.mxu0 %v9610_v55 }
 0x189   :  { %6865 = vmatprep.subr.bf16.mxu0 %v9618_v57 }
 0x18a   :  { %7192 = vmatpush1.bf16.msra.mxu1 %v9613_v56 }
 0x18b   :  { %7193 = vmatprep.subr.bf16.mxu1 %v9621_v58 }
 0x18c   :  { %6866 = vmatpush1.bf16.msra.mxu0 %v9616_v59 }
 0x18d   :  { %6867 = vmatprep.subr.bf16.mxu0 %v9624_v61 }
 0x18e   :  { %7194 = vmatpush1.bf16.msra.mxu1 %v9619_v60 }
 0x18f   :  { %7195 = vmatprep.subr.bf16.mxu1 %v9627_v62 }
 0x190   :  { %6868 = vmatpush1.bf16.msra.mxu0 %v9622_v63 }
 0x191   :  { %6869 = vmatprep.subr.bf16.mxu0 %v9630_v3 }
 0x192   :  { %7196 = vmatpush1.bf16.msra.mxu1 %v9625_v0 }
 0x193   :  { %7197 = vmatprep.subr.bf16.mxu1 %v9633_v4 }
 0x194   :  { %6870 = vmatpush1.bf16.msra.mxu0 %v9628_v6 }
 0x195   :  { %6871 = vmatprep.subr.bf16.mxu0 %v9636_v19 }
 0x196   :  { %v8799_v1 = vpop.f32.mrb[40].mxu0  ;;  %7198 = vmatpush1.bf16.msra.mxu1 %v9631_v8 }
 0x197   :  { %v8800_v5 = vpop.f32.mrb[41].mxu0  ;;  %v8827_v9 = vpop.f32.mrb[40].mxu1  ;;  %7199 = vmatprep.subr.bf16.mxu1 %v9639_v17 }
 0x198   :  { %v8801_v2 = vadd.f32 %v8800_v5, %v8799_v1  ;;  %v8802_v10 = vpop.f32.mrb[42].mxu0  ;;  %v8828_v11 = vpop.f32.mrb[41].mxu1  ;;  %6872 = vmatpush1.bf16.msra.mxu0 %v9634_v20 }
 0x199   :  { %v8803_v12 = vpop.f32.mrb[43].mxu0  ;;  %v8829_v14 = vadd.f32 %v8828_v11, %v8827_v9  ;;  %v8830_v15 = vpop.f32.mrb[42].mxu1  ;;  %6882 = vmatprep.subr.bf16.mxu0 %v9642_v26 }
 0x19a   :  { %v3299_v13 = vadd.f32 %v8801_v2, %v11604_v18  ;;  %v8804_v16 = vadd.f32 %v8803_v12, %v8802_v10  ;;  %v8831_v7 = vpop.f32.mrb[43].mxu1  ;;  %v9637_v18 = vld [vmem:[%s13278_s3 + $0x1e8] ss:$16 sps:$4 sm:$0xff]  }
 0x19b   :  { %v8832_v24 = vadd.f32 %v8831_v7, %v8830_v15  ;;  %7200 = vmatpush1.bf16.msra.mxu1 %v9637_v18 }
 0x19c   :  { %v3348_v21 = vadd.f32 %v8829_v14, %v3299_v13  ;;  %v3302_v23 = vadd.f32 %v8804_v16, %v11619_v22  ;;  %7210 = vmatprep.subr.bf16.mxu1 %v9645_v27 }
 0x19e   :  { %v3351_v25 = vadd.f32 %v8832_v24, %v3302_v23  ;;  %v8805_v28 = vpop.f32.mrb[44].mxu0 }
 0x19f   :  { %v8806_v29 = vpop.f32.mrb[45].mxu0  ;;  %v8833_v35 = vpop.f32.mrb[44].mxu1 }
 0x1a0   :  { %v8807_v30 = vadd.f32 %v8806_v29, %v8805_v28  ;;  %v8808_v22 = vpop.f32.mrb[46].mxu0  ;;  %v8834_v37 = vpop.f32.mrb[45].mxu1 }
 0x1a1   :  { %v8809_v31 = vpop.f32.mrb[47].mxu0  ;;  %v8835_v38 = vadd.f32 %v8834_v37, %v8833_v35  ;;  %v8836_v39 = vpop.f32.mrb[46].mxu1 }
 0x1a2   :  { %v3307_v32 = vadd.f32 %v8807_v30, %v11653_v47  ;;  %v8810_v34 = vadd.f32 %v8809_v31, %v8808_v22  ;;  %v8837_v40 = vpop.f32.mrb[47].mxu1 }
 0x1a3   :  { %v8838_v33 = vadd.f32 %v8837_v40, %v8836_v39 }
 0x1a4   :  { %v3310_v36 = vadd.f32 %v8810_v34, %v11661_v51  ;;  %v3356_v41 = vadd.f32 %v8835_v38, %v3307_v32 }
 0x1a6   :  { %v3359_v42 = vadd.f32 %v8838_v33, %v3310_v36 }
 0x1b6   :  { %v8855_v43 = vpop.f32.mrb[48].mxu0 }
 0x1b7   :  { %v8883_v45 = vpop.f32.mrb[48].mxu1  ;;  %v8856_v46 = vpop.f32.mrb[49].mxu0 }
 0x1b8   :  { %v8857_v48 = vadd.f32 %v8856_v46, %v8855_v43  ;;  %v8884_v50 = vpop.f32.mrb[49].mxu1  ;;  %v8858_v49 = vpop.f32.mrb[50].mxu0 }
 0x1b9   :  { %v8885_v52 = vadd.f32 %v8884_v50, %v8883_v45  ;;  %v8886_v53 = vpop.f32.mrb[50].mxu1  ;;  %v8859_v47 = vpop.f32.mrb[51].mxu0 }
 0x1ba   :  { %v3397_v44 = vadd.f32 %v8857_v48, %v3348_v21  ;;  %v8860_v54 = vadd.f32 %v8859_v47, %v8858_v49  ;;  %v8887_v55 = vpop.f32.mrb[51].mxu1 }
 0x1bb   :  { %v8888_v51 = vadd.f32 %v8887_v55, %v8886_v53 }
 0x1bc   :  { %v3446_v56 = vadd.f32 %v8885_v52, %v3397_v44  ;;  %v3400_v57 = vadd.f32 %v8860_v54, %v3351_v25 }
 0x1be   :  { %v3449_v58 = vadd.f32 %v8888_v51, %v3400_v57  ;;  %v8861_v59 = vpop.f32.mrb[52].mxu0 }
 0x1bf   :  { %v8862_v60 = vpop.f32.mrb[53].mxu0  ;;  %v8889_v3 = vpop.f32.mrb[52].mxu1 }
 0x1c0   :  { %v8863_v61 = vadd.f32 %v8862_v60, %v8861_v59  ;;  %v8864_v62 = vpop.f32.mrb[54].mxu0  ;;  %v8890_v5 = vpop.f32.mrb[53].mxu1 }
 0x1c1   :  { %v8865_v63 = vpop.f32.mrb[55].mxu0  ;;  %v8891_v6 = vadd.f32 %v8890_v5, %v8889_v3  ;;  %v8892_v8 = vpop.f32.mrb[54].mxu1 }
 0x1c2   :  { %v3405_v0 = vadd.f32 %v8863_v61, %v3356_v41  ;;  %v8866_v1 = vadd.f32 %v8865_v63, %v8864_v62  ;;  %v8893_v9 = vpop.f32.mrb[55].mxu1 }
 0x1c3   :  { %v8894_v10 = vadd.f32 %v8893_v9, %v8892_v8 }
 0x1c4   :  { %v3408_v4 = vadd.f32 %v8866_v1, %v3359_v42  ;;  %v3454_v2 = vadd.f32 %v8891_v6, %v3405_v0 }
 0x1c6   :  { %v3457_v11 = vadd.f32 %v8894_v10, %v3408_v4 }
 0x1d8   :  { %v8911_v12 = vpop.f32.mrb[56].mxu0 }
 0x1d9   :  { %v8912_v13 = vpop.f32.mrb[57].mxu0  ;;  %v8939_v14 = vpop.f32.mrb[56].mxu1 }
 0x1da   :  { %v8913_v15 = vadd.f32 %v8912_v13, %v8911_v12  ;;  %v8914_v16 = vpop.f32.mrb[58].mxu0  ;;  %v8940_v19 = vpop.f32.mrb[57].mxu1 }
 0x1db   :  { %v8915_v17 = vpop.f32.mrb[59].mxu0  ;;  %v8941_v20 = vadd.f32 %v8940_v19, %v8939_v14  ;;  %v8942_v18 = vpop.f32.mrb[58].mxu1 }
 0x1dc   :  { %v3495_v7 = vadd.f32 %v8913_v15, %v3446_v56  ;;  %v8916_v21 = vadd.f32 %v8915_v17, %v8914_v16  ;;  %v8943_v23 = vpop.f32.mrb[59].mxu1 }
 0x1dd   :  { %v8944_v26 = vadd.f32 %v8943_v23, %v8942_v18 }
 0x1de   :  { %v3544_v24 = vadd.f32 %v8941_v20, %v3495_v7  ;;  %v3498_v25 = vadd.f32 %v8916_v21, %v3449_v58 }
 0x1e0   :  { %v3547_v27 = vadd.f32 %v8944_v26, %v3498_v25  ;;  %v8917_v28 = vpop.f32.mrb[60].mxu0  ;;  %v9640_v26 = vld [vmem:[%s13278_s3 + $0x200] ss:$16 sps:$4 sm:$0xff]  }
 0x1e1   :  { %v8918_v29 = vpop.f32.mrb[61].mxu0  ;;  %v8945_v35 = vpop.f32.mrb[60].mxu1 }
 0x1e2   :  { %v8919_v30 = vadd.f32 %v8918_v29, %v8917_v28  ;;  %v8920_v22 = vpop.f32.mrb[62].mxu0  ;;  %v8946_v37 = vpop.f32.mrb[61].mxu1 }
 0x1e3   :  { %v8921_v31 = vpop.f32.mrb[63].mxu0  ;;  %v8947_v38 = vadd.f32 %v8946_v37, %v8945_v35  ;;  %v8948_v39 = vpop.f32.mrb[62].mxu1  ;;  %v9648_v37 = vld [vmem:[%s13278_s3 + $0x224] ss:$16 sps:$4 sm:$0xff]  }
 0x1e4   :  { %v3503_v32 = vadd.f32 %v8919_v30, %v3454_v2  ;;  %v8922_v34 = vadd.f32 %v8921_v31, %v8920_v22  ;;  %v8949_v40 = vpop.f32.mrb[63].mxu1 }
 0x1e5   :  { %v8950_v33 = vadd.f32 %v8949_v40, %v8948_v39 }
 0x1e6   :  { %v3506_v36 = vadd.f32 %v8922_v34, %v3457_v11  ;;  %v3552_v41 = vadd.f32 %v8947_v38, %v3503_v32  ;;  %v9651_v38 = vld [vmem:[%s13278_s3 + $0x22c] ss:$16 sps:$4 sm:$0xff]  }
 0x1e8   :  { %v3555_v42 = vadd.f32 %v8950_v33, %v3506_v36 }
 0x20b   :  { %v8967_v43 = vpop.f32.mrb[64].mxu0 }
 0x20c   :  { %v8968_v46 = vpop.f32.mrb[65].mxu0 }
 0x20d   :  { %v8969_v48 = vadd.f32 %v8968_v46, %v8967_v43  ;;  %v8970_v49 = vpop.f32.mrb[66].mxu0 }
 0x20e   :  { %v8971_v47 = vpop.f32.mrb[67].mxu0 }
 0x20f   :  { %v3593_v44 = vadd.f32 %v8969_v48, %v3544_v24  ;;  %v8972_v54 = vadd.f32 %v8971_v47, %v8970_v49  ;;  %v9649_v49 = vld [vmem:[%s13278_s3 + $0x228] ss:$16 sps:$4 sm:$0xff]  }
 0x211   :  { %v3596_v57 = vadd.f32 %v8972_v54, %v3547_v27  ;;  %v9643_v27 = vld [vmem:[%s13278_s3 + $0x208] ss:$16 sps:$4 sm:$0xff]   ;;  %v9654_v54 = vld [vmem:[%s13278_s3 + $0x244] ss:$16 sps:$4 sm:$0xff]  }
 0x212   :  { %v8995_v45 = vpop.f32.mrb[64].mxu1 }
 0x213   :  { %v8996_v50 = vpop.f32.mrb[65].mxu1  ;;  %v8973_v59 = vpop.f32.mrb[68].mxu0 }
 0x214   :  { %v8997_v52 = vadd.f32 %v8996_v50, %v8995_v45  ;;  %v8998_v53 = vpop.f32.mrb[66].mxu1  ;;  %v8974_v62 = vpop.f32.mrb[69].mxu0  ;;  %v9646_v50 = vld [vmem:[%s13278_s3 + $0x220] ss:$16 sps:$4 sm:$0xff]  }
 0x215   :  { %v8999_v55 = vpop.f32.mrb[67].mxu1  ;;  %v8975_v0 = vadd.f32 %v8974_v62, %v8973_v59  ;;  %v8976_v3 = vpop.f32.mrb[70].mxu0 }
 0x216   :  { %v9000_v51 = vadd.f32 %v8999_v55, %v8998_v53  ;;  %v3642_v56 = vadd.f32 %v8997_v52, %v3593_v44  ;;  %v8977_v6 = vpop.f32.mrb[71].mxu0  ;;  %v9657_v55 = vld [vmem:[%s13278_s3 + $0x24c] ss:$16 sps:$4 sm:$0xff]  }
 0x217   :  { %v3601_v9 = vadd.f32 %v8975_v0, %v3552_v41  ;;  %v8978_v2 = vadd.f32 %v8977_v6, %v8976_v3  ;;  %v9655_v0 = vld [vmem:[%s13278_s3 + $0x248] ss:$16 sps:$4 sm:$0xff]  }
 0x218   :  { %v3645_v58 = vadd.f32 %v9000_v51, %v3596_v57  ;;  %v3656_v60 = vmax.f32 %v3642_v56, 0.0 }
 0x219   :  { %v3604_v13 = vadd.f32 %v8978_v2, %v3555_v42 }
 0x21a   :  { %v9001_v61 = vpop.f32.mrb[68].mxu1  ;;  %v3657_v63 = vmax.f32 %v3645_v58, 0.0 }
 0x21b   :  { %v9002_v1 = vpop.f32.mrb[69].mxu1 }
 0x21c   :  { %v9003_v4 = vadd.f32 %v9002_v1, %v9001_v61  ;;  %v9004_v5 = vpop.f32.mrb[70].mxu1  ;;  %v11739_v8 = vpack.c.bf16 %v3657_v63, %v3656_v60  ;;  %v9652_v63 = vld [vmem:[%s13278_s3 + $0x240] ss:$16 sps:$4 sm:$0xff]  }
 0x21d   :  { %v9005_v10 = vpop.f32.mrb[71].mxu1 }
 0x21e   :  { %v9006_v11 = vadd.f32 %v9005_v10, %v9004_v5  ;;  %v3650_v12 = vadd.f32 %v9003_v4, %v3601_v9  ;;  %v11742_v14 = vshrl.u32 %v11739_v8, 16  ;;  %v3676_v7 = vrot.slane %v11739_v8, 1  ;;  %v9660_v10 = vld [vmem:[%s13278_s3 + $0x264] ss:$16 sps:$4 sm:$0xff]  }
 0x21f   :  { %v3687_v21 = vrot.slane %v11739_v8, 2  ;;  %v3697_v24 = vrot.slane %v11739_v8, 3  ;;  %v3707_v29 = vrot.slane %v11739_v8, 4  ;;  %v3717_v22 = vrot.slane %v11739_v8, 5 }
 0x220   :  { %v3653_v15 = vadd.f32 %v9006_v11, %v3604_v13  ;;  %v3658_v16 = vmax.f32 %v3650_v12, 0.0  ;;  %v3681_v17 = vrot.slane %v11742_v14, 1  ;;  %v3692_v18 = vrot.slane %v11742_v14, 2  ;;  %v9663_v11 = vld [vmem:[%s13278_s3 + $0x26c] ss:$16 sps:$4 sm:$0xff]  }
 0x221   :  { %v3702_v23 = vrot.slane %v11742_v14, 3  ;;  %v3712_v28 = vrot.slane %v11742_v14, 4  ;;  %v3722_v30 = vrot.slane %v11742_v14, 5  ;;  %v3732_v31 = vrot.slane %v11742_v14, 6  ;;  %v9658_v13 = vld [vmem:[%s13278_s3 + $0x260] ss:$16 sps:$4 sm:$0xff]  }
 0x222   :  { %v3659_v19 = vmax.f32 %v3653_v15, 0.0  ;;  %v3727_v32 = vrot.slane %v11739_v8, 6  ;;  %v3742_v4 = vrot.slane %v11742_v14, 7  ;;  %v3737_v9 = vrot.slane %v11739_v8, 7 }
 0x224   :  { %v11754_v25 = vpack.c.bf16 %v3659_v19, %v3658_v16 }
 0x226   :  { %v3674_v34 = vsel %vm11746_vm2, %v11742_v14, %v11754_v25  ;;  %v3663_v35 = vshll.u32 %v11754_v25, 16  ;;  %v3684_v36 = vrot.slane %v11754_v25, 1  ;;  %v3694_v39 = vrot.slane %v11754_v25, 2  ;;  %v9661_v14 = vld [vmem:[%s13278_s3 + $0x268] ss:$16 sps:$4 sm:$0xff]  }
 0x227   :  { %6873 = vmatprep.mubr.bf16.mxu0 %v3674_v34  ;;  %7201 = vmatprep.mubr.bf16.mxu1 %v3674_v34  ;;  %v3704_v40 = vrot.slane %v11754_v25, 3  ;;  %v3714_v41 = vrot.slane %v11754_v25, 4  ;;  %v3724_v33 = vrot.slane %v11754_v25, 5  ;;  %v3734_v42 = vrot.slane %v11754_v25, 6 }
 0x228   :  { %v3669_v43 = vsel %vm11746_vm2, %v11739_v8, %v3663_v35  ;;  %v3686_v45 = vsel %vm11746_vm2, %v3681_v17, %v3684_v36  ;;  %v3678_v46 = vrot.slane %v3663_v35, 1  ;;  %v11792_v48 = vsel %vm11746_vm2, %v3692_v18, %v3694_v39 }
 0x229   :  { %6874 = vmatmul.mubr.bf16.vlgmr.msra.gmra.mrb[72].mxu0 %v3669_v43  ;;  %7202 = vmatmul.mubr.bf16.vlgmr.msra.gmra.mrb[72].mxu1 %v3669_v43  ;;  %v3689_v52 = vrot.slane %v3663_v35, 2  ;;  %v11802_v53 = vsel %vm11746_vm2, %v3702_v23, %v3704_v40  ;;  %v3699_v47 = vrot.slane %v3663_v35, 3  ;;  %v11806_v44 = vsel %vm11746_vm2, %v3712_v28, %v3714_v41 }
 0x22a   :  { %6883 = vmatpush1.bf16.msra.mxu0 %v9640_v26  ;;  %7211 = vmatpush1.bf16.msra.mxu1 %v9643_v27  ;;  %v11816_v51 = vsel %vm11746_vm2, %v3676_v7, %v3678_v46  ;;  %v3709_v56 = vrot.slane %v3663_v35, 4  ;;  %v11820_v57 = vsel %vm11746_vm2, %v3722_v30, %v3724_v33  ;;  %v3719_v58 = vrot.slane %v3663_v35, 5 }
 0x22b   :  { %6914 = vmatprep.mubr.bf16.mxu0 %v3686_v45  ;;  %7242 = vmatprep.mubr.bf16.mxu1 %v3686_v45  ;;  %v11824_v59 = vsel %vm11746_vm2, %v3687_v21, %v3689_v52  ;;  %v11828_v60 = vsel %vm11746_vm2, %v3697_v24, %v3699_v47  ;;  %v11832_v61 = vsel %vm11746_vm2, %v3732_v31, %v3734_v42  ;;  %v3729_v62 = vrot.slane %v3663_v35, 6 }
 0x22c   :  { %6884 = vmatprep.subr.bf16.mxu0 %v9648_v37  ;;  %7212 = vmatprep.subr.bf16.mxu1 %v9651_v38  ;;  %v11842_v1 = vsel %vm11746_vm2, %v3707_v29, %v3709_v56  ;;  %v11846_v3 = vsel %vm11746_vm2, %v3717_v22, %v3719_v58  ;;  %v3744_v6 = vrot.slane %v11754_v25, 7  ;;  %v3739_v2 = vrot.slane %v3663_v35, 7 }
 0x22d   :  { %v11851_v5 = vsel %vm11746_vm2, %v3727_v32, %v3729_v62 }
 0x22e   :  { %6885 = vmatpush1.bf16.msra.mxu0 %v9646_v50  ;;  %7213 = vmatpush1.bf16.msra.mxu1 %v9649_v49  ;;  %v11863_v12 = vsel %vm11746_vm2, %v3742_v4, %v3744_v6  ;;  %v11867_v8 = vsel %vm11746_vm2, %v3737_v9, %v3739_v2 }
 0x22f   :  { %6886 = vmatprep.subr.bf16.mxu0 %v9654_v54  ;;  %7214 = vmatprep.subr.bf16.mxu1 %v9657_v55 }
 0x232   :  { %6887 = vmatpush1.bf16.msra.mxu0 %v9652_v63  ;;  %7215 = vmatpush1.bf16.msra.mxu1 %v9655_v0 }
 0x233   :  { %15 = vsyncpa [#allocation5], 0  ;;  %6888 = vmatprep.subr.bf16.mxu0 %v9660_v10  ;;  %7216 = vmatprep.subr.bf16.mxu1 %v9663_v11  ;;  %v9666_v15 = vld [vmem:[%s13278_s3 + $0x284] ss:$16 sps:$4 sm:$0xff]   ;;  %v9669_v16 = vld [vmem:[%s13278_s3 + $0x28c] ss:$16 sps:$4 sm:$0xff]  }
 0x234   :  { %v9664_v19 = vld [vmem:[%s13278_s3 + $0x280] ss:$16 sps:$4 sm:$0xff]   ;;  %v9667_v17 = vld [vmem:[%s13278_s3 + $0x288] ss:$16 sps:$4 sm:$0xff]   ;;  %v9672_v7 = vld [vmem:[%s13278_s3 + $0x2a4] ss:$16 sps:$4 sm:$0xff]  }
 0x235   :  { %v9675_v20 = vld [vmem:[%s13278_s3 + $0x2ac] ss:$16 sps:$4 sm:$0xff]   ;;  %v9670_v18 = vld [vmem:[%s13278_s3 + $0x2a0] ss:$16 sps:$4 sm:$0xff]   ;;  %v9673_v21 = vld [vmem:[%s13278_s3 + $0x2a8] ss:$16 sps:$4 sm:$0xff]  }
 0x236   :  { %6889 = vmatpush1.bf16.msra.mxu0 %v9658_v13  ;;  %7217 = vmatpush1.bf16.msra.mxu1 %v9661_v14  ;;  %v9678_v23 = vld [vmem:[%s13278_s3 + $0x2c4] ss:$16 sps:$4 sm:$0xff]   ;;  %v9681_v24 = vld [vmem:[%s13278_s3 + $0x2cc] ss:$16 sps:$4 sm:$0xff]   ;;  %v9676_v25 = vld [vmem:[%s13278_s3 + $0x2c0] ss:$16 sps:$4 sm:$0xff]  }
 0x237   :  { %6890 = vmatprep.subr.bf16.mxu0 %v9666_v15  ;;  %7218 = vmatprep.subr.bf16.mxu1 %v9669_v16  ;;  %v9679_v26 = vld [vmem:[%s13278_s3 + $0x2c8] ss:$16 sps:$4 sm:$0xff]   ;;  %v9684_v27 = vld [vmem:[%s13278_s3 + $0x2e4] ss:$16 sps:$4 sm:$0xff]   ;;  %v9687_v28 = vld [vmem:[%s13278_s3 + $0x2ec] ss:$16 sps:$4 sm:$0xff]  }
 0x238   :  { %v9682_v29 = vld [vmem:[%s13278_s3 + $0x2e0] ss:$16 sps:$4 sm:$0xff]   ;;  %v9685_v30 = vld [vmem:[%s13278_s3 + $0x2e8] ss:$16 sps:$4 sm:$0xff]   ;;  %v9690_v22 = vld [vmem:[%s13278_s3 + $0x304] ss:$16 sps:$4 sm:$0xff]  }
 0x239   :  { %v9693_v31 = vld [vmem:[%s13278_s3 + $0x30c] ss:$16 sps:$4 sm:$0xff]   ;;  %v9688_v32 = vld [vmem:[%s13278_s3 + $0x300] ss:$16 sps:$4 sm:$0xff]   ;;  %v9691_v34 = vld [vmem:[%s13278_s3 + $0x308] ss:$16 sps:$4 sm:$0xff]  }
 0x23a   :  { %6891 = vmatpush1.bf16.msra.mxu0 %v9664_v19  ;;  %7219 = vmatpush1.bf16.msra.mxu1 %v9667_v17  ;;  %v9696_v35 = vld [vmem:[%s13278_s3 + $0x324] ss:$16 sps:$4 sm:$0xff]   ;;  %v9699_v36 = vld [vmem:[%s13278_s3 + $0x32c] ss:$16 sps:$4 sm:$0xff]   ;;  %v9694_v37 = vld [vmem:[%s13278_s3 + $0x320] ss:$16 sps:$4 sm:$0xff]  }
 0x23b   :  { %6892 = vmatprep.subr.bf16.mxu0 %v9672_v7  ;;  %7220 = vmatprep.subr.bf16.mxu1 %v9675_v20  ;;  %v9697_v38 = vld [vmem:[%s13278_s3 + $0x328] ss:$16 sps:$4 sm:$0xff]   ;;  %v9702_v39 = vld [vmem:[%s13278_s3 + $0x344] ss:$16 sps:$4 sm:$0xff]   ;;  %v9705_v40 = vld [vmem:[%s13278_s3 + $0x34c] ss:$16 sps:$4 sm:$0xff]  }
 0x23c   :  { %v9700_v41 = vld [vmem:[%s13278_s3 + $0x340] ss:$16 sps:$4 sm:$0xff]   ;;  %v9703_v33 = vld [vmem:[%s13278_s3 + $0x348] ss:$16 sps:$4 sm:$0xff]   ;;  %v9708_v42 = vld [vmem:[%s13278_s3 + $0x364] ss:$16 sps:$4 sm:$0xff]  }
 0x23d   :  { %v9711_v43 = vld [vmem:[%s13278_s3 + $0x36c] ss:$16 sps:$4 sm:$0xff]   ;;  %v9706_v45 = vld [vmem:[%s13278_s3 + $0x360] ss:$16 sps:$4 sm:$0xff]   ;;  %v9709_v46 = vld [vmem:[%s13278_s3 + $0x368] ss:$16 sps:$4 sm:$0xff]  }
 0x23e   :  { %6893 = vmatpush1.bf16.msra.mxu0 %v9670_v18  ;;  %7221 = vmatpush1.bf16.msra.mxu1 %v9673_v21  ;;  %v9714_v50 = vld [vmem:[%s13278_s3 + $0x384] ss:$16 sps:$4 sm:$0xff]   ;;  %v9717_v49 = vld [vmem:[%s13278_s3 + $0x38c] ss:$16 sps:$4 sm:$0xff]   ;;  %v9712_v52 = vld [vmem:[%s13278_s3 + $0x380] ss:$16 sps:$4 sm:$0xff]  }
 0x23f   :  { %6894 = vmatprep.subr.bf16.mxu0 %v9678_v23  ;;  %7222 = vmatprep.subr.bf16.mxu1 %v9681_v24  ;;  %v9715_v47 = vld [vmem:[%s13278_s3 + $0x388] ss:$16 sps:$4 sm:$0xff]   ;;  %v9720_v54 = vld [vmem:[%s13278_s3 + $0x3a4] ss:$16 sps:$4 sm:$0xff]   ;;  %v9723_v55 = vld [vmem:[%s13278_s3 + $0x3ac] ss:$16 sps:$4 sm:$0xff]  }
 0x240   :  { %v9718_v56 = vld [vmem:[%s13278_s3 + $0x3a0] ss:$16 sps:$4 sm:$0xff]   ;;  %v9721_v58 = vld [vmem:[%s13278_s3 + $0x3a8] ss:$16 sps:$4 sm:$0xff]   ;;  %v9726_v62 = vld [vmem:[%s13278_s3 + $0x3c4] ss:$16 sps:$4 sm:$0xff]  }
 0x241   :  { %v9729_v63 = vld [vmem:[%s13278_s3 + $0x3cc] ss:$16 sps:$4 sm:$0xff]   ;;  %v9724_v0 = vld [vmem:[%s13278_s3 + $0x3c0] ss:$16 sps:$4 sm:$0xff]   ;;  %v9727_v4 = vld [vmem:[%s13278_s3 + $0x3c8] ss:$16 sps:$4 sm:$0xff]  }
 0x242   :  { %6895 = vmatpush1.bf16.msra.mxu0 %v9676_v25  ;;  %7223 = vmatpush1.bf16.msra.mxu1 %v9679_v26  ;;  %v9732_v6 = vld [vmem:[%s13278_s3 + $0x3e4] ss:$16 sps:$4 sm:$0xff]   ;;  %v9735_v9 = vld [vmem:[%s13278_s3 + $0x3ec] ss:$16 sps:$4 sm:$0xff]   ;;  %v9730_v2 = vld [vmem:[%s13278_s3 + $0x3e0] ss:$16 sps:$4 sm:$0xff]  }
 0x243   :  { %6896 = vmatprep.subr.bf16.mxu0 %v9684_v27  ;;  %7224 = vmatprep.subr.bf16.mxu1 %v9687_v28  ;;  %v9733_v10 = vld [vmem:[%s13278_s3 + $0x3e8] ss:$16 sps:$4 sm:$0xff]   ;;  %v9738_v11 = vld [vmem:[%s13278_s3 + $0x404] ss:$16 sps:$4 sm:$0xff]   ;;  %v9741_v13 = vld [vmem:[%s13278_s3 + $0x40c] ss:$16 sps:$4 sm:$0xff]  }
 0x244   :  { %v9736_v14 = vld [vmem:[%s13278_s3 + $0x400] ss:$16 sps:$4 sm:$0xff]   ;;  %v9739_v15 = vld [vmem:[%s13278_s3 + $0x408] ss:$16 sps:$4 sm:$0xff]   ;;  %v9744_v16 = vld [vmem:[%s13278_s3 + $0x424] ss:$16 sps:$4 sm:$0xff]  }
 0x245   :  { %v9747_v19 = vld [vmem:[%s13278_s3 + $0x42c] ss:$16 sps:$4 sm:$0xff]   ;;  %v9742_v17 = vld [vmem:[%s13278_s3 + $0x420] ss:$16 sps:$4 sm:$0xff]   ;;  %v9745_v7 = vld [vmem:[%s13278_s3 + $0x428] ss:$16 sps:$4 sm:$0xff]  }
 0x246   :  { %6897 = vmatpush1.bf16.msra.mxu0 %v9682_v29  ;;  %7225 = vmatpush1.bf16.msra.mxu1 %v9685_v30  ;;  %v9750_v20 = vld [vmem:[%s13278_s3 + $0x444] ss:$16 sps:$4 sm:$0xff]   ;;  %v9748_v18 = vld [vmem:[%s13278_s3 + $0x440] ss:$16 sps:$4 sm:$0xff]   ;;  %v9759_v23 = vld [vmem:[%s13278_s3 + $0x46c] ss:$16 sps:$4 sm:$0xff]  }
 0x247   :  { %6898 = vmatprep.subr.bf16.mxu0 %v9690_v22  ;;  %7226 = vmatprep.subr.bf16.mxu1 %v9693_v31  ;;  %v9756_v21 = vld [vmem:[%s13278_s3 + $0x464] ss:$16 sps:$4 sm:$0xff]   ;;  %v9754_v24 = vld [vmem:[%s13278_s3 + $0x460] ss:$16 sps:$4 sm:$0xff]   ;;  %v9757_v25 = vld [vmem:[%s13278_s3 + $0x468] ss:$16 sps:$4 sm:$0xff]  }
 0x248   :  { %v9762_v26 = vld [vmem:[%s13278_s3 + $0x484] ss:$16 sps:$4 sm:$0xff]   ;;  %v9765_v27 = vld [vmem:[%s13278_s3 + $0x48c] ss:$16 sps:$4 sm:$0xff]   ;;  %v9760_v28 = vld [vmem:[%s13278_s3 + $0x480] ss:$16 sps:$4 sm:$0xff]  }
 0x249   :  { %v9763_v29 = vld [vmem:[%s13278_s3 + $0x488] ss:$16 sps:$4 sm:$0xff]   ;;  %v9768_v30 = vld [vmem:[%s13278_s3 + $0x4a4] ss:$16 sps:$4 sm:$0xff]   ;;  %v9771_v22 = vld [vmem:[%s13278_s3 + $0x4ac] ss:$16 sps:$4 sm:$0xff]  }
 0x24a   :  { %6899 = vmatpush1.bf16.msra.mxu0 %v9688_v32  ;;  %7227 = vmatpush1.bf16.msra.mxu1 %v9691_v34  ;;  %v9766_v31 = vld [vmem:[%s13278_s3 + $0x4a0] ss:$16 sps:$4 sm:$0xff]   ;;  %v9769_v32 = vld [vmem:[%s13278_s3 + $0x4a8] ss:$16 sps:$4 sm:$0xff]   ;;  %v9774_v34 = vld [vmem:[%s13278_s3 + $0x4c4] ss:$16 sps:$4 sm:$0xff]  }
 0x24b   :  { %6900 = vmatprep.subr.bf16.mxu0 %v9696_v35  ;;  %7228 = vmatprep.subr.bf16.mxu1 %v9699_v36  ;;  %v9777_v35 = vld [vmem:[%s13278_s3 + $0x4cc] ss:$16 sps:$4 sm:$0xff]   ;;  %v9772_v36 = vld [vmem:[%s13278_s3 + $0x4c0] ss:$16 sps:$4 sm:$0xff]   ;;  %vm10361_vm3 = vmmov 0  }
 0x24e   :  { %6901 = vmatpush1.bf16.msra.mxu0 %v9694_v37  ;;  %7229 = vmatpush1.bf16.msra.mxu1 %v9697_v38  ;;  %v9775_v37 = vld [vmem:[%s13278_s3 + $0x4c8] ss:$16 sps:$4 sm:$0xff]   ;;  %v9780_v38 = vld [vmem:[%s13278_s3 + $0x4e4] ss:$16 sps:$4 sm:$0xff]  }
 0x24f   :  { %6902 = vmatprep.subr.bf16.mxu0 %v9702_v39  ;;  %7230 = vmatprep.subr.bf16.mxu1 %v9705_v40  ;;  %v9783_v39 = vld [vmem:[%s13278_s3 + $0x4ec] ss:$16 sps:$4 sm:$0xff]   ;;  %v9778_v40 = vld [vmem:[%s13278_s3 + $0x4e0] ss:$16 sps:$4 sm:$0xff]  }
 0x252   :  { %6903 = vmatpush1.bf16.msra.mxu0 %v9700_v41  ;;  %7231 = vmatpush1.bf16.msra.mxu1 %v9703_v33  ;;  %v9781_v41 = vld [vmem:[%s13278_s3 + $0x4e8] ss:$16 sps:$4 sm:$0xff]   ;;  %v9786_v33 = vld [vmem:[%s13278_s3 + $0x504] ss:$16 sps:$4 sm:$0xff]  }
 0x253   :  { %6904 = vmatprep.subr.bf16.mxu0 %v9708_v42  ;;  %7232 = vmatprep.subr.bf16.mxu1 %v9711_v43  ;;  %v9789_v42 = vld [vmem:[%s13278_s3 + $0x50c] ss:$16 sps:$4 sm:$0xff]   ;;  %v9784_v43 = vld [vmem:[%s13278_s3 + $0x500] ss:$16 sps:$4 sm:$0xff]  }
 0x256   :  { %6905 = vmatpush1.bf16.msra.mxu0 %v9706_v45  ;;  %7233 = vmatpush1.bf16.msra.mxu1 %v9709_v46  ;;  %v9787_v45 = vld [vmem:[%s13278_s3 + $0x508] ss:$16 sps:$4 sm:$0xff]   ;;  %v9792_v46 = vld [vmem:[%s13278_s3 + $0x524] ss:$16 sps:$4 sm:$0xff]  }
 0x257   :  { %6906 = vmatprep.subr.bf16.mxu0 %v9714_v50  ;;  %7234 = vmatprep.subr.bf16.mxu1 %v9717_v49  ;;  %v9795_v50 = vld [vmem:[%s13278_s3 + $0x52c] ss:$16 sps:$4 sm:$0xff]   ;;  %v9790_v49 = vld [vmem:[%s13278_s3 + $0x520] ss:$16 sps:$4 sm:$0xff]  }
 0x25a   :  { %6907 = vmatpush1.bf16.msra.mxu0 %v9712_v52  ;;  %7235 = vmatpush1.bf16.msra.mxu1 %v9715_v47  ;;  %v9793_v52 = vld [vmem:[%s13278_s3 + $0x528] ss:$16 sps:$4 sm:$0xff]   ;;  %v9798_v47 = vld [vmem:[%s13278_s3 + $0x544] ss:$16 sps:$4 sm:$0xff]  }
 0x25b   :  { %6908 = vmatprep.subr.bf16.mxu0 %v9720_v54  ;;  %7236 = vmatprep.subr.bf16.mxu1 %v9723_v55  ;;  %v9801_v54 = vld [vmem:[%s13278_s3 + $0x54c] ss:$16 sps:$4 sm:$0xff]   ;;  %v9796_v55 = vld [vmem:[%s13278_s3 + $0x540] ss:$16 sps:$4 sm:$0xff]  }
 0x25e   :  { %6909 = vmatpush1.bf16.msra.mxu0 %v9718_v56  ;;  %7237 = vmatpush1.bf16.msra.mxu1 %v9721_v58  ;;  %v9799_v56 = vld [vmem:[%s13278_s3 + $0x548] ss:$16 sps:$4 sm:$0xff]   ;;  %v9804_v58 = vld [vmem:[%s13278_s3 + $0x564] ss:$16 sps:$4 sm:$0xff]  }
 0x25f   :  { %6910 = vmatprep.subr.bf16.mxu0 %v9726_v62  ;;  %7238 = vmatprep.subr.bf16.mxu1 %v9729_v63  ;;  %v9807_v62 = vld [vmem:[%s13278_s3 + $0x56c] ss:$16 sps:$4 sm:$0xff]   ;;  %v9802_v63 = vld [vmem:[%s13278_s3 + $0x560] ss:$16 sps:$4 sm:$0xff]  }
 0x262   :  { %6911 = vmatpush1.bf16.msra.mxu0 %v9724_v0  ;;  %7239 = vmatpush1.bf16.msra.mxu1 %v9727_v4  ;;  %v9805_v0 = vld [vmem:[%s13278_s3 + $0x568] ss:$16 sps:$4 sm:$0xff]   ;;  %v9810_v4 = vld [vmem:[%s13278_s3 + $0x584] ss:$16 sps:$4 sm:$0xff]  }
 0x263   :  { %6912 = vmatprep.subr.bf16.mxu0 %v9732_v6  ;;  %7240 = vmatprep.subr.bf16.mxu1 %v9735_v9  ;;  %v9813_v6 = vld [vmem:[%s13278_s3 + $0x58c] ss:$16 sps:$4 sm:$0xff]   ;;  %v9808_v9 = vld [vmem:[%s13278_s3 + $0x580] ss:$16 sps:$4 sm:$0xff]  }
 0x266   :  { %6913 = vmatpush1.bf16.msra.mxu0 %v9730_v2  ;;  %7241 = vmatpush1.bf16.msra.mxu1 %v9733_v10  ;;  %v9811_v2 = vld [vmem:[%s13278_s3 + $0x588] ss:$16 sps:$4 sm:$0xff]   ;;  %v9816_v10 = vld [vmem:[%s13278_s3 + $0x5a4] ss:$16 sps:$4 sm:$0xff]  }
 0x267   :  { %6923 = vmatprep.subr.bf16.mxu0 %v9738_v11  ;;  %7251 = vmatprep.subr.bf16.mxu1 %v9741_v13  ;;  %v9819_v11 = vld [vmem:[%s13278_s3 + $0x5ac] ss:$16 sps:$4 sm:$0xff]   ;;  %v9814_v13 = vld [vmem:[%s13278_s3 + $0x5a0] ss:$16 sps:$4 sm:$0xff]  }
 0x269   :  { %6915 = vmatmul.mubr.bf16.vlgmr.msra.gmra.mrb[72].mxu0 %v11816_v51  ;;  %7243 = vmatmul.mubr.bf16.vlgmr.msra.gmra.mrb[72].mxu1 %v11816_v51  ;;  %v9753_v51 = vld [vmem:[%s13278_s3 + $0x44c] ss:$16 sps:$4 sm:$0xff]  }
 0x26a   :  { %6924 = vmatpush1.bf16.msra.mxu0 %v9736_v14  ;;  %6955 = vmatprep.mubr.bf16.mxu0 %v11792_v48  ;;  %v9817_v14 = vld [vmem:[%s13278_s3 + $0x5a8] ss:$16 sps:$4 sm:$0xff]  }
 0x26b   :  { %7252 = vmatpush1.bf16.msra.mxu1 %v9739_v15  ;;  %7283 = vmatprep.mubr.bf16.mxu1 %v11792_v48  ;;  %v9751_v48 = vld [vmem:[%s13278_s3 + $0x448] ss:$16 sps:$4 sm:$0xff]   ;;  %v9822_v15 = vld [vmem:[%s13278_s3 + $0x5c4] ss:$16 sps:$4 sm:$0xff]  }
 0x26c   :  { %6925 = vmatprep.subr.bf16.mxu0 %v9744_v16  ;;  %7253 = vmatprep.subr.bf16.mxu1 %v9747_v19  ;;  %v9825_v16 = vld [vmem:[%s13278_s3 + $0x5cc] ss:$16 sps:$4 sm:$0xff]   ;;  %v9820_v19 = vld [vmem:[%s13278_s3 + $0x5c0] ss:$16 sps:$4 sm:$0xff]  }
 0x26e   :  { %6926 = vmatpush1.bf16.msra.mxu0 %v9742_v17  ;;  %v9823_v17 = vld [vmem:[%s13278_s3 + $0x5c8] ss:$16 sps:$4 sm:$0xff]  }
 0x26f   :  { %7254 = vmatpush1.bf16.msra.mxu1 %v9745_v7  ;;  %6927 = vmatprep.subr.bf16.mxu0 %v9750_v20  ;;  %v9828_v7 = vld [vmem:[%s13278_s3 + $0x5e4] ss:$16 sps:$4 sm:$0xff]   ;;  %v9831_v20 = vld [vmem:[%s13278_s3 + $0x5ec] ss:$16 sps:$4 sm:$0xff]  }
 0x270   :  { %7255 = vmatprep.subr.bf16.mxu1 %v9753_v51  ;;  %v9826_v51 = vld [vmem:[%s13278_s3 + $0x5e0] ss:$16 sps:$4 sm:$0xff]  }
 0x272   :  { %6928 = vmatpush1.bf16.msra.mxu0 %v9748_v18  ;;  %v9829_v18 = vld [vmem:[%s13278_s3 + $0x5e8] ss:$16 sps:$4 sm:$0xff]  }
 0x273   :  { %7256 = vmatpush1.bf16.msra.mxu1 %v9751_v48  ;;  %6929 = vmatprep.subr.bf16.mxu0 %v9756_v21  ;;  %v9834_v48 = vld [vmem:[%s13278_s3 + $0x604] ss:$16 sps:$4 sm:$0xff]   ;;  %v9837_v21 = vld [vmem:[%s13278_s3 + $0x60c] ss:$16 sps:$4 sm:$0xff]  }
 0x274   :  { %7257 = vmatprep.subr.bf16.mxu1 %v9759_v23  ;;  %v9832_v23 = vld [vmem:[%s13278_s3 + $0x600] ss:$16 sps:$4 sm:$0xff]  }
 0x276   :  { %6930 = vmatpush1.bf16.msra.mxu0 %v9754_v24  ;;  %v9835_v24 = vld [vmem:[%s13278_s3 + $0x608] ss:$16 sps:$4 sm:$0xff]  }
 0x277   :  { %7258 = vmatpush1.bf16.msra.mxu1 %v9757_v25  ;;  %6931 = vmatprep.subr.bf16.mxu0 %v9762_v26  ;;  %v9840_v25 = vld [vmem:[%s13278_s3 + $0x624] ss:$16 sps:$4 sm:$0xff]   ;;  %v9843_v26 = vld [vmem:[%s13278_s3 + $0x62c] ss:$16 sps:$4 sm:$0xff]  }
 0x278   :  { %7259 = vmatprep.subr.bf16.mxu1 %v9765_v27  ;;  %v9838_v27 = vld [vmem:[%s13278_s3 + $0x620] ss:$16 sps:$4 sm:$0xff]  }
 0x27a   :  { %6932 = vmatpush1.bf16.msra.mxu0 %v9760_v28  ;;  %v9841_v28 = vld [vmem:[%s13278_s3 + $0x628] ss:$16 sps:$4 sm:$0xff]  }
 0x27b   :  { %7260 = vmatpush1.bf16.msra.mxu1 %v9763_v29  ;;  %6933 = vmatprep.subr.bf16.mxu0 %v9768_v30  ;;  %v9846_v29 = vld [vmem:[%s13278_s3 + $0x644] ss:$16 sps:$4 sm:$0xff]   ;;  %v9844_v30 = vld [vmem:[%s13278_s3 + $0x640] ss:$16 sps:$4 sm:$0xff]  }
 0x27c   :  { %7261 = vmatprep.subr.bf16.mxu1 %v9771_v22  ;;  %v9847_v22 = vld [vmem:[%s13278_s3 + $0x648] ss:$16 sps:$4 sm:$0xff]  }
 0x27e   :  { %6934 = vmatpush1.bf16.msra.mxu0 %v9766_v31  ;;  %v9855_v31 = vld [vmem:[%s13278_s3 + $0x66c] ss:$16 sps:$4 sm:$0xff]  }
 0x27f   :  { %7262 = vmatpush1.bf16.msra.mxu1 %v9769_v32  ;;  %6935 = vmatprep.subr.bf16.mxu0 %v9774_v34  ;;  %v9850_v32 = vld [vmem:[%s13278_s3 + $0x660] ss:$16 sps:$4 sm:$0xff]   ;;  %v9853_v34 = vld [vmem:[%s13278_s3 + $0x668] ss:$16 sps:$4 sm:$0xff]  }
 0x280   :  { %7263 = vmatprep.subr.bf16.mxu1 %v9777_v35  ;;  %v9858_v35 = vld [vmem:[%s13278_s3 + $0x684] ss:$16 sps:$4 sm:$0xff]  }
 0x282   :  { %6936 = vmatpush1.bf16.msra.mxu0 %v9772_v36  ;;  %v9861_v36 = vld [vmem:[%s13278_s3 + $0x68c] ss:$16 sps:$4 sm:$0xff]  }
 0x283   :  { %7264 = vmatpush1.bf16.msra.mxu1 %v9775_v37  ;;  %6937 = vmatprep.subr.bf16.mxu0 %v9780_v38  ;;  %v9856_v37 = vld [vmem:[%s13278_s3 + $0x680] ss:$16 sps:$4 sm:$0xff]   ;;  %v9859_v38 = vld [vmem:[%s13278_s3 + $0x688] ss:$16 sps:$4 sm:$0xff]  }
 0x284   :  { %7265 = vmatprep.subr.bf16.mxu1 %v9783_v39  ;;  %v9864_v39 = vld [vmem:[%s13278_s3 + $0x6a4] ss:$16 sps:$4 sm:$0xff]  }
 0x286   :  { %6938 = vmatpush1.bf16.msra.mxu0 %v9778_v40  ;;  %v9867_v40 = vld [vmem:[%s13278_s3 + $0x6ac] ss:$16 sps:$4 sm:$0xff]  }
 0x287   :  { %7266 = vmatpush1.bf16.msra.mxu1 %v9781_v41  ;;  %6939 = vmatprep.subr.bf16.mxu0 %v9786_v33  ;;  %v9862_v41 = vld [vmem:[%s13278_s3 + $0x6a0] ss:$16 sps:$4 sm:$0xff]   ;;  %v9865_v33 = vld [vmem:[%s13278_s3 + $0x6a8] ss:$16 sps:$4 sm:$0xff]  }
 0x288   :  { %7267 = vmatprep.subr.bf16.mxu1 %v9789_v42  ;;  %v9870_v42 = vld [vmem:[%s13278_s3 + $0x6c4] ss:$16 sps:$4 sm:$0xff]  }
 0x28a   :  { %6940 = vmatpush1.bf16.msra.mxu0 %v9784_v43  ;;  %v9873_v43 = vld [vmem:[%s13278_s3 + $0x6cc] ss:$16 sps:$4 sm:$0xff]  }
 0x28b   :  { %7268 = vmatpush1.bf16.msra.mxu1 %v9787_v45  ;;  %6941 = vmatprep.subr.bf16.mxu0 %v9792_v46  ;;  %v9868_v45 = vld [vmem:[%s13278_s3 + $0x6c0] ss:$16 sps:$4 sm:$0xff]   ;;  %v9871_v46 = vld [vmem:[%s13278_s3 + $0x6c8] ss:$16 sps:$4 sm:$0xff]  }
 0x28c   :  { %7269 = vmatprep.subr.bf16.mxu1 %v9795_v50  ;;  %v9876_v50 = vld [vmem:[%s13278_s3 + $0x6e4] ss:$16 sps:$4 sm:$0xff]  }
 0x28e   :  { %6942 = vmatpush1.bf16.msra.mxu0 %v9790_v49  ;;  %v9879_v49 = vld [vmem:[%s13278_s3 + $0x6ec] ss:$16 sps:$4 sm:$0xff]  }
 0x28f   :  { %7270 = vmatpush1.bf16.msra.mxu1 %v9793_v52  ;;  %6943 = vmatprep.subr.bf16.mxu0 %v9798_v47  ;;  %v9874_v52 = vld [vmem:[%s13278_s3 + $0x6e0] ss:$16 sps:$4 sm:$0xff]   ;;  %v9877_v47 = vld [vmem:[%s13278_s3 + $0x6e8] ss:$16 sps:$4 sm:$0xff]  }
 0x290   :  { %7271 = vmatprep.subr.bf16.mxu1 %v9801_v54  ;;  %v9882_v54 = vld [vmem:[%s13278_s3 + $0x704] ss:$16 sps:$4 sm:$0xff]  }
 0x292   :  { %6944 = vmatpush1.bf16.msra.mxu0 %v9796_v55  ;;  %v9885_v55 = vld [vmem:[%s13278_s3 + $0x70c] ss:$16 sps:$4 sm:$0xff]  }
 0x293   :  { %7272 = vmatpush1.bf16.msra.mxu1 %v9799_v56  ;;  %6945 = vmatprep.subr.bf16.mxu0 %v9804_v58  ;;  %v9880_v56 = vld [vmem:[%s13278_s3 + $0x700] ss:$16 sps:$4 sm:$0xff]   ;;  %v9883_v58 = vld [vmem:[%s13278_s3 + $0x708] ss:$16 sps:$4 sm:$0xff]  }
 0x294   :  { %7273 = vmatprep.subr.bf16.mxu1 %v9807_v62  ;;  %v9888_v62 = vld [vmem:[%s13278_s3 + $0x724] ss:$16 sps:$4 sm:$0xff]  }
 0x296   :  { %6946 = vmatpush1.bf16.msra.mxu0 %v9802_v63  ;;  %v9891_v63 = vld [vmem:[%s13278_s3 + $0x72c] ss:$16 sps:$4 sm:$0xff]  }
 0x297   :  { %7274 = vmatpush1.bf16.msra.mxu1 %v9805_v0  ;;  %6947 = vmatprep.subr.bf16.mxu0 %v9810_v4  ;;  %v9886_v0 = vld [vmem:[%s13278_s3 + $0x720] ss:$16 sps:$4 sm:$0xff]   ;;  %v9889_v4 = vld [vmem:[%s13278_s3 + $0x728] ss:$16 sps:$4 sm:$0xff]  }
 0x298   :  { %7275 = vmatprep.subr.bf16.mxu1 %v9813_v6  ;;  %v9894_v6 = vld [vmem:[%s13278_s3 + $0x744] ss:$16 sps:$4 sm:$0xff]  }
 0x29a   :  { %6948 = vmatpush1.bf16.msra.mxu0 %v9808_v9  ;;  %v9897_v9 = vld [vmem:[%s13278_s3 + $0x74c] ss:$16 sps:$4 sm:$0xff]  }
 0x29b   :  { %7276 = vmatpush1.bf16.msra.mxu1 %v9811_v2  ;;  %6949 = vmatprep.subr.bf16.mxu0 %v9816_v10  ;;  %v9892_v2 = vld [vmem:[%s13278_s3 + $0x740] ss:$16 sps:$4 sm:$0xff]   ;;  %v9895_v10 = vld [vmem:[%s13278_s3 + $0x748] ss:$16 sps:$4 sm:$0xff]  }
 0x29c   :  { %7277 = vmatprep.subr.bf16.mxu1 %v9819_v11  ;;  %v9900_v11 = vld [vmem:[%s13278_s3 + $0x764] ss:$16 sps:$4 sm:$0xff]  }
 0x29e   :  { %6950 = vmatpush1.bf16.msra.mxu0 %v9814_v13  ;;  %v9903_v13 = vld [vmem:[%s13278_s3 + $0x76c] ss:$16 sps:$4 sm:$0xff]  }
 0x29f   :  { %7278 = vmatpush1.bf16.msra.mxu1 %v9817_v14  ;;  %6951 = vmatprep.subr.bf16.mxu0 %v9822_v15  ;;  %v9898_v14 = vld [vmem:[%s13278_s3 + $0x760] ss:$16 sps:$4 sm:$0xff]   ;;  %v9901_v15 = vld [vmem:[%s13278_s3 + $0x768] ss:$16 sps:$4 sm:$0xff]  }
 0x2a0   :  { %7279 = vmatprep.subr.bf16.mxu1 %v9825_v16  ;;  %v9906_v16 = vld [vmem:[%s13278_s3 + $0x784] ss:$16 sps:$4 sm:$0xff]  }
 0x2a2   :  { %6952 = vmatpush1.bf16.msra.mxu0 %v9820_v19  ;;  %v9909_v19 = vld [vmem:[%s13278_s3 + $0x78c] ss:$16 sps:$4 sm:$0xff]  }
 0x2a3   :  { %7280 = vmatpush1.bf16.msra.mxu1 %v9823_v17  ;;  %6953 = vmatprep.subr.bf16.mxu0 %v9828_v7  ;;  %v9904_v17 = vld [vmem:[%s13278_s3 + $0x780] ss:$16 sps:$4 sm:$0xff]   ;;  %v9907_v7 = vld [vmem:[%s13278_s3 + $0x788] ss:$16 sps:$4 sm:$0xff]  }
 0x2a4   :  { %7281 = vmatprep.subr.bf16.mxu1 %v9831_v20  ;;  %v9912_v20 = vld [vmem:[%s13278_s3 + $0x7a4] ss:$16 sps:$4 sm:$0xff]  }
 0x2a6   :  { %6954 = vmatpush1.bf16.msra.mxu0 %v9826_v51  ;;  %v9915_v51 = vld [vmem:[%s13278_s3 + $0x7ac] ss:$16 sps:$4 sm:$0xff]  }
 0x2a7   :  { %7282 = vmatpush1.bf16.msra.mxu1 %v9829_v18  ;;  %6964 = vmatprep.subr.bf16.mxu0 %v9834_v48  ;;  %v9910_v18 = vld [vmem:[%s13278_s3 + $0x7a0] ss:$16 sps:$4 sm:$0xff]   ;;  %v9913_v48 = vld [vmem:[%s13278_s3 + $0x7a8] ss:$16 sps:$4 sm:$0xff]  }
 0x2a8   :  { %7292 = vmatprep.subr.bf16.mxu1 %v9837_v21  ;;  %v9918_v21 = vld [vmem:[%s13278_s3 + $0x7c4] ss:$16 sps:$4 sm:$0xff]  }
 0x2a9   :  { %6956 = vmatmul.mubr.bf16.vlgmr.msra.gmra.mrb[72].mxu0 %v11824_v59 }
 0x2aa   :  { %7284 = vmatmul.mubr.bf16.vlgmr.msra.gmra.mrb[72].mxu1 %v11824_v59  ;;  %6965 = vmatpush1.bf16.msra.mxu0 %v9832_v23  ;;  %v9849_v59 = vld [vmem:[%s13278_s3 + $0x64c] ss:$16 sps:$4 sm:$0xff]  }
 0x2ab   :  { %6996 = vmatprep.mubr.bf16.mxu0 %v11802_v53  ;;  %7293 = vmatpush1.bf16.msra.mxu1 %v9835_v24  ;;  %v9921_v23 = vld [vmem:[%s13278_s3 + $0x7cc] ss:$16 sps:$4 sm:$0xff]   ;;  %v9916_v24 = vld [vmem:[%s13278_s3 + $0x7c0] ss:$16 sps:$4 sm:$0xff]  }
 0x2ac   :  { %7324 = vmatprep.mubr.bf16.mxu1 %v11802_v53  ;;  %6966 = vmatprep.subr.bf16.mxu0 %v9840_v25  ;;  %v9852_v53 = vld [vmem:[%s13278_s3 + $0x664] ss:$16 sps:$4 sm:$0xff]   ;;  %v9919_v25 = vld [vmem:[%s13278_s3 + $0x7c8] ss:$16 sps:$4 sm:$0xff]  }
 0x2ad   :  { %7294 = vmatprep.subr.bf16.mxu1 %v9843_v26  ;;  %v9924_v26 = vld [vmem:[%s13278_s3 + $0x7e4] ss:$16 sps:$4 sm:$0xff]  }
 0x2ae   :  { %6967 = vmatpush1.bf16.msra.mxu0 %v9838_v27  ;;  %v9927_v27 = vld [vmem:[%s13278_s3 + $0x7ec] ss:$16 sps:$4 sm:$0xff]  }
 0x2af   :  { %7295 = vmatpush1.bf16.msra.mxu1 %v9841_v28  ;;  %6968 = vmatprep.subr.bf16.mxu0 %v9846_v29  ;;  %v9922_v28 = vld [vmem:[%s13278_s3 + $0x7e0] ss:$16 sps:$4 sm:$0xff]   ;;  %v9925_v29 = vld [vmem:[%s13278_s3 + $0x7e8] ss:$16 sps:$4 sm:$0xff]  }
 0x2b0   :  { %7296 = vmatprep.subr.bf16.mxu1 %v9849_v59  ;;  %v9930_v59 = vld [vmem:[%s13278_s3 + $0x804] ss:$16 sps:$4 sm:$0xff]  }
 0x2b2   :  { %6969 = vmatpush1.bf16.msra.mxu0 %v9844_v30  ;;  %v9933_v30 = vld [vmem:[%s13278_s3 + $0x80c] ss:$16 sps:$4 sm:$0xff]  }
 0x2b3   :  { %7297 = vmatpush1.bf16.msra.mxu1 %v9847_v22  ;;  %6970 = vmatprep.subr.bf16.mxu0 %v9852_v53  ;;  %v9928_v22 = vld [vmem:[%s13278_s3 + $0x800] ss:$16 sps:$4 sm:$0xff]   ;;  %v9931_v53 = vld [vmem:[%s13278_s3 + $0x808] ss:$16 sps:$4 sm:$0xff]  }
 0x2b4   :  { %7298 = vmatprep.subr.bf16.mxu1 %v9855_v31  ;;  %v9936_v31 = vld [vmem:[%s13278_s3 + $0x824] ss:$16 sps:$4 sm:$0xff]  }
 0x2b6   :  { %6971 = vmatpush1.bf16.msra.mxu0 %v9850_v32  ;;  %v9939_v32 = vld [vmem:[%s13278_s3 + $0x82c] ss:$16 sps:$4 sm:$0xff]  }
 0x2b7   :  { %7299 = vmatpush1.bf16.msra.mxu1 %v9853_v34  ;;  %6972 = vmatprep.subr.bf16.mxu0 %v9858_v35  ;;  %v9934_v34 = vld [vmem:[%s13278_s3 + $0x820] ss:$16 sps:$4 sm:$0xff]   ;;  %v9937_v35 = vld [vmem:[%s13278_s3 + $0x828] ss:$16 sps:$4 sm:$0xff]  }
 0x2b8   :  { %7300 = vmatprep.subr.bf16.mxu1 %v9861_v36  ;;  %v9942_v36 = vld [vmem:[%s13278_s3 + $0x844] ss:$16 sps:$4 sm:$0xff]  }
 0x2ba   :  { %6973 = vmatpush1.bf16.msra.mxu0 %v9856_v37  ;;  %v9940_v37 = vld [vmem:[%s13278_s3 + $0x840] ss:$16 sps:$4 sm:$0xff]  }
 0x2bb   :  { %7301 = vmatpush1.bf16.msra.mxu1 %v9859_v38  ;;  %6974 = vmatprep.subr.bf16.mxu0 %v9864_v39  ;;  %v9943_v38 = vld [vmem:[%s13278_s3 + $0x848] ss:$16 sps:$4 sm:$0xff]   ;;  %v9951_v39 = vld [vmem:[%s13278_s3 + $0x86c] ss:$16 sps:$4 sm:$0xff]  }
 0x2bc   :  { %7302 = vmatprep.subr.bf16.mxu1 %v9867_v40  ;;  %v9946_v40 = vld [vmem:[%s13278_s3 + $0x860] ss:$16 sps:$4 sm:$0xff]  }
 0x2be   :  { %6975 = vmatpush1.bf16.msra.mxu0 %v9862_v41  ;;  %v9949_v41 = vld [vmem:[%s13278_s3 + $0x868] ss:$16 sps:$4 sm:$0xff]  }
 0x2bf   :  { %7303 = vmatpush1.bf16.msra.mxu1 %v9865_v33  ;;  %6976 = vmatprep.subr.bf16.mxu0 %v9870_v42  ;;  %v9954_v33 = vld [vmem:[%s13278_s3 + $0x884] ss:$16 sps:$4 sm:$0xff]   ;;  %v9957_v42 = vld [vmem:[%s13278_s3 + $0x88c] ss:$16 sps:$4 sm:$0xff]  }
 0x2c0   :  { %7304 = vmatprep.subr.bf16.mxu1 %v9873_v43  ;;  %v9952_v43 = vld [vmem:[%s13278_s3 + $0x880] ss:$16 sps:$4 sm:$0xff]  }
 0x2c2   :  { %6977 = vmatpush1.bf16.msra.mxu0 %v9868_v45  ;;  %v9955_v45 = vld [vmem:[%s13278_s3 + $0x888] ss:$16 sps:$4 sm:$0xff]  }
 0x2c3   :  { %7305 = vmatpush1.bf16.msra.mxu1 %v9871_v46  ;;  %6978 = vmatprep.subr.bf16.mxu0 %v9876_v50  ;;  %v9960_v46 = vld [vmem:[%s13278_s3 + $0x8a4] ss:$16 sps:$4 sm:$0xff]   ;;  %v9963_v50 = vld [vmem:[%s13278_s3 + $0x8ac] ss:$16 sps:$4 sm:$0xff]  }
 0x2c4   :  { %7306 = vmatprep.subr.bf16.mxu1 %v9879_v49  ;;  %v9958_v49 = vld [vmem:[%s13278_s3 + $0x8a0] ss:$16 sps:$4 sm:$0xff]  }
 0x2c6   :  { %6979 = vmatpush1.bf16.msra.mxu0 %v9874_v52  ;;  %v9961_v52 = vld [vmem:[%s13278_s3 + $0x8a8] ss:$16 sps:$4 sm:$0xff]  }
 0x2c7   :  { %7307 = vmatpush1.bf16.msra.mxu1 %v9877_v47  ;;  %6980 = vmatprep.subr.bf16.mxu0 %v9882_v54  ;;  %v9966_v47 = vld [vmem:[%s13278_s3 + $0x8c4] ss:$16 sps:$4 sm:$0xff]   ;;  %v9969_v54 = vld [vmem:[%s13278_s3 + $0x8cc] ss:$16 sps:$4 sm:$0xff]  }
 0x2c8   :  { %7308 = vmatprep.subr.bf16.mxu1 %v9885_v55  ;;  %v9964_v55 = vld [vmem:[%s13278_s3 + $0x8c0] ss:$16 sps:$4 sm:$0xff]  }
 0x2ca   :  { %6981 = vmatpush1.bf16.msra.mxu0 %v9880_v56  ;;  %v9967_v56 = vld [vmem:[%s13278_s3 + $0x8c8] ss:$16 sps:$4 sm:$0xff]  }
 0x2cb   :  { %7309 = vmatpush1.bf16.msra.mxu1 %v9883_v58  ;;  %6982 = vmatprep.subr.bf16.mxu0 %v9888_v62  ;;  %v9972_v58 = vld [vmem:[%s13278_s3 + $0x8e4] ss:$16 sps:$4 sm:$0xff]   ;;  %v9975_v62 = vld [vmem:[%s13278_s3 + $0x8ec] ss:$16 sps:$4 sm:$0xff]  }
 0x2cc   :  { %7310 = vmatprep.subr.bf16.mxu1 %v9891_v63  ;;  %v9970_v63 = vld [vmem:[%s13278_s3 + $0x8e0] ss:$16 sps:$4 sm:$0xff]  }
 0x2ce   :  { %6983 = vmatpush1.bf16.msra.mxu0 %v9886_v0  ;;  %v9973_v0 = vld [vmem:[%s13278_s3 + $0x8e8] ss:$16 sps:$4 sm:$0xff]  }
 0x2cf   :  { %7311 = vmatpush1.bf16.msra.mxu1 %v9889_v4  ;;  %6984 = vmatprep.subr.bf16.mxu0 %v9894_v6  ;;  %v9978_v4 = vld [vmem:[%s13278_s3 + $0x904] ss:$16 sps:$4 sm:$0xff]   ;;  %v9981_v6 = vld [vmem:[%s13278_s3 + $0x90c] ss:$16 sps:$4 sm:$0xff]  }
 0x2d0   :  { %7312 = vmatprep.subr.bf16.mxu1 %v9897_v9  ;;  %v9976_v9 = vld [vmem:[%s13278_s3 + $0x900] ss:$16 sps:$4 sm:$0xff]  }
 0x2d2   :  { %6985 = vmatpush1.bf16.msra.mxu0 %v9892_v2  ;;  %v9979_v2 = vld [vmem:[%s13278_s3 + $0x908] ss:$16 sps:$4 sm:$0xff]  }
 0x2d3   :  { %7313 = vmatpush1.bf16.msra.mxu1 %v9895_v10  ;;  %6986 = vmatprep.subr.bf16.mxu0 %v9900_v11  ;;  %v9984_v10 = vld [vmem:[%s13278_s3 + $0x924] ss:$16 sps:$4 sm:$0xff]   ;;  %v9987_v11 = vld [vmem:[%s13278_s3 + $0x92c] ss:$16 sps:$4 sm:$0xff]  }
 0x2d4   :  { %7314 = vmatprep.subr.bf16.mxu1 %v9903_v13  ;;  %v9982_v13 = vld [vmem:[%s13278_s3 + $0x920] ss:$16 sps:$4 sm:$0xff]  }
 0x2d6   :  { %6987 = vmatpush1.bf16.msra.mxu0 %v9898_v14  ;;  %v9985_v14 = vld [vmem:[%s13278_s3 + $0x928] ss:$16 sps:$4 sm:$0xff]  }
 0x2d7   :  { %7315 = vmatpush1.bf16.msra.mxu1 %v9901_v15  ;;  %6988 = vmatprep.subr.bf16.mxu0 %v9906_v16  ;;  %v9990_v15 = vld [vmem:[%s13278_s3 + $0x944] ss:$16 sps:$4 sm:$0xff]   ;;  %v9993_v16 = vld [vmem:[%s13278_s3 + $0x94c] ss:$16 sps:$4 sm:$0xff]  }
 0x2d8   :  { %7316 = vmatprep.subr.bf16.mxu1 %v9909_v19  ;;  %v9988_v19 = vld [vmem:[%s13278_s3 + $0x940] ss:$16 sps:$4 sm:$0xff]  }
 0x2da   :  { %6989 = vmatpush1.bf16.msra.mxu0 %v9904_v17  ;;  %v9991_v17 = vld [vmem:[%s13278_s3 + $0x948] ss:$16 sps:$4 sm:$0xff]  }
 0x2db   :  { %7317 = vmatpush1.bf16.msra.mxu1 %v9907_v7  ;;  %6990 = vmatprep.subr.bf16.mxu0 %v9912_v20  ;;  %v9996_v7 = vld [vmem:[%s13278_s3 + $0x964] ss:$16 sps:$4 sm:$0xff]   ;;  %v9999_v20 = vld [vmem:[%s13278_s3 + $0x96c] ss:$16 sps:$4 sm:$0xff]  }
 0x2dc   :  { %7318 = vmatprep.subr.bf16.mxu1 %v9915_v51  ;;  %v9994_v51 = vld [vmem:[%s13278_s3 + $0x960] ss:$16 sps:$4 sm:$0xff]  }
 0x2de   :  { %6991 = vmatpush1.bf16.msra.mxu0 %v9910_v18  ;;  %v9997_v18 = vld [vmem:[%s13278_s3 + $0x968] ss:$16 sps:$4 sm:$0xff]  }
 0x2df   :  { %7319 = vmatpush1.bf16.msra.mxu1 %v9913_v48  ;;  %6992 = vmatprep.subr.bf16.mxu0 %v9918_v21  ;;  %v10002_v48 = vld [vmem:[%s13278_s3 + $0x984] ss:$16 sps:$4 sm:$0xff]   ;;  %v10005_v21 = vld [vmem:[%s13278_s3 + $0x98c] ss:$16 sps:$4 sm:$0xff]  }
 0x2e0   :  { %7320 = vmatprep.subr.bf16.mxu1 %v9921_v23  ;;  %v10000_v23 = vld [vmem:[%s13278_s3 + $0x980] ss:$16 sps:$4 sm:$0xff]  }
 0x2e2   :  { %6993 = vmatpush1.bf16.msra.mxu0 %v9916_v24  ;;  %v10003_v24 = vld [vmem:[%s13278_s3 + $0x988] ss:$16 sps:$4 sm:$0xff]  }
 0x2e3   :  { %7321 = vmatpush1.bf16.msra.mxu1 %v9919_v25  ;;  %6994 = vmatprep.subr.bf16.mxu0 %v9924_v26  ;;  %v10008_v25 = vld [vmem:[%s13278_s3 + $0x9a4] ss:$16 sps:$4 sm:$0xff]   ;;  %v10011_v26 = vld [vmem:[%s13278_s3 + $0x9ac] ss:$16 sps:$4 sm:$0xff]  }
 0x2e4   :  { %7322 = vmatprep.subr.bf16.mxu1 %v9927_v27  ;;  %v10006_v27 = vld [vmem:[%s13278_s3 + $0x9a0] ss:$16 sps:$4 sm:$0xff]  }
 0x2e6   :  { %6995 = vmatpush1.bf16.msra.mxu0 %v9922_v28  ;;  %v10009_v28 = vld [vmem:[%s13278_s3 + $0x9a8] ss:$16 sps:$4 sm:$0xff]  }
 0x2e7   :  { %7323 = vmatpush1.bf16.msra.mxu1 %v9925_v29  ;;  %7005 = vmatprep.subr.bf16.mxu0 %v9930_v59  ;;  %v10014_v29 = vld [vmem:[%s13278_s3 + $0x9c4] ss:$16 sps:$4 sm:$0xff]   ;;  %v10017_v59 = vld [vmem:[%s13278_s3 + $0x9cc] ss:$16 sps:$4 sm:$0xff]  }
 0x2e8   :  { %7333 = vmatprep.subr.bf16.mxu1 %v9933_v30  ;;  %v10012_v30 = vld [vmem:[%s13278_s3 + $0x9c0] ss:$16 sps:$4 sm:$0xff]  }
 0x2e9   :  { %6997 = vmatmul.mubr.bf16.vlgmr.msra.gmra.mrb[72].mxu0 %v11828_v60 }
 0x2ea   :  { %7325 = vmatmul.mubr.bf16.vlgmr.msra.gmra.mrb[72].mxu1 %v11828_v60  ;;  %7006 = vmatpush1.bf16.msra.mxu0 %v9928_v22  ;;  %v9945_v60 = vld [vmem:[%s13278_s3 + $0x84c] ss:$16 sps:$4 sm:$0xff]   ;;  %v10015_v22 = vld [vmem:[%s13278_s3 + $0x9c8] ss:$16 sps:$4 sm:$0xff]  }
 0x2eb   :  { %7037 = vmatprep.mubr.bf16.mxu0 %v11806_v44  ;;  %7334 = vmatpush1.bf16.msra.mxu1 %v9931_v53  ;;  %v10020_v53 = vld [vmem:[%s13278_s3 + $0x9e4] ss:$16 sps:$4 sm:$0xff]  }
 0x2ec   :  { %7365 = vmatprep.mubr.bf16.mxu1 %v11806_v44  ;;  %7007 = vmatprep.subr.bf16.mxu0 %v9936_v31  ;;  %v9948_v44 = vld [vmem:[%s13278_s3 + $0x864] ss:$16 sps:$4 sm:$0xff]   ;;  %v10023_v31 = vld [vmem:[%s13278_s3 + $0x9ec] ss:$16 sps:$4 sm:$0xff]  }
 0x2ed   :  { %7335 = vmatprep.subr.bf16.mxu1 %v9939_v32  ;;  %v10018_v32 = vld [vmem:[%s13278_s3 + $0x9e0] ss:$16 sps:$4 sm:$0xff]  }
 0x2ee   :  { %7008 = vmatpush1.bf16.msra.mxu0 %v9934_v34  ;;  %v10021_v34 = vld [vmem:[%s13278_s3 + $0x9e8] ss:$16 sps:$4 sm:$0xff]  }
 0x2ef   :  { %7336 = vmatpush1.bf16.msra.mxu1 %v9937_v35  ;;  %7009 = vmatprep.subr.bf16.mxu0 %v9942_v36  ;;  %v10026_v35 = vld [vmem:[%s13278_s3 + $0xa04] ss:$16 sps:$4 sm:$0xff]   ;;  %v10029_v36 = vld [vmem:[%s13278_s3 + $0xa0c] ss:$16 sps:$4 sm:$0xff]  }
 0x2f0   :  { %7337 = vmatprep.subr.bf16.mxu1 %v9945_v60  ;;  %v10024_v60 = vld [vmem:[%s13278_s3 + $0xa00] ss:$16 sps:$4 sm:$0xff]  }
 0x2f2   :  { %7010 = vmatpush1.bf16.msra.mxu0 %v9940_v37  ;;  %v10027_v37 = vld [vmem:[%s13278_s3 + $0xa08] ss:$16 sps:$4 sm:$0xff]  }
 0x2f3   :  { %7338 = vmatpush1.bf16.msra.mxu1 %v9943_v38  ;;  %7011 = vmatprep.subr.bf16.mxu0 %v9948_v44  ;;  %v10032_v38 = vld [vmem:[%s13278_s3 + $0xa24] ss:$16 sps:$4 sm:$0xff]   ;;  %v10035_v44 = vld [vmem:[%s13278_s3 + $0xa2c] ss:$16 sps:$4 sm:$0xff]  }
 0x2f4   :  { %7339 = vmatprep.subr.bf16.mxu1 %v9951_v39  ;;  %v10030_v39 = vld [vmem:[%s13278_s3 + $0xa20] ss:$16 sps:$4 sm:$0xff]  }
 0x2f6   :  { %7012 = vmatpush1.bf16.msra.mxu0 %v9946_v40  ;;  %v10033_v40 = vld [vmem:[%s13278_s3 + $0xa28] ss:$16 sps:$4 sm:$0xff]  }
 0x2f7   :  { %7340 = vmatpush1.bf16.msra.mxu1 %v9949_v41  ;;  %7013 = vmatprep.subr.bf16.mxu0 %v9954_v33  ;;  %v10038_v41 = vld [vmem:[%s13278_s3 + $0xa44] ss:$16 sps:$4 sm:$0xff]   ;;  %v10036_v33 = vld [vmem:[%s13278_s3 + $0xa40] ss:$16 sps:$4 sm:$0xff]  }
 0x2f8   :  { %7341 = vmatprep.subr.bf16.mxu1 %v9957_v42  ;;  %v10039_v42 = vld [vmem:[%s13278_s3 + $0xa48] ss:$16 sps:$4 sm:$0xff]  }
 0x2fa   :  { %7014 = vmatpush1.bf16.msra.mxu0 %v9952_v43  ;;  %v10047_v43 = vld [vmem:[%s13278_s3 + $0xa6c] ss:$16 sps:$4 sm:$0xff]  }
 0x2fb   :  { %7342 = vmatpush1.bf16.msra.mxu1 %v9955_v45  ;;  %7015 = vmatprep.subr.bf16.mxu0 %v9960_v46  ;;  %v10042_v45 = vld [vmem:[%s13278_s3 + $0xa60] ss:$16 sps:$4 sm:$0xff]   ;;  %v10045_v46 = vld [vmem:[%s13278_s3 + $0xa68] ss:$16 sps:$4 sm:$0xff]  }
 0x2fc   :  { %7343 = vmatprep.subr.bf16.mxu1 %v9963_v50  ;;  %v10050_v50 = vld [vmem:[%s13278_s3 + $0xa84] ss:$16 sps:$4 sm:$0xff]  }
 0x2fe   :  { %7016 = vmatpush1.bf16.msra.mxu0 %v9958_v49  ;;  %v10053_v49 = vld [vmem:[%s13278_s3 + $0xa8c] ss:$16 sps:$4 sm:$0xff]  }
 0x2ff   :  { %7344 = vmatpush1.bf16.msra.mxu1 %v9961_v52  ;;  %7017 = vmatprep.subr.bf16.mxu0 %v9966_v47  ;;  %v10048_v52 = vld [vmem:[%s13278_s3 + $0xa80] ss:$16 sps:$4 sm:$0xff]   ;;  %v10051_v47 = vld [vmem:[%s13278_s3 + $0xa88] ss:$16 sps:$4 sm:$0xff]  }
 0x300   :  { %7345 = vmatprep.subr.bf16.mxu1 %v9969_v54  ;;  %v10056_v54 = vld [vmem:[%s13278_s3 + $0xaa4] ss:$16 sps:$4 sm:$0xff]  }
 0x302   :  { %7018 = vmatpush1.bf16.msra.mxu0 %v9964_v55  ;;  %v10059_v55 = vld [vmem:[%s13278_s3 + $0xaac] ss:$16 sps:$4 sm:$0xff]  }
 0x303   :  { %7346 = vmatpush1.bf16.msra.mxu1 %v9967_v56  ;;  %7019 = vmatprep.subr.bf16.mxu0 %v9972_v58  ;;  %v10054_v56 = vld [vmem:[%s13278_s3 + $0xaa0] ss:$16 sps:$4 sm:$0xff]   ;;  %v10057_v58 = vld [vmem:[%s13278_s3 + $0xaa8] ss:$16 sps:$4 sm:$0xff]  }
 0x304   :  { %7347 = vmatprep.subr.bf16.mxu1 %v9975_v62  ;;  %v10062_v62 = vld [vmem:[%s13278_s3 + $0xac4] ss:$16 sps:$4 sm:$0xff]  }
 0x306   :  { %7020 = vmatpush1.bf16.msra.mxu0 %v9970_v63  ;;  %v10065_v63 = vld [vmem:[%s13278_s3 + $0xacc] ss:$16 sps:$4 sm:$0xff]  }
 0x307   :  { %7348 = vmatpush1.bf16.msra.mxu1 %v9973_v0  ;;  %7021 = vmatprep.subr.bf16.mxu0 %v9978_v4  ;;  %v10060_v0 = vld [vmem:[%s13278_s3 + $0xac0] ss:$16 sps:$4 sm:$0xff]   ;;  %v10063_v4 = vld [vmem:[%s13278_s3 + $0xac8] ss:$16 sps:$4 sm:$0xff]  }
 0x308   :  { %7349 = vmatprep.subr.bf16.mxu1 %v9981_v6  ;;  %v10068_v6 = vld [vmem:[%s13278_s3 + $0xae4] ss:$16 sps:$4 sm:$0xff]  }
 0x30a   :  { %7022 = vmatpush1.bf16.msra.mxu0 %v9976_v9  ;;  %v10071_v9 = vld [vmem:[%s13278_s3 + $0xaec] ss:$16 sps:$4 sm:$0xff]  }
 0x30b   :  { %7350 = vmatpush1.bf16.msra.mxu1 %v9979_v2  ;;  %7023 = vmatprep.subr.bf16.mxu0 %v9984_v10  ;;  %v10066_v2 = vld [vmem:[%s13278_s3 + $0xae0] ss:$16 sps:$4 sm:$0xff]   ;;  %v10069_v10 = vld [vmem:[%s13278_s3 + $0xae8] ss:$16 sps:$4 sm:$0xff]  }
 0x30c   :  { %7351 = vmatprep.subr.bf16.mxu1 %v9987_v11  ;;  %v10074_v11 = vld [vmem:[%s13278_s3 + $0xb04] ss:$16 sps:$4 sm:$0xff]  }
 0x30e   :  { %7024 = vmatpush1.bf16.msra.mxu0 %v9982_v13  ;;  %v10077_v13 = vld [vmem:[%s13278_s3 + $0xb0c] ss:$16 sps:$4 sm:$0xff]  }
 0x30f   :  { %7352 = vmatpush1.bf16.msra.mxu1 %v9985_v14  ;;  %7025 = vmatprep.subr.bf16.mxu0 %v9990_v15  ;;  %v10072_v14 = vld [vmem:[%s13278_s3 + $0xb00] ss:$16 sps:$4 sm:$0xff]   ;;  %v10075_v15 = vld [vmem:[%s13278_s3 + $0xb08] ss:$16 sps:$4 sm:$0xff]  }
 0x310   :  { %7353 = vmatprep.subr.bf16.mxu1 %v9993_v16  ;;  %v10080_v16 = vld [vmem:[%s13278_s3 + $0xb24] ss:$16 sps:$4 sm:$0xff]  }
 0x312   :  { %7026 = vmatpush1.bf16.msra.mxu0 %v9988_v19  ;;  %v10083_v19 = vld [vmem:[%s13278_s3 + $0xb2c] ss:$16 sps:$4 sm:$0xff]  }
 0x313   :  { %7354 = vmatpush1.bf16.msra.mxu1 %v9991_v17  ;;  %7027 = vmatprep.subr.bf16.mxu0 %v9996_v7  ;;  %v10078_v17 = vld [vmem:[%s13278_s3 + $0xb20] ss:$16 sps:$4 sm:$0xff]   ;;  %v10081_v7 = vld [vmem:[%s13278_s3 + $0xb28] ss:$16 sps:$4 sm:$0xff]  }
 0x314   :  { %7355 = vmatprep.subr.bf16.mxu1 %v9999_v20  ;;  %v10086_v20 = vld [vmem:[%s13278_s3 + $0xb44] ss:$16 sps:$4 sm:$0xff]  }
 0x316   :  { %7028 = vmatpush1.bf16.msra.mxu0 %v9994_v51  ;;  %v10089_v51 = vld [vmem:[%s13278_s3 + $0xb4c] ss:$16 sps:$4 sm:$0xff]  }
 0x317   :  { %7356 = vmatpush1.bf16.msra.mxu1 %v9997_v18  ;;  %7029 = vmatprep.subr.bf16.mxu0 %v10002_v48  ;;  %v10084_v18 = vld [vmem:[%s13278_s3 + $0xb40] ss:$16 sps:$4 sm:$0xff]   ;;  %v10087_v48 = vld [vmem:[%s13278_s3 + $0xb48] ss:$16 sps:$4 sm:$0xff]  }
 0x318   :  { %7357 = vmatprep.subr.bf16.mxu1 %v10005_v21  ;;  %v10092_v21 = vld [vmem:[%s13278_s3 + $0xb64] ss:$16 sps:$4 sm:$0xff]  }
 0x31a   :  { %7030 = vmatpush1.bf16.msra.mxu0 %v10000_v23  ;;  %v10095_v23 = vld [vmem:[%s13278_s3 + $0xb6c] ss:$16 sps:$4 sm:$0xff]  }
 0x31b   :  { %7358 = vmatpush1.bf16.msra.mxu1 %v10003_v24  ;;  %7031 = vmatprep.subr.bf16.mxu0 %v10008_v25  ;;  %v10090_v24 = vld [vmem:[%s13278_s3 + $0xb60] ss:$16 sps:$4 sm:$0xff]   ;;  %v10093_v25 = vld [vmem:[%s13278_s3 + $0xb68] ss:$16 sps:$4 sm:$0xff]  }
 0x31c   :  { %7359 = vmatprep.subr.bf16.mxu1 %v10011_v26  ;;  %v10098_v26 = vld [vmem:[%s13278_s3 + $0xb84] ss:$16 sps:$4 sm:$0xff]  }
 0x31e   :  { %7032 = vmatpush1.bf16.msra.mxu0 %v10006_v27  ;;  %v10101_v27 = vld [vmem:[%s13278_s3 + $0xb8c] ss:$16 sps:$4 sm:$0xff]  }
 0x31f   :  { %7360 = vmatpush1.bf16.msra.mxu1 %v10009_v28  ;;  %7033 = vmatprep.subr.bf16.mxu0 %v10014_v29  ;;  %v10096_v28 = vld [vmem:[%s13278_s3 + $0xb80] ss:$16 sps:$4 sm:$0xff]   ;;  %v10099_v29 = vld [vmem:[%s13278_s3 + $0xb88] ss:$16 sps:$4 sm:$0xff]  }
 0x320   :  { %7361 = vmatprep.subr.bf16.mxu1 %v10017_v59  ;;  %v10104_v59 = vld [vmem:[%s13278_s3 + $0xba4] ss:$16 sps:$4 sm:$0xff]  }
 0x322   :  { %7034 = vmatpush1.bf16.msra.mxu0 %v10012_v30  ;;  %v10107_v30 = vld [vmem:[%s13278_s3 + $0xbac] ss:$16 sps:$4 sm:$0xff]  }
 0x323   :  { %7362 = vmatpush1.bf16.msra.mxu1 %v10015_v22  ;;  %7035 = vmatprep.subr.bf16.mxu0 %v10020_v53  ;;  %v10102_v22 = vld [vmem:[%s13278_s3 + $0xba0] ss:$16 sps:$4 sm:$0xff]   ;;  %v10105_v53 = vld [vmem:[%s13278_s3 + $0xba8] ss:$16 sps:$4 sm:$0xff]  }
 0x324   :  { %7363 = vmatprep.subr.bf16.mxu1 %v10023_v31  ;;  %v10110_v31 = vld [vmem:[%s13278_s3 + $0xbc4] ss:$16 sps:$4 sm:$0xff]  }
 0x326   :  { %7036 = vmatpush1.bf16.msra.mxu0 %v10018_v32  ;;  %v10113_v32 = vld [vmem:[%s13278_s3 + $0xbcc] ss:$16 sps:$4 sm:$0xff]  }
 0x327   :  { %7364 = vmatpush1.bf16.msra.mxu1 %v10021_v34  ;;  %7046 = vmatprep.subr.bf16.mxu0 %v10026_v35  ;;  %v10108_v34 = vld [vmem:[%s13278_s3 + $0xbc0] ss:$16 sps:$4 sm:$0xff]   ;;  %v10111_v35 = vld [vmem:[%s13278_s3 + $0xbc8] ss:$16 sps:$4 sm:$0xff]  }
 0x328   :  { %7374 = vmatprep.subr.bf16.mxu1 %v10029_v36  ;;  %v10116_v36 = vld [vmem:[%s13278_s3 + $0xbe4] ss:$16 sps:$4 sm:$0xff]  }
 0x329   :  { %7038 = vmatmul.mubr.bf16.vlgmr.msra.gmra.mrb[72].mxu0 %v11842_v1 }
 0x32a   :  { %7366 = vmatmul.mubr.bf16.vlgmr.msra.gmra.mrb[72].mxu1 %v11842_v1  ;;  %7047 = vmatpush1.bf16.msra.mxu0 %v10024_v60  ;;  %v10041_v1 = vld [vmem:[%s13278_s3 + $0xa4c] ss:$16 sps:$4 sm:$0xff]  }
 0x32b   :  { %7078 = vmatprep.mubr.bf16.mxu0 %v11820_v57  ;;  %7375 = vmatpush1.bf16.msra.mxu1 %v10027_v37  ;;  %v10119_v60 = vld [vmem:[%s13278_s3 + $0xbec] ss:$16 sps:$4 sm:$0xff]   ;;  %v10114_v37 = vld [vmem:[%s13278_s3 + $0xbe0] ss:$16 sps:$4 sm:$0xff]  }
 0x32c   :  { %7406 = vmatprep.mubr.bf16.mxu1 %v11820_v57  ;;  %7048 = vmatprep.subr.bf16.mxu0 %v10032_v38  ;;  %v10044_v57 = vld [vmem:[%s13278_s3 + $0xa64] ss:$16 sps:$4 sm:$0xff]   ;;  %v10117_v38 = vld [vmem:[%s13278_s3 + $0xbe8] ss:$16 sps:$4 sm:$0xff]  }
 0x32d   :  { %7376 = vmatprep.subr.bf16.mxu1 %v10035_v44  ;;  %v10122_v44 = vld [vmem:[%s13278_s3 + $0xc04] ss:$16 sps:$4 sm:$0xff]  }
 0x32e   :  { %7049 = vmatpush1.bf16.msra.mxu0 %v10030_v39  ;;  %v10125_v39 = vld [vmem:[%s13278_s3 + $0xc0c] ss:$16 sps:$4 sm:$0xff]  }
 0x32f   :  { %7377 = vmatpush1.bf16.msra.mxu1 %v10033_v40  ;;  %7050 = vmatprep.subr.bf16.mxu0 %v10038_v41  ;;  %v10120_v40 = vld [vmem:[%s13278_s3 + $0xc00] ss:$16 sps:$4 sm:$0xff]   ;;  %v10123_v41 = vld [vmem:[%s13278_s3 + $0xc08] ss:$16 sps:$4 sm:$0xff]  }
 0x330   :  { %7378 = vmatprep.subr.bf16.mxu1 %v10041_v1  ;;  %v10128_v1 = vld [vmem:[%s13278_s3 + $0xc24] ss:$16 sps:$4 sm:$0xff]  }
 0x332   :  { %7051 = vmatpush1.bf16.msra.mxu0 %v10036_v33  ;;  %v10131_v33 = vld [vmem:[%s13278_s3 + $0xc2c] ss:$16 sps:$4 sm:$0xff]  }
 0x333   :  { %7379 = vmatpush1.bf16.msra.mxu1 %v10039_v42  ;;  %7052 = vmatprep.subr.bf16.mxu0 %v10044_v57  ;;  %v10126_v42 = vld [vmem:[%s13278_s3 + $0xc20] ss:$16 sps:$4 sm:$0xff]   ;;  %v10129_v57 = vld [vmem:[%s13278_s3 + $0xc28] ss:$16 sps:$4 sm:$0xff]  }
 0x334   :  { %7380 = vmatprep.subr.bf16.mxu1 %v10047_v43  ;;  %v10134_v43 = vld [vmem:[%s13278_s3 + $0xc44] ss:$16 sps:$4 sm:$0xff]  }
 0x336   :  { %7053 = vmatpush1.bf16.msra.mxu0 %v10042_v45  ;;  %v10132_v45 = vld [vmem:[%s13278_s3 + $0xc40] ss:$16 sps:$4 sm:$0xff]  }
 0x337   :  { %7381 = vmatpush1.bf16.msra.mxu1 %v10045_v46  ;;  %7054 = vmatprep.subr.bf16.mxu0 %v10050_v50  ;;  %v10135_v46 = vld [vmem:[%s13278_s3 + $0xc48] ss:$16 sps:$4 sm:$0xff]   ;;  %v10143_v50 = vld [vmem:[%s13278_s3 + $0xc6c] ss:$16 sps:$4 sm:$0xff]  }
 0x338   :  { %7382 = vmatprep.subr.bf16.mxu1 %v10053_v49  ;;  %v10138_v49 = vld [vmem:[%s13278_s3 + $0xc60] ss:$16 sps:$4 sm:$0xff]  }
 0x33a   :  { %7055 = vmatpush1.bf16.msra.mxu0 %v10048_v52  ;;  %v10141_v52 = vld [vmem:[%s13278_s3 + $0xc68] ss:$16 sps:$4 sm:$0xff]  }
 0x33b   :  { %7383 = vmatpush1.bf16.msra.mxu1 %v10051_v47  ;;  %7056 = vmatprep.subr.bf16.mxu0 %v10056_v54  ;;  %v10146_v47 = vld [vmem:[%s13278_s3 + $0xc84] ss:$16 sps:$4 sm:$0xff]   ;;  %v10149_v54 = vld [vmem:[%s13278_s3 + $0xc8c] ss:$16 sps:$4 sm:$0xff]  }
 0x33c   :  { %7384 = vmatprep.subr.bf16.mxu1 %v10059_v55  ;;  %v10144_v55 = vld [vmem:[%s13278_s3 + $0xc80] ss:$16 sps:$4 sm:$0xff]  }
 0x33e   :  { %7057 = vmatpush1.bf16.msra.mxu0 %v10054_v56  ;;  %v10147_v56 = vld [vmem:[%s13278_s3 + $0xc88] ss:$16 sps:$4 sm:$0xff]  }
 0x33f   :  { %7385 = vmatpush1.bf16.msra.mxu1 %v10057_v58  ;;  %7058 = vmatprep.subr.bf16.mxu0 %v10062_v62  ;;  %v10152_v58 = vld [vmem:[%s13278_s3 + $0xca4] ss:$16 sps:$4 sm:$0xff]   ;;  %v10155_v62 = vld [vmem:[%s13278_s3 + $0xcac] ss:$16 sps:$4 sm:$0xff]  }
 0x340   :  { %7386 = vmatprep.subr.bf16.mxu1 %v10065_v63  ;;  %v10150_v63 = vld [vmem:[%s13278_s3 + $0xca0] ss:$16 sps:$4 sm:$0xff]  }
 0x342   :  { %7059 = vmatpush1.bf16.msra.mxu0 %v10060_v0  ;;  %v10153_v0 = vld [vmem:[%s13278_s3 + $0xca8] ss:$16 sps:$4 sm:$0xff]  }
 0x343   :  { %7387 = vmatpush1.bf16.msra.mxu1 %v10063_v4  ;;  %7060 = vmatprep.subr.bf16.mxu0 %v10068_v6  ;;  %v10158_v4 = vld [vmem:[%s13278_s3 + $0xcc4] ss:$16 sps:$4 sm:$0xff]   ;;  %v10161_v6 = vld [vmem:[%s13278_s3 + $0xccc] ss:$16 sps:$4 sm:$0xff]  }
 0x344   :  { %7388 = vmatprep.subr.bf16.mxu1 %v10071_v9  ;;  %v10156_v9 = vld [vmem:[%s13278_s3 + $0xcc0] ss:$16 sps:$4 sm:$0xff]  }
 0x346   :  { %7061 = vmatpush1.bf16.msra.mxu0 %v10066_v2  ;;  %v10159_v2 = vld [vmem:[%s13278_s3 + $0xcc8] ss:$16 sps:$4 sm:$0xff]  }
 0x347   :  { %7389 = vmatpush1.bf16.msra.mxu1 %v10069_v10  ;;  %7062 = vmatprep.subr.bf16.mxu0 %v10074_v11  ;;  %v10164_v10 = vld [vmem:[%s13278_s3 + $0xce4] ss:$16 sps:$4 sm:$0xff]   ;;  %v10167_v11 = vld [vmem:[%s13278_s3 + $0xcec] ss:$16 sps:$4 sm:$0xff]  }
 0x348   :  { %7390 = vmatprep.subr.bf16.mxu1 %v10077_v13  ;;  %v10162_v13 = vld [vmem:[%s13278_s3 + $0xce0] ss:$16 sps:$4 sm:$0xff]  }
 0x34a   :  { %7063 = vmatpush1.bf16.msra.mxu0 %v10072_v14  ;;  %v10165_v14 = vld [vmem:[%s13278_s3 + $0xce8] ss:$16 sps:$4 sm:$0xff]  }
 0x34b   :  { %7391 = vmatpush1.bf16.msra.mxu1 %v10075_v15  ;;  %7064 = vmatprep.subr.bf16.mxu0 %v10080_v16  ;;  %v10170_v15 = vld [vmem:[%s13278_s3 + $0xd04] ss:$16 sps:$4 sm:$0xff]   ;;  %v10173_v16 = vld [vmem:[%s13278_s3 + $0xd0c] ss:$16 sps:$4 sm:$0xff]  }
 0x34c   :  { %7392 = vmatprep.subr.bf16.mxu1 %v10083_v19  ;;  %v10168_v19 = vld [vmem:[%s13278_s3 + $0xd00] ss:$16 sps:$4 sm:$0xff]  }
 0x34e   :  { %7065 = vmatpush1.bf16.msra.mxu0 %v10078_v17  ;;  %v10171_v17 = vld [vmem:[%s13278_s3 + $0xd08] ss:$16 sps:$4 sm:$0xff]  }
 0x34f   :  { %7393 = vmatpush1.bf16.msra.mxu1 %v10081_v7  ;;  %7066 = vmatprep.subr.bf16.mxu0 %v10086_v20  ;;  %v10176_v7 = vld [vmem:[%s13278_s3 + $0xd24] ss:$16 sps:$4 sm:$0xff]   ;;  %v10179_v20 = vld [vmem:[%s13278_s3 + $0xd2c] ss:$16 sps:$4 sm:$0xff]  }
 0x350   :  { %7394 = vmatprep.subr.bf16.mxu1 %v10089_v51  ;;  %v10174_v51 = vld [vmem:[%s13278_s3 + $0xd20] ss:$16 sps:$4 sm:$0xff]  }
 0x352   :  { %7067 = vmatpush1.bf16.msra.mxu0 %v10084_v18  ;;  %v10177_v18 = vld [vmem:[%s13278_s3 + $0xd28] ss:$16 sps:$4 sm:$0xff]  }
 0x353   :  { %7395 = vmatpush1.bf16.msra.mxu1 %v10087_v48  ;;  %7068 = vmatprep.subr.bf16.mxu0 %v10092_v21  ;;  %v10182_v48 = vld [vmem:[%s13278_s3 + $0xd44] ss:$16 sps:$4 sm:$0xff]   ;;  %v10185_v21 = vld [vmem:[%s13278_s3 + $0xd4c] ss:$16 sps:$4 sm:$0xff]  }
 0x354   :  { %7396 = vmatprep.subr.bf16.mxu1 %v10095_v23  ;;  %v10180_v23 = vld [vmem:[%s13278_s3 + $0xd40] ss:$16 sps:$4 sm:$0xff]  }
 0x356   :  { %7069 = vmatpush1.bf16.msra.mxu0 %v10090_v24  ;;  %v10183_v24 = vld [vmem:[%s13278_s3 + $0xd48] ss:$16 sps:$4 sm:$0xff]  }
 0x357   :  { %7397 = vmatpush1.bf16.msra.mxu1 %v10093_v25  ;;  %7070 = vmatprep.subr.bf16.mxu0 %v10098_v26  ;;  %v10188_v25 = vld [vmem:[%s13278_s3 + $0xd64] ss:$16 sps:$4 sm:$0xff]   ;;  %v10191_v26 = vld [vmem:[%s13278_s3 + $0xd6c] ss:$16 sps:$4 sm:$0xff]  }
 0x358   :  { %7398 = vmatprep.subr.bf16.mxu1 %v10101_v27  ;;  %v10186_v27 = vld [vmem:[%s13278_s3 + $0xd60] ss:$16 sps:$4 sm:$0xff]  }
 0x35a   :  { %7071 = vmatpush1.bf16.msra.mxu0 %v10096_v28  ;;  %v10189_v28 = vld [vmem:[%s13278_s3 + $0xd68] ss:$16 sps:$4 sm:$0xff]  }
 0x35b   :  { %7399 = vmatpush1.bf16.msra.mxu1 %v10099_v29  ;;  %7072 = vmatprep.subr.bf16.mxu0 %v10104_v59  ;;  %v10194_v29 = vld [vmem:[%s13278_s3 + $0xd84] ss:$16 sps:$4 sm:$0xff]   ;;  %v10197_v59 = vld [vmem:[%s13278_s3 + $0xd8c] ss:$16 sps:$4 sm:$0xff]  }
 0x35c   :  { %7400 = vmatprep.subr.bf16.mxu1 %v10107_v30  ;;  %v10192_v30 = vld [vmem:[%s13278_s3 + $0xd80] ss:$16 sps:$4 sm:$0xff]  }
 0x35e   :  { %7073 = vmatpush1.bf16.msra.mxu0 %v10102_v22  ;;  %v10195_v22 = vld [vmem:[%s13278_s3 + $0xd88] ss:$16 sps:$4 sm:$0xff]  }
 0x35f   :  { %7401 = vmatpush1.bf16.msra.mxu1 %v10105_v53  ;;  %7074 = vmatprep.subr.bf16.mxu0 %v10110_v31  ;;  %v10200_v53 = vld [vmem:[%s13278_s3 + $0xda4] ss:$16 sps:$4 sm:$0xff]   ;;  %v10203_v31 = vld [vmem:[%s13278_s3 + $0xdac] ss:$16 sps:$4 sm:$0xff]  }
 0x360   :  { %7402 = vmatprep.subr.bf16.mxu1 %v10113_v32  ;;  %v10198_v32 = vld [vmem:[%s13278_s3 + $0xda0] ss:$16 sps:$4 sm:$0xff]  }
 0x362   :  { %7075 = vmatpush1.bf16.msra.mxu0 %v10108_v34  ;;  %v10201_v34 = vld [vmem:[%s13278_s3 + $0xda8] ss:$16 sps:$4 sm:$0xff]  }
 0x363   :  { %7403 = vmatpush1.bf16.msra.mxu1 %v10111_v35  ;;  %7076 = vmatprep.subr.bf16.mxu0 %v10116_v36  ;;  %v10206_v35 = vld [vmem:[%s13278_s3 + $0xdc4] ss:$16 sps:$4 sm:$0xff]   ;;  %v10209_v36 = vld [vmem:[%s13278_s3 + $0xdcc] ss:$16 sps:$4 sm:$0xff]  }
 0x364   :  { %7404 = vmatprep.subr.bf16.mxu1 %v10119_v60  ;;  %v10204_v60 = vld [vmem:[%s13278_s3 + $0xdc0] ss:$16 sps:$4 sm:$0xff]  }
 0x366   :  { %7077 = vmatpush1.bf16.msra.mxu0 %v10114_v37  ;;  %v10207_v37 = vld [vmem:[%s13278_s3 + $0xdc8] ss:$16 sps:$4 sm:$0xff]  }
 0x367   :  { %7405 = vmatpush1.bf16.msra.mxu1 %v10117_v38  ;;  %7087 = vmatprep.subr.bf16.mxu0 %v10122_v44  ;;  %v10212_v38 = vld [vmem:[%s13278_s3 + $0xde4] ss:$16 sps:$4 sm:$0xff]   ;;  %v10215_v44 = vld [vmem:[%s13278_s3 + $0xdec] ss:$16 sps:$4 sm:$0xff]  }
 0x368   :  { %7415 = vmatprep.subr.bf16.mxu1 %v10125_v39  ;;  %v10210_v39 = vld [vmem:[%s13278_s3 + $0xde0] ss:$16 sps:$4 sm:$0xff]  }
 0x369   :  { %7079 = vmatmul.mubr.bf16.vlgmr.msra.gmra.mrb[72].mxu0 %v11846_v3 }
 0x36a   :  { %7407 = vmatmul.mubr.bf16.vlgmr.msra.gmra.mrb[72].mxu1 %v11846_v3  ;;  %7088 = vmatpush1.bf16.msra.mxu0 %v10120_v40  ;;  %v10137_v3 = vld [vmem:[%s13278_s3 + $0xc4c] ss:$16 sps:$4 sm:$0xff]   ;;  %v10213_v40 = vld [vmem:[%s13278_s3 + $0xde8] ss:$16 sps:$4 sm:$0xff]  }
 0x36b   :  { %7119 = vmatprep.mubr.bf16.mxu0 %v11832_v61  ;;  %7416 = vmatpush1.bf16.msra.mxu1 %v10123_v41  ;;  %v10218_v41 = vld [vmem:[%s13278_s3 + $0xe04] ss:$16 sps:$4 sm:$0xff]  }
 0x36c   :  { %7447 = vmatprep.mubr.bf16.mxu1 %v11832_v61  ;;  %7089 = vmatprep.subr.bf16.mxu0 %v10128_v1  ;;  %v10140_v61 = vld [vmem:[%s13278_s3 + $0xc64] ss:$16 sps:$4 sm:$0xff]   ;;  %v10221_v1 = vld [vmem:[%s13278_s3 + $0xe0c] ss:$16 sps:$4 sm:$0xff]  }
 0x36d   :  { %7417 = vmatprep.subr.bf16.mxu1 %v10131_v33  ;;  %v10216_v33 = vld [vmem:[%s13278_s3 + $0xe00] ss:$16 sps:$4 sm:$0xff]  }
 0x36e   :  { %7090 = vmatpush1.bf16.msra.mxu0 %v10126_v42  ;;  %v10219_v42 = vld [vmem:[%s13278_s3 + $0xe08] ss:$16 sps:$4 sm:$0xff]  }
 0x36f   :  { %7418 = vmatpush1.bf16.msra.mxu1 %v10129_v57  ;;  %7091 = vmatprep.subr.bf16.mxu0 %v10134_v43  ;;  %v10224_v57 = vld [vmem:[%s13278_s3 + $0xe24] ss:$16 sps:$4 sm:$0xff]   ;;  %v10227_v43 = vld [vmem:[%s13278_s3 + $0xe2c] ss:$16 sps:$4 sm:$0xff]  }
 0x370   :  { %7419 = vmatprep.subr.bf16.mxu1 %v10137_v3  ;;  %v10222_v3 = vld [vmem:[%s13278_s3 + $0xe20] ss:$16 sps:$4 sm:$0xff]  }
 0x372   :  { %7092 = vmatpush1.bf16.msra.mxu0 %v10132_v45  ;;  %v10225_v45 = vld [vmem:[%s13278_s3 + $0xe28] ss:$16 sps:$4 sm:$0xff]  }
 0x373   :  { %7420 = vmatpush1.bf16.msra.mxu1 %v10135_v46  ;;  %7093 = vmatprep.subr.bf16.mxu0 %v10140_v61  ;;  %v10230_v46 = vld [vmem:[%s13278_s3 + $0xe44] ss:$16 sps:$4 sm:$0xff]   ;;  %v10228_v61 = vld [vmem:[%s13278_s3 + $0xe40] ss:$16 sps:$4 sm:$0xff]  }
 0x374   :  { %7421 = vmatprep.subr.bf16.mxu1 %v10143_v50  ;;  %v10231_v50 = vld [vmem:[%s13278_s3 + $0xe48] ss:$16 sps:$4 sm:$0xff]  }
 0x376   :  { %7094 = vmatpush1.bf16.msra.mxu0 %v10138_v49  ;;  %v10239_v49 = vld [vmem:[%s13278_s3 + $0xe6c] ss:$16 sps:$4 sm:$0xff]  }
 0x377   :  { %7422 = vmatpush1.bf16.msra.mxu1 %v10141_v52  ;;  %7095 = vmatprep.subr.bf16.mxu0 %v10146_v47  ;;  %v10234_v52 = vld [vmem:[%s13278_s3 + $0xe60] ss:$16 sps:$4 sm:$0xff]   ;;  %v10237_v47 = vld [vmem:[%s13278_s3 + $0xe68] ss:$16 sps:$4 sm:$0xff]  }
 0x378   :  { %7423 = vmatprep.subr.bf16.mxu1 %v10149_v54  ;;  %v10242_v54 = vld [vmem:[%s13278_s3 + $0xe84] ss:$16 sps:$4 sm:$0xff]  }
 0x37a   :  { %7096 = vmatpush1.bf16.msra.mxu0 %v10144_v55  ;;  %v10245_v55 = vld [vmem:[%s13278_s3 + $0xe8c] ss:$16 sps:$4 sm:$0xff]  }
 0x37b   :  { %7424 = vmatpush1.bf16.msra.mxu1 %v10147_v56  ;;  %7097 = vmatprep.subr.bf16.mxu0 %v10152_v58  ;;  %v10240_v56 = vld [vmem:[%s13278_s3 + $0xe80] ss:$16 sps:$4 sm:$0xff]   ;;  %v10243_v58 = vld [vmem:[%s13278_s3 + $0xe88] ss:$16 sps:$4 sm:$0xff]  }
 0x37c   :  { %7425 = vmatprep.subr.bf16.mxu1 %v10155_v62  ;;  %v10248_v62 = vld [vmem:[%s13278_s3 + $0xea4] ss:$16 sps:$4 sm:$0xff]  }
 0x37e   :  { %7098 = vmatpush1.bf16.msra.mxu0 %v10150_v63  ;;  %v10251_v63 = vld [vmem:[%s13278_s3 + $0xeac] ss:$16 sps:$4 sm:$0xff]  }
 0x37f   :  { %7426 = vmatpush1.bf16.msra.mxu1 %v10153_v0  ;;  %7099 = vmatprep.subr.bf16.mxu0 %v10158_v4  ;;  %v10246_v0 = vld [vmem:[%s13278_s3 + $0xea0] ss:$16 sps:$4 sm:$0xff]   ;;  %v10249_v4 = vld [vmem:[%s13278_s3 + $0xea8] ss:$16 sps:$4 sm:$0xff]  }
 0x380   :  { %7427 = vmatprep.subr.bf16.mxu1 %v10161_v6  ;;  %v10254_v6 = vld [vmem:[%s13278_s3 + $0xec4] ss:$16 sps:$4 sm:$0xff]  }
 0x382   :  { %7100 = vmatpush1.bf16.msra.mxu0 %v10156_v9  ;;  %v10257_v9 = vld [vmem:[%s13278_s3 + $0xecc] ss:$16 sps:$4 sm:$0xff]  }
 0x383   :  { %7428 = vmatpush1.bf16.msra.mxu1 %v10159_v2  ;;  %7101 = vmatprep.subr.bf16.mxu0 %v10164_v10  ;;  %v10252_v2 = vld [vmem:[%s13278_s3 + $0xec0] ss:$16 sps:$4 sm:$0xff]   ;;  %v10255_v10 = vld [vmem:[%s13278_s3 + $0xec8] ss:$16 sps:$4 sm:$0xff]  }
 0x384   :  { %7429 = vmatprep.subr.bf16.mxu1 %v10167_v11  ;;  %v10260_v11 = vld [vmem:[%s13278_s3 + $0xee4] ss:$16 sps:$4 sm:$0xff]  }
 0x386   :  { %7102 = vmatpush1.bf16.msra.mxu0 %v10162_v13  ;;  %v10263_v13 = vld [vmem:[%s13278_s3 + $0xeec] ss:$16 sps:$4 sm:$0xff]  }
 0x387   :  { %7430 = vmatpush1.bf16.msra.mxu1 %v10165_v14  ;;  %7103 = vmatprep.subr.bf16.mxu0 %v10170_v15  ;;  %v10258_v14 = vld [vmem:[%s13278_s3 + $0xee0] ss:$16 sps:$4 sm:$0xff]   ;;  %v10261_v15 = vld [vmem:[%s13278_s3 + $0xee8] ss:$16 sps:$4 sm:$0xff]  }
 0x388   :  { %7431 = vmatprep.subr.bf16.mxu1 %v10173_v16  ;;  %v10266_v16 = vld [vmem:[%s13278_s3 + $0xf04] ss:$16 sps:$4 sm:$0xff]  }
 0x38a   :  { %7104 = vmatpush1.bf16.msra.mxu0 %v10168_v19  ;;  %v10269_v19 = vld [vmem:[%s13278_s3 + $0xf0c] ss:$16 sps:$4 sm:$0xff]  }
 0x38b   :  { %7432 = vmatpush1.bf16.msra.mxu1 %v10171_v17  ;;  %7105 = vmatprep.subr.bf16.mxu0 %v10176_v7  ;;  %v10264_v17 = vld [vmem:[%s13278_s3 + $0xf00] ss:$16 sps:$4 sm:$0xff]   ;;  %v10267_v7 = vld [vmem:[%s13278_s3 + $0xf08] ss:$16 sps:$4 sm:$0xff]  }
 0x38c   :  { %7433 = vmatprep.subr.bf16.mxu1 %v10179_v20  ;;  %v10272_v20 = vld [vmem:[%s13278_s3 + $0xf24] ss:$16 sps:$4 sm:$0xff]  }
 0x38e   :  { %7106 = vmatpush1.bf16.msra.mxu0 %v10174_v51  ;;  %v10275_v51 = vld [vmem:[%s13278_s3 + $0xf2c] ss:$16 sps:$4 sm:$0xff]  }
 0x38f   :  { %7434 = vmatpush1.bf16.msra.mxu1 %v10177_v18  ;;  %7107 = vmatprep.subr.bf16.mxu0 %v10182_v48  ;;  %v10270_v18 = vld [vmem:[%s13278_s3 + $0xf20] ss:$16 sps:$4 sm:$0xff]   ;;  %v10273_v48 = vld [vmem:[%s13278_s3 + $0xf28] ss:$16 sps:$4 sm:$0xff]  }
 0x390   :  { %7435 = vmatprep.subr.bf16.mxu1 %v10185_v21  ;;  %v10278_v21 = vld [vmem:[%s13278_s3 + $0xf44] ss:$16 sps:$4 sm:$0xff]  }
 0x392   :  { %7108 = vmatpush1.bf16.msra.mxu0 %v10180_v23  ;;  %v10281_v23 = vld [vmem:[%s13278_s3 + $0xf4c] ss:$16 sps:$4 sm:$0xff]  }
 0x393   :  { %7436 = vmatpush1.bf16.msra.mxu1 %v10183_v24  ;;  %7109 = vmatprep.subr.bf16.mxu0 %v10188_v25  ;;  %v10276_v24 = vld [vmem:[%s13278_s3 + $0xf40] ss:$16 sps:$4 sm:$0xff]   ;;  %v10279_v25 = vld [vmem:[%s13278_s3 + $0xf48] ss:$16 sps:$4 sm:$0xff]  }
 0x394   :  { %7437 = vmatprep.subr.bf16.mxu1 %v10191_v26  ;;  %v10284_v26 = vld [vmem:[%s13278_s3 + $0xf64] ss:$16 sps:$4 sm:$0xff]  }
 0x396   :  { %7110 = vmatpush1.bf16.msra.mxu0 %v10186_v27  ;;  %v10287_v27 = vld [vmem:[%s13278_s3 + $0xf6c] ss:$16 sps:$4 sm:$0xff]  }
 0x397   :  { %7438 = vmatpush1.bf16.msra.mxu1 %v10189_v28  ;;  %7111 = vmatprep.subr.bf16.mxu0 %v10194_v29  ;;  %v10282_v28 = vld [vmem:[%s13278_s3 + $0xf60] ss:$16 sps:$4 sm:$0xff]   ;;  %v10285_v29 = vld [vmem:[%s13278_s3 + $0xf68] ss:$16 sps:$4 sm:$0xff]  }
 0x398   :  { %7439 = vmatprep.subr.bf16.mxu1 %v10197_v59  ;;  %v10290_v59 = vld [vmem:[%s13278_s3 + $0xf84] ss:$16 sps:$4 sm:$0xff]  }
 0x39a   :  { %7112 = vmatpush1.bf16.msra.mxu0 %v10192_v30  ;;  %v10293_v30 = vld [vmem:[%s13278_s3 + $0xf8c] ss:$16 sps:$4 sm:$0xff]  }
 0x39b   :  { %7440 = vmatpush1.bf16.msra.mxu1 %v10195_v22  ;;  %7113 = vmatprep.subr.bf16.mxu0 %v10200_v53  ;;  %v10288_v22 = vld [vmem:[%s13278_s3 + $0xf80] ss:$16 sps:$4 sm:$0xff]   ;;  %v10291_v53 = vld [vmem:[%s13278_s3 + $0xf88] ss:$16 sps:$4 sm:$0xff]  }
 0x39c   :  { %7441 = vmatprep.subr.bf16.mxu1 %v10203_v31  ;;  %v10296_v31 = vld [vmem:[%s13278_s3 + $0xfa4] ss:$16 sps:$4 sm:$0xff]  }
 0x39e   :  { %7114 = vmatpush1.bf16.msra.mxu0 %v10198_v32  ;;  %v10299_v32 = vld [vmem:[%s13278_s3 + $0xfac] ss:$16 sps:$4 sm:$0xff]  }
 0x39f   :  { %7442 = vmatpush1.bf16.msra.mxu1 %v10201_v34  ;;  %7115 = vmatprep.subr.bf16.mxu0 %v10206_v35  ;;  %v10294_v34 = vld [vmem:[%s13278_s3 + $0xfa0] ss:$16 sps:$4 sm:$0xff]   ;;  %v10297_v35 = vld [vmem:[%s13278_s3 + $0xfa8] ss:$16 sps:$4 sm:$0xff]  }
 0x3a0   :  { %7443 = vmatprep.subr.bf16.mxu1 %v10209_v36  ;;  %v10302_v36 = vld [vmem:[%s13278_s3 + $0xfc4] ss:$16 sps:$4 sm:$0xff]  }
 0x3a2   :  { %7116 = vmatpush1.bf16.msra.mxu0 %v10204_v60  ;;  %v10305_v60 = vld [vmem:[%s13278_s3 + $0xfcc] ss:$16 sps:$4 sm:$0xff]  }
 0x3a3   :  { %7444 = vmatpush1.bf16.msra.mxu1 %v10207_v37  ;;  %7117 = vmatprep.subr.bf16.mxu0 %v10212_v38  ;;  %v10300_v37 = vld [vmem:[%s13278_s3 + $0xfc0] ss:$16 sps:$4 sm:$0xff]   ;;  %v10303_v38 = vld [vmem:[%s13278_s3 + $0xfc8] ss:$16 sps:$4 sm:$0xff]  }
 0x3a4   :  { %7445 = vmatprep.subr.bf16.mxu1 %v10215_v44  ;;  %v10308_v44 = vld [vmem:[%s13278_s3 + $0xfe4] ss:$16 sps:$4 sm:$0xff]  }
 0x3a6   :  { %7118 = vmatpush1.bf16.msra.mxu0 %v10210_v39  ;;  %v10311_v39 = vld [vmem:[%s13278_s3 + $0xfec] ss:$16 sps:$4 sm:$0xff]  }
 0x3a7   :  { %7446 = vmatpush1.bf16.msra.mxu1 %v10213_v40  ;;  %7128 = vmatprep.subr.bf16.mxu0 %v10218_v41  ;;  %v10306_v40 = vld [vmem:[%s13278_s3 + $0xfe0] ss:$16 sps:$4 sm:$0xff]   ;;  %v10309_v41 = vld [vmem:[%s13278_s3 + $0xfe8] ss:$16 sps:$4 sm:$0xff]  }
 0x3a8   :  { %7456 = vmatprep.subr.bf16.mxu1 %v10221_v1  ;;  %v7506_v1 = vld [vmem:[%s13280_s5] sm:$0xff] }
 0x3a9   :  { %7120 = vmatmul.mubr.bf16.vlgmr.msra.gmra.mrb[72].mxu0 %v11851_v5 }
 0x3aa   :  { %7448 = vmatmul.mubr.bf16.vlgmr.msra.gmra.mrb[72].mxu1 %v11851_v5  ;;  %7129 = vmatpush1.bf16.msra.mxu0 %v10216_v33  ;;  %v10233_v5 = vld [vmem:[%s13278_s3 + $0xe4c] ss:$16 sps:$4 sm:$0xff]  }
 0x3ab   :  { %7160 = vmatprep.mubr.bf16.mxu0 %v11863_v12  ;;  %7457 = vmatpush1.bf16.msra.mxu1 %v10219_v42  ;;  %v7507_v33 = vld [vmem:[%s13280_s5 + $0x8] sm:$0xff] }
 0x3ac   :  { %7488 = vmatprep.mubr.bf16.mxu1 %v11863_v12  ;;  %7130 = vmatprep.subr.bf16.mxu0 %v10224_v57  ;;  %v10236_v12 = vld [vmem:[%s13278_s3 + $0xe64] ss:$16 sps:$4 sm:$0xff]   ;;  %v9060_v42 = vpack.c.bf16 %v7507_v33, %v7506_v1  ;;  %v10360_v57 = vmov 0.0|0.0  }
 0x3ad   :  { %7458 = vmatprep.subr.bf16.mxu1 %v10227_v43  ;;  %v7508_v43 = vld [vmem:[%s13280_s5 + $0x10] sm:$0xff] }
 0x3ae   :  { %7131 = vmatpush1.bf16.msra.mxu0 %v10222_v3  ;;  %v7509_v3 = vld [vmem:[%s13280_s5 + $0x18] sm:$0xff] }
 0x3af   :  { %7459 = vmatpush1.bf16.msra.mxu1 %v10225_v45  ;;  %7132 = vmatprep.subr.bf16.mxu0 %v10230_v46  ;;  %v9063_v45 = vpack.c.bf16 %v7509_v3, %v7508_v43  ;;  %v7510_v46 = vld [vmem:[%s13280_s5 + $0x20] sm:$0xff] }
 0x3b0   :  { %7460 = vmatprep.subr.bf16.mxu1 %v10233_v5  ;;  %v7511_v5 = vld [vmem:[%s13280_s5 + $0x28] sm:$0xff] }
 0x3b2   :  { %7133 = vmatpush1.bf16.msra.mxu0 %v10228_v61  ;;  %v9066_v61 = vpack.c.bf16 %v7511_v5, %v7510_v46 }
 0x3b3   :  { %7461 = vmatpush1.bf16.msra.mxu1 %v10231_v50  ;;  %7134 = vmatprep.subr.bf16.mxu0 %v10236_v12  ;;  %v7512_v50 = vld [vmem:[%s13280_s5 + $0x30] sm:$0xff] }
 0x3b4   :  { %7462 = vmatprep.subr.bf16.mxu1 %v10239_v49  ;;  %v7514_v49 = vld [vmem:[%s13280_s5 + $0x40] sm:$0xff] }
 0x3b6   :  { %7135 = vmatpush1.bf16.msra.mxu0 %v10234_v52  ;;  %v7515_v52 = vld [vmem:[%s13280_s5 + $0x48] sm:$0xff] }
 0x3b7   :  { %7463 = vmatpush1.bf16.msra.mxu1 %v10237_v47  ;;  %7136 = vmatprep.subr.bf16.mxu0 %v10242_v54  ;;  %v9072_v47 = vpack.c.bf16 %v7515_v52, %v7514_v49  ;;  %v7516_v54 = vld [vmem:[%s13280_s5 + $0x50] sm:$0xff] }
 0x3b8   :  { %7464 = vmatprep.subr.bf16.mxu1 %v10245_v55  ;;  %v7517_v55 = vld [vmem:[%s13280_s5 + $0x58] sm:$0xff] }
 0x3ba   :  { %7137 = vmatpush1.bf16.msra.mxu0 %v10240_v56  ;;  %v9075_v56 = vpack.c.bf16 %v7517_v55, %v7516_v54 }
 0x3bb   :  { %7465 = vmatpush1.bf16.msra.mxu1 %v10243_v58  ;;  %7138 = vmatprep.subr.bf16.mxu0 %v10248_v62  ;;  %v7518_v58 = vld [vmem:[%s13280_s5 + $0x60] sm:$0xff]  ;;  %v7519_v62 = vld [vmem:[%s13280_s5 + $0x68] sm:$0xff] }
 0x3bc   :  { %7466 = vmatprep.subr.bf16.mxu1 %v10251_v63  ;;  %v9078_v63 = vpack.c.bf16 %v7519_v62, %v7518_v58 }
 0x3be   :  { %7139 = vmatpush1.bf16.msra.mxu0 %v10246_v0  ;;  %v7520_v0 = vld [vmem:[%s13280_s5 + $0x70] sm:$0xff] }
 0x3bf   :  { %7467 = vmatpush1.bf16.msra.mxu1 %v10249_v4  ;;  %7140 = vmatprep.subr.bf16.mxu0 %v10254_v6  ;;  %v7521_v4 = vld [vmem:[%s13280_s5 + $0x78] sm:$0xff] }
 0x3c0   :  { %7468 = vmatprep.subr.bf16.mxu1 %v10257_v9  ;;  %v9081_v6 = vpack.c.bf16 %v7521_v4, %v7520_v0  ;;  %v10362_v9 = vmov 0.0  }
 0x3c2   :  { %7141 = vmatpush1.bf16.msra.mxu0 %v10252_v2  ;;  %v4261_v2 = vlaneseq }
 0x3c3   :  { %7469 = vmatpush1.bf16.msra.mxu1 %v10255_v10  ;;  %7142 = vmatprep.subr.bf16.mxu0 %v10260_v11 }
 0x3c4   :  { %7470 = vmatprep.subr.bf16.mxu1 %v10263_v13  ;;  %v4262_v10 = vshrl.u32 %v4261_v2, 7  ;;  %v4259_v13 = vld [vmem:[%s13279_s4] sm:$0xf]  ;;  %s10363_s4 = smov [#allocation4]  }
 0x3c6   :  { %7143 = vmatpush1.bf16.msra.mxu0 %v10258_v14  ;;  %v4263_v11 = vsub.s32 0, %v4262_v10  ;;  %v4271_v14 = vsub.s32 2, %v4262_v10 }
 0x3c7   :  { %7471 = vmatpush1.bf16.msra.mxu1 %v10261_v15  ;;  %7144 = vmatprep.subr.bf16.mxu0 %v10266_v16  ;;  %v4267_v15 = vsub.s32 1, %v4262_v10  ;;  %v4275_v16 = vsub.s32 3, %v4262_v10 }
 0x3c8   :  { %7472 = vmatprep.subr.bf16.mxu1 %v10269_v19  ;;  %v4264_v19 = vrot.slane %v4259_v13, %v4263_v11 }
 0x3ca   :  { %7145 = vmatpush1.bf16.msra.mxu0 %v10264_v17  ;;  %v4272_v17 = vrot.slane %v4259_v13, %v4271_v14 }
 0x3cb   :  { %7473 = vmatpush1.bf16.msra.mxu1 %v10267_v7  ;;  %7146 = vmatprep.subr.bf16.mxu0 %v10272_v20  ;;  %v4268_v7 = vrot.slane %v4259_v13, %v4267_v15 }
 0x3cc   :  { %7474 = vmatprep.subr.bf16.mxu1 %v10275_v51  ;;  %v4276_v51 = vrot.slane %v4259_v13, %v4275_v16 }
 0x3ce   :  { %7147 = vmatpush1.bf16.msra.mxu0 %v10270_v18 }
 0x3cf   :  { %7475 = vmatpush1.bf16.msra.mxu1 %v10273_v48  ;;  %7148 = vmatprep.subr.bf16.mxu0 %v10278_v21 }
 0x3d0   :  { %7476 = vmatprep.subr.bf16.mxu1 %v10281_v23 }
 0x3d2   :  { %7149 = vmatpush1.bf16.msra.mxu0 %v10276_v24 }
 0x3d3   :  { %7477 = vmatpush1.bf16.msra.mxu1 %v10279_v25  ;;  %7150 = vmatprep.subr.bf16.mxu0 %v10284_v26 }
 0x3d4   :  { %7478 = vmatprep.subr.bf16.mxu1 %v10287_v27 }
 0x3d6   :  { %7151 = vmatpush1.bf16.msra.mxu0 %v10282_v28 }
 0x3d7   :  { %7479 = vmatpush1.bf16.msra.mxu1 %v10285_v29  ;;  %7152 = vmatprep.subr.bf16.mxu0 %v10290_v59 }
 0x3d8   :  { %7480 = vmatprep.subr.bf16.mxu1 %v10293_v30 }
 0x3da   :  { %7153 = vmatpush1.bf16.msra.mxu0 %v10288_v22 }
 0x3db   :  { %7481 = vmatpush1.bf16.msra.mxu1 %v10291_v53  ;;  %7154 = vmatprep.subr.bf16.mxu0 %v10296_v31 }
 0x3dc   :  { %7482 = vmatprep.subr.bf16.mxu1 %v10299_v32 }
 0x3de   :  { %7155 = vmatpush1.bf16.msra.mxu0 %v10294_v34 }
 0x3df   :  { %7483 = vmatpush1.bf16.msra.mxu1 %v10297_v35  ;;  %7156 = vmatprep.subr.bf16.mxu0 %v10302_v36 }
 0x3e0   :  { %7484 = vmatprep.subr.bf16.mxu1 %v10305_v60 }
 0x3e2   :  { %7157 = vmatpush1.bf16.msra.mxu0 %v10300_v37 }
 0x3e3   :  { %7485 = vmatpush1.bf16.msra.mxu1 %v10303_v38  ;;  %7158 = vmatprep.subr.bf16.mxu0 %v10308_v44 }
 0x3e4   :  { %7486 = vmatprep.subr.bf16.mxu1 %v10311_v39 }
 0x3e6   :  { %7159 = vmatpush1.bf16.msra.mxu0 %v10306_v40 }
 0x3e7   :  { %7487 = vmatpush1.bf16.msra.mxu1 %v10309_v41  ;;  %9059 = vmatprep.subr.bf16.mxu0 %v10360_v57 }
 0x3e9   :  { %7161 = vmatmul.mubr.bf16.vlgmr.msra.gmra.mrb[72].mxu0 %v11867_v8 }
 0x3ea   :  { %7489 = vmatmul.mubr.bf16.vlgmr.msra.gmra.mrb[72].mxu1 %v11867_v8  ;;  %9061 = vmatpush3.bf16.msra.mxu0 %v9060_v42  ;;  %v7513_v8 = vld [vmem:[%s13280_s5 + $0x38] sm:$0xff]  ;;  %s7617_s5 = sshll.u32 %s10363_s4, 4  ;;  %s7618_s5 = int_to_ptr.vmem [resolvable:$true] %s7617_s5 }
 0x3eb   :  { %9062 = vmatprep.subr.bf16.mxu0 %v10360_v57  ;;  %v9069_v12 = vpack.c.bf16 %v7513_v8, %v7512_v50  ;;  %9056 = vmatprep.mubr.msk.f32.mxu0 %vm10361_vm3, %v10362_v9  ;;  %s10312_s21 = scalar_lea.vmem %s7618_s5, 32  ;;  %p10317_p1 = scmp.lt.s32.totalorder %s7618_s5, %s7618_s5 }
 0x3ec   :  { %p10313_p0 = scmp.ne.s32.totalorder %s7618_s5, %s10312_s21  ;;  %p10318_p2 = scmp.lt.s32.totalorder %s10312_s21, %s10312_s21 }
 0x3ee   :  { %9064 = vmatpush3.bf16.msra.mxu0 %v9063_v45  ;;  %p10319_p3 = por %p10318_p2, %p10317_p1 }
 0x3ef   :  { %9065 = vmatprep.subr.bf16.mxu0 %v10360_v57 }
 0x3f0   :  { %p10320_p4 = pnand %p10319_p3, %p10313_p0 }
 0x3f2   :  { %9067 = vmatpush3.bf16.msra.mxu0 %v9066_v61 }
 0x3f3   :  { %9068 = vmatprep.subr.bf16.mxu0 %v10360_v57 }
 0x3f6   :  { %9070 = vmatpush3.bf16.msra.mxu0 %v9069_v12 }
 0x3f7   :  { %9071 = vmatprep.subr.bf16.mxu0 %v10360_v57 }
 0x3fa   :  { %9073 = vmatpush3.bf16.msra.mxu0 %v9072_v47 }
 0x3fb   :  { %9074 = vmatprep.subr.bf16.mxu0 %v10360_v57 }
 0x3fe   :  { %9076 = vmatpush3.bf16.msra.mxu0 %v9075_v56 }
 0x3ff   :  { %9077 = vmatprep.subr.bf16.mxu0 %v10360_v57 }
 0x402   :  { %9079 = vmatpush3.bf16.msra.mxu0 %v9078_v63 }
 0x403   :  { %9080 = vmatprep.subr.bf16.mxu0 %v10360_v57 }
 0x406   :  { %9082 = vmatpush3.bf16.msra.mxu0 %v9081_v6 }
 0x4bc   :  { %v7162_v20 = vpop.f32.mrb[72].mxu0 }
 0x4bd   :  { %v9083_v18 = vadd.f32 %v7162_v20, %v4264_v19  ;;  %v7490_v48 = vpop.f32.mrb[72].mxu1  ;;  %v7164_v21 = vpop.f32.mrb[73].mxu0 }
 0x4be   :  { %v9085_v23 = vadd.f32 %v7490_v48, %v4272_v17  ;;  %v9084_v24 = vadd.f32 %v7164_v21, %v4268_v7  ;;  %v7492_v25 = vpop.f32.mrb[73].mxu1  ;;  %v7166_v26 = vpop.f32.mrb[74].mxu0 }
 0x4bf   :  { %v7497_v27 = vmax.f32 %v9083_v18, 0.0  ;;  %v7494_v28 = vpop.f32.mrb[74].mxu1  ;;  %v7167_v29 = vpop.f32.mrb[75].mxu0  ;;  %v9086_v30 = vadd.f32 %v7492_v25, %v4276_v51 }
 0x4c0   :  { %v7498_v59 = vmax.f32 %v9084_v24, 0.0  ;;  %v7495_v22 = vpop.f32.mrb[75].mxu1  ;;  %v7499_v53 = vmax.f32 %v9085_v23, 0.0 }
 0x4c1   :  { %v7500_v32 = vmax.f32 %v9086_v30, 0.0 }
 0x4c2   :  { %v7501_v31 = vadd.f32 %v7498_v59, %v7497_v27 }
 0x4c4   :  { %v7502_v34 = vadd.f32 %v7501_v31, %v7499_v53 }
 0x4c6   :  { %v7503_v35 = vadd.f32 %v7502_v34, %v7500_v32 }
 0x4c8   :  { %v7504_v36 = vmul.f32 0.25, %v7503_v35 }
 0x4ca   :  { %7505 = vst [vmem:[#allocation4] sm:$0x3] %v7504_v36  ;;  %9057 = vmatmul.mubr.f32.vlgmr.msra.gmra.mrb[76].mxu0 %v7504_v36 }
 0x4cb   :  { %10323 = shalt.err (!%p10320_p4)
}
 0x4cc   :  { %s10324_s24 = scalar_lea.hbm %s13283_s8, 32 }
 0x4cd   :  { %p10325_p5 = scmp.ne.s32.totalorder %s13283_s8, %s10324_s24  ;;  %p10328_p6 = scmp.lt.u32.totalorder %s10324_s24, %s13283_s8 }
 0x4cf   :  { %p10330_p7 = pnand %p10328_p6, %p10325_p5 }
 0x4d1   :  { %10333 = shalt.err (!%p10330_p7)
}
 0x4d2   :  { %7620 = dma.vmem_to_hbm [thread:$0]  %s7618_s5, 32, %s13283_s8, [#allocation5]   ;;  %v8502_v60 = vld [vmem:[%s13281_s6] ss:$0 sm:$0xff]  ;;  %vm7599_vm4 = vcmask 9216  }
 0x4d3   :  { %s10364_s10 = smov [#allocation2]  }
 0x4d4   :  { %s7607_s11 = sshll.u32 %s10364_s10, 4  ;;  %s7608_s11 = int_to_ptr.vmem [resolvable:$true] %s7607_s11 }
 0x4d5   :  { %s10334_s12 = scalar_lea.vmem %s7608_s11, 32  ;;  %p10339_p9 = scmp.lt.s32.totalorder %s7608_s11, %s7608_s11 }
 0x4d6   :  { %p10335_p8 = scmp.ne.s32.totalorder %s7608_s11, %s10334_s12  ;;  %p10340_p10 = scmp.lt.s32.totalorder %s10334_s12, %s10334_s12 }
 0x4d8   :  { %p10341_p11 = por %p10340_p10, %p10339_p9 }
 0x4da   :  { %p10342_p12 = pnand %p10341_p11, %p10335_p8 }
 0x59d   :  { %v7595_v37 = vpop.f32.mrb[76].mxu0 }
 0x59e   :  { %v7596_v38 = vadd.f32 %v8502_v60, %v7595_v37  ;;  %v9058_v44 = vpop.f32.mrb[77].mxu0 }
 0x5a0   :  { %7600 = vst.msk [vmem:[#allocation2] sm:$0x3] %vm7599_vm4, %v7596_v38 }
 0x5a1   :  { %10345 = shalt.err (!%p10342_p12)
}
 0x5a2   :  { %s10346_s14 = scalar_lea.hbm %s13282_s7, 32 }
 0x5a3   :  { %p10347_p13 = scmp.ne.s32.totalorder %s13282_s7, %s10346_s14  ;;  %p10350_p0 = scmp.lt.u32.totalorder %s10346_s14, %s13282_s7 }
 0x5a5   :  { %p10352_p1 = pnand %p10350_p0, %p10347_p13 }
 0x5a7   :  { %10355 = shalt.err (!%p10352_p1)
}
 0x5a8   :  { %7610 = dma.vmem_to_hbm [thread:$0]  %s7608_s11, 32, %s13282_s7, [#allocation3]  }
 0x5a9   :  { %10356 = dma.done.wait [#allocation3], 32  }
 0x5aa   :  { %10357 = vsyncadd [#allocation3], 4294967264 }
 0x5ab   :  { %10358 = dma.done.wait [#allocation5], 32  }
 0x5ac   :  { %10359 = vsyncadd [#allocation5], 4294967264 }
 0x5ad   :  { %7627 = vsyncpa [#allocation3], 1 }
 0x5ae   :  { %7628 = vsyncpa [#allocation5], 1 }

// kernel: image_layer3_forward.2
= control target key start
LH: loop header
LB: loop body
LE: loop exit
PB: predicated region body
PF: predicated region fallthrough
CT: control target
= control target key end

     0   :  { %s22363_s1 = inlined_call_operand.vmem [shape: bf16[4608,512], index: 1, kind: input, shape index: {}]   ;;  %s22364_s0 = inlined_call_operand.vmem [shape: bf16[128,4608], index: 0, kind: input, shape index: {}]   ;;  %s22365_s2 = inlined_call_operand.vmem [shape: f32[1,512], index: 2, kind: input, shape index: {}]   ;;  %s22366_s3 = inlined_call_operand.vmem [shape: bf16[128,512], index: 3, kind: output, shape index: {}]  }
   0x1   :  { %v15692_v0 = vld [vmem:[%s22363_s1 + $0x4] ss:$16 sps:$4 sm:$0xff]   ;;  %v15694_v1 = vld [vmem:[%s22363_s1 + $0xc] ss:$16 sps:$4 sm:$0xff]   ;;  %v15696_v2 = vld [vmem:[%s22363_s1] ss:$16 sps:$4 sm:$0xff]  }
   0x2   :  { %8676 = vmatprep.subr.bf16.mxu0 %v15692_v0  ;;  %v15697_v3 = vld [vmem:[%s22363_s1 + $0x8] ss:$16 sps:$4 sm:$0xff]   ;;  %10710 = vmatprep.subr.bf16.mxu1 %v15694_v1  ;;  %v15698_v4 = vld [vmem:[%s22363_s1 + $0x24] ss:$16 sps:$4 sm:$0xff]   ;;  %v15700_v5 = vld [vmem:[%s22363_s1 + $0x2c] ss:$16 sps:$4 sm:$0xff]  }
   0x3   :  { %8677 = vmatpush1.bf16.msra.mxu0 %v15696_v2  ;;  %10711 = vmatpush1.bf16.msra.mxu1 %v15697_v3  ;;  %v15702_v6 = vld [vmem:[%s22363_s1 + $0x20] ss:$16 sps:$4 sm:$0xff]   ;;  %v15703_v7 = vld [vmem:[%s22363_s1 + $0x28] ss:$16 sps:$4 sm:$0xff]   ;;  %v15704_v8 = vld [vmem:[%s22363_s1 + $0x44] ss:$16 sps:$4 sm:$0xff]  }
   0x4   :  { %8678 = vmatprep.subr.bf16.mxu0 %v15698_v4  ;;  %10712 = vmatprep.subr.bf16.mxu1 %v15700_v5  ;;  %v15706_v9 = vld [vmem:[%s22363_s1 + $0x4c] ss:$16 sps:$4 sm:$0xff]   ;;  %v15708_v10 = vld [vmem:[%s22363_s1 + $0x40] ss:$16 sps:$4 sm:$0xff]   ;;  %v15709_v11 = vld [vmem:[%s22363_s1 + $0x48] ss:$16 sps:$4 sm:$0xff]  }
   0x5   :  { %v15710_v12 = vld [vmem:[%s22363_s1 + $0x64] ss:$16 sps:$4 sm:$0xff]   ;;  %v15712_v13 = vld [vmem:[%s22363_s1 + $0x6c] ss:$16 sps:$4 sm:$0xff]   ;;  %v15714_v14 = vld [vmem:[%s22363_s1 + $0x60] ss:$16 sps:$4 sm:$0xff]  }
   0x6   :  { %v15715_v15 = vld [vmem:[%s22363_s1 + $0x68] ss:$16 sps:$4 sm:$0xff]   ;;  %v15716_v16 = vld [vmem:[%s22363_s1 + $0x84] ss:$16 sps:$4 sm:$0xff]   ;;  %v15718_v17 = vld [vmem:[%s22363_s1 + $0x8c] ss:$16 sps:$4 sm:$0xff]  }
   0x7   :  { %8679 = vmatpush1.bf16.msra.mxu0 %v15702_v6  ;;  %10713 = vmatpush1.bf16.msra.mxu1 %v15703_v7  ;;  %v15720_v18 = vld [vmem:[%s22363_s1 + $0x80] ss:$16 sps:$4 sm:$0xff]   ;;  %v15721_v19 = vld [vmem:[%s22363_s1 + $0x88] ss:$16 sps:$4 sm:$0xff]   ;;  %v15722_v20 = vld [vmem:[%s22363_s1 + $0xa4] ss:$16 sps:$4 sm:$0xff]  }
   0x8   :  { %8680 = vmatprep.subr.bf16.mxu0 %v15704_v8  ;;  %10714 = vmatprep.subr.bf16.mxu1 %v15706_v9  ;;  %v15724_v21 = vld [vmem:[%s22363_s1 + $0xac] ss:$16 sps:$4 sm:$0xff]   ;;  %v15726_v22 = vld [vmem:[%s22363_s1 + $0xa0] ss:$16 sps:$4 sm:$0xff]   ;;  %v15727_v23 = vld [vmem:[%s22363_s1 + $0xa8] ss:$16 sps:$4 sm:$0xff]  }
   0x9   :  { %v15728_v24 = vld [vmem:[%s22363_s1 + $0xc4] ss:$16 sps:$4 sm:$0xff]   ;;  %v15730_v25 = vld [vmem:[%s22363_s1 + $0xcc] ss:$16 sps:$4 sm:$0xff]   ;;  %v15732_v26 = vld [vmem:[%s22363_s1 + $0xc0] ss:$16 sps:$4 sm:$0xff]  }
   0xa   :  { %v15733_v27 = vld [vmem:[%s22363_s1 + $0xc8] ss:$16 sps:$4 sm:$0xff]   ;;  %v15734_v28 = vld [vmem:[%s22363_s1 + $0xe4] ss:$16 sps:$4 sm:$0xff]   ;;  %v15736_v29 = vld [vmem:[%s22363_s1 + $0xec] ss:$16 sps:$4 sm:$0xff]  }
   0xb   :  { %8681 = vmatpush1.bf16.msra.mxu0 %v15708_v10  ;;  %10715 = vmatpush1.bf16.msra.mxu1 %v15709_v11  ;;  %v15738_v30 = vld [vmem:[%s22363_s1 + $0xe0] ss:$16 sps:$4 sm:$0xff]   ;;  %v15739_v31 = vld [vmem:[%s22363_s1 + $0xe8] ss:$16 sps:$4 sm:$0xff]   ;;  %v15740_v32 = vld [vmem:[%s22363_s1 + $0x104] ss:$16 sps:$4 sm:$0xff]  }
   0xc   :  { %8682 = vmatprep.subr.bf16.mxu0 %v15710_v12  ;;  %10716 = vmatprep.subr.bf16.mxu1 %v15712_v13  ;;  %v15742_v33 = vld [vmem:[%s22363_s1 + $0x10c] ss:$16 sps:$4 sm:$0xff]   ;;  %v15744_v34 = vld [vmem:[%s22363_s1 + $0x100] ss:$16 sps:$4 sm:$0xff]   ;;  %v15745_v35 = vld [vmem:[%s22363_s1 + $0x108] ss:$16 sps:$4 sm:$0xff]  }
   0xd   :  { %v15746_v36 = vld [vmem:[%s22363_s1 + $0x124] ss:$16 sps:$4 sm:$0xff]   ;;  %v15748_v37 = vld [vmem:[%s22363_s1 + $0x12c] ss:$16 sps:$4 sm:$0xff]   ;;  %v15750_v38 = vld [vmem:[%s22363_s1 + $0x120] ss:$16 sps:$4 sm:$0xff]  }
   0xe   :  { %v15751_v39 = vld [vmem:[%s22363_s1 + $0x128] ss:$16 sps:$4 sm:$0xff]   ;;  %v15752_v40 = vld [vmem:[%s22363_s1 + $0x144] ss:$16 sps:$4 sm:$0xff]   ;;  %v15754_v41 = vld [vmem:[%s22363_s1 + $0x14c] ss:$16 sps:$4 sm:$0xff]  }
   0xf   :  { %8683 = vmatpush1.bf16.msra.mxu0 %v15714_v14  ;;  %10717 = vmatpush1.bf16.msra.mxu1 %v15715_v15  ;;  %v15756_v42 = vld [vmem:[%s22363_s1 + $0x140] ss:$16 sps:$4 sm:$0xff]   ;;  %v15757_v43 = vld [vmem:[%s22363_s1 + $0x148] ss:$16 sps:$4 sm:$0xff]   ;;  %v15758_v44 = vld [vmem:[%s22363_s1 + $0x164] ss:$16 sps:$4 sm:$0xff]  }
  0x10   :  { %8684 = vmatprep.subr.bf16.mxu0 %v15716_v16  ;;  %10718 = vmatprep.subr.bf16.mxu1 %v15718_v17  ;;  %v15760_v45 = vld [vmem:[%s22363_s1 + $0x16c] ss:$16 sps:$4 sm:$0xff]   ;;  %v15762_v46 = vld [vmem:[%s22363_s1 + $0x160] ss:$16 sps:$4 sm:$0xff]   ;;  %v15763_v47 = vld [vmem:[%s22363_s1 + $0x168] ss:$16 sps:$4 sm:$0xff]  }
  0x11   :  { %v15790_v48 = vld [vmem:[%s22364_s0 + $0x4] ss:$144 sps:$4 sm:$0xff]   ;;  %v15766_v50 = vld [vmem:[%s22363_s1 + $0x18c] ss:$16 sps:$4 sm:$0xff]   ;;  %v15768_v51 = vld [vmem:[%s22363_s1 + $0x180] ss:$16 sps:$4 sm:$0xff]  }
  0x12   :  { %v15764_v49 = vld [vmem:[%s22363_s1 + $0x184] ss:$16 sps:$4 sm:$0xff]   ;;  %8708 = vmatprep.mubr.bf16.mxu0 %v15790_v48  ;;  %10742 = vmatprep.mubr.bf16.mxu1 %v15790_v48  ;;  %v15769_v52 = vld [vmem:[%s22363_s1 + $0x188] ss:$16 sps:$4 sm:$0xff]   ;;  %v15772_v54 = vld [vmem:[%s22363_s1 + $0x1ac] ss:$16 sps:$4 sm:$0xff]  }
  0x13   :  { %8685 = vmatpush1.bf16.msra.mxu0 %v15720_v18  ;;  %10719 = vmatpush1.bf16.msra.mxu1 %v15721_v19  ;;  %v15770_v53 = vld [vmem:[%s22363_s1 + $0x1a4] ss:$16 sps:$4 sm:$0xff]   ;;  %v15774_v55 = vld [vmem:[%s22363_s1 + $0x1a0] ss:$16 sps:$4 sm:$0xff]   ;;  %v15775_v56 = vld [vmem:[%s22363_s1 + $0x1a8] ss:$16 sps:$4 sm:$0xff]  }
  0x14   :  { %8686 = vmatprep.subr.bf16.mxu0 %v15722_v20  ;;  %10720 = vmatprep.subr.bf16.mxu1 %v15724_v21  ;;  %v15776_v57 = vld [vmem:[%s22363_s1 + $0x1c4] ss:$16 sps:$4 sm:$0xff]   ;;  %v15778_v58 = vld [vmem:[%s22363_s1 + $0x1cc] ss:$16 sps:$4 sm:$0xff]   ;;  %v15780_v59 = vld [vmem:[%s22363_s1 + $0x1c0] ss:$16 sps:$4 sm:$0xff]  }
  0x15   :  { %v15781_v60 = vld [vmem:[%s22363_s1 + $0x1c8] ss:$16 sps:$4 sm:$0xff]   ;;  %v15782_v61 = vld [vmem:[%s22363_s1 + $0x1e4] ss:$16 sps:$4 sm:$0xff]   ;;  %v15784_v62 = vld [vmem:[%s22363_s1 + $0x1ec] ss:$16 sps:$4 sm:$0xff]  }
  0x16   :  { %v15786_v63 = vld [vmem:[%s22363_s1 + $0x1e0] ss:$16 sps:$4 sm:$0xff]   ;;  %v15787_v0 = vld [vmem:[%s22363_s1 + $0x1e8] ss:$16 sps:$4 sm:$0xff]   ;;  %v15793_v1 = vld [vmem:[%s22363_s1 + $0x204] ss:$16 sps:$4 sm:$0xff]  }
  0x17   :  { %8687 = vmatpush1.bf16.msra.mxu0 %v15726_v22  ;;  %10721 = vmatpush1.bf16.msra.mxu1 %v15727_v23  ;;  %v15796_v2 = vld [vmem:[%s22363_s1 + $0x20c] ss:$16 sps:$4 sm:$0xff]   ;;  %v15788_v3 = vld [vmem:[%s22364_s0] ss:$144 sps:$4 sm:$0xff]   ;;  %v15794_v5 = vld [vmem:[%s22363_s1 + $0x208] ss:$16 sps:$4 sm:$0xff]  }
  0x18   :  { %8688 = vmatprep.subr.bf16.mxu0 %v15728_v24  ;;  %10722 = vmatprep.subr.bf16.mxu1 %v15730_v25  ;;  %v15791_v4 = vld [vmem:[%s22363_s1 + $0x200] ss:$16 sps:$4 sm:$0xff]   ;;  %v15799_v6 = vld [vmem:[%s22363_s1 + $0x224] ss:$16 sps:$4 sm:$0xff]   ;;  %v15802_v7 = vld [vmem:[%s22363_s1 + $0x22c] ss:$16 sps:$4 sm:$0xff]  }
  0x19   :  { %v15803_v8 = vld [vmem:[%s22364_s0 + $0x124] ss:$144 sps:$4 sm:$0xff]   ;;  %v15797_v9 = vld [vmem:[%s22363_s1 + $0x220] ss:$16 sps:$4 sm:$0xff]   ;;  %v15800_v10 = vld [vmem:[%s22363_s1 + $0x228] ss:$16 sps:$4 sm:$0xff]  }
  0x1a   :  { %v15808_v11 = vld [vmem:[%s22363_s1 + $0x244] ss:$16 sps:$4 sm:$0xff]   ;;  %v15811_v12 = vld [vmem:[%s22363_s1 + $0x24c] ss:$16 sps:$4 sm:$0xff]   ;;  %v15805_v13 = vld [vmem:[%s22364_s0 + $0x120] ss:$144 sps:$4 sm:$0xff]  }
  0x1b   :  { %8689 = vmatpush1.bf16.msra.mxu0 %v15732_v26  ;;  %10723 = vmatpush1.bf16.msra.mxu1 %v15733_v27  ;;  %v15806_v14 = vld [vmem:[%s22363_s1 + $0x240] ss:$16 sps:$4 sm:$0xff]   ;;  %v15809_v15 = vld [vmem:[%s22363_s1 + $0x248] ss:$16 sps:$4 sm:$0xff]   ;;  %v15814_v16 = vld [vmem:[%s22363_s1 + $0x264] ss:$16 sps:$4 sm:$0xff]  }
  0x1c   :  { %8690 = vmatprep.subr.bf16.mxu0 %v15734_v28  ;;  %10724 = vmatprep.subr.bf16.mxu1 %v15736_v29  ;;  %v15817_v17 = vld [vmem:[%s22363_s1 + $0x26c] ss:$16 sps:$4 sm:$0xff]   ;;  %v15818_v18 = vld [vmem:[%s22364_s0 + $0x244] ss:$144 sps:$4 sm:$0xff]   ;;  %v15812_v19 = vld [vmem:[%s22363_s1 + $0x260] ss:$16 sps:$4 sm:$0xff]  }
  0x1d   :  { %v15815_v20 = vld [vmem:[%s22363_s1 + $0x268] ss:$16 sps:$4 sm:$0xff]   ;;  %v15823_v21 = vld [vmem:[%s22363_s1 + $0x284] ss:$16 sps:$4 sm:$0xff]   ;;  %v15826_v22 = vld [vmem:[%s22363_s1 + $0x28c] ss:$16 sps:$4 sm:$0xff]  }
  0x1e   :  { %v15820_v23 = vld [vmem:[%s22364_s0 + $0x240] ss:$144 sps:$4 sm:$0xff]   ;;  %v15824_v25 = vld [vmem:[%s22363_s1 + $0x288] ss:$16 sps:$4 sm:$0xff]   ;;  %v15829_v26 = vld [vmem:[%s22363_s1 + $0x2a4] ss:$16 sps:$4 sm:$0xff]  }
  0x1f   :  { %8691 = vmatpush1.bf16.msra.mxu0 %v15738_v30  ;;  %10725 = vmatpush1.bf16.msra.mxu1 %v15739_v31  ;;  %v15821_v24 = vld [vmem:[%s22363_s1 + $0x280] ss:$16 sps:$4 sm:$0xff]   ;;  %v15832_v27 = vld [vmem:[%s22363_s1 + $0x2ac] ss:$16 sps:$4 sm:$0xff]   ;;  %v15833_v28 = vld [vmem:[%s22364_s0 + $0x364] ss:$144 sps:$4 sm:$0xff]  }
  0x20   :  { %8692 = vmatprep.subr.bf16.mxu0 %v15740_v32  ;;  %10726 = vmatprep.subr.bf16.mxu1 %v15742_v33  ;;  %v15827_v29 = vld [vmem:[%s22363_s1 + $0x2a0] ss:$16 sps:$4 sm:$0xff]   ;;  %v15830_v30 = vld [vmem:[%s22363_s1 + $0x2a8] ss:$16 sps:$4 sm:$0xff]   ;;  %v15838_v31 = vld [vmem:[%s22363_s1 + $0x2c4] ss:$16 sps:$4 sm:$0xff]  }
  0x21   :  { %v15841_v32 = vld [vmem:[%s22363_s1 + $0x2cc] ss:$16 sps:$4 sm:$0xff]   ;;  %v15835_v33 = vld [vmem:[%s22364_s0 + $0x360] ss:$144 sps:$4 sm:$0xff]   ;;  %v15863_v48 = vld [vmem:[%s22364_s0 + $0x5a4] ss:$144 sps:$4 sm:$0xff]  }
  0x23   :  { %8693 = vmatpush1.bf16.msra.mxu0 %v15744_v34  ;;  %10727 = vmatpush1.bf16.msra.mxu1 %v15745_v35  ;;  %v15836_v34 = vld [vmem:[%s22363_s1 + $0x2c0] ss:$16 sps:$4 sm:$0xff]   ;;  %v15839_v35 = vld [vmem:[%s22363_s1 + $0x2c8] ss:$16 sps:$4 sm:$0xff]  }
  0x24   :  { %8694 = vmatprep.subr.bf16.mxu0 %v15746_v36  ;;  %10728 = vmatprep.subr.bf16.mxu1 %v15748_v37  ;;  %v15844_v36 = vld [vmem:[%s22363_s1 + $0x2e4] ss:$16 sps:$4 sm:$0xff]   ;;  %v15847_v37 = vld [vmem:[%s22363_s1 + $0x2ec] ss:$16 sps:$4 sm:$0xff]  }
  0x27   :  { %8695 = vmatpush1.bf16.msra.mxu0 %v15750_v38  ;;  %10729 = vmatpush1.bf16.msra.mxu1 %v15751_v39  ;;  %v15848_v38 = vld [vmem:[%s22364_s0 + $0x484] ss:$144 sps:$4 sm:$0xff]   ;;  %v15842_v39 = vld [vmem:[%s22363_s1 + $0x2e0] ss:$16 sps:$4 sm:$0xff]  }
  0x28   :  { %8696 = vmatprep.subr.bf16.mxu0 %v15752_v40  ;;  %10730 = vmatprep.subr.bf16.mxu1 %v15754_v41  ;;  %v15845_v40 = vld [vmem:[%s22363_s1 + $0x2e8] ss:$16 sps:$4 sm:$0xff]   ;;  %v15853_v41 = vld [vmem:[%s22363_s1 + $0x304] ss:$16 sps:$4 sm:$0xff]  }
  0x2b   :  { %8697 = vmatpush1.bf16.msra.mxu0 %v15756_v42  ;;  %10731 = vmatpush1.bf16.msra.mxu1 %v15757_v43  ;;  %v15856_v42 = vld [vmem:[%s22363_s1 + $0x30c] ss:$16 sps:$4 sm:$0xff]   ;;  %v15850_v43 = vld [vmem:[%s22364_s0 + $0x480] ss:$144 sps:$4 sm:$0xff]  }
  0x2c   :  { %8698 = vmatprep.subr.bf16.mxu0 %v15758_v44  ;;  %10732 = vmatprep.subr.bf16.mxu1 %v15760_v45  ;;  %v15851_v44 = vld [vmem:[%s22363_s1 + $0x300] ss:$16 sps:$4 sm:$0xff]   ;;  %v15854_v45 = vld [vmem:[%s22363_s1 + $0x308] ss:$16 sps:$4 sm:$0xff]  }
  0x2f   :  { %8699 = vmatpush1.bf16.msra.mxu0 %v15762_v46  ;;  %10733 = vmatpush1.bf16.msra.mxu1 %v15763_v47  ;;  %v15859_v46 = vld [vmem:[%s22363_s1 + $0x324] ss:$16 sps:$4 sm:$0xff]   ;;  %v15862_v47 = vld [vmem:[%s22363_s1 + $0x32c] ss:$16 sps:$4 sm:$0xff]  }
  0x30   :  { %8700 = vmatprep.subr.bf16.mxu0 %v15764_v49  ;;  %10734 = vmatprep.subr.bf16.mxu1 %v15766_v50  ;;  %v15857_v49 = vld [vmem:[%s22363_s1 + $0x320] ss:$16 sps:$4 sm:$0xff]   ;;  %v15860_v50 = vld [vmem:[%s22363_s1 + $0x328] ss:$16 sps:$4 sm:$0xff]  }
  0x33   :  { %8701 = vmatpush1.bf16.msra.mxu0 %v15768_v51  ;;  %10735 = vmatpush1.bf16.msra.mxu1 %v15769_v52  ;;  %v15868_v51 = vld [vmem:[%s22363_s1 + $0x344] ss:$16 sps:$4 sm:$0xff]   ;;  %v15871_v52 = vld [vmem:[%s22363_s1 + $0x34c] ss:$16 sps:$4 sm:$0xff]  }
  0x34   :  { %8702 = vmatprep.subr.bf16.mxu0 %v15770_v53  ;;  %10736 = vmatprep.subr.bf16.mxu1 %v15772_v54  ;;  %v15865_v53 = vld [vmem:[%s22364_s0 + $0x5a0] ss:$144 sps:$4 sm:$0xff]  }
  0x35   :  { %v15866_v54 = vld [vmem:[%s22363_s1 + $0x340] ss:$16 sps:$4 sm:$0xff]  }
  0x37   :  { %8703 = vmatpush1.bf16.msra.mxu0 %v15774_v55  ;;  %10737 = vmatpush1.bf16.msra.mxu1 %v15775_v56  ;;  %v15869_v55 = vld [vmem:[%s22363_s1 + $0x348] ss:$16 sps:$4 sm:$0xff]   ;;  %v15874_v56 = vld [vmem:[%s22363_s1 + $0x364] ss:$16 sps:$4 sm:$0xff]  }
  0x38   :  { %8704 = vmatprep.subr.bf16.mxu0 %v15776_v57  ;;  %10738 = vmatprep.subr.bf16.mxu1 %v15778_v58  ;;  %v15877_v57 = vld [vmem:[%s22363_s1 + $0x36c] ss:$16 sps:$4 sm:$0xff]   ;;  %v15878_v58 = vld [vmem:[%s22364_s0 + $0x6c4] ss:$144 sps:$4 sm:$0xff]  }
  0x3b   :  { %8705 = vmatpush1.bf16.msra.mxu0 %v15780_v59  ;;  %10739 = vmatpush1.bf16.msra.mxu1 %v15781_v60  ;;  %v15872_v59 = vld [vmem:[%s22363_s1 + $0x360] ss:$16 sps:$4 sm:$0xff]   ;;  %v15875_v60 = vld [vmem:[%s22363_s1 + $0x368] ss:$16 sps:$4 sm:$0xff]  }
  0x3c   :  { %8706 = vmatprep.subr.bf16.mxu0 %v15782_v61  ;;  %10740 = vmatprep.subr.bf16.mxu1 %v15784_v62  ;;  %v15883_v61 = vld [vmem:[%s22363_s1 + $0x384] ss:$16 sps:$4 sm:$0xff]   ;;  %v15886_v62 = vld [vmem:[%s22363_s1 + $0x38c] ss:$16 sps:$4 sm:$0xff]  }
  0x3f   :  { %8707 = vmatpush1.bf16.msra.mxu0 %v15786_v63  ;;  %10741 = vmatpush1.bf16.msra.mxu1 %v15787_v0  ;;  %v15880_v63 = vld [vmem:[%s22364_s0 + $0x6c0] ss:$144 sps:$4 sm:$0xff]  }
  0x40   :  { %8789 = vmatprep.subr.bf16.mxu0 %v15793_v1  ;;  %10823 = vmatprep.subr.bf16.mxu1 %v15796_v2  ;;  %v15881_v0 = vld [vmem:[%s22363_s1 + $0x380] ss:$16 sps:$4 sm:$0xff]   ;;  %v15884_v1 = vld [vmem:[%s22363_s1 + $0x388] ss:$16 sps:$4 sm:$0xff]   ;;  %v15889_v2 = vld [vmem:[%s22363_s1 + $0x3a4] ss:$16 sps:$4 sm:$0xff]  }
  0x42   :  { %8709 = vmatmul.mubr.bf16.vlgmr.msra.gmra.mrb[0].mxu0 %v15788_v3  ;;  %10743 = vmatmul.mubr.bf16.vlgmr.msra.gmra.mrb[0].mxu1 %v15788_v3  ;;  %v15892_v3 = vld [vmem:[%s22363_s1 + $0x3ac] ss:$16 sps:$4 sm:$0xff]  }
  0x43   :  { %8790 = vmatpush1.bf16.msra.mxu0 %v15791_v4  ;;  %10824 = vmatpush1.bf16.msra.mxu1 %v15794_v5  ;;  %v15893_v4 = vld [vmem:[%s22364_s0 + $0x7e4] ss:$144 sps:$4 sm:$0xff]   ;;  %v15887_v5 = vld [vmem:[%s22363_s1 + $0x3a0] ss:$16 sps:$4 sm:$0xff]  }
  0x44   :  { %8791 = vmatprep.subr.bf16.mxu0 %v15799_v6  ;;  %10825 = vmatprep.subr.bf16.mxu1 %v15802_v7  ;;  %v15890_v6 = vld [vmem:[%s22363_s1 + $0x3a8] ss:$16 sps:$4 sm:$0xff]   ;;  %v15898_v7 = vld [vmem:[%s22363_s1 + $0x3c4] ss:$16 sps:$4 sm:$0xff]  }
  0x45   :  { %8718 = vmatprep.mubr.bf16.mxu0 %v15803_v8  ;;  %10752 = vmatprep.mubr.bf16.mxu1 %v15803_v8  ;;  %v15901_v8 = vld [vmem:[%s22363_s1 + $0x3cc] ss:$16 sps:$4 sm:$0xff]  }
  0x47   :  { %8792 = vmatpush1.bf16.msra.mxu0 %v15797_v9  ;;  %10826 = vmatpush1.bf16.msra.mxu1 %v15800_v10  ;;  %v15895_v9 = vld [vmem:[%s22364_s0 + $0x7e0] ss:$144 sps:$4 sm:$0xff]  }
  0x48   :  { %8793 = vmatprep.subr.bf16.mxu0 %v15808_v11  ;;  %10827 = vmatprep.subr.bf16.mxu1 %v15811_v12  ;;  %v15896_v10 = vld [vmem:[%s22363_s1 + $0x3c0] ss:$16 sps:$4 sm:$0xff]   ;;  %v15899_v11 = vld [vmem:[%s22363_s1 + $0x3c8] ss:$16 sps:$4 sm:$0xff]   ;;  %v15904_v12 = vld [vmem:[%s22363_s1 + $0x3e4] ss:$16 sps:$4 sm:$0xff]  }
  0x4a   :  { %8719 = vmatmul.mubr.bf16.gmra.mrb[4].mxu0 %v15805_v13  ;;  %10753 = vmatmul.mubr.bf16.gmra.mrb[4].mxu1 %v15805_v13  ;;  %v15907_v13 = vld [vmem:[%s22363_s1 + $0x3ec] ss:$16 sps:$4 sm:$0xff]  }
  0x4b   :  { %8794 = vmatpush1.bf16.msra.mxu0 %v15806_v14  ;;  %10828 = vmatpush1.bf16.msra.mxu1 %v15809_v15  ;;  %v15910_v14 = vld [vmem:[%s22364_s0 + $0xc] ss:$144 sps:$4 sm:$0xff]   ;;  %v15902_v15 = vld [vmem:[%s22363_s1 + $0x3e0] ss:$16 sps:$4 sm:$0xff]  }
  0x4c   :  { %8795 = vmatprep.subr.bf16.mxu0 %v15814_v16  ;;  %10829 = vmatprep.subr.bf16.mxu1 %v15817_v17  ;;  %v15905_v16 = vld [vmem:[%s22363_s1 + $0x3e8] ss:$16 sps:$4 sm:$0xff]   ;;  %v15913_v17 = vld [vmem:[%s22363_s1 + $0x404] ss:$16 sps:$4 sm:$0xff]  }
  0x4d   :  { %8728 = vmatprep.mubr.bf16.mxu0 %v15818_v18  ;;  %10762 = vmatprep.mubr.bf16.mxu1 %v15818_v18  ;;  %v15916_v18 = vld [vmem:[%s22363_s1 + $0x40c] ss:$16 sps:$4 sm:$0xff]  }
  0x4f   :  { %8796 = vmatpush1.bf16.msra.mxu0 %v15812_v19  ;;  %10830 = vmatpush1.bf16.msra.mxu1 %v15815_v20  ;;  %v15908_v19 = vld [vmem:[%s22364_s0 + $0x8] ss:$144 sps:$4 sm:$0xff]   ;;  %v15911_v20 = vld [vmem:[%s22363_s1 + $0x400] ss:$16 sps:$4 sm:$0xff]  }
  0x50   :  { %8797 = vmatprep.subr.bf16.mxu0 %v15823_v21  ;;  %10831 = vmatprep.subr.bf16.mxu1 %v15826_v22  ;;  %v15914_v21 = vld [vmem:[%s22363_s1 + $0x408] ss:$16 sps:$4 sm:$0xff]   ;;  %v15919_v22 = vld [vmem:[%s22363_s1 + $0x424] ss:$16 sps:$4 sm:$0xff]  }
  0x52   :  { %8729 = vmatmul.mubr.bf16.gmra.mrb[8].mxu0 %v15820_v23  ;;  %10763 = vmatmul.mubr.bf16.gmra.mrb[8].mxu1 %v15820_v23  ;;  %v15922_v23 = vld [vmem:[%s22363_s1 + $0x42c] ss:$16 sps:$4 sm:$0xff]  }
  0x53   :  { %8798 = vmatpush1.bf16.msra.mxu0 %v15821_v24  ;;  %10832 = vmatpush1.bf16.msra.mxu1 %v15824_v25  ;;  %v15923_v24 = vld [vmem:[%s22364_s0 + $0x12c] ss:$144 sps:$4 sm:$0xff]   ;;  %v15917_v25 = vld [vmem:[%s22363_s1 + $0x420] ss:$16 sps:$4 sm:$0xff]  }
  0x54   :  { %8799 = vmatprep.subr.bf16.mxu0 %v15829_v26  ;;  %10833 = vmatprep.subr.bf16.mxu1 %v15832_v27  ;;  %v15920_v26 = vld [vmem:[%s22363_s1 + $0x428] ss:$16 sps:$4 sm:$0xff]   ;;  %v15928_v27 = vld [vmem:[%s22363_s1 + $0x444] ss:$16 sps:$4 sm:$0xff]  }
  0x55   :  { %8738 = vmatprep.mubr.bf16.mxu0 %v15833_v28  ;;  %10772 = vmatprep.mubr.bf16.mxu1 %v15833_v28  ;;  %v15931_v28 = vld [vmem:[%s22363_s1 + $0x44c] ss:$16 sps:$4 sm:$0xff]  }
  0x57   :  { %8800 = vmatpush1.bf16.msra.mxu0 %v15827_v29  ;;  %10834 = vmatpush1.bf16.msra.mxu1 %v15830_v30  ;;  %v15925_v29 = vld [vmem:[%s22364_s0 + $0x128] ss:$144 sps:$4 sm:$0xff]   ;;  %v15926_v30 = vld [vmem:[%s22363_s1 + $0x440] ss:$16 sps:$4 sm:$0xff]  }
  0x58   :  { %8801 = vmatprep.subr.bf16.mxu0 %v15838_v31  ;;  %10835 = vmatprep.subr.bf16.mxu1 %v15841_v32  ;;  %v15929_v31 = vld [vmem:[%s22363_s1 + $0x448] ss:$16 sps:$4 sm:$0xff]   ;;  %v15934_v32 = vld [vmem:[%s22363_s1 + $0x464] ss:$16 sps:$4 sm:$0xff]  }
  0x5a   :  { %8739 = vmatmul.mubr.bf16.gmra.mrb[12].mxu0 %v15835_v33  ;;  %10773 = vmatmul.mubr.bf16.gmra.mrb[12].mxu1 %v15835_v33  ;;  %v15937_v33 = vld [vmem:[%s22363_s1 + $0x46c] ss:$16 sps:$4 sm:$0xff]  }
  0x5b   :  { %8802 = vmatpush1.bf16.msra.mxu0 %v15836_v34  ;;  %10836 = vmatpush1.bf16.msra.mxu1 %v15839_v35  ;;  %v15938_v34 = vld [vmem:[%s22364_s0 + $0x24c] ss:$144 sps:$4 sm:$0xff]   ;;  %v15932_v35 = vld [vmem:[%s22363_s1 + $0x460] ss:$16 sps:$4 sm:$0xff]  }
  0x5c   :  { %8803 = vmatprep.subr.bf16.mxu0 %v15844_v36  ;;  %10837 = vmatprep.subr.bf16.mxu1 %v15847_v37  ;;  %v15935_v36 = vld [vmem:[%s22363_s1 + $0x468] ss:$16 sps:$4 sm:$0xff]   ;;  %v15943_v37 = vld [vmem:[%s22363_s1 + $0x484] ss:$16 sps:$4 sm:$0xff]  }
  0x5d   :  { %8748 = vmatprep.mubr.bf16.mxu0 %v15848_v38  ;;  %10782 = vmatprep.mubr.bf16.mxu1 %v15848_v38  ;;  %v15946_v38 = vld [vmem:[%s22363_s1 + $0x48c] ss:$16 sps:$4 sm:$0xff]  }
  0x5f   :  { %8804 = vmatpush1.bf16.msra.mxu0 %v15842_v39  ;;  %10838 = vmatpush1.bf16.msra.mxu1 %v15845_v40  ;;  %v15940_v39 = vld [vmem:[%s22364_s0 + $0x248] ss:$144 sps:$4 sm:$0xff]   ;;  %v15941_v40 = vld [vmem:[%s22363_s1 + $0x480] ss:$16 sps:$4 sm:$0xff]  }
  0x60   :  { %8805 = vmatprep.subr.bf16.mxu0 %v15853_v41  ;;  %10839 = vmatprep.subr.bf16.mxu1 %v15856_v42  ;;  %v15944_v41 = vld [vmem:[%s22363_s1 + $0x488] ss:$16 sps:$4 sm:$0xff]   ;;  %v15949_v42 = vld [vmem:[%s22363_s1 + $0x4a4] ss:$16 sps:$4 sm:$0xff]  }
  0x62   :  { %8749 = vmatmul.mubr.bf16.gmra.mrb[16].mxu0 %v15850_v43  ;;  %10783 = vmatmul.mubr.bf16.gmra.mrb[16].mxu1 %v15850_v43  ;;  %v15952_v43 = vld [vmem:[%s22363_s1 + $0x4ac] ss:$16 sps:$4 sm:$0xff]  }
  0x63   :  { %8806 = vmatpush1.bf16.msra.mxu0 %v15851_v44  ;;  %10840 = vmatpush1.bf16.msra.mxu1 %v15854_v45  ;;  %v15953_v44 = vld [vmem:[%s22364_s0 + $0x36c] ss:$144 sps:$4 sm:$0xff]   ;;  %v15947_v45 = vld [vmem:[%s22363_s1 + $0x4a0] ss:$16 sps:$4 sm:$0xff]  }
  0x64   :  { %8807 = vmatprep.subr.bf16.mxu0 %v15859_v46  ;;  %10841 = vmatprep.subr.bf16.mxu1 %v15862_v47  ;;  %v15950_v46 = vld [vmem:[%s22363_s1 + $0x4a8] ss:$16 sps:$4 sm:$0xff]   ;;  %v15958_v47 = vld [vmem:[%s22363_s1 + $0x4c4] ss:$16 sps:$4 sm:$0xff]  }
  0x65   :  { %8758 = vmatprep.mubr.bf16.mxu0 %v15863_v48  ;;  %10792 = vmatprep.mubr.bf16.mxu1 %v15863_v48  ;;  %v15961_v48 = vld [vmem:[%s22363_s1 + $0x4cc] ss:$16 sps:$4 sm:$0xff]  }
  0x67   :  { %8808 = vmatpush1.bf16.msra.mxu0 %v15857_v49  ;;  %10842 = vmatpush1.bf16.msra.mxu1 %v15860_v50  ;;  %v15955_v49 = vld [vmem:[%s22364_s0 + $0x368] ss:$144 sps:$4 sm:$0xff]   ;;  %v15956_v50 = vld [vmem:[%s22363_s1 + $0x4c0] ss:$16 sps:$4 sm:$0xff]  }
  0x68   :  { %8809 = vmatprep.subr.bf16.mxu0 %v15868_v51  ;;  %10843 = vmatprep.subr.bf16.mxu1 %v15871_v52  ;;  %v15959_v51 = vld [vmem:[%s22363_s1 + $0x4c8] ss:$16 sps:$4 sm:$0xff]   ;;  %v15964_v52 = vld [vmem:[%s22363_s1 + $0x4e4] ss:$16 sps:$4 sm:$0xff]  }
  0x6a   :  { %8759 = vmatmul.mubr.bf16.gmra.mrb[20].mxu0 %v15865_v53  ;;  %10793 = vmatmul.mubr.bf16.gmra.mrb[20].mxu1 %v15865_v53  ;;  %v15967_v53 = vld [vmem:[%s22363_s1 + $0x4ec] ss:$16 sps:$4 sm:$0xff]  }
  0x6b   :  { %8810 = vmatpush1.bf16.msra.mxu0 %v15866_v54  ;;  %10844 = vmatpush1.bf16.msra.mxu1 %v15869_v55  ;;  %v15968_v54 = vld [vmem:[%s22364_s0 + $0x48c] ss:$144 sps:$4 sm:$0xff]   ;;  %v15962_v55 = vld [vmem:[%s22363_s1 + $0x4e0] ss:$16 sps:$4 sm:$0xff]  }
  0x6c   :  { %8811 = vmatprep.subr.bf16.mxu0 %v15874_v56  ;;  %10845 = vmatprep.subr.bf16.mxu1 %v15877_v57  ;;  %v15965_v56 = vld [vmem:[%s22363_s1 + $0x4e8] ss:$16 sps:$4 sm:$0xff]   ;;  %v15973_v57 = vld [vmem:[%s22363_s1 + $0x504] ss:$16 sps:$4 sm:$0xff]  }
  0x6d   :  { %8768 = vmatprep.mubr.bf16.mxu0 %v15878_v58  ;;  %10802 = vmatprep.mubr.bf16.mxu1 %v15878_v58  ;;  %v15976_v58 = vld [vmem:[%s22363_s1 + $0x50c] ss:$16 sps:$4 sm:$0xff]  }
  0x6f   :  { %8812 = vmatpush1.bf16.msra.mxu0 %v15872_v59  ;;  %10846 = vmatpush1.bf16.msra.mxu1 %v15875_v60  ;;  %v15970_v59 = vld [vmem:[%s22364_s0 + $0x488] ss:$144 sps:$4 sm:$0xff]   ;;  %v15971_v60 = vld [vmem:[%s22363_s1 + $0x500] ss:$16 sps:$4 sm:$0xff]  }
  0x70   :  { %8813 = vmatprep.subr.bf16.mxu0 %v15883_v61  ;;  %10847 = vmatprep.subr.bf16.mxu1 %v15886_v62  ;;  %v15974_v61 = vld [vmem:[%s22363_s1 + $0x508] ss:$16 sps:$4 sm:$0xff]   ;;  %v15979_v62 = vld [vmem:[%s22363_s1 + $0x524] ss:$16 sps:$4 sm:$0xff]  }
  0x72   :  { %8769 = vmatmul.mubr.bf16.gmra.mrb[24].mxu0 %v15880_v63  ;;  %10803 = vmatmul.mubr.bf16.gmra.mrb[24].mxu1 %v15880_v63  ;;  %v15982_v63 = vld [vmem:[%s22363_s1 + $0x52c] ss:$16 sps:$4 sm:$0xff]  }
  0x73   :  { %8814 = vmatpush1.bf16.msra.mxu0 %v15881_v0  ;;  %10848 = vmatpush1.bf16.msra.mxu1 %v15884_v1  ;;  %v15983_v0 = vld [vmem:[%s22364_s0 + $0x5ac] ss:$144 sps:$4 sm:$0xff]   ;;  %v15977_v1 = vld [vmem:[%s22363_s1 + $0x520] ss:$16 sps:$4 sm:$0xff]  }
  0x74   :  { %8815 = vmatprep.subr.bf16.mxu0 %v15889_v2  ;;  %10849 = vmatprep.subr.bf16.mxu1 %v15892_v3  ;;  %v15980_v2 = vld [vmem:[%s22363_s1 + $0x528] ss:$16 sps:$4 sm:$0xff]   ;;  %v15988_v3 = vld [vmem:[%s22363_s1 + $0x544] ss:$16 sps:$4 sm:$0xff]  }
  0x75   :  { %8778 = vmatprep.mubr.bf16.mxu0 %v15893_v4  ;;  %10812 = vmatprep.mubr.bf16.mxu1 %v15893_v4  ;;  %v15991_v4 = vld [vmem:[%s22363_s1 + $0x54c] ss:$16 sps:$4 sm:$0xff]  }
  0x77   :  { %8816 = vmatpush1.bf16.msra.mxu0 %v15887_v5  ;;  %10850 = vmatpush1.bf16.msra.mxu1 %v15890_v6  ;;  %v15985_v5 = vld [vmem:[%s22364_s0 + $0x5a8] ss:$144 sps:$4 sm:$0xff]   ;;  %v15986_v6 = vld [vmem:[%s22363_s1 + $0x540] ss:$16 sps:$4 sm:$0xff]  }
  0x78   :  { %8817 = vmatprep.subr.bf16.mxu0 %v15898_v7  ;;  %10851 = vmatprep.subr.bf16.mxu1 %v15901_v8  ;;  %v15989_v7 = vld [vmem:[%s22363_s1 + $0x548] ss:$16 sps:$4 sm:$0xff]   ;;  %v15994_v8 = vld [vmem:[%s22363_s1 + $0x564] ss:$16 sps:$4 sm:$0xff]  }
  0x7a   :  { %8779 = vmatmul.mubr.bf16.gmra.mrb[28].mxu0 %v15895_v9  ;;  %10813 = vmatmul.mubr.bf16.gmra.mrb[28].mxu1 %v15895_v9  ;;  %v15997_v9 = vld [vmem:[%s22363_s1 + $0x56c] ss:$16 sps:$4 sm:$0xff]  }
  0x7b   :  { %8818 = vmatpush1.bf16.msra.mxu0 %v15896_v10  ;;  %10852 = vmatpush1.bf16.msra.mxu1 %v15899_v11  ;;  %v15998_v10 = vld [vmem:[%s22364_s0 + $0x6cc] ss:$144 sps:$4 sm:$0xff]   ;;  %v15992_v11 = vld [vmem:[%s22363_s1 + $0x560] ss:$16 sps:$4 sm:$0xff]  }
  0x7c   :  { %8819 = vmatprep.subr.bf16.mxu0 %v15904_v12  ;;  %10853 = vmatprep.subr.bf16.mxu1 %v15907_v13  ;;  %v15995_v12 = vld [vmem:[%s22363_s1 + $0x568] ss:$16 sps:$4 sm:$0xff]   ;;  %v16003_v13 = vld [vmem:[%s22363_s1 + $0x584] ss:$16 sps:$4 sm:$0xff]  }
  0x7d   :  { %8821 = vmatprep.mubr.bf16.mxu0 %v15910_v14  ;;  %10855 = vmatprep.mubr.bf16.mxu1 %v15910_v14  ;;  %v16006_v14 = vld [vmem:[%s22363_s1 + $0x58c] ss:$16 sps:$4 sm:$0xff]  }
  0x7f   :  { %8820 = vmatpush1.bf16.msra.mxu0 %v15902_v15  ;;  %10854 = vmatpush1.bf16.msra.mxu1 %v15905_v16  ;;  %v16000_v15 = vld [vmem:[%s22364_s0 + $0x6c8] ss:$144 sps:$4 sm:$0xff]   ;;  %v16001_v16 = vld [vmem:[%s22363_s1 + $0x580] ss:$16 sps:$4 sm:$0xff]  }
  0x80   :  { %8902 = vmatprep.subr.bf16.mxu0 %v15913_v17  ;;  %10936 = vmatprep.subr.bf16.mxu1 %v15916_v18  ;;  %v16004_v17 = vld [vmem:[%s22363_s1 + $0x588] ss:$16 sps:$4 sm:$0xff]   ;;  %v16009_v18 = vld [vmem:[%s22363_s1 + $0x5a4] ss:$16 sps:$4 sm:$0xff]  }
  0x82   :  { %8822 = vmatmul.mubr.bf16.vlgmr.msra.gmra.mrb[0].mxu0 %v15908_v19  ;;  %10856 = vmatmul.mubr.bf16.vlgmr.msra.gmra.mrb[0].mxu1 %v15908_v19  ;;  %v16012_v19 = vld [vmem:[%s22363_s1 + $0x5ac] ss:$16 sps:$4 sm:$0xff]  }
  0x83   :  { %8903 = vmatpush1.bf16.msra.mxu0 %v15911_v20  ;;  %10937 = vmatpush1.bf16.msra.mxu1 %v15914_v21  ;;  %v16013_v20 = vld [vmem:[%s22364_s0 + $0x7ec] ss:$144 sps:$4 sm:$0xff]   ;;  %v16007_v21 = vld [vmem:[%s22363_s1 + $0x5a0] ss:$16 sps:$4 sm:$0xff]  }
  0x84   :  { %8904 = vmatprep.subr.bf16.mxu0 %v15919_v22  ;;  %10938 = vmatprep.subr.bf16.mxu1 %v15922_v23  ;;  %v16010_v22 = vld [vmem:[%s22363_s1 + $0x5a8] ss:$16 sps:$4 sm:$0xff]   ;;  %v16018_v23 = vld [vmem:[%s22363_s1 + $0x5c4] ss:$16 sps:$4 sm:$0xff]  }
  0x85   :  { %8831 = vmatprep.mubr.bf16.mxu0 %v15923_v24  ;;  %10865 = vmatprep.mubr.bf16.mxu1 %v15923_v24  ;;  %v16021_v24 = vld [vmem:[%s22363_s1 + $0x5cc] ss:$16 sps:$4 sm:$0xff]  }
  0x87   :  { %8905 = vmatpush1.bf16.msra.mxu0 %v15917_v25  ;;  %10939 = vmatpush1.bf16.msra.mxu1 %v15920_v26  ;;  %v16015_v25 = vld [vmem:[%s22364_s0 + $0x7e8] ss:$144 sps:$4 sm:$0xff]   ;;  %v16016_v26 = vld [vmem:[%s22363_s1 + $0x5c0] ss:$16 sps:$4 sm:$0xff]  }
  0x88   :  { %8906 = vmatprep.subr.bf16.mxu0 %v15928_v27  ;;  %10940 = vmatprep.subr.bf16.mxu1 %v15931_v28  ;;  %v16019_v27 = vld [vmem:[%s22363_s1 + $0x5c8] ss:$16 sps:$4 sm:$0xff]   ;;  %v16024_v28 = vld [vmem:[%s22363_s1 + $0x5e4] ss:$16 sps:$4 sm:$0xff]  }
  0x8a   :  { %8832 = vmatmul.mubr.bf16.gmra.mrb[4].mxu0 %v15925_v29  ;;  %10866 = vmatmul.mubr.bf16.gmra.mrb[4].mxu1 %v15925_v29  ;;  %v16027_v29 = vld [vmem:[%s22363_s1 + $0x5ec] ss:$16 sps:$4 sm:$0xff]  }
  0x8b   :  { %8907 = vmatpush1.bf16.msra.mxu0 %v15926_v30  ;;  %10941 = vmatpush1.bf16.msra.mxu1 %v15929_v31  ;;  %v16030_v30 = vld [vmem:[%s22364_s0 + $0x14] ss:$144 sps:$4 sm:$0xff]   ;;  %v16022_v31 = vld [vmem:[%s22363_s1 + $0x5e0] ss:$16 sps:$4 sm:$0xff]  }
  0x8c   :  { %8908 = vmatprep.subr.bf16.mxu0 %v15934_v32  ;;  %10942 = vmatprep.subr.bf16.mxu1 %v15937_v33  ;;  %v16025_v32 = vld [vmem:[%s22363_s1 + $0x5e8] ss:$16 sps:$4 sm:$0xff]   ;;  %v16033_v33 = vld [vmem:[%s22363_s1 + $0x604] ss:$16 sps:$4 sm:$0xff]  }
  0x8d   :  { %8841 = vmatprep.mubr.bf16.mxu0 %v15938_v34  ;;  %10875 = vmatprep.mubr.bf16.mxu1 %v15938_v34  ;;  %v16036_v34 = vld [vmem:[%s22363_s1 + $0x60c] ss:$16 sps:$4 sm:$0xff]  }
  0x8f   :  { %8909 = vmatpush1.bf16.msra.mxu0 %v15932_v35  ;;  %10943 = vmatpush1.bf16.msra.mxu1 %v15935_v36  ;;  %v16028_v35 = vld [vmem:[%s22364_s0 + $0x10] ss:$144 sps:$4 sm:$0xff]  }
  0x90   :  { %8910 = vmatprep.subr.bf16.mxu0 %v15943_v37  ;;  %10944 = vmatprep.subr.bf16.mxu1 %v15946_v38  ;;  %v16031_v36 = vld [vmem:[%s22363_s1 + $0x600] ss:$16 sps:$4 sm:$0xff]   ;;  %v16034_v37 = vld [vmem:[%s22363_s1 + $0x608] ss:$16 sps:$4 sm:$0xff]   ;;  %v16039_v38 = vld [vmem:[%s22363_s1 + $0x624] ss:$16 sps:$4 sm:$0xff]  }
  0x92   :  { %8842 = vmatmul.mubr.bf16.gmra.mrb[8].mxu0 %v15940_v39  ;;  %10876 = vmatmul.mubr.bf16.gmra.mrb[8].mxu1 %v15940_v39  ;;  %v16042_v39 = vld [vmem:[%s22363_s1 + $0x62c] ss:$16 sps:$4 sm:$0xff]  }
  0x93   :  { %8911 = vmatpush1.bf16.msra.mxu0 %v15941_v40  ;;  %10945 = vmatpush1.bf16.msra.mxu1 %v15944_v41  ;;  %v16043_v40 = vld [vmem:[%s22364_s0 + $0x134] ss:$144 sps:$4 sm:$0xff]   ;;  %v16037_v41 = vld [vmem:[%s22363_s1 + $0x620] ss:$16 sps:$4 sm:$0xff]  }
  0x94   :  { %8912 = vmatprep.subr.bf16.mxu0 %v15949_v42  ;;  %10946 = vmatprep.subr.bf16.mxu1 %v15952_v43  ;;  %v16040_v42 = vld [vmem:[%s22363_s1 + $0x628] ss:$16 sps:$4 sm:$0xff]   ;;  %v16048_v43 = vld [vmem:[%s22363_s1 + $0x644] ss:$16 sps:$4 sm:$0xff]  }
  0x95   :  { %8851 = vmatprep.mubr.bf16.mxu0 %v15953_v44  ;;  %10885 = vmatprep.mubr.bf16.mxu1 %v15953_v44  ;;  %v16051_v44 = vld [vmem:[%s22363_s1 + $0x64c] ss:$16 sps:$4 sm:$0xff]  }
  0x97   :  { %8913 = vmatpush1.bf16.msra.mxu0 %v15947_v45  ;;  %10947 = vmatpush1.bf16.msra.mxu1 %v15950_v46  ;;  %v16045_v45 = vld [vmem:[%s22364_s0 + $0x130] ss:$144 sps:$4 sm:$0xff]  }
  0x98   :  { %8914 = vmatprep.subr.bf16.mxu0 %v15958_v47  ;;  %10948 = vmatprep.subr.bf16.mxu1 %v15961_v48  ;;  %v16046_v46 = vld [vmem:[%s22363_s1 + $0x640] ss:$16 sps:$4 sm:$0xff]   ;;  %v16049_v47 = vld [vmem:[%s22363_s1 + $0x648] ss:$16 sps:$4 sm:$0xff]   ;;  %v16054_v48 = vld [vmem:[%s22363_s1 + $0x664] ss:$16 sps:$4 sm:$0xff]  }
  0x9a   :  { %8852 = vmatmul.mubr.bf16.gmra.mrb[12].mxu0 %v15955_v49  ;;  %10886 = vmatmul.mubr.bf16.gmra.mrb[12].mxu1 %v15955_v49  ;;  %v16057_v49 = vld [vmem:[%s22363_s1 + $0x66c] ss:$16 sps:$4 sm:$0xff]  }
  0x9b   :  { %8915 = vmatpush1.bf16.msra.mxu0 %v15956_v50  ;;  %10949 = vmatpush1.bf16.msra.mxu1 %v15959_v51  ;;  %v16058_v50 = vld [vmem:[%s22364_s0 + $0x254] ss:$144 sps:$4 sm:$0xff]   ;;  %v16052_v51 = vld [vmem:[%s22363_s1 + $0x660] ss:$16 sps:$4 sm:$0xff]  }
  0x9c   :  { %8916 = vmatprep.subr.bf16.mxu0 %v15964_v52  ;;  %10950 = vmatprep.subr.bf16.mxu1 %v15967_v53  ;;  %v16055_v52 = vld [vmem:[%s22363_s1 + $0x668] ss:$16 sps:$4 sm:$0xff]   ;;  %v16063_v53 = vld [vmem:[%s22363_s1 + $0x684] ss:$16 sps:$4 sm:$0xff]  }
  0x9d   :  { %8861 = vmatprep.mubr.bf16.mxu0 %v15968_v54  ;;  %10895 = vmatprep.mubr.bf16.mxu1 %v15968_v54  ;;  %v16066_v54 = vld [vmem:[%s22363_s1 + $0x68c] ss:$16 sps:$4 sm:$0xff]  }
  0x9f   :  { %8917 = vmatpush1.bf16.msra.mxu0 %v15962_v55  ;;  %10951 = vmatpush1.bf16.msra.mxu1 %v15965_v56  ;;  %v16060_v55 = vld [vmem:[%s22364_s0 + $0x250] ss:$144 sps:$4 sm:$0xff]  }
  0xa0   :  { %8918 = vmatprep.subr.bf16.mxu0 %v15973_v57  ;;  %10952 = vmatprep.subr.bf16.mxu1 %v15976_v58  ;;  %v16061_v56 = vld [vmem:[%s22363_s1 + $0x680] ss:$16 sps:$4 sm:$0xff]   ;;  %v16064_v57 = vld [vmem:[%s22363_s1 + $0x688] ss:$16 sps:$4 sm:$0xff]   ;;  %v16069_v58 = vld [vmem:[%s22363_s1 + $0x6a4] ss:$16 sps:$4 sm:$0xff]  }
  0xa2   :  { %8862 = vmatmul.mubr.bf16.gmra.mrb[16].mxu0 %v15970_v59  ;;  %10896 = vmatmul.mubr.bf16.gmra.mrb[16].mxu1 %v15970_v59  ;;  %v16072_v59 = vld [vmem:[%s22363_s1 + $0x6ac] ss:$16 sps:$4 sm:$0xff]  }
  0xa3   :  { %8919 = vmatpush1.bf16.msra.mxu0 %v15971_v60  ;;  %10953 = vmatpush1.bf16.msra.mxu1 %v15974_v61  ;;  %v16073_v60 = vld [vmem:[%s22364_s0 + $0x374] ss:$144 sps:$4 sm:$0xff]   ;;  %v16067_v61 = vld [vmem:[%s22363_s1 + $0x6a0] ss:$16 sps:$4 sm:$0xff]  }
  0xa4   :  { %8920 = vmatprep.subr.bf16.mxu0 %v15979_v62  ;;  %10954 = vmatprep.subr.bf16.mxu1 %v15982_v63  ;;  %v16070_v62 = vld [vmem:[%s22363_s1 + $0x6a8] ss:$16 sps:$4 sm:$0xff]   ;;  %v16078_v63 = vld [vmem:[%s22363_s1 + $0x6c4] ss:$16 sps:$4 sm:$0xff]  }
  0xa5   :  { %8871 = vmatprep.mubr.bf16.mxu0 %v15983_v0  ;;  %10905 = vmatprep.mubr.bf16.mxu1 %v15983_v0  ;;  %v16081_v0 = vld [vmem:[%s22363_s1 + $0x6cc] ss:$16 sps:$4 sm:$0xff]  }
  0xa7   :  { %8921 = vmatpush1.bf16.msra.mxu0 %v15977_v1  ;;  %10955 = vmatpush1.bf16.msra.mxu1 %v15980_v2  ;;  %v16075_v1 = vld [vmem:[%s22364_s0 + $0x370] ss:$144 sps:$4 sm:$0xff]  }
  0xa8   :  { %8922 = vmatprep.subr.bf16.mxu0 %v15988_v3  ;;  %10956 = vmatprep.subr.bf16.mxu1 %v15991_v4  ;;  %v16076_v2 = vld [vmem:[%s22363_s1 + $0x6c0] ss:$16 sps:$4 sm:$0xff]   ;;  %v16079_v3 = vld [vmem:[%s22363_s1 + $0x6c8] ss:$16 sps:$4 sm:$0xff]   ;;  %v16084_v4 = vld [vmem:[%s22363_s1 + $0x6e4] ss:$16 sps:$4 sm:$0xff]  }
  0xaa   :  { %8872 = vmatmul.mubr.bf16.gmra.mrb[20].mxu0 %v15985_v5  ;;  %10906 = vmatmul.mubr.bf16.gmra.mrb[20].mxu1 %v15985_v5  ;;  %v16087_v5 = vld [vmem:[%s22363_s1 + $0x6ec] ss:$16 sps:$4 sm:$0xff]  }
  0xab   :  { %8923 = vmatpush1.bf16.msra.mxu0 %v15986_v6  ;;  %10957 = vmatpush1.bf16.msra.mxu1 %v15989_v7  ;;  %v16088_v6 = vld [vmem:[%s22364_s0 + $0x494] ss:$144 sps:$4 sm:$0xff]   ;;  %v16082_v7 = vld [vmem:[%s22363_s1 + $0x6e0] ss:$16 sps:$4 sm:$0xff]  }
  0xac   :  { %8924 = vmatprep.subr.bf16.mxu0 %v15994_v8  ;;  %10958 = vmatprep.subr.bf16.mxu1 %v15997_v9  ;;  %v16085_v8 = vld [vmem:[%s22363_s1 + $0x6e8] ss:$16 sps:$4 sm:$0xff]   ;;  %v16093_v9 = vld [vmem:[%s22363_s1 + $0x704] ss:$16 sps:$4 sm:$0xff]  }
  0xad   :  { %8881 = vmatprep.mubr.bf16.mxu0 %v15998_v10  ;;  %10915 = vmatprep.mubr.bf16.mxu1 %v15998_v10  ;;  %v16096_v10 = vld [vmem:[%s22363_s1 + $0x70c] ss:$16 sps:$4 sm:$0xff]  }
  0xaf   :  { %8925 = vmatpush1.bf16.msra.mxu0 %v15992_v11  ;;  %10959 = vmatpush1.bf16.msra.mxu1 %v15995_v12  ;;  %v16090_v11 = vld [vmem:[%s22364_s0 + $0x490] ss:$144 sps:$4 sm:$0xff]  }
  0xb0   :  { %8926 = vmatprep.subr.bf16.mxu0 %v16003_v13  ;;  %10960 = vmatprep.subr.bf16.mxu1 %v16006_v14  ;;  %v16091_v12 = vld [vmem:[%s22363_s1 + $0x700] ss:$16 sps:$4 sm:$0xff]   ;;  %v16094_v13 = vld [vmem:[%s22363_s1 + $0x708] ss:$16 sps:$4 sm:$0xff]   ;;  %v16099_v14 = vld [vmem:[%s22363_s1 + $0x724] ss:$16 sps:$4 sm:$0xff]  }
  0xb2   :  { %8882 = vmatmul.mubr.bf16.gmra.mrb[24].mxu0 %v16000_v15  ;;  %10916 = vmatmul.mubr.bf16.gmra.mrb[24].mxu1 %v16000_v15  ;;  %v16102_v15 = vld [vmem:[%s22363_s1 + $0x72c] ss:$16 sps:$4 sm:$0xff]  }
  0xb3   :  { %8927 = vmatpush1.bf16.msra.mxu0 %v16001_v16  ;;  %10961 = vmatpush1.bf16.msra.mxu1 %v16004_v17  ;;  %v16103_v16 = vld [vmem:[%s22364_s0 + $0x5b4] ss:$144 sps:$4 sm:$0xff]   ;;  %v16097_v17 = vld [vmem:[%s22363_s1 + $0x720] ss:$16 sps:$4 sm:$0xff]  }
  0xb4   :  { %8928 = vmatprep.subr.bf16.mxu0 %v16009_v18  ;;  %10962 = vmatprep.subr.bf16.mxu1 %v16012_v19  ;;  %v16100_v18 = vld [vmem:[%s22363_s1 + $0x728] ss:$16 sps:$4 sm:$0xff]   ;;  %v16108_v19 = vld [vmem:[%s22363_s1 + $0x744] ss:$16 sps:$4 sm:$0xff]  }
  0xb5   :  { %8891 = vmatprep.mubr.bf16.mxu0 %v16013_v20  ;;  %10925 = vmatprep.mubr.bf16.mxu1 %v16013_v20  ;;  %v16111_v20 = vld [vmem:[%s22363_s1 + $0x74c] ss:$16 sps:$4 sm:$0xff]  }
  0xb7   :  { %8929 = vmatpush1.bf16.msra.mxu0 %v16007_v21  ;;  %10963 = vmatpush1.bf16.msra.mxu1 %v16010_v22  ;;  %v16105_v21 = vld [vmem:[%s22364_s0 + $0x5b0] ss:$144 sps:$4 sm:$0xff]  }
  0xb8   :  { %8930 = vmatprep.subr.bf16.mxu0 %v16018_v23  ;;  %10964 = vmatprep.subr.bf16.mxu1 %v16021_v24  ;;  %v16106_v22 = vld [vmem:[%s22363_s1 + $0x740] ss:$16 sps:$4 sm:$0xff]   ;;  %v16109_v23 = vld [vmem:[%s22363_s1 + $0x748] ss:$16 sps:$4 sm:$0xff]   ;;  %v16114_v24 = vld [vmem:[%s22363_s1 + $0x764] ss:$16 sps:$4 sm:$0xff]  }
  0xba   :  { %8892 = vmatmul.mubr.bf16.gmra.mrb[28].mxu0 %v16015_v25  ;;  %10926 = vmatmul.mubr.bf16.gmra.mrb[28].mxu1 %v16015_v25  ;;  %v16117_v25 = vld [vmem:[%s22363_s1 + $0x76c] ss:$16 sps:$4 sm:$0xff]  }
  0xbb   :  { %8931 = vmatpush1.bf16.msra.mxu0 %v16016_v26  ;;  %10965 = vmatpush1.bf16.msra.mxu1 %v16019_v27  ;;  %v16118_v26 = vld [vmem:[%s22364_s0 + $0x6d4] ss:$144 sps:$4 sm:$0xff]   ;;  %v16112_v27 = vld [vmem:[%s22363_s1 + $0x760] ss:$16 sps:$4 sm:$0xff]  }
  0xbc   :  { %8932 = vmatprep.subr.bf16.mxu0 %v16024_v28  ;;  %10966 = vmatprep.subr.bf16.mxu1 %v16027_v29  ;;  %v16115_v28 = vld [vmem:[%s22363_s1 + $0x768] ss:$16 sps:$4 sm:$0xff]   ;;  %v16123_v29 = vld [vmem:[%s22363_s1 + $0x784] ss:$16 sps:$4 sm:$0xff]  }
  0xbd   :  { %8934 = vmatprep.mubr.bf16.mxu0 %v16030_v30  ;;  %10968 = vmatprep.mubr.bf16.mxu1 %v16030_v30  ;;  %v16126_v30 = vld [vmem:[%s22363_s1 + $0x78c] ss:$16 sps:$4 sm:$0xff]  }
  0xbf   :  { %8933 = vmatpush1.bf16.msra.mxu0 %v16022_v31  ;;  %10967 = vmatpush1.bf16.msra.mxu1 %v16025_v32  ;;  %v16120_v31 = vld [vmem:[%s22364_s0 + $0x6d0] ss:$144 sps:$4 sm:$0xff]  }
  0xc0   :  { %9015 = vmatprep.subr.bf16.mxu0 %v16033_v33  ;;  %11049 = vmatprep.subr.bf16.mxu1 %v16036_v34  ;;  %v16121_v32 = vld [vmem:[%s22363_s1 + $0x780] ss:$16 sps:$4 sm:$0xff]   ;;  %v16124_v33 = vld [vmem:[%s22363_s1 + $0x788] ss:$16 sps:$4 sm:$0xff]   ;;  %v16129_v34 = vld [vmem:[%s22363_s1 + $0x7a4] ss:$16 sps:$4 sm:$0xff]  }
  0xc2   :  { %8935 = vmatmul.mubr.bf16.vlgmr.msra.gmra.mrb[0].mxu0 %v16028_v35  ;;  %10969 = vmatmul.mubr.bf16.vlgmr.msra.gmra.mrb[0].mxu1 %v16028_v35  ;;  %v16132_v35 = vld [vmem:[%s22363_s1 + $0x7ac] ss:$16 sps:$4 sm:$0xff]  }
  0xc3   :  { %9016 = vmatpush1.bf16.msra.mxu0 %v16031_v36  ;;  %11050 = vmatpush1.bf16.msra.mxu1 %v16034_v37  ;;  %v16133_v36 = vld [vmem:[%s22364_s0 + $0x7f4] ss:$144 sps:$4 sm:$0xff]   ;;  %v16127_v37 = vld [vmem:[%s22363_s1 + $0x7a0] ss:$16 sps:$4 sm:$0xff]  }
  0xc4   :  { %9017 = vmatprep.subr.bf16.mxu0 %v16039_v38  ;;  %11051 = vmatprep.subr.bf16.mxu1 %v16042_v39  ;;  %v16130_v38 = vld [vmem:[%s22363_s1 + $0x7a8] ss:$16 sps:$4 sm:$0xff]   ;;  %v16138_v39 = vld [vmem:[%s22363_s1 + $0x7c4] ss:$16 sps:$4 sm:$0xff]  }
  0xc5   :  { %8944 = vmatprep.mubr.bf16.mxu0 %v16043_v40  ;;  %10978 = vmatprep.mubr.bf16.mxu1 %v16043_v40  ;;  %v16141_v40 = vld [vmem:[%s22363_s1 + $0x7cc] ss:$16 sps:$4 sm:$0xff]  }
  0xc7   :  { %9018 = vmatpush1.bf16.msra.mxu0 %v16037_v41  ;;  %11052 = vmatpush1.bf16.msra.mxu1 %v16040_v42  ;;  %v16135_v41 = vld [vmem:[%s22364_s0 + $0x7f0] ss:$144 sps:$4 sm:$0xff]  }
  0xc8   :  { %9019 = vmatprep.subr.bf16.mxu0 %v16048_v43  ;;  %11053 = vmatprep.subr.bf16.mxu1 %v16051_v44  ;;  %v16136_v42 = vld [vmem:[%s22363_s1 + $0x7c0] ss:$16 sps:$4 sm:$0xff]   ;;  %v16139_v43 = vld [vmem:[%s22363_s1 + $0x7c8] ss:$16 sps:$4 sm:$0xff]   ;;  %v16144_v44 = vld [vmem:[%s22363_s1 + $0x7e4] ss:$16 sps:$4 sm:$0xff]  }
  0xca   :  { %8945 = vmatmul.mubr.bf16.gmra.mrb[4].mxu0 %v16045_v45  ;;  %10979 = vmatmul.mubr.bf16.gmra.mrb[4].mxu1 %v16045_v45  ;;  %v16147_v45 = vld [vmem:[%s22363_s1 + $0x7ec] ss:$16 sps:$4 sm:$0xff]  }
  0xcb   :  { %9020 = vmatpush1.bf16.msra.mxu0 %v16046_v46  ;;  %11054 = vmatpush1.bf16.msra.mxu1 %v16049_v47  ;;  %v16150_v46 = vld [vmem:[%s22364_s0 + $0x1c] ss:$144 sps:$4 sm:$0xff]   ;;  %v16142_v47 = vld [vmem:[%s22363_s1 + $0x7e0] ss:$16 sps:$4 sm:$0xff]  }
  0xcc   :  { %9021 = vmatprep.subr.bf16.mxu0 %v16054_v48  ;;  %11055 = vmatprep.subr.bf16.mxu1 %v16057_v49  ;;  %v16145_v48 = vld [vmem:[%s22363_s1 + $0x7e8] ss:$16 sps:$4 sm:$0xff]   ;;  %v16153_v49 = vld [vmem:[%s22363_s1 + $0x804] ss:$16 sps:$4 sm:$0xff]  }
  0xcd   :  { %8954 = vmatprep.mubr.bf16.mxu0 %v16058_v50  ;;  %10988 = vmatprep.mubr.bf16.mxu1 %v16058_v50  ;;  %v16156_v50 = vld [vmem:[%s22363_s1 + $0x80c] ss:$16 sps:$4 sm:$0xff]  }
  0xcf   :  { %9022 = vmatpush1.bf16.msra.mxu0 %v16052_v51  ;;  %11056 = vmatpush1.bf16.msra.mxu1 %v16055_v52  ;;  %v16148_v51 = vld [vmem:[%s22364_s0 + $0x18] ss:$144 sps:$4 sm:$0xff]   ;;  %v16151_v52 = vld [vmem:[%s22363_s1 + $0x800] ss:$16 sps:$4 sm:$0xff]  }
  0xd0   :  { %9023 = vmatprep.subr.bf16.mxu0 %v16063_v53  ;;  %11057 = vmatprep.subr.bf16.mxu1 %v16066_v54  ;;  %v16154_v53 = vld [vmem:[%s22363_s1 + $0x808] ss:$16 sps:$4 sm:$0xff]   ;;  %v16159_v54 = vld [vmem:[%s22363_s1 + $0x824] ss:$16 sps:$4 sm:$0xff]  }
  0xd2   :  { %8955 = vmatmul.mubr.bf16.gmra.mrb[8].mxu0 %v16060_v55  ;;  %10989 = vmatmul.mubr.bf16.gmra.mrb[8].mxu1 %v16060_v55  ;;  %v16162_v55 = vld [vmem:[%s22363_s1 + $0x82c] ss:$16 sps:$4 sm:$0xff]  }
  0xd3   :  { %9024 = vmatpush1.bf16.msra.mxu0 %v16061_v56  ;;  %11058 = vmatpush1.bf16.msra.mxu1 %v16064_v57  ;;  %v16163_v56 = vld [vmem:[%s22364_s0 + $0x13c] ss:$144 sps:$4 sm:$0xff]   ;;  %v16157_v57 = vld [vmem:[%s22363_s1 + $0x820] ss:$16 sps:$4 sm:$0xff]  }
  0xd4   :  { %9025 = vmatprep.subr.bf16.mxu0 %v16069_v58  ;;  %11059 = vmatprep.subr.bf16.mxu1 %v16072_v59  ;;  %v16160_v58 = vld [vmem:[%s22363_s1 + $0x828] ss:$16 sps:$4 sm:$0xff]   ;;  %v16168_v59 = vld [vmem:[%s22363_s1 + $0x844] ss:$16 sps:$4 sm:$0xff]  }
  0xd5   :  { %8964 = vmatprep.mubr.bf16.mxu0 %v16073_v60  ;;  %10998 = vmatprep.mubr.bf16.mxu1 %v16073_v60  ;;  %v16171_v60 = vld [vmem:[%s22363_s1 + $0x84c] ss:$16 sps:$4 sm:$0xff]  }
  0xd7   :  { %9026 = vmatpush1.bf16.msra.mxu0 %v16067_v61  ;;  %11060 = vmatpush1.bf16.msra.mxu1 %v16070_v62  ;;  %v16165_v61 = vld [vmem:[%s22364_s0 + $0x138] ss:$144 sps:$4 sm:$0xff]   ;;  %v16166_v62 = vld [vmem:[%s22363_s1 + $0x840] ss:$16 sps:$4 sm:$0xff]  }
  0xd8   :  { %9027 = vmatprep.subr.bf16.mxu0 %v16078_v63  ;;  %11061 = vmatprep.subr.bf16.mxu1 %v16081_v0  ;;  %v16169_v63 = vld [vmem:[%s22363_s1 + $0x848] ss:$16 sps:$4 sm:$0xff]   ;;  %v16174_v0 = vld [vmem:[%s22363_s1 + $0x864] ss:$16 sps:$4 sm:$0xff]  }
  0xda   :  { %8965 = vmatmul.mubr.bf16.gmra.mrb[12].mxu0 %v16075_v1  ;;  %10999 = vmatmul.mubr.bf16.gmra.mrb[12].mxu1 %v16075_v1  ;;  %v16177_v1 = vld [vmem:[%s22363_s1 + $0x86c] ss:$16 sps:$4 sm:$0xff]  }
  0xdb   :  { %9028 = vmatpush1.bf16.msra.mxu0 %v16076_v2  ;;  %11062 = vmatpush1.bf16.msra.mxu1 %v16079_v3  ;;  %v16178_v2 = vld [vmem:[%s22364_s0 + $0x25c] ss:$144 sps:$4 sm:$0xff]   ;;  %v16172_v3 = vld [vmem:[%s22363_s1 + $0x860] ss:$16 sps:$4 sm:$0xff]  }
  0xdc   :  { %9029 = vmatprep.subr.bf16.mxu0 %v16084_v4  ;;  %11063 = vmatprep.subr.bf16.mxu1 %v16087_v5  ;;  %v16175_v4 = vld [vmem:[%s22363_s1 + $0x868] ss:$16 sps:$4 sm:$0xff]   ;;  %v16183_v5 = vld [vmem:[%s22363_s1 + $0x884] ss:$16 sps:$4 sm:$0xff]  }
  0xdd   :  { %8974 = vmatprep.mubr.bf16.mxu0 %v16088_v6  ;;  %11008 = vmatprep.mubr.bf16.mxu1 %v16088_v6  ;;  %v16186_v6 = vld [vmem:[%s22363_s1 + $0x88c] ss:$16 sps:$4 sm:$0xff]  }
  0xdf   :  { %9030 = vmatpush1.bf16.msra.mxu0 %v16082_v7  ;;  %11064 = vmatpush1.bf16.msra.mxu1 %v16085_v8  ;;  %v16180_v7 = vld [vmem:[%s22364_s0 + $0x258] ss:$144 sps:$4 sm:$0xff]   ;;  %v16181_v8 = vld [vmem:[%s22363_s1 + $0x880] ss:$16 sps:$4 sm:$0xff]  }
  0xe0   :  { %9031 = vmatprep.subr.bf16.mxu0 %v16093_v9  ;;  %11065 = vmatprep.subr.bf16.mxu1 %v16096_v10  ;;  %v16184_v9 = vld [vmem:[%s22363_s1 + $0x888] ss:$16 sps:$4 sm:$0xff]   ;;  %v16189_v10 = vld [vmem:[%s22363_s1 + $0x8a4] ss:$16 sps:$4 sm:$0xff]  }
  0xe2   :  { %8975 = vmatmul.mubr.bf16.gmra.mrb[16].mxu0 %v16090_v11  ;;  %11009 = vmatmul.mubr.bf16.gmra.mrb[16].mxu1 %v16090_v11  ;;  %v16192_v11 = vld [vmem:[%s22363_s1 + $0x8ac] ss:$16 sps:$4 sm:$0xff]  }
  0xe3   :  { %9032 = vmatpush1.bf16.msra.mxu0 %v16091_v12  ;;  %11066 = vmatpush1.bf16.msra.mxu1 %v16094_v13  ;;  %v16193_v12 = vld [vmem:[%s22364_s0 + $0x37c] ss:$144 sps:$4 sm:$0xff]   ;;  %v16187_v13 = vld [vmem:[%s22363_s1 + $0x8a0] ss:$16 sps:$4 sm:$0xff]  }
  0xe4   :  { %9033 = vmatprep.subr.bf16.mxu0 %v16099_v14  ;;  %11067 = vmatprep.subr.bf16.mxu1 %v16102_v15  ;;  %v16190_v14 = vld [vmem:[%s22363_s1 + $0x8a8] ss:$16 sps:$4 sm:$0xff]   ;;  %v16198_v15 = vld [vmem:[%s22363_s1 + $0x8c4] ss:$16 sps:$4 sm:$0xff]  }
  0xe5   :  { %8984 = vmatprep.mubr.bf16.mxu0 %v16103_v16  ;;  %11018 = vmatprep.mubr.bf16.mxu1 %v16103_v16  ;;  %v16201_v16 = vld [vmem:[%s22363_s1 + $0x8cc] ss:$16 sps:$4 sm:$0xff]  }
  0xe7   :  { %9034 = vmatpush1.bf16.msra.mxu0 %v16097_v17  ;;  %11068 = vmatpush1.bf16.msra.mxu1 %v16100_v18  ;;  %v16195_v17 = vld [vmem:[%s22364_s0 + $0x378] ss:$144 sps:$4 sm:$0xff]   ;;  %v16196_v18 = vld [vmem:[%s22363_s1 + $0x8c0] ss:$16 sps:$4 sm:$0xff]  }
  0xe8   :  { %9035 = vmatprep.subr.bf16.mxu0 %v16108_v19  ;;  %11069 = vmatprep.subr.bf16.mxu1 %v16111_v20  ;;  %v16199_v19 = vld [vmem:[%s22363_s1 + $0x8c8] ss:$16 sps:$4 sm:$0xff]   ;;  %v16204_v20 = vld [vmem:[%s22363_s1 + $0x8e4] ss:$16 sps:$4 sm:$0xff]  }
  0xea   :  { %8985 = vmatmul.mubr.bf16.gmra.mrb[20].mxu0 %v16105_v21  ;;  %11019 = vmatmul.mubr.bf16.gmra.mrb[20].mxu1 %v16105_v21  ;;  %v16207_v21 = vld [vmem:[%s22363_s1 + $0x8ec] ss:$16 sps:$4 sm:$0xff]  }
  0xeb   :  { %9036 = vmatpush1.bf16.msra.mxu0 %v16106_v22  ;;  %11070 = vmatpush1.bf16.msra.mxu1 %v16109_v23  ;;  %v16208_v22 = vld [vmem:[%s22364_s0 + $0x49c] ss:$144 sps:$4 sm:$0xff]   ;;  %v16202_v23 = vld [vmem:[%s22363_s1 + $0x8e0] ss:$16 sps:$4 sm:$0xff]  }
  0xec   :  { %9037 = vmatprep.subr.bf16.mxu0 %v16114_v24  ;;  %11071 = vmatprep.subr.bf16.mxu1 %v16117_v25  ;;  %v16205_v24 = vld [vmem:[%s22363_s1 + $0x8e8] ss:$16 sps:$4 sm:$0xff]   ;;  %v16213_v25 = vld [vmem:[%s22363_s1 + $0x904] ss:$16 sps:$4 sm:$0xff]  }
  0xed   :  { %8994 = vmatprep.mubr.bf16.mxu0 %v16118_v26  ;;  %11028 = vmatprep.mubr.bf16.mxu1 %v16118_v26  ;;  %v16216_v26 = vld [vmem:[%s22363_s1 + $0x90c] ss:$16 sps:$4 sm:$0xff]  }
  0xef   :  { %9038 = vmatpush1.bf16.msra.mxu0 %v16112_v27  ;;  %11072 = vmatpush1.bf16.msra.mxu1 %v16115_v28  ;;  %v16210_v27 = vld [vmem:[%s22364_s0 + $0x498] ss:$144 sps:$4 sm:$0xff]   ;;  %v16211_v28 = vld [vmem:[%s22363_s1 + $0x900] ss:$16 sps:$4 sm:$0xff]  }
  0xf0   :  { %9039 = vmatprep.subr.bf16.mxu0 %v16123_v29  ;;  %11073 = vmatprep.subr.bf16.mxu1 %v16126_v30  ;;  %v16214_v29 = vld [vmem:[%s22363_s1 + $0x908] ss:$16 sps:$4 sm:$0xff]   ;;  %v16219_v30 = vld [vmem:[%s22363_s1 + $0x924] ss:$16 sps:$4 sm:$0xff]  }
  0xf2   :  { %8995 = vmatmul.mubr.bf16.gmra.mrb[24].mxu0 %v16120_v31  ;;  %11029 = vmatmul.mubr.bf16.gmra.mrb[24].mxu1 %v16120_v31  ;;  %v16222_v31 = vld [vmem:[%s22363_s1 + $0x92c] ss:$16 sps:$4 sm:$0xff]  }
  0xf3   :  { %9040 = vmatpush1.bf16.msra.mxu0 %v16121_v32  ;;  %11074 = vmatpush1.bf16.msra.mxu1 %v16124_v33  ;;  %v16223_v32 = vld [vmem:[%s22364_s0 + $0x5bc] ss:$144 sps:$4 sm:$0xff]   ;;  %v16217_v33 = vld [vmem:[%s22363_s1 + $0x920] ss:$16 sps:$4 sm:$0xff]  }
  0xf4   :  { %9041 = vmatprep.subr.bf16.mxu0 %v16129_v34  ;;  %11075 = vmatprep.subr.bf16.mxu1 %v16132_v35  ;;  %v16220_v34 = vld [vmem:[%s22363_s1 + $0x928] ss:$16 sps:$4 sm:$0xff]   ;;  %v16228_v35 = vld [vmem:[%s22363_s1 + $0x944] ss:$16 sps:$4 sm:$0xff]  }
  0xf5   :  { %9004 = vmatprep.mubr.bf16.mxu0 %v16133_v36  ;;  %11038 = vmatprep.mubr.bf16.mxu1 %v16133_v36  ;;  %v16231_v36 = vld [vmem:[%s22363_s1 + $0x94c] ss:$16 sps:$4 sm:$0xff]  }
  0xf7   :  { %9042 = vmatpush1.bf16.msra.mxu0 %v16127_v37  ;;  %11076 = vmatpush1.bf16.msra.mxu1 %v16130_v38  ;;  %v16225_v37 = vld [vmem:[%s22364_s0 + $0x5b8] ss:$144 sps:$4 sm:$0xff]   ;;  %v16226_v38 = vld [vmem:[%s22363_s1 + $0x940] ss:$16 sps:$4 sm:$0xff]  }
  0xf8   :  { %9043 = vmatprep.subr.bf16.mxu0 %v16138_v39  ;;  %11077 = vmatprep.subr.bf16.mxu1 %v16141_v40  ;;  %v16229_v39 = vld [vmem:[%s22363_s1 + $0x948] ss:$16 sps:$4 sm:$0xff]   ;;  %v16234_v40 = vld [vmem:[%s22363_s1 + $0x964] ss:$16 sps:$4 sm:$0xff]  }
  0xfa   :  { %9005 = vmatmul.mubr.bf16.gmra.mrb[28].mxu0 %v16135_v41  ;;  %11039 = vmatmul.mubr.bf16.gmra.mrb[28].mxu1 %v16135_v41  ;;  %v16237_v41 = vld [vmem:[%s22363_s1 + $0x96c] ss:$16 sps:$4 sm:$0xff]  }
  0xfb   :  { %9044 = vmatpush1.bf16.msra.mxu0 %v16136_v42  ;;  %11078 = vmatpush1.bf16.msra.mxu1 %v16139_v43  ;;  %v16238_v42 = vld [vmem:[%s22364_s0 + $0x6dc] ss:$144 sps:$4 sm:$0xff]   ;;  %v16232_v43 = vld [vmem:[%s22363_s1 + $0x960] ss:$16 sps:$4 sm:$0xff]  }
  0xfc   :  { %9045 = vmatprep.subr.bf16.mxu0 %v16144_v44  ;;  %11079 = vmatprep.subr.bf16.mxu1 %v16147_v45  ;;  %v16235_v44 = vld [vmem:[%s22363_s1 + $0x968] ss:$16 sps:$4 sm:$0xff]   ;;  %v16243_v45 = vld [vmem:[%s22363_s1 + $0x984] ss:$16 sps:$4 sm:$0xff]  }
  0xfd   :  { %9047 = vmatprep.mubr.bf16.mxu0 %v16150_v46  ;;  %11081 = vmatprep.mubr.bf16.mxu1 %v16150_v46  ;;  %v16246_v46 = vld [vmem:[%s22363_s1 + $0x98c] ss:$16 sps:$4 sm:$0xff]  }
  0xff   :  { %9046 = vmatpush1.bf16.msra.mxu0 %v16142_v47  ;;  %11080 = vmatpush1.bf16.msra.mxu1 %v16145_v48  ;;  %v16240_v47 = vld [vmem:[%s22364_s0 + $0x6d8] ss:$144 sps:$4 sm:$0xff]   ;;  %v16241_v48 = vld [vmem:[%s22363_s1 + $0x980] ss:$16 sps:$4 sm:$0xff]  }
 0x100   :  { %9128 = vmatprep.subr.bf16.mxu0 %v16153_v49  ;;  %11162 = vmatprep.subr.bf16.mxu1 %v16156_v50  ;;  %v16244_v49 = vld [vmem:[%s22363_s1 + $0x988] ss:$16 sps:$4 sm:$0xff]   ;;  %v16249_v50 = vld [vmem:[%s22363_s1 + $0x9a4] ss:$16 sps:$4 sm:$0xff]  }
 0x102   :  { %9048 = vmatmul.mubr.bf16.vlgmr.msra.gmra.mrb[0].mxu0 %v16148_v51  ;;  %11082 = vmatmul.mubr.bf16.vlgmr.msra.gmra.mrb[0].mxu1 %v16148_v51  ;;  %v16252_v51 = vld [vmem:[%s22363_s1 + $0x9ac] ss:$16 sps:$4 sm:$0xff]  }
 0x103   :  { %9129 = vmatpush1.bf16.msra.mxu0 %v16151_v52  ;;  %11163 = vmatpush1.bf16.msra.mxu1 %v16154_v53  ;;  %v16253_v52 = vld [vmem:[%s22364_s0 + $0x7fc] ss:$144 sps:$4 sm:$0xff]   ;;  %v16247_v53 = vld [vmem:[%s22363_s1 + $0x9a0] ss:$16 sps:$4 sm:$0xff]  }
 0x104   :  { %9130 = vmatprep.subr.bf16.mxu0 %v16159_v54  ;;  %11164 = vmatprep.subr.bf16.mxu1 %v16162_v55  ;;  %v16250_v54 = vld [vmem:[%s22363_s1 + $0x9a8] ss:$16 sps:$4 sm:$0xff]   ;;  %v16258_v55 = vld [vmem:[%s22363_s1 + $0x9c4] ss:$16 sps:$4 sm:$0xff]  }
 0x105   :  { %9057 = vmatprep.mubr.bf16.mxu0 %v16163_v56  ;;  %11091 = vmatprep.mubr.bf16.mxu1 %v16163_v56  ;;  %v16261_v56 = vld [vmem:[%s22363_s1 + $0x9cc] ss:$16 sps:$4 sm:$0xff]  }
 0x107   :  { %9131 = vmatpush1.bf16.msra.mxu0 %v16157_v57  ;;  %11165 = vmatpush1.bf16.msra.mxu1 %v16160_v58  ;;  %v16255_v57 = vld [vmem:[%s22364_s0 + $0x7f8] ss:$144 sps:$4 sm:$0xff]   ;;  %v16256_v58 = vld [vmem:[%s22363_s1 + $0x9c0] ss:$16 sps:$4 sm:$0xff]  }
 0x108   :  { %9132 = vmatprep.subr.bf16.mxu0 %v16168_v59  ;;  %11166 = vmatprep.subr.bf16.mxu1 %v16171_v60  ;;  %v16259_v59 = vld [vmem:[%s22363_s1 + $0x9c8] ss:$16 sps:$4 sm:$0xff]   ;;  %v16264_v60 = vld [vmem:[%s22363_s1 + $0x9e4] ss:$16 sps:$4 sm:$0xff]  }
 0x10a   :  { %9058 = vmatmul.mubr.bf16.gmra.mrb[4].mxu0 %v16165_v61  ;;  %11092 = vmatmul.mubr.bf16.gmra.mrb[4].mxu1 %v16165_v61  ;;  %v16267_v61 = vld [vmem:[%s22363_s1 + $0x9ec] ss:$16 sps:$4 sm:$0xff]  }
 0x10b   :  { %9133 = vmatpush1.bf16.msra.mxu0 %v16166_v62  ;;  %11167 = vmatpush1.bf16.msra.mxu1 %v16169_v63  ;;  %v16270_v62 = vld [vmem:[%s22364_s0 + $0x24] ss:$144 sps:$4 sm:$0xff]   ;;  %v16262_v63 = vld [vmem:[%s22363_s1 + $0x9e0] ss:$16 sps:$4 sm:$0xff]  }
 0x10c   :  { %9134 = vmatprep.subr.bf16.mxu0 %v16174_v0  ;;  %11168 = vmatprep.subr.bf16.mxu1 %v16177_v1  ;;  %v16265_v0 = vld [vmem:[%s22363_s1 + $0x9e8] ss:$16 sps:$4 sm:$0xff]   ;;  %v16273_v1 = vld [vmem:[%s22363_s1 + $0xa04] ss:$16 sps:$4 sm:$0xff]  }
 0x10d   :  { %9067 = vmatprep.mubr.bf16.mxu0 %v16178_v2  ;;  %11101 = vmatprep.mubr.bf16.mxu1 %v16178_v2  ;;  %v16276_v2 = vld [vmem:[%s22363_s1 + $0xa0c] ss:$16 sps:$4 sm:$0xff]  }
 0x10f   :  { %9135 = vmatpush1.bf16.msra.mxu0 %v16172_v3  ;;  %11169 = vmatpush1.bf16.msra.mxu1 %v16175_v4  ;;  %v16268_v3 = vld [vmem:[%s22364_s0 + $0x20] ss:$144 sps:$4 sm:$0xff]  }
 0x110   :  { %9136 = vmatprep.subr.bf16.mxu0 %v16183_v5  ;;  %11170 = vmatprep.subr.bf16.mxu1 %v16186_v6  ;;  %v16271_v4 = vld [vmem:[%s22363_s1 + $0xa00] ss:$16 sps:$4 sm:$0xff]   ;;  %v16274_v5 = vld [vmem:[%s22363_s1 + $0xa08] ss:$16 sps:$4 sm:$0xff]   ;;  %v16279_v6 = vld [vmem:[%s22363_s1 + $0xa24] ss:$16 sps:$4 sm:$0xff]  }
 0x112   :  { %9068 = vmatmul.mubr.bf16.gmra.mrb[8].mxu0 %v16180_v7  ;;  %11102 = vmatmul.mubr.bf16.gmra.mrb[8].mxu1 %v16180_v7  ;;  %v16282_v7 = vld [vmem:[%s22363_s1 + $0xa2c] ss:$16 sps:$4 sm:$0xff]  }
 0x113   :  { %9137 = vmatpush1.bf16.msra.mxu0 %v16181_v8  ;;  %11171 = vmatpush1.bf16.msra.mxu1 %v16184_v9  ;;  %v16283_v8 = vld [vmem:[%s22364_s0 + $0x144] ss:$144 sps:$4 sm:$0xff]   ;;  %v16277_v9 = vld [vmem:[%s22363_s1 + $0xa20] ss:$16 sps:$4 sm:$0xff]  }
 0x114   :  { %9138 = vmatprep.subr.bf16.mxu0 %v16189_v10  ;;  %11172 = vmatprep.subr.bf16.mxu1 %v16192_v11  ;;  %v16280_v10 = vld [vmem:[%s22363_s1 + $0xa28] ss:$16 sps:$4 sm:$0xff]   ;;  %v16288_v11 = vld [vmem:[%s22363_s1 + $0xa44] ss:$16 sps:$4 sm:$0xff]  }
 0x115   :  { %9077 = vmatprep.mubr.bf16.mxu0 %v16193_v12  ;;  %11111 = vmatprep.mubr.bf16.mxu1 %v16193_v12  ;;  %v16291_v12 = vld [vmem:[%s22363_s1 + $0xa4c] ss:$16 sps:$4 sm:$0xff]  }
 0x117   :  { %9139 = vmatpush1.bf16.msra.mxu0 %v16187_v13  ;;  %11173 = vmatpush1.bf16.msra.mxu1 %v16190_v14  ;;  %v16285_v13 = vld [vmem:[%s22364_s0 + $0x140] ss:$144 sps:$4 sm:$0xff]  }
 0x118   :  { %9140 = vmatprep.subr.bf16.mxu0 %v16198_v15  ;;  %11174 = vmatprep.subr.bf16.mxu1 %v16201_v16  ;;  %v16286_v14 = vld [vmem:[%s22363_s1 + $0xa40] ss:$16 sps:$4 sm:$0xff]   ;;  %v16289_v15 = vld [vmem:[%s22363_s1 + $0xa48] ss:$16 sps:$4 sm:$0xff]   ;;  %v16294_v16 = vld [vmem:[%s22363_s1 + $0xa64] ss:$16 sps:$4 sm:$0xff]  }
 0x11a   :  { %9078 = vmatmul.mubr.bf16.gmra.mrb[12].mxu0 %v16195_v17  ;;  %11112 = vmatmul.mubr.bf16.gmra.mrb[12].mxu1 %v16195_v17  ;;  %v16297_v17 = vld [vmem:[%s22363_s1 + $0xa6c] ss:$16 sps:$4 sm:$0xff]  }
 0x11b   :  { %9141 = vmatpush1.bf16.msra.mxu0 %v16196_v18  ;;  %11175 = vmatpush1.bf16.msra.mxu1 %v16199_v19  ;;  %v16298_v18 = vld [vmem:[%s22364_s0 + $0x264] ss:$144 sps:$4 sm:$0xff]   ;;  %v16292_v19 = vld [vmem:[%s22363_s1 + $0xa60] ss:$16 sps:$4 sm:$0xff]  }
 0x11c   :  { %9142 = vmatprep.subr.bf16.mxu0 %v16204_v20  ;;  %11176 = vmatprep.subr.bf16.mxu1 %v16207_v21  ;;  %v16295_v20 = vld [vmem:[%s22363_s1 + $0xa68] ss:$16 sps:$4 sm:$0xff]   ;;  %v16303_v21 = vld [vmem:[%s22363_s1 + $0xa84] ss:$16 sps:$4 sm:$0xff]  }
 0x11d   :  { %9087 = vmatprep.mubr.bf16.mxu0 %v16208_v22  ;;  %11121 = vmatprep.mubr.bf16.mxu1 %v16208_v22  ;;  %v16306_v22 = vld [vmem:[%s22363_s1 + $0xa8c] ss:$16 sps:$4 sm:$0xff]  }
 0x11f   :  { %9143 = vmatpush1.bf16.msra.mxu0 %v16202_v23  ;;  %11177 = vmatpush1.bf16.msra.mxu1 %v16205_v24  ;;  %v16300_v23 = vld [vmem:[%s22364_s0 + $0x260] ss:$144 sps:$4 sm:$0xff]  }
 0x120   :  { %9144 = vmatprep.subr.bf16.mxu0 %v16213_v25  ;;  %11178 = vmatprep.subr.bf16.mxu1 %v16216_v26  ;;  %v16301_v24 = vld [vmem:[%s22363_s1 + $0xa80] ss:$16 sps:$4 sm:$0xff]   ;;  %v16304_v25 = vld [vmem:[%s22363_s1 + $0xa88] ss:$16 sps:$4 sm:$0xff]   ;;  %v16309_v26 = vld [vmem:[%s22363_s1 + $0xaa4] ss:$16 sps:$4 sm:$0xff]  }
 0x122   :  { %9088 = vmatmul.mubr.bf16.gmra.mrb[16].mxu0 %v16210_v27  ;;  %11122 = vmatmul.mubr.bf16.gmra.mrb[16].mxu1 %v16210_v27  ;;  %v16312_v27 = vld [vmem:[%s22363_s1 + $0xaac] ss:$16 sps:$4 sm:$0xff]  }
 0x123   :  { %9145 = vmatpush1.bf16.msra.mxu0 %v16211_v28  ;;  %11179 = vmatpush1.bf16.msra.mxu1 %v16214_v29  ;;  %v16313_v28 = vld [vmem:[%s22364_s0 + $0x384] ss:$144 sps:$4 sm:$0xff]   ;;  %v16307_v29 = vld [vmem:[%s22363_s1 + $0xaa0] ss:$16 sps:$4 sm:$0xff]  }
 0x124   :  { %9146 = vmatprep.subr.bf16.mxu0 %v16219_v30  ;;  %11180 = vmatprep.subr.bf16.mxu1 %v16222_v31  ;;  %v16310_v30 = vld [vmem:[%s22363_s1 + $0xaa8] ss:$16 sps:$4 sm:$0xff]   ;;  %v16318_v31 = vld [vmem:[%s22363_s1 + $0xac4] ss:$16 sps:$4 sm:$0xff]  }
 0x125   :  { %9097 = vmatprep.mubr.bf16.mxu0 %v16223_v32  ;;  %11131 = vmatprep.mubr.bf16.mxu1 %v16223_v32  ;;  %v16321_v32 = vld [vmem:[%s22363_s1 + $0xacc] ss:$16 sps:$4 sm:$0xff]  }
 0x127   :  { %9147 = vmatpush1.bf16.msra.mxu0 %v16217_v33  ;;  %11181 = vmatpush1.bf16.msra.mxu1 %v16220_v34  ;;  %v16315_v33 = vld [vmem:[%s22364_s0 + $0x380] ss:$144 sps:$4 sm:$0xff]  }
 0x128   :  { %9148 = vmatprep.subr.bf16.mxu0 %v16228_v35  ;;  %11182 = vmatprep.subr.bf16.mxu1 %v16231_v36  ;;  %v16316_v34 = vld [vmem:[%s22363_s1 + $0xac0] ss:$16 sps:$4 sm:$0xff]   ;;  %v16319_v35 = vld [vmem:[%s22363_s1 + $0xac8] ss:$16 sps:$4 sm:$0xff]   ;;  %v16324_v36 = vld [vmem:[%s22363_s1 + $0xae4] ss:$16 sps:$4 sm:$0xff]  }
 0x12a   :  { %9098 = vmatmul.mubr.bf16.gmra.mrb[20].mxu0 %v16225_v37  ;;  %11132 = vmatmul.mubr.bf16.gmra.mrb[20].mxu1 %v16225_v37  ;;  %v16327_v37 = vld [vmem:[%s22363_s1 + $0xaec] ss:$16 sps:$4 sm:$0xff]  }
 0x12b   :  { %9149 = vmatpush1.bf16.msra.mxu0 %v16226_v38  ;;  %11183 = vmatpush1.bf16.msra.mxu1 %v16229_v39  ;;  %v16328_v38 = vld [vmem:[%s22364_s0 + $0x4a4] ss:$144 sps:$4 sm:$0xff]   ;;  %v16322_v39 = vld [vmem:[%s22363_s1 + $0xae0] ss:$16 sps:$4 sm:$0xff]  }
 0x12c   :  { %9150 = vmatprep.subr.bf16.mxu0 %v16234_v40  ;;  %11184 = vmatprep.subr.bf16.mxu1 %v16237_v41  ;;  %v16325_v40 = vld [vmem:[%s22363_s1 + $0xae8] ss:$16 sps:$4 sm:$0xff]   ;;  %v16333_v41 = vld [vmem:[%s22363_s1 + $0xb04] ss:$16 sps:$4 sm:$0xff]  }
 0x12d   :  { %9107 = vmatprep.mubr.bf16.mxu0 %v16238_v42  ;;  %11141 = vmatprep.mubr.bf16.mxu1 %v16238_v42  ;;  %v16336_v42 = vld [vmem:[%s22363_s1 + $0xb0c] ss:$16 sps:$4 sm:$0xff]  }
 0x12f   :  { %9151 = vmatpush1.bf16.msra.mxu0 %v16232_v43  ;;  %11185 = vmatpush1.bf16.msra.mxu1 %v16235_v44  ;;  %v16330_v43 = vld [vmem:[%s22364_s0 + $0x4a0] ss:$144 sps:$4 sm:$0xff]  }
 0x130   :  { %9152 = vmatprep.subr.bf16.mxu0 %v16243_v45  ;;  %11186 = vmatprep.subr.bf16.mxu1 %v16246_v46  ;;  %v16331_v44 = vld [vmem:[%s22363_s1 + $0xb00] ss:$16 sps:$4 sm:$0xff]   ;;  %v16334_v45 = vld [vmem:[%s22363_s1 + $0xb08] ss:$16 sps:$4 sm:$0xff]   ;;  %v16339_v46 = vld [vmem:[%s22363_s1 + $0xb24] ss:$16 sps:$4 sm:$0xff]  }
 0x132   :  { %9108 = vmatmul.mubr.bf16.gmra.mrb[24].mxu0 %v16240_v47  ;;  %11142 = vmatmul.mubr.bf16.gmra.mrb[24].mxu1 %v16240_v47  ;;  %v16342_v47 = vld [vmem:[%s22363_s1 + $0xb2c] ss:$16 sps:$4 sm:$0xff]  }
 0x133   :  { %9153 = vmatpush1.bf16.msra.mxu0 %v16241_v48  ;;  %11187 = vmatpush1.bf16.msra.mxu1 %v16244_v49  ;;  %v16343_v48 = vld [vmem:[%s22364_s0 + $0x5c4] ss:$144 sps:$4 sm:$0xff]   ;;  %v16337_v49 = vld [vmem:[%s22363_s1 + $0xb20] ss:$16 sps:$4 sm:$0xff]  }
 0x134   :  { %9154 = vmatprep.subr.bf16.mxu0 %v16249_v50  ;;  %11188 = vmatprep.subr.bf16.mxu1 %v16252_v51  ;;  %v16340_v50 = vld [vmem:[%s22363_s1 + $0xb28] ss:$16 sps:$4 sm:$0xff]   ;;  %v16348_v51 = vld [vmem:[%s22363_s1 + $0xb44] ss:$16 sps:$4 sm:$0xff]  }
 0x135   :  { %9117 = vmatprep.mubr.bf16.mxu0 %v16253_v52  ;;  %11151 = vmatprep.mubr.bf16.mxu1 %v16253_v52  ;;  %v16351_v52 = vld [vmem:[%s22363_s1 + $0xb4c] ss:$16 sps:$4 sm:$0xff]  }
 0x137   :  { %9155 = vmatpush1.bf16.msra.mxu0 %v16247_v53  ;;  %11189 = vmatpush1.bf16.msra.mxu1 %v16250_v54  ;;  %v16345_v53 = vld [vmem:[%s22364_s0 + $0x5c0] ss:$144 sps:$4 sm:$0xff]  }
 0x138   :  { %9156 = vmatprep.subr.bf16.mxu0 %v16258_v55  ;;  %11190 = vmatprep.subr.bf16.mxu1 %v16261_v56  ;;  %v16346_v54 = vld [vmem:[%s22363_s1 + $0xb40] ss:$16 sps:$4 sm:$0xff]   ;;  %v16349_v55 = vld [vmem:[%s22363_s1 + $0xb48] ss:$16 sps:$4 sm:$0xff]   ;;  %v16354_v56 = vld [vmem:[%s22363_s1 + $0xb64] ss:$16 sps:$4 sm:$0xff]  }
 0x13a   :  { %9118 = vmatmul.mubr.bf16.gmra.mrb[28].mxu0 %v16255_v57  ;;  %11152 = vmatmul.mubr.bf16.gmra.mrb[28].mxu1 %v16255_v57  ;;  %v16357_v57 = vld [vmem:[%s22363_s1 + $0xb6c] ss:$16 sps:$4 sm:$0xff]  }
 0x13b   :  { %9157 = vmatpush1.bf16.msra.mxu0 %v16256_v58  ;;  %11191 = vmatpush1.bf16.msra.mxu1 %v16259_v59  ;;  %v16358_v58 = vld [vmem:[%s22364_s0 + $0x6e4] ss:$144 sps:$4 sm:$0xff]   ;;  %v16352_v59 = vld [vmem:[%s22363_s1 + $0xb60] ss:$16 sps:$4 sm:$0xff]  }
 0x13c   :  { %9158 = vmatprep.subr.bf16.mxu0 %v16264_v60  ;;  %11192 = vmatprep.subr.bf16.mxu1 %v16267_v61  ;;  %v16355_v60 = vld [vmem:[%s22363_s1 + $0xb68] ss:$16 sps:$4 sm:$0xff]   ;;  %v16363_v61 = vld [vmem:[%s22363_s1 + $0xb84] ss:$16 sps:$4 sm:$0xff]  }
 0x13d   :  { %9160 = vmatprep.mubr.bf16.mxu0 %v16270_v62  ;;  %11194 = vmatprep.mubr.bf16.mxu1 %v16270_v62  ;;  %v16366_v62 = vld [vmem:[%s22363_s1 + $0xb8c] ss:$16 sps:$4 sm:$0xff]  }
 0x13f   :  { %9159 = vmatpush1.bf16.msra.mxu0 %v16262_v63  ;;  %11193 = vmatpush1.bf16.msra.mxu1 %v16265_v0  ;;  %v16360_v63 = vld [vmem:[%s22364_s0 + $0x6e0] ss:$144 sps:$4 sm:$0xff]  }
 0x140   :  { %9241 = vmatprep.subr.bf16.mxu0 %v16273_v1  ;;  %11275 = vmatprep.subr.bf16.mxu1 %v16276_v2  ;;  %v16361_v0 = vld [vmem:[%s22363_s1 + $0xb80] ss:$16 sps:$4 sm:$0xff]   ;;  %v16364_v1 = vld [vmem:[%s22363_s1 + $0xb88] ss:$16 sps:$4 sm:$0xff]   ;;  %v16369_v2 = vld [vmem:[%s22363_s1 + $0xba4] ss:$16 sps:$4 sm:$0xff]  }
 0x142   :  { %9161 = vmatmul.mubr.bf16.vlgmr.msra.gmra.mrb[0].mxu0 %v16268_v3  ;;  %11195 = vmatmul.mubr.bf16.vlgmr.msra.gmra.mrb[0].mxu1 %v16268_v3  ;;  %v16372_v3 = vld [vmem:[%s22363_s1 + $0xbac] ss:$16 sps:$4 sm:$0xff]  }
 0x143   :  { %9242 = vmatpush1.bf16.msra.mxu0 %v16271_v4  ;;  %11276 = vmatpush1.bf16.msra.mxu1 %v16274_v5  ;;  %v16373_v4 = vld [vmem:[%s22364_s0 + $0x804] ss:$144 sps:$4 sm:$0xff]   ;;  %v16367_v5 = vld [vmem:[%s22363_s1 + $0xba0] ss:$16 sps:$4 sm:$0xff]  }
 0x144   :  { %9243 = vmatprep.subr.bf16.mxu0 %v16279_v6  ;;  %11277 = vmatprep.subr.bf16.mxu1 %v16282_v7  ;;  %v16370_v6 = vld [vmem:[%s22363_s1 + $0xba8] ss:$16 sps:$4 sm:$0xff]   ;;  %v16378_v7 = vld [vmem:[%s22363_s1 + $0xbc4] ss:$16 sps:$4 sm:$0xff]  }
 0x145   :  { %9170 = vmatprep.mubr.bf16.mxu0 %v16283_v8  ;;  %11204 = vmatprep.mubr.bf16.mxu1 %v16283_v8  ;;  %v16381_v8 = vld [vmem:[%s22363_s1 + $0xbcc] ss:$16 sps:$4 sm:$0xff]  }
 0x147   :  { %9244 = vmatpush1.bf16.msra.mxu0 %v16277_v9  ;;  %11278 = vmatpush1.bf16.msra.mxu1 %v16280_v10  ;;  %v16375_v9 = vld [vmem:[%s22364_s0 + $0x800] ss:$144 sps:$4 sm:$0xff]  }
 0x148   :  { %9245 = vmatprep.subr.bf16.mxu0 %v16288_v11  ;;  %11279 = vmatprep.subr.bf16.mxu1 %v16291_v12  ;;  %v16376_v10 = vld [vmem:[%s22363_s1 + $0xbc0] ss:$16 sps:$4 sm:$0xff]   ;;  %v16379_v11 = vld [vmem:[%s22363_s1 + $0xbc8] ss:$16 sps:$4 sm:$0xff]   ;;  %v16384_v12 = vld [vmem:[%s22363_s1 + $0xbe4] ss:$16 sps:$4 sm:$0xff]  }
 0x14a   :  { %9171 = vmatmul.mubr.bf16.gmra.mrb[4].mxu0 %v16285_v13  ;;  %11205 = vmatmul.mubr.bf16.gmra.mrb[4].mxu1 %v16285_v13  ;;  %v16387_v13 = vld [vmem:[%s22363_s1 + $0xbec] ss:$16 sps:$4 sm:$0xff]  }
 0x14b   :  { %9246 = vmatpush1.bf16.msra.mxu0 %v16286_v14  ;;  %11280 = vmatpush1.bf16.msra.mxu1 %v16289_v15  ;;  %v16390_v14 = vld [vmem:[%s22364_s0 + $0x2c] ss:$144 sps:$4 sm:$0xff]   ;;  %v16382_v15 = vld [vmem:[%s22363_s1 + $0xbe0] ss:$16 sps:$4 sm:$0xff]  }
 0x14c   :  { %9247 = vmatprep.subr.bf16.mxu0 %v16294_v16  ;;  %11281 = vmatprep.subr.bf16.mxu1 %v16297_v17  ;;  %v16385_v16 = vld [vmem:[%s22363_s1 + $0xbe8] ss:$16 sps:$4 sm:$0xff]   ;;  %v16393_v17 = vld [vmem:[%s22363_s1 + $0xc04] ss:$16 sps:$4 sm:$0xff]  }
 0x14d   :  { %9180 = vmatprep.mubr.bf16.mxu0 %v16298_v18  ;;  %11214 = vmatprep.mubr.bf16.mxu1 %v16298_v18  ;;  %v16396_v18 = vld [vmem:[%s22363_s1 + $0xc0c] ss:$16 sps:$4 sm:$0xff]  }
 0x14f   :  { %9248 = vmatpush1.bf16.msra.mxu0 %v16292_v19  ;;  %11282 = vmatpush1.bf16.msra.mxu1 %v16295_v20  ;;  %v16388_v19 = vld [vmem:[%s22364_s0 + $0x28] ss:$144 sps:$4 sm:$0xff]   ;;  %v16391_v20 = vld [vmem:[%s22363_s1 + $0xc00] ss:$16 sps:$4 sm:$0xff]  }
 0x150   :  { %9249 = vmatprep.subr.bf16.mxu0 %v16303_v21  ;;  %11283 = vmatprep.subr.bf16.mxu1 %v16306_v22  ;;  %v16394_v21 = vld [vmem:[%s22363_s1 + $0xc08] ss:$16 sps:$4 sm:$0xff]   ;;  %v16399_v22 = vld [vmem:[%s22363_s1 + $0xc24] ss:$16 sps:$4 sm:$0xff]  }
 0x152   :  { %9181 = vmatmul.mubr.bf16.gmra.mrb[8].mxu0 %v16300_v23  ;;  %11215 = vmatmul.mubr.bf16.gmra.mrb[8].mxu1 %v16300_v23  ;;  %v16402_v23 = vld [vmem:[%s22363_s1 + $0xc2c] ss:$16 sps:$4 sm:$0xff]  }
 0x153   :  { %9250 = vmatpush1.bf16.msra.mxu0 %v16301_v24  ;;  %11284 = vmatpush1.bf16.msra.mxu1 %v16304_v25  ;;  %v16403_v24 = vld [vmem:[%s22364_s0 + $0x14c] ss:$144 sps:$4 sm:$0xff]   ;;  %v16397_v25 = vld [vmem:[%s22363_s1 + $0xc20] ss:$16 sps:$4 sm:$0xff]  }
 0x154   :  { %9251 = vmatprep.subr.bf16.mxu0 %v16309_v26  ;;  %11285 = vmatprep.subr.bf16.mxu1 %v16312_v27  ;;  %v16400_v26 = vld [vmem:[%s22363_s1 + $0xc28] ss:$16 sps:$4 sm:$0xff]   ;;  %v16408_v27 = vld [vmem:[%s22363_s1 + $0xc44] ss:$16 sps:$4 sm:$0xff]  }
 0x155   :  { %9190 = vmatprep.mubr.bf16.mxu0 %v16313_v28  ;;  %11224 = vmatprep.mubr.bf16.mxu1 %v16313_v28  ;;  %v16411_v28 = vld [vmem:[%s22363_s1 + $0xc4c] ss:$16 sps:$4 sm:$0xff]  }
 0x157   :  { %9252 = vmatpush1.bf16.msra.mxu0 %v16307_v29  ;;  %11286 = vmatpush1.bf16.msra.mxu1 %v16310_v30  ;;  %v16405_v29 = vld [vmem:[%s22364_s0 + $0x148] ss:$144 sps:$4 sm:$0xff]   ;;  %v16406_v30 = vld [vmem:[%s22363_s1 + $0xc40] ss:$16 sps:$4 sm:$0xff]  }
 0x158   :  { %9253 = vmatprep.subr.bf16.mxu0 %v16318_v31  ;;  %11287 = vmatprep.subr.bf16.mxu1 %v16321_v32  ;;  %v16409_v31 = vld [vmem:[%s22363_s1 + $0xc48] ss:$16 sps:$4 sm:$0xff]   ;;  %v16414_v32 = vld [vmem:[%s22363_s1 + $0xc64] ss:$16 sps:$4 sm:$0xff]  }
 0x15a   :  { %9191 = vmatmul.mubr.bf16.gmra.mrb[12].mxu0 %v16315_v33  ;;  %11225 = vmatmul.mubr.bf16.gmra.mrb[12].mxu1 %v16315_v33  ;;  %v16417_v33 = vld [vmem:[%s22363_s1 + $0xc6c] ss:$16 sps:$4 sm:$0xff]  }
 0x15b   :  { %9254 = vmatpush1.bf16.msra.mxu0 %v16316_v34  ;;  %11288 = vmatpush1.bf16.msra.mxu1 %v16319_v35  ;;  %v16418_v34 = vld [vmem:[%s22364_s0 + $0x26c] ss:$144 sps:$4 sm:$0xff]   ;;  %v16412_v35 = vld [vmem:[%s22363_s1 + $0xc60] ss:$16 sps:$4 sm:$0xff]  }
 0x15c   :  { %9255 = vmatprep.subr.bf16.mxu0 %v16324_v36  ;;  %11289 = vmatprep.subr.bf16.mxu1 %v16327_v37  ;;  %v16415_v36 = vld [vmem:[%s22363_s1 + $0xc68] ss:$16 sps:$4 sm:$0xff]   ;;  %v16423_v37 = vld [vmem:[%s22363_s1 + $0xc84] ss:$16 sps:$4 sm:$0xff]  }
 0x15d   :  { %9200 = vmatprep.mubr.bf16.mxu0 %v16328_v38  ;;  %11234 = vmatprep.mubr.bf16.mxu1 %v16328_v38  ;;  %v16426_v38 = vld [vmem:[%s22363_s1 + $0xc8c] ss:$16 sps:$4 sm:$0xff]  }
 0x15f   :  { %9256 = vmatpush1.bf16.msra.mxu0 %v16322_v39  ;;  %11290 = vmatpush1.bf16.msra.mxu1 %v16325_v40  ;;  %v16420_v39 = vld [vmem:[%s22364_s0 + $0x268] ss:$144 sps:$4 sm:$0xff]   ;;  %v16421_v40 = vld [vmem:[%s22363_s1 + $0xc80] ss:$16 sps:$4 sm:$0xff]  }
 0x160   :  { %9257 = vmatprep.subr.bf16.mxu0 %v16333_v41  ;;  %11291 = vmatprep.subr.bf16.mxu1 %v16336_v42  ;;  %v16424_v41 = vld [vmem:[%s22363_s1 + $0xc88] ss:$16 sps:$4 sm:$0xff]   ;;  %v16429_v42 = vld [vmem:[%s22363_s1 + $0xca4] ss:$16 sps:$4 sm:$0xff]  }
 0x162   :  { %9201 = vmatmul.mubr.bf16.gmra.mrb[16].mxu0 %v16330_v43  ;;  %11235 = vmatmul.mubr.bf16.gmra.mrb[16].mxu1 %v16330_v43  ;;  %v16432_v43 = vld [vmem:[%s22363_s1 + $0xcac] ss:$16 sps:$4 sm:$0xff]  }
 0x163   :  { %9258 = vmatpush1.bf16.msra.mxu0 %v16331_v44  ;;  %11292 = vmatpush1.bf16.msra.mxu1 %v16334_v45  ;;  %v16433_v44 = vld [vmem:[%s22364_s0 + $0x38c] ss:$144 sps:$4 sm:$0xff]   ;;  %v16427_v45 = vld [vmem:[%s22363_s1 + $0xca0] ss:$16 sps:$4 sm:$0xff]  }
 0x164   :  { %9259 = vmatprep.subr.bf16.mxu0 %v16339_v46  ;;  %11293 = vmatprep.subr.bf16.mxu1 %v16342_v47  ;;  %v16430_v46 = vld [vmem:[%s22363_s1 + $0xca8] ss:$16 sps:$4 sm:$0xff]   ;;  %v16438_v47 = vld [vmem:[%s22363_s1 + $0xcc4] ss:$16 sps:$4 sm:$0xff]  }
 0x165   :  { %9210 = vmatprep.mubr.bf16.mxu0 %v16343_v48  ;;  %11244 = vmatprep.mubr.bf16.mxu1 %v16343_v48  ;;  %v16441_v48 = vld [vmem:[%s22363_s1 + $0xccc] ss:$16 sps:$4 sm:$0xff]  }
 0x167   :  { %9260 = vmatpush1.bf16.msra.mxu0 %v16337_v49  ;;  %11294 = vmatpush1.bf16.msra.mxu1 %v16340_v50  ;;  %v16435_v49 = vld [vmem:[%s22364_s0 + $0x388] ss:$144 sps:$4 sm:$0xff]   ;;  %v16436_v50 = vld [vmem:[%s22363_s1 + $0xcc0] ss:$16 sps:$4 sm:$0xff]  }
 0x168   :  { %9261 = vmatprep.subr.bf16.mxu0 %v16348_v51  ;;  %11295 = vmatprep.subr.bf16.mxu1 %v16351_v52  ;;  %v16439_v51 = vld [vmem:[%s22363_s1 + $0xcc8] ss:$16 sps:$4 sm:$0xff]   ;;  %v16444_v52 = vld [vmem:[%s22363_s1 + $0xce4] ss:$16 sps:$4 sm:$0xff]  }
 0x16a   :  { %9211 = vmatmul.mubr.bf16.gmra.mrb[20].mxu0 %v16345_v53  ;;  %11245 = vmatmul.mubr.bf16.gmra.mrb[20].mxu1 %v16345_v53  ;;  %v16447_v53 = vld [vmem:[%s22363_s1 + $0xcec] ss:$16 sps:$4 sm:$0xff]  }
 0x16b   :  { %9262 = vmatpush1.bf16.msra.mxu0 %v16346_v54  ;;  %11296 = vmatpush1.bf16.msra.mxu1 %v16349_v55  ;;  %v16448_v54 = vld [vmem:[%s22364_s0 + $0x4ac] ss:$144 sps:$4 sm:$0xff]   ;;  %v16442_v55 = vld [vmem:[%s22363_s1 + $0xce0] ss:$16 sps:$4 sm:$0xff]  }
 0x16c   :  { %9263 = vmatprep.subr.bf16.mxu0 %v16354_v56  ;;  %11297 = vmatprep.subr.bf16.mxu1 %v16357_v57  ;;  %v16445_v56 = vld [vmem:[%s22363_s1 + $0xce8] ss:$16 sps:$4 sm:$0xff]   ;;  %v16453_v57 = vld [vmem:[%s22363_s1 + $0xd04] ss:$16 sps:$4 sm:$0xff]  }
 0x16d   :  { %9220 = vmatprep.mubr.bf16.mxu0 %v16358_v58  ;;  %11254 = vmatprep.mubr.bf16.mxu1 %v16358_v58  ;;  %v16456_v58 = vld [vmem:[%s22363_s1 + $0xd0c] ss:$16 sps:$4 sm:$0xff]  }
 0x16f   :  { %9264 = vmatpush1.bf16.msra.mxu0 %v16352_v59  ;;  %11298 = vmatpush1.bf16.msra.mxu1 %v16355_v60  ;;  %v16450_v59 = vld [vmem:[%s22364_s0 + $0x4a8] ss:$144 sps:$4 sm:$0xff]   ;;  %v16451_v60 = vld [vmem:[%s22363_s1 + $0xd00] ss:$16 sps:$4 sm:$0xff]  }
 0x170   :  { %9265 = vmatprep.subr.bf16.mxu0 %v16363_v61  ;;  %11299 = vmatprep.subr.bf16.mxu1 %v16366_v62  ;;  %v16454_v61 = vld [vmem:[%s22363_s1 + $0xd08] ss:$16 sps:$4 sm:$0xff]   ;;  %v16459_v62 = vld [vmem:[%s22363_s1 + $0xd24] ss:$16 sps:$4 sm:$0xff]  }
 0x172   :  { %9221 = vmatmul.mubr.bf16.gmra.mrb[24].mxu0 %v16360_v63  ;;  %11255 = vmatmul.mubr.bf16.gmra.mrb[24].mxu1 %v16360_v63  ;;  %v16462_v63 = vld [vmem:[%s22363_s1 + $0xd2c] ss:$16 sps:$4 sm:$0xff]  }
 0x173   :  { %9266 = vmatpush1.bf16.msra.mxu0 %v16361_v0  ;;  %11300 = vmatpush1.bf16.msra.mxu1 %v16364_v1  ;;  %v16463_v0 = vld [vmem:[%s22364_s0 + $0x5cc] ss:$144 sps:$4 sm:$0xff]   ;;  %v16457_v1 = vld [vmem:[%s22363_s1 + $0xd20] ss:$16 sps:$4 sm:$0xff]  }
 0x174   :  { %9267 = vmatprep.subr.bf16.mxu0 %v16369_v2  ;;  %11301 = vmatprep.subr.bf16.mxu1 %v16372_v3  ;;  %v16460_v2 = vld [vmem:[%s22363_s1 + $0xd28] ss:$16 sps:$4 sm:$0xff]   ;;  %v16468_v3 = vld [vmem:[%s22363_s1 + $0xd44] ss:$16 sps:$4 sm:$0xff]  }
 0x175   :  { %9230 = vmatprep.mubr.bf16.mxu0 %v16373_v4  ;;  %11264 = vmatprep.mubr.bf16.mxu1 %v16373_v4  ;;  %v16471_v4 = vld [vmem:[%s22363_s1 + $0xd4c] ss:$16 sps:$4 sm:$0xff]  }
 0x177   :  { %9268 = vmatpush1.bf16.msra.mxu0 %v16367_v5  ;;  %11302 = vmatpush1.bf16.msra.mxu1 %v16370_v6  ;;  %v16465_v5 = vld [vmem:[%s22364_s0 + $0x5c8] ss:$144 sps:$4 sm:$0xff]   ;;  %v16466_v6 = vld [vmem:[%s22363_s1 + $0xd40] ss:$16 sps:$4 sm:$0xff]  }
 0x178   :  { %9269 = vmatprep.subr.bf16.mxu0 %v16378_v7  ;;  %11303 = vmatprep.subr.bf16.mxu1 %v16381_v8  ;;  %v16469_v7 = vld [vmem:[%s22363_s1 + $0xd48] ss:$16 sps:$4 sm:$0xff]   ;;  %v16474_v8 = vld [vmem:[%s22363_s1 + $0xd64] ss:$16 sps:$4 sm:$0xff]  }
 0x17a   :  { %9231 = vmatmul.mubr.bf16.gmra.mrb[28].mxu0 %v16375_v9  ;;  %11265 = vmatmul.mubr.bf16.gmra.mrb[28].mxu1 %v16375_v9  ;;  %v16477_v9 = vld [vmem:[%s22363_s1 + $0xd6c] ss:$16 sps:$4 sm:$0xff]  }
 0x17b   :  { %9270 = vmatpush1.bf16.msra.mxu0 %v16376_v10  ;;  %11304 = vmatpush1.bf16.msra.mxu1 %v16379_v11  ;;  %v16478_v10 = vld [vmem:[%s22364_s0 + $0x6ec] ss:$144 sps:$4 sm:$0xff]   ;;  %v16472_v11 = vld [vmem:[%s22363_s1 + $0xd60] ss:$16 sps:$4 sm:$0xff]  }
 0x17c   :  { %9271 = vmatprep.subr.bf16.mxu0 %v16384_v12  ;;  %11305 = vmatprep.subr.bf16.mxu1 %v16387_v13  ;;  %v16475_v12 = vld [vmem:[%s22363_s1 + $0xd68] ss:$16 sps:$4 sm:$0xff]   ;;  %v16483_v13 = vld [vmem:[%s22363_s1 + $0xd84] ss:$16 sps:$4 sm:$0xff]  }
 0x17d   :  { %9273 = vmatprep.mubr.bf16.mxu0 %v16390_v14  ;;  %11307 = vmatprep.mubr.bf16.mxu1 %v16390_v14  ;;  %v16486_v14 = vld [vmem:[%s22363_s1 + $0xd8c] ss:$16 sps:$4 sm:$0xff]  }
 0x17f   :  { %9272 = vmatpush1.bf16.msra.mxu0 %v16382_v15  ;;  %11306 = vmatpush1.bf16.msra.mxu1 %v16385_v16  ;;  %v16480_v15 = vld [vmem:[%s22364_s0 + $0x6e8] ss:$144 sps:$4 sm:$0xff]   ;;  %v16481_v16 = vld [vmem:[%s22363_s1 + $0xd80] ss:$16 sps:$4 sm:$0xff]  }
 0x180   :  { %9354 = vmatprep.subr.bf16.mxu0 %v16393_v17  ;;  %11388 = vmatprep.subr.bf16.mxu1 %v16396_v18  ;;  %v16484_v17 = vld [vmem:[%s22363_s1 + $0xd88] ss:$16 sps:$4 sm:$0xff]   ;;  %v16489_v18 = vld [vmem:[%s22363_s1 + $0xda4] ss:$16 sps:$4 sm:$0xff]  }
 0x182   :  { %9274 = vmatmul.mubr.bf16.vlgmr.msra.gmra.mrb[0].mxu0 %v16388_v19  ;;  %11308 = vmatmul.mubr.bf16.vlgmr.msra.gmra.mrb[0].mxu1 %v16388_v19  ;;  %v16492_v19 = vld [vmem:[%s22363_s1 + $0xdac] ss:$16 sps:$4 sm:$0xff]  }
 0x183   :  { %9355 = vmatpush1.bf16.msra.mxu0 %v16391_v20  ;;  %11389 = vmatpush1.bf16.msra.mxu1 %v16394_v21  ;;  %v16493_v20 = vld [vmem:[%s22364_s0 + $0x80c] ss:$144 sps:$4 sm:$0xff]   ;;  %v16487_v21 = vld [vmem:[%s22363_s1 + $0xda0] ss:$16 sps:$4 sm:$0xff]  }
 0x184   :  { %9356 = vmatprep.subr.bf16.mxu0 %v16399_v22  ;;  %11390 = vmatprep.subr.bf16.mxu1 %v16402_v23  ;;  %v16490_v22 = vld [vmem:[%s22363_s1 + $0xda8] ss:$16 sps:$4 sm:$0xff]   ;;  %v16498_v23 = vld [vmem:[%s22363_s1 + $0xdc4] ss:$16 sps:$4 sm:$0xff]  }
 0x185   :  { %9283 = vmatprep.mubr.bf16.mxu0 %v16403_v24  ;;  %11317 = vmatprep.mubr.bf16.mxu1 %v16403_v24  ;;  %v16501_v24 = vld [vmem:[%s22363_s1 + $0xdcc] ss:$16 sps:$4 sm:$0xff]  }
 0x187   :  { %9357 = vmatpush1.bf16.msra.mxu0 %v16397_v25  ;;  %11391 = vmatpush1.bf16.msra.mxu1 %v16400_v26  ;;  %v16495_v25 = vld [vmem:[%s22364_s0 + $0x808] ss:$144 sps:$4 sm:$0xff]   ;;  %v16496_v26 = vld [vmem:[%s22363_s1 + $0xdc0] ss:$16 sps:$4 sm:$0xff]  }
 0x188   :  { %9358 = vmatprep.subr.bf16.mxu0 %v16408_v27  ;;  %11392 = vmatprep.subr.bf16.mxu1 %v16411_v28  ;;  %v16499_v27 = vld [vmem:[%s22363_s1 + $0xdc8] ss:$16 sps:$4 sm:$0xff]   ;;  %v16504_v28 = vld [vmem:[%s22363_s1 + $0xde4] ss:$16 sps:$4 sm:$0xff]  }
 0x18a   :  { %9284 = vmatmul.mubr.bf16.gmra.mrb[4].mxu0 %v16405_v29  ;;  %11318 = vmatmul.mubr.bf16.gmra.mrb[4].mxu1 %v16405_v29  ;;  %v16507_v29 = vld [vmem:[%s22363_s1 + $0xdec] ss:$16 sps:$4 sm:$0xff]  }
 0x18b   :  { %9359 = vmatpush1.bf16.msra.mxu0 %v16406_v30  ;;  %11393 = vmatpush1.bf16.msra.mxu1 %v16409_v31  ;;  %v16510_v30 = vld [vmem:[%s22364_s0 + $0x34] ss:$144 sps:$4 sm:$0xff]   ;;  %v16502_v31 = vld [vmem:[%s22363_s1 + $0xde0] ss:$16 sps:$4 sm:$0xff]  }
 0x18c   :  { %9360 = vmatprep.subr.bf16.mxu0 %v16414_v32  ;;  %11394 = vmatprep.subr.bf16.mxu1 %v16417_v33  ;;  %v16505_v32 = vld [vmem:[%s22363_s1 + $0xde8] ss:$16 sps:$4 sm:$0xff]   ;;  %v16513_v33 = vld [vmem:[%s22363_s1 + $0xe04] ss:$16 sps:$4 sm:$0xff]  }
 0x18d   :  { %9293 = vmatprep.mubr.bf16.mxu0 %v16418_v34  ;;  %11327 = vmatprep.mubr.bf16.mxu1 %v16418_v34  ;;  %v16516_v34 = vld [vmem:[%s22363_s1 + $0xe0c] ss:$16 sps:$4 sm:$0xff]  }
 0x18f   :  { %9361 = vmatpush1.bf16.msra.mxu0 %v16412_v35  ;;  %11395 = vmatpush1.bf16.msra.mxu1 %v16415_v36  ;;  %v16508_v35 = vld [vmem:[%s22364_s0 + $0x30] ss:$144 sps:$4 sm:$0xff]  }
 0x190   :  { %9362 = vmatprep.subr.bf16.mxu0 %v16423_v37  ;;  %11396 = vmatprep.subr.bf16.mxu1 %v16426_v38  ;;  %v16511_v36 = vld [vmem:[%s22363_s1 + $0xe00] ss:$16 sps:$4 sm:$0xff]   ;;  %v16514_v37 = vld [vmem:[%s22363_s1 + $0xe08] ss:$16 sps:$4 sm:$0xff]   ;;  %v16519_v38 = vld [vmem:[%s22363_s1 + $0xe24] ss:$16 sps:$4 sm:$0xff]  }
 0x192   :  { %9294 = vmatmul.mubr.bf16.gmra.mrb[8].mxu0 %v16420_v39  ;;  %11328 = vmatmul.mubr.bf16.gmra.mrb[8].mxu1 %v16420_v39  ;;  %v16522_v39 = vld [vmem:[%s22363_s1 + $0xe2c] ss:$16 sps:$4 sm:$0xff]  }
 0x193   :  { %9363 = vmatpush1.bf16.msra.mxu0 %v16421_v40  ;;  %11397 = vmatpush1.bf16.msra.mxu1 %v16424_v41  ;;  %v16523_v40 = vld [vmem:[%s22364_s0 + $0x154] ss:$144 sps:$4 sm:$0xff]   ;;  %v16517_v41 = vld [vmem:[%s22363_s1 + $0xe20] ss:$16 sps:$4 sm:$0xff]  }
 0x194   :  { %9364 = vmatprep.subr.bf16.mxu0 %v16429_v42  ;;  %11398 = vmatprep.subr.bf16.mxu1 %v16432_v43  ;;  %v16520_v42 = vld [vmem:[%s22363_s1 + $0xe28] ss:$16 sps:$4 sm:$0xff]   ;;  %v16528_v43 = vld [vmem:[%s22363_s1 + $0xe44] ss:$16 sps:$4 sm:$0xff]  }
 0x195   :  { %9303 = vmatprep.mubr.bf16.mxu0 %v16433_v44  ;;  %11337 = vmatprep.mubr.bf16.mxu1 %v16433_v44  ;;  %v16531_v44 = vld [vmem:[%s22363_s1 + $0xe4c] ss:$16 sps:$4 sm:$0xff]  }
 0x197   :  { %9365 = vmatpush1.bf16.msra.mxu0 %v16427_v45  ;;  %11399 = vmatpush1.bf16.msra.mxu1 %v16430_v46  ;;  %v16525_v45 = vld [vmem:[%s22364_s0 + $0x150] ss:$144 sps:$4 sm:$0xff]  }
 0x198   :  { %9366 = vmatprep.subr.bf16.mxu0 %v16438_v47  ;;  %11400 = vmatprep.subr.bf16.mxu1 %v16441_v48  ;;  %v16526_v46 = vld [vmem:[%s22363_s1 + $0xe40] ss:$16 sps:$4 sm:$0xff]   ;;  %v16529_v47 = vld [vmem:[%s22363_s1 + $0xe48] ss:$16 sps:$4 sm:$0xff]   ;;  %v16534_v48 = vld [vmem:[%s22363_s1 + $0xe64] ss:$16 sps:$4 sm:$0xff]  }
 0x19a   :  { %9304 = vmatmul.mubr.bf16.gmra.mrb[12].mxu0 %v16435_v49  ;;  %11338 = vmatmul.mubr.bf16.gmra.mrb[12].mxu1 %v16435_v49  ;;  %v16537_v49 = vld [vmem:[%s22363_s1 + $0xe6c] ss:$16 sps:$4 sm:$0xff]  }
 0x19b   :  { %9367 = vmatpush1.bf16.msra.mxu0 %v16436_v50  ;;  %11401 = vmatpush1.bf16.msra.mxu1 %v16439_v51  ;;  %v16538_v50 = vld [vmem:[%s22364_s0 + $0x274] ss:$144 sps:$4 sm:$0xff]   ;;  %v16532_v51 = vld [vmem:[%s22363_s1 + $0xe60] ss:$16 sps:$4 sm:$0xff]  }
 0x19c   :  { %9368 = vmatprep.subr.bf16.mxu0 %v16444_v52  ;;  %11402 = vmatprep.subr.bf16.mxu1 %v16447_v53  ;;  %v16535_v52 = vld [vmem:[%s22363_s1 + $0xe68] ss:$16 sps:$4 sm:$0xff]   ;;  %v16543_v53 = vld [vmem:[%s22363_s1 + $0xe84] ss:$16 sps:$4 sm:$0xff]  }
 0x19d   :  { %9313 = vmatprep.mubr.bf16.mxu0 %v16448_v54  ;;  %11347 = vmatprep.mubr.bf16.mxu1 %v16448_v54  ;;  %v16546_v54 = vld [vmem:[%s22363_s1 + $0xe8c] ss:$16 sps:$4 sm:$0xff]  }
 0x19f   :  { %9369 = vmatpush1.bf16.msra.mxu0 %v16442_v55  ;;  %11403 = vmatpush1.bf16.msra.mxu1 %v16445_v56  ;;  %v16540_v55 = vld [vmem:[%s22364_s0 + $0x270] ss:$144 sps:$4 sm:$0xff]  }
 0x1a0   :  { %9370 = vmatprep.subr.bf16.mxu0 %v16453_v57  ;;  %11404 = vmatprep.subr.bf16.mxu1 %v16456_v58  ;;  %v16541_v56 = vld [vmem:[%s22363_s1 + $0xe80] ss:$16 sps:$4 sm:$0xff]   ;;  %v16544_v57 = vld [vmem:[%s22363_s1 + $0xe88] ss:$16 sps:$4 sm:$0xff]   ;;  %v16549_v58 = vld [vmem:[%s22363_s1 + $0xea4] ss:$16 sps:$4 sm:$0xff]  }
 0x1a2   :  { %9314 = vmatmul.mubr.bf16.gmra.mrb[16].mxu0 %v16450_v59  ;;  %11348 = vmatmul.mubr.bf16.gmra.mrb[16].mxu1 %v16450_v59  ;;  %v16552_v59 = vld [vmem:[%s22363_s1 + $0xeac] ss:$16 sps:$4 sm:$0xff]  }
 0x1a3   :  { %9371 = vmatpush1.bf16.msra.mxu0 %v16451_v60  ;;  %11405 = vmatpush1.bf16.msra.mxu1 %v16454_v61  ;;  %v16553_v60 = vld [vmem:[%s22364_s0 + $0x394] ss:$144 sps:$4 sm:$0xff]   ;;  %v16547_v61 = vld [vmem:[%s22363_s1 + $0xea0] ss:$16 sps:$4 sm:$0xff]  }
 0x1a4   :  { %9372 = vmatprep.subr.bf16.mxu0 %v16459_v62  ;;  %11406 = vmatprep.subr.bf16.mxu1 %v16462_v63  ;;  %v16550_v62 = vld [vmem:[%s22363_s1 + $0xea8] ss:$16 sps:$4 sm:$0xff]   ;;  %v16558_v63 = vld [vmem:[%s22363_s1 + $0xec4] ss:$16 sps:$4 sm:$0xff]  }
 0x1a5   :  { %9323 = vmatprep.mubr.bf16.mxu0 %v16463_v0  ;;  %11357 = vmatprep.mubr.bf16.mxu1 %v16463_v0  ;;  %v16561_v0 = vld [vmem:[%s22363_s1 + $0xecc] ss:$16 sps:$4 sm:$0xff]  }
 0x1a7   :  { %9373 = vmatpush1.bf16.msra.mxu0 %v16457_v1  ;;  %11407 = vmatpush1.bf16.msra.mxu1 %v16460_v2  ;;  %v16555_v1 = vld [vmem:[%s22364_s0 + $0x390] ss:$144 sps:$4 sm:$0xff]  }
 0x1a8   :  { %9374 = vmatprep.subr.bf16.mxu0 %v16468_v3  ;;  %11408 = vmatprep.subr.bf16.mxu1 %v16471_v4  ;;  %v16556_v2 = vld [vmem:[%s22363_s1 + $0xec0] ss:$16 sps:$4 sm:$0xff]   ;;  %v16559_v3 = vld [vmem:[%s22363_s1 + $0xec8] ss:$16 sps:$4 sm:$0xff]   ;;  %v16564_v4 = vld [vmem:[%s22363_s1 + $0xee4] ss:$16 sps:$4 sm:$0xff]  }
 0x1aa   :  { %9324 = vmatmul.mubr.bf16.gmra.mrb[20].mxu0 %v16465_v5  ;;  %11358 = vmatmul.mubr.bf16.gmra.mrb[20].mxu1 %v16465_v5  ;;  %v16567_v5 = vld [vmem:[%s22363_s1 + $0xeec] ss:$16 sps:$4 sm:$0xff]  }
 0x1ab   :  { %9375 = vmatpush1.bf16.msra.mxu0 %v16466_v6  ;;  %11409 = vmatpush1.bf16.msra.mxu1 %v16469_v7  ;;  %v16568_v6 = vld [vmem:[%s22364_s0 + $0x4b4] ss:$144 sps:$4 sm:$0xff]   ;;  %v16562_v7 = vld [vmem:[%s22363_s1 + $0xee0] ss:$16 sps:$4 sm:$0xff]  }
 0x1ac   :  { %9376 = vmatprep.subr.bf16.mxu0 %v16474_v8  ;;  %11410 = vmatprep.subr.bf16.mxu1 %v16477_v9  ;;  %v16565_v8 = vld [vmem:[%s22363_s1 + $0xee8] ss:$16 sps:$4 sm:$0xff]   ;;  %v16573_v9 = vld [vmem:[%s22363_s1 + $0xf04] ss:$16 sps:$4 sm:$0xff]  }
 0x1ad   :  { %9333 = vmatprep.mubr.bf16.mxu0 %v16478_v10  ;;  %11367 = vmatprep.mubr.bf16.mxu1 %v16478_v10  ;;  %v16576_v10 = vld [vmem:[%s22363_s1 + $0xf0c] ss:$16 sps:$4 sm:$0xff]  }
 0x1af   :  { %9377 = vmatpush1.bf16.msra.mxu0 %v16472_v11  ;;  %11411 = vmatpush1.bf16.msra.mxu1 %v16475_v12  ;;  %v16570_v11 = vld [vmem:[%s22364_s0 + $0x4b0] ss:$144 sps:$4 sm:$0xff]  }
 0x1b0   :  { %9378 = vmatprep.subr.bf16.mxu0 %v16483_v13  ;;  %11412 = vmatprep.subr.bf16.mxu1 %v16486_v14  ;;  %v16571_v12 = vld [vmem:[%s22363_s1 + $0xf00] ss:$16 sps:$4 sm:$0xff]   ;;  %v16574_v13 = vld [vmem:[%s22363_s1 + $0xf08] ss:$16 sps:$4 sm:$0xff]   ;;  %v16579_v14 = vld [vmem:[%s22363_s1 + $0xf24] ss:$16 sps:$4 sm:$0xff]  }
 0x1b2   :  { %9334 = vmatmul.mubr.bf16.gmra.mrb[24].mxu0 %v16480_v15  ;;  %11368 = vmatmul.mubr.bf16.gmra.mrb[24].mxu1 %v16480_v15  ;;  %v16582_v15 = vld [vmem:[%s22363_s1 + $0xf2c] ss:$16 sps:$4 sm:$0xff]  }
 0x1b3   :  { %9379 = vmatpush1.bf16.msra.mxu0 %v16481_v16  ;;  %11413 = vmatpush1.bf16.msra.mxu1 %v16484_v17  ;;  %v16583_v16 = vld [vmem:[%s22364_s0 + $0x5d4] ss:$144 sps:$4 sm:$0xff]   ;;  %v16577_v17 = vld [vmem:[%s22363_s1 + $0xf20] ss:$16 sps:$4 sm:$0xff]  }
 0x1b4   :  { %9380 = vmatprep.subr.bf16.mxu0 %v16489_v18  ;;  %11414 = vmatprep.subr.bf16.mxu1 %v16492_v19  ;;  %v16580_v18 = vld [vmem:[%s22363_s1 + $0xf28] ss:$16 sps:$4 sm:$0xff]   ;;  %v16588_v19 = vld [vmem:[%s22363_s1 + $0xf44] ss:$16 sps:$4 sm:$0xff]  }
 0x1b5   :  { %9343 = vmatprep.mubr.bf16.mxu0 %v16493_v20  ;;  %11377 = vmatprep.mubr.bf16.mxu1 %v16493_v20  ;;  %v16591_v20 = vld [vmem:[%s22363_s1 + $0xf4c] ss:$16 sps:$4 sm:$0xff]  }
 0x1b7   :  { %9381 = vmatpush1.bf16.msra.mxu0 %v16487_v21  ;;  %11415 = vmatpush1.bf16.msra.mxu1 %v16490_v22  ;;  %v16585_v21 = vld [vmem:[%s22364_s0 + $0x5d0] ss:$144 sps:$4 sm:$0xff]  }
 0x1b8   :  { %9382 = vmatprep.subr.bf16.mxu0 %v16498_v23  ;;  %11416 = vmatprep.subr.bf16.mxu1 %v16501_v24  ;;  %v16586_v22 = vld [vmem:[%s22363_s1 + $0xf40] ss:$16 sps:$4 sm:$0xff]   ;;  %v16589_v23 = vld [vmem:[%s22363_s1 + $0xf48] ss:$16 sps:$4 sm:$0xff]   ;;  %v16594_v24 = vld [vmem:[%s22363_s1 + $0xf64] ss:$16 sps:$4 sm:$0xff]  }
 0x1ba   :  { %9344 = vmatmul.mubr.bf16.gmra.mrb[28].mxu0 %v16495_v25  ;;  %11378 = vmatmul.mubr.bf16.gmra.mrb[28].mxu1 %v16495_v25  ;;  %v16597_v25 = vld [vmem:[%s22363_s1 + $0xf6c] ss:$16 sps:$4 sm:$0xff]  }
 0x1bb   :  { %9383 = vmatpush1.bf16.msra.mxu0 %v16496_v26  ;;  %11417 = vmatpush1.bf16.msra.mxu1 %v16499_v27  ;;  %v16598_v26 = vld [vmem:[%s22364_s0 + $0x6f4] ss:$144 sps:$4 sm:$0xff]   ;;  %v16592_v27 = vld [vmem:[%s22363_s1 + $0xf60] ss:$16 sps:$4 sm:$0xff]  }
 0x1bc   :  { %9384 = vmatprep.subr.bf16.mxu0 %v16504_v28  ;;  %11418 = vmatprep.subr.bf16.mxu1 %v16507_v29  ;;  %v16595_v28 = vld [vmem:[%s22363_s1 + $0xf68] ss:$16 sps:$4 sm:$0xff]   ;;  %v16603_v29 = vld [vmem:[%s22363_s1 + $0xf84] ss:$16 sps:$4 sm:$0xff]  }
 0x1bd   :  { %9386 = vmatprep.mubr.bf16.mxu0 %v16510_v30  ;;  %11420 = vmatprep.mubr.bf16.mxu1 %v16510_v30  ;;  %v16606_v30 = vld [vmem:[%s22363_s1 + $0xf8c] ss:$16 sps:$4 sm:$0xff]  }
 0x1bf   :  { %9385 = vmatpush1.bf16.msra.mxu0 %v16502_v31  ;;  %11419 = vmatpush1.bf16.msra.mxu1 %v16505_v32  ;;  %v16600_v31 = vld [vmem:[%s22364_s0 + $0x6f0] ss:$144 sps:$4 sm:$0xff]  }
 0x1c0   :  { %9467 = vmatprep.subr.bf16.mxu0 %v16513_v33  ;;  %11501 = vmatprep.subr.bf16.mxu1 %v16516_v34  ;;  %v16601_v32 = vld [vmem:[%s22363_s1 + $0xf80] ss:$16 sps:$4 sm:$0xff]   ;;  %v16604_v33 = vld [vmem:[%s22363_s1 + $0xf88] ss:$16 sps:$4 sm:$0xff]   ;;  %v16609_v34 = vld [vmem:[%s22363_s1 + $0xfa4] ss:$16 sps:$4 sm:$0xff]  }
 0x1c2   :  { %9387 = vmatmul.mubr.bf16.vlgmr.msra.gmra.mrb[0].mxu0 %v16508_v35  ;;  %11421 = vmatmul.mubr.bf16.vlgmr.msra.gmra.mrb[0].mxu1 %v16508_v35  ;;  %v16612_v35 = vld [vmem:[%s22363_s1 + $0xfac] ss:$16 sps:$4 sm:$0xff]  }
 0x1c3   :  { %9468 = vmatpush1.bf16.msra.mxu0 %v16511_v36  ;;  %11502 = vmatpush1.bf16.msra.mxu1 %v16514_v37  ;;  %v16613_v36 = vld [vmem:[%s22364_s0 + $0x814] ss:$144 sps:$4 sm:$0xff]   ;;  %v16607_v37 = vld [vmem:[%s22363_s1 + $0xfa0] ss:$16 sps:$4 sm:$0xff]  }
 0x1c4   :  { %9469 = vmatprep.subr.bf16.mxu0 %v16519_v38  ;;  %11503 = vmatprep.subr.bf16.mxu1 %v16522_v39  ;;  %v16610_v38 = vld [vmem:[%s22363_s1 + $0xfa8] ss:$16 sps:$4 sm:$0xff]   ;;  %v16618_v39 = vld [vmem:[%s22363_s1 + $0xfc4] ss:$16 sps:$4 sm:$0xff]  }
 0x1c5   :  { %9396 = vmatprep.mubr.bf16.mxu0 %v16523_v40  ;;  %11430 = vmatprep.mubr.bf16.mxu1 %v16523_v40  ;;  %v16621_v40 = vld [vmem:[%s22363_s1 + $0xfcc] ss:$16 sps:$4 sm:$0xff]  }
 0x1c7   :  { %9470 = vmatpush1.bf16.msra.mxu0 %v16517_v41  ;;  %11504 = vmatpush1.bf16.msra.mxu1 %v16520_v42  ;;  %v16615_v41 = vld [vmem:[%s22364_s0 + $0x810] ss:$144 sps:$4 sm:$0xff]  }
 0x1c8   :  { %9471 = vmatprep.subr.bf16.mxu0 %v16528_v43  ;;  %11505 = vmatprep.subr.bf16.mxu1 %v16531_v44  ;;  %v16616_v42 = vld [vmem:[%s22363_s1 + $0xfc0] ss:$16 sps:$4 sm:$0xff]   ;;  %v16619_v43 = vld [vmem:[%s22363_s1 + $0xfc8] ss:$16 sps:$4 sm:$0xff]   ;;  %v16624_v44 = vld [vmem:[%s22363_s1 + $0xfe4] ss:$16 sps:$4 sm:$0xff]  }
 0x1ca   :  { %9397 = vmatmul.mubr.bf16.gmra.mrb[4].mxu0 %v16525_v45  ;;  %11431 = vmatmul.mubr.bf16.gmra.mrb[4].mxu1 %v16525_v45  ;;  %v16627_v45 = vld [vmem:[%s22363_s1 + $0xfec] ss:$16 sps:$4 sm:$0xff]  }
 0x1cb   :  { %9472 = vmatpush1.bf16.msra.mxu0 %v16526_v46  ;;  %11506 = vmatpush1.bf16.msra.mxu1 %v16529_v47  ;;  %v16630_v46 = vld [vmem:[%s22364_s0 + $0x3c] ss:$144 sps:$4 sm:$0xff]   ;;  %v16622_v47 = vld [vmem:[%s22363_s1 + $0xfe0] ss:$16 sps:$4 sm:$0xff]  }
 0x1cc   :  { %9473 = vmatprep.subr.bf16.mxu0 %v16534_v48  ;;  %11507 = vmatprep.subr.bf16.mxu1 %v16537_v49  ;;  %v16625_v48 = vld [vmem:[%s22363_s1 + $0xfe8] ss:$16 sps:$4 sm:$0xff]   ;;  %v16633_v49 = vld [vmem:[%s22363_s1 + $0x1004] ss:$16 sps:$4 sm:$0xff]  }
 0x1cd   :  { %9406 = vmatprep.mubr.bf16.mxu0 %v16538_v50  ;;  %11440 = vmatprep.mubr.bf16.mxu1 %v16538_v50  ;;  %v16636_v50 = vld [vmem:[%s22363_s1 + $0x100c] ss:$16 sps:$4 sm:$0xff]  }
 0x1cf   :  { %9474 = vmatpush1.bf16.msra.mxu0 %v16532_v51  ;;  %11508 = vmatpush1.bf16.msra.mxu1 %v16535_v52  ;;  %v16628_v51 = vld [vmem:[%s22364_s0 + $0x38] ss:$144 sps:$4 sm:$0xff]   ;;  %v16631_v52 = vld [vmem:[%s22363_s1 + $0x1000] ss:$16 sps:$4 sm:$0xff]  }
 0x1d0   :  { %9475 = vmatprep.subr.bf16.mxu0 %v16543_v53  ;;  %11509 = vmatprep.subr.bf16.mxu1 %v16546_v54  ;;  %v16634_v53 = vld [vmem:[%s22363_s1 + $0x1008] ss:$16 sps:$4 sm:$0xff]   ;;  %v16639_v54 = vld [vmem:[%s22363_s1 + $0x1024] ss:$16 sps:$4 sm:$0xff]  }
 0x1d2   :  { %9407 = vmatmul.mubr.bf16.gmra.mrb[8].mxu0 %v16540_v55  ;;  %11441 = vmatmul.mubr.bf16.gmra.mrb[8].mxu1 %v16540_v55  ;;  %v16642_v55 = vld [vmem:[%s22363_s1 + $0x102c] ss:$16 sps:$4 sm:$0xff]  }
 0x1d3   :  { %9476 = vmatpush1.bf16.msra.mxu0 %v16541_v56  ;;  %11510 = vmatpush1.bf16.msra.mxu1 %v16544_v57  ;;  %v16643_v56 = vld [vmem:[%s22364_s0 + $0x15c] ss:$144 sps:$4 sm:$0xff]   ;;  %v16637_v57 = vld [vmem:[%s22363_s1 + $0x1020] ss:$16 sps:$4 sm:$0xff]  }
 0x1d4   :  { %9477 = vmatprep.subr.bf16.mxu0 %v16549_v58  ;;  %11511 = vmatprep.subr.bf16.mxu1 %v16552_v59  ;;  %v16640_v58 = vld [vmem:[%s22363_s1 + $0x1028] ss:$16 sps:$4 sm:$0xff]   ;;  %v16648_v59 = vld [vmem:[%s22363_s1 + $0x1044] ss:$16 sps:$4 sm:$0xff]  }
 0x1d5   :  { %9416 = vmatprep.mubr.bf16.mxu0 %v16553_v60  ;;  %11450 = vmatprep.mubr.bf16.mxu1 %v16553_v60  ;;  %v16651_v60 = vld [vmem:[%s22363_s1 + $0x104c] ss:$16 sps:$4 sm:$0xff]  }
 0x1d7   :  { %9478 = vmatpush1.bf16.msra.mxu0 %v16547_v61  ;;  %11512 = vmatpush1.bf16.msra.mxu1 %v16550_v62  ;;  %v16645_v61 = vld [vmem:[%s22364_s0 + $0x158] ss:$144 sps:$4 sm:$0xff]   ;;  %v16646_v62 = vld [vmem:[%s22363_s1 + $0x1040] ss:$16 sps:$4 sm:$0xff]  }
 0x1d8   :  { %9479 = vmatprep.subr.bf16.mxu0 %v16558_v63  ;;  %11513 = vmatprep.subr.bf16.mxu1 %v16561_v0  ;;  %v16649_v63 = vld [vmem:[%s22363_s1 + $0x1048] ss:$16 sps:$4 sm:$0xff]   ;;  %v16654_v0 = vld [vmem:[%s22363_s1 + $0x1064] ss:$16 sps:$4 sm:$0xff]  }
 0x1da   :  { %9417 = vmatmul.mubr.bf16.gmra.mrb[12].mxu0 %v16555_v1  ;;  %11451 = vmatmul.mubr.bf16.gmra.mrb[12].mxu1 %v16555_v1  ;;  %v16657_v1 = vld [vmem:[%s22363_s1 + $0x106c] ss:$16 sps:$4 sm:$0xff]  }
 0x1db   :  { %9480 = vmatpush1.bf16.msra.mxu0 %v16556_v2  ;;  %11514 = vmatpush1.bf16.msra.mxu1 %v16559_v3  ;;  %v16658_v2 = vld [vmem:[%s22364_s0 + $0x27c] ss:$144 sps:$4 sm:$0xff]   ;;  %v16652_v3 = vld [vmem:[%s22363_s1 + $0x1060] ss:$16 sps:$4 sm:$0xff]  }
 0x1dc   :  { %9481 = vmatprep.subr.bf16.mxu0 %v16564_v4  ;;  %11515 = vmatprep.subr.bf16.mxu1 %v16567_v5  ;;  %v16655_v4 = vld [vmem:[%s22363_s1 + $0x1068] ss:$16 sps:$4 sm:$0xff]   ;;  %v16663_v5 = vld [vmem:[%s22363_s1 + $0x1084] ss:$16 sps:$4 sm:$0xff]  }
 0x1dd   :  { %9426 = vmatprep.mubr.bf16.mxu0 %v16568_v6  ;;  %11460 = vmatprep.mubr.bf16.mxu1 %v16568_v6  ;;  %v16666_v6 = vld [vmem:[%s22363_s1 + $0x108c] ss:$16 sps:$4 sm:$0xff]  }
 0x1df   :  { %9482 = vmatpush1.bf16.msra.mxu0 %v16562_v7  ;;  %11516 = vmatpush1.bf16.msra.mxu1 %v16565_v8  ;;  %v16660_v7 = vld [vmem:[%s22364_s0 + $0x278] ss:$144 sps:$4 sm:$0xff]   ;;  %v16661_v8 = vld [vmem:[%s22363_s1 + $0x1080] ss:$16 sps:$4 sm:$0xff]  }
 0x1e0   :  { %9483 = vmatprep.subr.bf16.mxu0 %v16573_v9  ;;  %11517 = vmatprep.subr.bf16.mxu1 %v16576_v10  ;;  %v16664_v9 = vld [vmem:[%s22363_s1 + $0x1088] ss:$16 sps:$4 sm:$0xff]   ;;  %v16669_v10 = vld [vmem:[%s22363_s1 + $0x10a4] ss:$16 sps:$4 sm:$0xff]  }
 0x1e2   :  { %9427 = vmatmul.mubr.bf16.gmra.mrb[16].mxu0 %v16570_v11  ;;  %11461 = vmatmul.mubr.bf16.gmra.mrb[16].mxu1 %v16570_v11  ;;  %v16672_v11 = vld [vmem:[%s22363_s1 + $0x10ac] ss:$16 sps:$4 sm:$0xff]  }
 0x1e3   :  { %9484 = vmatpush1.bf16.msra.mxu0 %v16571_v12  ;;  %11518 = vmatpush1.bf16.msra.mxu1 %v16574_v13  ;;  %v16673_v12 = vld [vmem:[%s22364_s0 + $0x39c] ss:$144 sps:$4 sm:$0xff]   ;;  %v16667_v13 = vld [vmem:[%s22363_s1 + $0x10a0] ss:$16 sps:$4 sm:$0xff]  }
 0x1e4   :  { %9485 = vmatprep.subr.bf16.mxu0 %v16579_v14  ;;  %11519 = vmatprep.subr.bf16.mxu1 %v16582_v15  ;;  %v16670_v14 = vld [vmem:[%s22363_s1 + $0x10a8] ss:$16 sps:$4 sm:$0xff]   ;;  %v16678_v15 = vld [vmem:[%s22363_s1 + $0x10c4] ss:$16 sps:$4 sm:$0xff]  }
 0x1e5   :  { %9436 = vmatprep.mubr.bf16.mxu0 %v16583_v16  ;;  %11470 = vmatprep.mubr.bf16.mxu1 %v16583_v16  ;;  %v16681_v16 = vld [vmem:[%s22363_s1 + $0x10cc] ss:$16 sps:$4 sm:$0xff]  }
 0x1e7   :  { %9486 = vmatpush1.bf16.msra.mxu0 %v16577_v17  ;;  %11520 = vmatpush1.bf16.msra.mxu1 %v16580_v18  ;;  %v16675_v17 = vld [vmem:[%s22364_s0 + $0x398] ss:$144 sps:$4 sm:$0xff]   ;;  %v16676_v18 = vld [vmem:[%s22363_s1 + $0x10c0] ss:$16 sps:$4 sm:$0xff]  }
 0x1e8   :  { %9487 = vmatprep.subr.bf16.mxu0 %v16588_v19  ;;  %11521 = vmatprep.subr.bf16.mxu1 %v16591_v20  ;;  %v16679_v19 = vld [vmem:[%s22363_s1 + $0x10c8] ss:$16 sps:$4 sm:$0xff]   ;;  %v16684_v20 = vld [vmem:[%s22363_s1 + $0x10e4] ss:$16 sps:$4 sm:$0xff]  }
 0x1ea   :  { %9437 = vmatmul.mubr.bf16.gmra.mrb[20].mxu0 %v16585_v21  ;;  %11471 = vmatmul.mubr.bf16.gmra.mrb[20].mxu1 %v16585_v21  ;;  %v16687_v21 = vld [vmem:[%s22363_s1 + $0x10ec] ss:$16 sps:$4 sm:$0xff]  }
 0x1eb   :  { %9488 = vmatpush1.bf16.msra.mxu0 %v16586_v22  ;;  %11522 = vmatpush1.bf16.msra.mxu1 %v16589_v23  ;;  %v16688_v22 = vld [vmem:[%s22364_s0 + $0x4bc] ss:$144 sps:$4 sm:$0xff]   ;;  %v16682_v23 = vld [vmem:[%s22363_s1 + $0x10e0] ss:$16 sps:$4 sm:$0xff]  }
 0x1ec   :  { %9489 = vmatprep.subr.bf16.mxu0 %v16594_v24  ;;  %11523 = vmatprep.subr.bf16.mxu1 %v16597_v25  ;;  %v16685_v24 = vld [vmem:[%s22363_s1 + $0x10e8] ss:$16 sps:$4 sm:$0xff]   ;;  %v16693_v25 = vld [vmem:[%s22363_s1 + $0x1104] ss:$16 sps:$4 sm:$0xff]  }
 0x1ed   :  { %9446 = vmatprep.mubr.bf16.mxu0 %v16598_v26  ;;  %11480 = vmatprep.mubr.bf16.mxu1 %v16598_v26  ;;  %v16696_v26 = vld [vmem:[%s22363_s1 + $0x110c] ss:$16 sps:$4 sm:$0xff]  }
 0x1ef   :  { %9490 = vmatpush1.bf16.msra.mxu0 %v16592_v27  ;;  %11524 = vmatpush1.bf16.msra.mxu1 %v16595_v28  ;;  %v16690_v27 = vld [vmem:[%s22364_s0 + $0x4b8] ss:$144 sps:$4 sm:$0xff]   ;;  %v16691_v28 = vld [vmem:[%s22363_s1 + $0x1100] ss:$16 sps:$4 sm:$0xff]  }
 0x1f0   :  { %9491 = vmatprep.subr.bf16.mxu0 %v16603_v29  ;;  %11525 = vmatprep.subr.bf16.mxu1 %v16606_v30  ;;  %v16694_v29 = vld [vmem:[%s22363_s1 + $0x1108] ss:$16 sps:$4 sm:$0xff]   ;;  %v16699_v30 = vld [vmem:[%s22363_s1 + $0x1124] ss:$16 sps:$4 sm:$0xff]  }
 0x1f2   :  { %9447 = vmatmul.mubr.bf16.gmra.mrb[24].mxu0 %v16600_v31  ;;  %11481 = vmatmul.mubr.bf16.gmra.mrb[24].mxu1 %v16600_v31  ;;  %v16702_v31 = vld [vmem:[%s22363_s1 + $0x112c] ss:$16 sps:$4 sm:$0xff]  }
 0x1f3   :  { %9492 = vmatpush1.bf16.msra.mxu0 %v16601_v32  ;;  %11526 = vmatpush1.bf16.msra.mxu1 %v16604_v33  ;;  %v16703_v32 = vld [vmem:[%s22364_s0 + $0x5dc] ss:$144 sps:$4 sm:$0xff]   ;;  %v16697_v33 = vld [vmem:[%s22363_s1 + $0x1120] ss:$16 sps:$4 sm:$0xff]  }
 0x1f4   :  { %9493 = vmatprep.subr.bf16.mxu0 %v16609_v34  ;;  %11527 = vmatprep.subr.bf16.mxu1 %v16612_v35  ;;  %v16700_v34 = vld [vmem:[%s22363_s1 + $0x1128] ss:$16 sps:$4 sm:$0xff]   ;;  %v16708_v35 = vld [vmem:[%s22363_s1 + $0x1144] ss:$16 sps:$4 sm:$0xff]  }
 0x1f5   :  { %9456 = vmatprep.mubr.bf16.mxu0 %v16613_v36  ;;  %11490 = vmatprep.mubr.bf16.mxu1 %v16613_v36  ;;  %v16711_v36 = vld [vmem:[%s22363_s1 + $0x114c] ss:$16 sps:$4 sm:$0xff]  }
 0x1f7   :  { %9494 = vmatpush1.bf16.msra.mxu0 %v16607_v37  ;;  %11528 = vmatpush1.bf16.msra.mxu1 %v16610_v38  ;;  %v16705_v37 = vld [vmem:[%s22364_s0 + $0x5d8] ss:$144 sps:$4 sm:$0xff]   ;;  %v16706_v38 = vld [vmem:[%s22363_s1 + $0x1140] ss:$16 sps:$4 sm:$0xff]  }
 0x1f8   :  { %9495 = vmatprep.subr.bf16.mxu0 %v16618_v39  ;;  %11529 = vmatprep.subr.bf16.mxu1 %v16621_v40  ;;  %v16709_v39 = vld [vmem:[%s22363_s1 + $0x1148] ss:$16 sps:$4 sm:$0xff]   ;;  %v16714_v40 = vld [vmem:[%s22363_s1 + $0x1164] ss:$16 sps:$4 sm:$0xff]  }
 0x1fa   :  { %9457 = vmatmul.mubr.bf16.gmra.mrb[28].mxu0 %v16615_v41  ;;  %11491 = vmatmul.mubr.bf16.gmra.mrb[28].mxu1 %v16615_v41  ;;  %v16717_v41 = vld [vmem:[%s22363_s1 + $0x116c] ss:$16 sps:$4 sm:$0xff]  }
 0x1fb   :  { %9496 = vmatpush1.bf16.msra.mxu0 %v16616_v42  ;;  %11530 = vmatpush1.bf16.msra.mxu1 %v16619_v43  ;;  %v16718_v42 = vld [vmem:[%s22364_s0 + $0x6fc] ss:$144 sps:$4 sm:$0xff]   ;;  %v16712_v43 = vld [vmem:[%s22363_s1 + $0x1160] ss:$16 sps:$4 sm:$0xff]  }
 0x1fc   :  { %9497 = vmatprep.subr.bf16.mxu0 %v16624_v44  ;;  %11531 = vmatprep.subr.bf16.mxu1 %v16627_v45  ;;  %v16715_v44 = vld [vmem:[%s22363_s1 + $0x1168] ss:$16 sps:$4 sm:$0xff]   ;;  %v16723_v45 = vld [vmem:[%s22363_s1 + $0x1184] ss:$16 sps:$4 sm:$0xff]  }
 0x1fd   :  { %9499 = vmatprep.mubr.bf16.mxu0 %v16630_v46  ;;  %11533 = vmatprep.mubr.bf16.mxu1 %v16630_v46  ;;  %v16726_v46 = vld [vmem:[%s22363_s1 + $0x118c] ss:$16 sps:$4 sm:$0xff]  }
 0x1ff   :  { %9498 = vmatpush1.bf16.msra.mxu0 %v16622_v47  ;;  %11532 = vmatpush1.bf16.msra.mxu1 %v16625_v48  ;;  %v16720_v47 = vld [vmem:[%s22364_s0 + $0x6f8] ss:$144 sps:$4 sm:$0xff]   ;;  %v16721_v48 = vld [vmem:[%s22363_s1 + $0x1180] ss:$16 sps:$4 sm:$0xff]  }
 0x200   :  { %9580 = vmatprep.subr.bf16.mxu0 %v16633_v49  ;;  %11614 = vmatprep.subr.bf16.mxu1 %v16636_v50  ;;  %v16724_v49 = vld [vmem:[%s22363_s1 + $0x1188] ss:$16 sps:$4 sm:$0xff]   ;;  %v16729_v50 = vld [vmem:[%s22363_s1 + $0x11a4] ss:$16 sps:$4 sm:$0xff]  }
 0x202   :  { %9500 = vmatmul.mubr.bf16.vlgmr.msra.gmra.mrb[0].mxu0 %v16628_v51  ;;  %11534 = vmatmul.mubr.bf16.vlgmr.msra.gmra.mrb[0].mxu1 %v16628_v51  ;;  %v16732_v51 = vld [vmem:[%s22363_s1 + $0x11ac] ss:$16 sps:$4 sm:$0xff]  }
 0x203   :  { %9581 = vmatpush1.bf16.msra.mxu0 %v16631_v52  ;;  %11615 = vmatpush1.bf16.msra.mxu1 %v16634_v53  ;;  %v16733_v52 = vld [vmem:[%s22364_s0 + $0x81c] ss:$144 sps:$4 sm:$0xff]   ;;  %v16727_v53 = vld [vmem:[%s22363_s1 + $0x11a0] ss:$16 sps:$4 sm:$0xff]  }
 0x204   :  { %9582 = vmatprep.subr.bf16.mxu0 %v16639_v54  ;;  %11616 = vmatprep.subr.bf16.mxu1 %v16642_v55  ;;  %v16730_v54 = vld [vmem:[%s22363_s1 + $0x11a8] ss:$16 sps:$4 sm:$0xff]   ;;  %v16738_v55 = vld [vmem:[%s22363_s1 + $0x11c4] ss:$16 sps:$4 sm:$0xff]  }
 0x205   :  { %9509 = vmatprep.mubr.bf16.mxu0 %v16643_v56  ;;  %11543 = vmatprep.mubr.bf16.mxu1 %v16643_v56  ;;  %v16741_v56 = vld [vmem:[%s22363_s1 + $0x11cc] ss:$16 sps:$4 sm:$0xff]  }
 0x207   :  { %9583 = vmatpush1.bf16.msra.mxu0 %v16637_v57  ;;  %11617 = vmatpush1.bf16.msra.mxu1 %v16640_v58  ;;  %v16735_v57 = vld [vmem:[%s22364_s0 + $0x818] ss:$144 sps:$4 sm:$0xff]   ;;  %v16736_v58 = vld [vmem:[%s22363_s1 + $0x11c0] ss:$16 sps:$4 sm:$0xff]  }
 0x208   :  { %9584 = vmatprep.subr.bf16.mxu0 %v16648_v59  ;;  %11618 = vmatprep.subr.bf16.mxu1 %v16651_v60  ;;  %v16739_v59 = vld [vmem:[%s22363_s1 + $0x11c8] ss:$16 sps:$4 sm:$0xff]   ;;  %v16744_v60 = vld [vmem:[%s22363_s1 + $0x11e4] ss:$16 sps:$4 sm:$0xff]  }
 0x20a   :  { %9510 = vmatmul.mubr.bf16.gmra.mrb[4].mxu0 %v16645_v61  ;;  %11544 = vmatmul.mubr.bf16.gmra.mrb[4].mxu1 %v16645_v61  ;;  %v16747_v61 = vld [vmem:[%s22363_s1 + $0x11ec] ss:$16 sps:$4 sm:$0xff]  }
 0x20b   :  { %9585 = vmatpush1.bf16.msra.mxu0 %v16646_v62  ;;  %11619 = vmatpush1.bf16.msra.mxu1 %v16649_v63  ;;  %v16750_v62 = vld [vmem:[%s22364_s0 + $0x44] ss:$144 sps:$4 sm:$0xff]   ;;  %v16742_v63 = vld [vmem:[%s22363_s1 + $0x11e0] ss:$16 sps:$4 sm:$0xff]  }
 0x20c   :  { %9586 = vmatprep.subr.bf16.mxu0 %v16654_v0  ;;  %11620 = vmatprep.subr.bf16.mxu1 %v16657_v1  ;;  %v16745_v0 = vld [vmem:[%s22363_s1 + $0x11e8] ss:$16 sps:$4 sm:$0xff]   ;;  %v16753_v1 = vld [vmem:[%s22363_s1 + $0x1204] ss:$16 sps:$4 sm:$0xff]  }
 0x20d   :  { %9519 = vmatprep.mubr.bf16.mxu0 %v16658_v2  ;;  %11553 = vmatprep.mubr.bf16.mxu1 %v16658_v2  ;;  %v16756_v2 = vld [vmem:[%s22363_s1 + $0x120c] ss:$16 sps:$4 sm:$0xff]  }
 0x20f   :  { %9587 = vmatpush1.bf16.msra.mxu0 %v16652_v3  ;;  %11621 = vmatpush1.bf16.msra.mxu1 %v16655_v4  ;;  %v16748_v3 = vld [vmem:[%s22364_s0 + $0x40] ss:$144 sps:$4 sm:$0xff]  }
 0x210   :  { %9588 = vmatprep.subr.bf16.mxu0 %v16663_v5  ;;  %11622 = vmatprep.subr.bf16.mxu1 %v16666_v6  ;;  %v16751_v4 = vld [vmem:[%s22363_s1 + $0x1200] ss:$16 sps:$4 sm:$0xff]   ;;  %v16754_v5 = vld [vmem:[%s22363_s1 + $0x1208] ss:$16 sps:$4 sm:$0xff]   ;;  %v16759_v6 = vld [vmem:[%s22363_s1 + $0x1224] ss:$16 sps:$4 sm:$0xff]  }
 0x212   :  { %9520 = vmatmul.mubr.bf16.gmra.mrb[8].mxu0 %v16660_v7  ;;  %11554 = vmatmul.mubr.bf16.gmra.mrb[8].mxu1 %v16660_v7  ;;  %v16762_v7 = vld [vmem:[%s22363_s1 + $0x122c] ss:$16 sps:$4 sm:$0xff]  }
 0x213   :  { %9589 = vmatpush1.bf16.msra.mxu0 %v16661_v8  ;;  %11623 = vmatpush1.bf16.msra.mxu1 %v16664_v9  ;;  %v16763_v8 = vld [vmem:[%s22364_s0 + $0x164] ss:$144 sps:$4 sm:$0xff]   ;;  %v16757_v9 = vld [vmem:[%s22363_s1 + $0x1220] ss:$16 sps:$4 sm:$0xff]  }
 0x214   :  { %9590 = vmatprep.subr.bf16.mxu0 %v16669_v10  ;;  %11624 = vmatprep.subr.bf16.mxu1 %v16672_v11  ;;  %v16760_v10 = vld [vmem:[%s22363_s1 + $0x1228] ss:$16 sps:$4 sm:$0xff]   ;;  %v16768_v11 = vld [vmem:[%s22363_s1 + $0x1244] ss:$16 sps:$4 sm:$0xff]  }
 0x215   :  { %9529 = vmatprep.mubr.bf16.mxu0 %v16673_v12  ;;  %11563 = vmatprep.mubr.bf16.mxu1 %v16673_v12  ;;  %v16771_v12 = vld [vmem:[%s22363_s1 + $0x124c] ss:$16 sps:$4 sm:$0xff]  }
 0x217   :  { %9591 = vmatpush1.bf16.msra.mxu0 %v16667_v13  ;;  %11625 = vmatpush1.bf16.msra.mxu1 %v16670_v14  ;;  %v16765_v13 = vld [vmem:[%s22364_s0 + $0x160] ss:$144 sps:$4 sm:$0xff]  }
 0x218   :  { %9592 = vmatprep.subr.bf16.mxu0 %v16678_v15  ;;  %11626 = vmatprep.subr.bf16.mxu1 %v16681_v16  ;;  %v16766_v14 = vld [vmem:[%s22363_s1 + $0x1240] ss:$16 sps:$4 sm:$0xff]   ;;  %v16769_v15 = vld [vmem:[%s22363_s1 + $0x1248] ss:$16 sps:$4 sm:$0xff]   ;;  %v16774_v16 = vld [vmem:[%s22363_s1 + $0x1264] ss:$16 sps:$4 sm:$0xff]  }
 0x21a   :  { %9530 = vmatmul.mubr.bf16.gmra.mrb[12].mxu0 %v16675_v17  ;;  %11564 = vmatmul.mubr.bf16.gmra.mrb[12].mxu1 %v16675_v17  ;;  %v16777_v17 = vld [vmem:[%s22363_s1 + $0x126c] ss:$16 sps:$4 sm:$0xff]  }
 0x21b   :  { %9593 = vmatpush1.bf16.msra.mxu0 %v16676_v18  ;;  %11627 = vmatpush1.bf16.msra.mxu1 %v16679_v19  ;;  %v16778_v18 = vld [vmem:[%s22364_s0 + $0x284] ss:$144 sps:$4 sm:$0xff]   ;;  %v16772_v19 = vld [vmem:[%s22363_s1 + $0x1260] ss:$16 sps:$4 sm:$0xff]  }
 0x21c   :  { %9594 = vmatprep.subr.bf16.mxu0 %v16684_v20  ;;  %11628 = vmatprep.subr.bf16.mxu1 %v16687_v21  ;;  %v16775_v20 = vld [vmem:[%s22363_s1 + $0x1268] ss:$16 sps:$4 sm:$0xff]   ;;  %v16780_v21 = vld [vmem:[%s22364_s0 + $0x280] ss:$144 sps:$4 sm:$0xff]  }
 0x21d   :  { %9539 = vmatprep.mubr.bf16.mxu0 %v16688_v22  ;;  %11573 = vmatprep.mubr.bf16.mxu1 %v16688_v22  ;;  %v16783_v22 = vld [vmem:[%s22363_s1 + $0x1284] ss:$16 sps:$4 sm:$0xff]  }
 0x21f   :  { %9595 = vmatpush1.bf16.msra.mxu0 %v16682_v23  ;;  %11629 = vmatpush1.bf16.msra.mxu1 %v16685_v24  ;;  %v16786_v23 = vld [vmem:[%s22363_s1 + $0x128c] ss:$16 sps:$4 sm:$0xff]   ;;  %v16781_v24 = vld [vmem:[%s22363_s1 + $0x1280] ss:$16 sps:$4 sm:$0xff]  }
 0x220   :  { %9596 = vmatprep.subr.bf16.mxu0 %v16693_v25  ;;  %11630 = vmatprep.subr.bf16.mxu1 %v16696_v26  ;;  %v16784_v25 = vld [vmem:[%s22363_s1 + $0x1288] ss:$16 sps:$4 sm:$0xff]   ;;  %v16789_v26 = vld [vmem:[%s22363_s1 + $0x12a4] ss:$16 sps:$4 sm:$0xff]  }
 0x222   :  { %9540 = vmatmul.mubr.bf16.gmra.mrb[16].mxu0 %v16690_v27  ;;  %11574 = vmatmul.mubr.bf16.gmra.mrb[16].mxu1 %v16690_v27  ;;  %v16792_v27 = vld [vmem:[%s22363_s1 + $0x12ac] ss:$16 sps:$4 sm:$0xff]  }
 0x223   :  { %9597 = vmatpush1.bf16.msra.mxu0 %v16691_v28  ;;  %11631 = vmatpush1.bf16.msra.mxu1 %v16694_v29  ;;  %v16793_v28 = vld [vmem:[%s22364_s0 + $0x3a4] ss:$144 sps:$4 sm:$0xff]   ;;  %v16787_v29 = vld [vmem:[%s22363_s1 + $0x12a0] ss:$16 sps:$4 sm:$0xff]  }
 0x224   :  { %9598 = vmatprep.subr.bf16.mxu0 %v16699_v30  ;;  %11632 = vmatprep.subr.bf16.mxu1 %v16702_v31  ;;  %v16790_v30 = vld [vmem:[%s22363_s1 + $0x12a8] ss:$16 sps:$4 sm:$0xff]   ;;  %v16795_v31 = vld [vmem:[%s22364_s0 + $0x3a0] ss:$144 sps:$4 sm:$0xff]  }
 0x225   :  { %9549 = vmatprep.mubr.bf16.mxu0 %v16703_v32  ;;  %11583 = vmatprep.mubr.bf16.mxu1 %v16703_v32  ;;  %v16798_v32 = vld [vmem:[%s22363_s1 + $0x12c4] ss:$16 sps:$4 sm:$0xff]  }
 0x227   :  { %9599 = vmatpush1.bf16.msra.mxu0 %v16697_v33  ;;  %11633 = vmatpush1.bf16.msra.mxu1 %v16700_v34  ;;  %v16801_v33 = vld [vmem:[%s22363_s1 + $0x12cc] ss:$16 sps:$4 sm:$0xff]   ;;  %v16796_v34 = vld [vmem:[%s22363_s1 + $0x12c0] ss:$16 sps:$4 sm:$0xff]  }
 0x228   :  { %9600 = vmatprep.subr.bf16.mxu0 %v16708_v35  ;;  %11634 = vmatprep.subr.bf16.mxu1 %v16711_v36  ;;  %v16799_v35 = vld [vmem:[%s22363_s1 + $0x12c8] ss:$16 sps:$4 sm:$0xff]   ;;  %v16804_v36 = vld [vmem:[%s22363_s1 + $0x12e4] ss:$16 sps:$4 sm:$0xff]  }
 0x22a   :  { %9550 = vmatmul.mubr.bf16.gmra.mrb[20].mxu0 %v16705_v37  ;;  %11584 = vmatmul.mubr.bf16.gmra.mrb[20].mxu1 %v16705_v37  ;;  %v16807_v37 = vld [vmem:[%s22363_s1 + $0x12ec] ss:$16 sps:$4 sm:$0xff]  }
 0x22b   :  { %9601 = vmatpush1.bf16.msra.mxu0 %v16706_v38  ;;  %11635 = vmatpush1.bf16.msra.mxu1 %v16709_v39  ;;  %v16808_v38 = vld [vmem:[%s22364_s0 + $0x4c4] ss:$144 sps:$4 sm:$0xff]   ;;  %v16802_v39 = vld [vmem:[%s22363_s1 + $0x12e0] ss:$16 sps:$4 sm:$0xff]  }
 0x22c   :  { %9602 = vmatprep.subr.bf16.mxu0 %v16714_v40  ;;  %11636 = vmatprep.subr.bf16.mxu1 %v16717_v41  ;;  %v16805_v40 = vld [vmem:[%s22363_s1 + $0x12e8] ss:$16 sps:$4 sm:$0xff]   ;;  %v16810_v41 = vld [vmem:[%s22364_s0 + $0x4c0] ss:$144 sps:$4 sm:$0xff]  }
 0x22d   :  { %9559 = vmatprep.mubr.bf16.mxu0 %v16718_v42  ;;  %11593 = vmatprep.mubr.bf16.mxu1 %v16718_v42  ;;  %v16813_v42 = vld [vmem:[%s22363_s1 + $0x1304] ss:$16 sps:$4 sm:$0xff]  }
 0x22f   :  { %9603 = vmatpush1.bf16.msra.mxu0 %v16712_v43  ;;  %11637 = vmatpush1.bf16.msra.mxu1 %v16715_v44  ;;  %v16816_v43 = vld [vmem:[%s22363_s1 + $0x130c] ss:$16 sps:$4 sm:$0xff]   ;;  %v16811_v44 = vld [vmem:[%s22363_s1 + $0x1300] ss:$16 sps:$4 sm:$0xff]  }
 0x230   :  { %9604 = vmatprep.subr.bf16.mxu0 %v16723_v45  ;;  %11638 = vmatprep.subr.bf16.mxu1 %v16726_v46  ;;  %v16814_v45 = vld [vmem:[%s22363_s1 + $0x1308] ss:$16 sps:$4 sm:$0xff]   ;;  %v16819_v46 = vld [vmem:[%s22363_s1 + $0x1324] ss:$16 sps:$4 sm:$0xff]  }
 0x232   :  { %9560 = vmatmul.mubr.bf16.gmra.mrb[24].mxu0 %v16720_v47  ;;  %11594 = vmatmul.mubr.bf16.gmra.mrb[24].mxu1 %v16720_v47  ;;  %v16822_v47 = vld [vmem:[%s22363_s1 + $0x132c] ss:$16 sps:$4 sm:$0xff]  }
 0x233   :  { %9605 = vmatpush1.bf16.msra.mxu0 %v16721_v48  ;;  %11639 = vmatpush1.bf16.msra.mxu1 %v16724_v49  ;;  %v16823_v48 = vld [vmem:[%s22364_s0 + $0x5e4] ss:$144 sps:$4 sm:$0xff]   ;;  %v16817_v49 = vld [vmem:[%s22363_s1 + $0x1320] ss:$16 sps:$4 sm:$0xff]  }
 0x234   :  { %9606 = vmatprep.subr.bf16.mxu0 %v16729_v50  ;;  %11640 = vmatprep.subr.bf16.mxu1 %v16732_v51  ;;  %v16820_v50 = vld [vmem:[%s22363_s1 + $0x1328] ss:$16 sps:$4 sm:$0xff]   ;;  %v16825_v51 = vld [vmem:[%s22364_s0 + $0x5e0] ss:$144 sps:$4 sm:$0xff]  }
 0x235   :  { %9569 = vmatprep.mubr.bf16.mxu0 %v16733_v52  ;;  %11603 = vmatprep.mubr.bf16.mxu1 %v16733_v52  ;;  %v16828_v52 = vld [vmem:[%s22363_s1 + $0x1344] ss:$16 sps:$4 sm:$0xff]  }
 0x237   :  { %9607 = vmatpush1.bf16.msra.mxu0 %v16727_v53  ;;  %11641 = vmatpush1.bf16.msra.mxu1 %v16730_v54  ;;  %v16831_v53 = vld [vmem:[%s22363_s1 + $0x134c] ss:$16 sps:$4 sm:$0xff]   ;;  %v16826_v54 = vld [vmem:[%s22363_s1 + $0x1340] ss:$16 sps:$4 sm:$0xff]  }
 0x238   :  { %9608 = vmatprep.subr.bf16.mxu0 %v16738_v55  ;;  %11642 = vmatprep.subr.bf16.mxu1 %v16741_v56  ;;  %v16829_v55 = vld [vmem:[%s22363_s1 + $0x1348] ss:$16 sps:$4 sm:$0xff]   ;;  %v16834_v56 = vld [vmem:[%s22363_s1 + $0x1364] ss:$16 sps:$4 sm:$0xff]  }
 0x23a   :  { %9570 = vmatmul.mubr.bf16.gmra.mrb[28].mxu0 %v16735_v57  ;;  %11604 = vmatmul.mubr.bf16.gmra.mrb[28].mxu1 %v16735_v57  ;;  %v16837_v57 = vld [vmem:[%s22363_s1 + $0x136c] ss:$16 sps:$4 sm:$0xff]  }
 0x23b   :  { %9609 = vmatpush1.bf16.msra.mxu0 %v16736_v58  ;;  %11643 = vmatpush1.bf16.msra.mxu1 %v16739_v59  ;;  %v16838_v58 = vld [vmem:[%s22364_s0 + $0x704] ss:$144 sps:$4 sm:$0xff]   ;;  %v16832_v59 = vld [vmem:[%s22363_s1 + $0x1360] ss:$16 sps:$4 sm:$0xff]  }
 0x23c   :  { %9610 = vmatprep.subr.bf16.mxu0 %v16744_v60  ;;  %11644 = vmatprep.subr.bf16.mxu1 %v16747_v61  ;;  %v16835_v60 = vld [vmem:[%s22363_s1 + $0x1368] ss:$16 sps:$4 sm:$0xff]   ;;  %v16840_v61 = vld [vmem:[%s22364_s0 + $0x700] ss:$144 sps:$4 sm:$0xff]  }
 0x23d   :  { %9612 = vmatprep.mubr.bf16.mxu0 %v16750_v62  ;;  %11646 = vmatprep.mubr.bf16.mxu1 %v16750_v62  ;;  %v16843_v62 = vld [vmem:[%s22363_s1 + $0x1384] ss:$16 sps:$4 sm:$0xff]  }
 0x23f   :  { %9611 = vmatpush1.bf16.msra.mxu0 %v16742_v63  ;;  %11645 = vmatpush1.bf16.msra.mxu1 %v16745_v0  ;;  %v16846_v63 = vld [vmem:[%s22363_s1 + $0x138c] ss:$16 sps:$4 sm:$0xff]   ;;  %v16841_v0 = vld [vmem:[%s22363_s1 + $0x1380] ss:$16 sps:$4 sm:$0xff]  }
 0x240   :  { %9693 = vmatprep.subr.bf16.mxu0 %v16753_v1  ;;  %11727 = vmatprep.subr.bf16.mxu1 %v16756_v2  ;;  %v16844_v1 = vld [vmem:[%s22363_s1 + $0x1388] ss:$16 sps:$4 sm:$0xff]   ;;  %v16849_v2 = vld [vmem:[%s22363_s1 + $0x13a4] ss:$16 sps:$4 sm:$0xff]  }
 0x242   :  { %9613 = vmatmul.mubr.bf16.vlgmr.msra.gmra.mrb[0].mxu0 %v16748_v3  ;;  %11647 = vmatmul.mubr.bf16.vlgmr.msra.gmra.mrb[0].mxu1 %v16748_v3  ;;  %v16852_v3 = vld [vmem:[%s22363_s1 + $0x13ac] ss:$16 sps:$4 sm:$0xff]  }
 0x243   :  { %9694 = vmatpush1.bf16.msra.mxu0 %v16751_v4  ;;  %11728 = vmatpush1.bf16.msra.mxu1 %v16754_v5  ;;  %v16853_v4 = vld [vmem:[%s22364_s0 + $0x824] ss:$144 sps:$4 sm:$0xff]   ;;  %v16847_v5 = vld [vmem:[%s22363_s1 + $0x13a0] ss:$16 sps:$4 sm:$0xff]  }
 0x244   :  { %9695 = vmatprep.subr.bf16.mxu0 %v16759_v6  ;;  %11729 = vmatprep.subr.bf16.mxu1 %v16762_v7  ;;  %v16850_v6 = vld [vmem:[%s22363_s1 + $0x13a8] ss:$16 sps:$4 sm:$0xff]   ;;  %v16855_v7 = vld [vmem:[%s22364_s0 + $0x820] ss:$144 sps:$4 sm:$0xff]  }
 0x245   :  { %9622 = vmatprep.mubr.bf16.mxu0 %v16763_v8  ;;  %11656 = vmatprep.mubr.bf16.mxu1 %v16763_v8  ;;  %v16858_v8 = vld [vmem:[%s22363_s1 + $0x13c4] ss:$16 sps:$4 sm:$0xff]  }
 0x247   :  { %9696 = vmatpush1.bf16.msra.mxu0 %v16757_v9  ;;  %11730 = vmatpush1.bf16.msra.mxu1 %v16760_v10  ;;  %v16861_v9 = vld [vmem:[%s22363_s1 + $0x13cc] ss:$16 sps:$4 sm:$0xff]   ;;  %v16856_v10 = vld [vmem:[%s22363_s1 + $0x13c0] ss:$16 sps:$4 sm:$0xff]  }
 0x248   :  { %9697 = vmatprep.subr.bf16.mxu0 %v16768_v11  ;;  %11731 = vmatprep.subr.bf16.mxu1 %v16771_v12  ;;  %v16859_v11 = vld [vmem:[%s22363_s1 + $0x13c8] ss:$16 sps:$4 sm:$0xff]   ;;  %v16864_v12 = vld [vmem:[%s22363_s1 + $0x13e4] ss:$16 sps:$4 sm:$0xff]  }
 0x24a   :  { %9623 = vmatmul.mubr.bf16.gmra.mrb[4].mxu0 %v16765_v13  ;;  %11657 = vmatmul.mubr.bf16.gmra.mrb[4].mxu1 %v16765_v13  ;;  %v16867_v13 = vld [vmem:[%s22363_s1 + $0x13ec] ss:$16 sps:$4 sm:$0xff]  }
 0x24b   :  { %9698 = vmatpush1.bf16.msra.mxu0 %v16766_v14  ;;  %11732 = vmatpush1.bf16.msra.mxu1 %v16769_v15  ;;  %v16870_v14 = vld [vmem:[%s22364_s0 + $0x4c] ss:$144 sps:$4 sm:$0xff]   ;;  %v16862_v15 = vld [vmem:[%s22363_s1 + $0x13e0] ss:$16 sps:$4 sm:$0xff]  }
 0x24c   :  { %9699 = vmatprep.subr.bf16.mxu0 %v16774_v16  ;;  %11733 = vmatprep.subr.bf16.mxu1 %v16777_v17  ;;  %v16865_v16 = vld [vmem:[%s22363_s1 + $0x13e8] ss:$16 sps:$4 sm:$0xff]  }
 0x24d   :  { %9632 = vmatprep.mubr.bf16.mxu0 %v16778_v18  ;;  %11666 = vmatprep.mubr.bf16.mxu1 %v16778_v18  ;;  %v16868_v17 = vld [vmem:[%s22364_s0 + $0x48] ss:$144 sps:$4 sm:$0xff]   ;;  %v16873_v18 = vld [vmem:[%s22363_s1 + $0x1404] ss:$16 sps:$4 sm:$0xff]  }
 0x24f   :  { %9700 = vmatpush1.bf16.msra.mxu0 %v16772_v19  ;;  %11734 = vmatpush1.bf16.msra.mxu1 %v16775_v20  ;;  %v16876_v19 = vld [vmem:[%s22363_s1 + $0x140c] ss:$16 sps:$4 sm:$0xff]   ;;  %v16871_v20 = vld [vmem:[%s22363_s1 + $0x1400] ss:$16 sps:$4 sm:$0xff]  }
 0x250   :  { %9701 = vmatprep.subr.bf16.mxu0 %v16783_v22  ;;  %11735 = vmatprep.subr.bf16.mxu1 %v16786_v23  ;;  %v16879_v22 = vld [vmem:[%s22363_s1 + $0x1424] ss:$16 sps:$4 sm:$0xff]   ;;  %v16882_v23 = vld [vmem:[%s22363_s1 + $0x142c] ss:$16 sps:$4 sm:$0xff]  }
 0x252   :  { %9633 = vmatmul.mubr.bf16.gmra.mrb[8].mxu0 %v16780_v21  ;;  %11667 = vmatmul.mubr.bf16.gmra.mrb[8].mxu1 %v16780_v21  ;;  %v16874_v21 = vld [vmem:[%s22363_s1 + $0x1408] ss:$16 sps:$4 sm:$0xff]  }
 0x253   :  { %9702 = vmatpush1.bf16.msra.mxu0 %v16781_v24  ;;  %11736 = vmatpush1.bf16.msra.mxu1 %v16784_v25  ;;  %v16883_v24 = vld [vmem:[%s22364_s0 + $0x16c] ss:$144 sps:$4 sm:$0xff]   ;;  %v16877_v25 = vld [vmem:[%s22363_s1 + $0x1420] ss:$16 sps:$4 sm:$0xff]  }
 0x254   :  { %9703 = vmatprep.subr.bf16.mxu0 %v16789_v26  ;;  %11737 = vmatprep.subr.bf16.mxu1 %v16792_v27  ;;  %v16880_v26 = vld [vmem:[%s22363_s1 + $0x1428] ss:$16 sps:$4 sm:$0xff]  }
 0x255   :  { %9642 = vmatprep.mubr.bf16.mxu0 %v16793_v28  ;;  %11676 = vmatprep.mubr.bf16.mxu1 %v16793_v28  ;;  %v16885_v27 = vld [vmem:[%s22364_s0 + $0x168] ss:$144 sps:$4 sm:$0xff]   ;;  %v16888_v28 = vld [vmem:[%s22363_s1 + $0x1444] ss:$16 sps:$4 sm:$0xff]  }
 0x257   :  { %9704 = vmatpush1.bf16.msra.mxu0 %v16787_v29  ;;  %11738 = vmatpush1.bf16.msra.mxu1 %v16790_v30  ;;  %v16891_v29 = vld [vmem:[%s22363_s1 + $0x144c] ss:$16 sps:$4 sm:$0xff]   ;;  %v16886_v30 = vld [vmem:[%s22363_s1 + $0x1440] ss:$16 sps:$4 sm:$0xff]  }
 0x258   :  { %9705 = vmatprep.subr.bf16.mxu0 %v16798_v32  ;;  %11739 = vmatprep.subr.bf16.mxu1 %v16801_v33  ;;  %v16894_v32 = vld [vmem:[%s22363_s1 + $0x1464] ss:$16 sps:$4 sm:$0xff]   ;;  %v16897_v33 = vld [vmem:[%s22363_s1 + $0x146c] ss:$16 sps:$4 sm:$0xff]  }
 0x25a   :  { %9643 = vmatmul.mubr.bf16.gmra.mrb[12].mxu0 %v16795_v31  ;;  %11677 = vmatmul.mubr.bf16.gmra.mrb[12].mxu1 %v16795_v31  ;;  %v16889_v31 = vld [vmem:[%s22363_s1 + $0x1448] ss:$16 sps:$4 sm:$0xff]  }
 0x25b   :  { %9706 = vmatpush1.bf16.msra.mxu0 %v16796_v34  ;;  %11740 = vmatpush1.bf16.msra.mxu1 %v16799_v35  ;;  %v16898_v34 = vld [vmem:[%s22364_s0 + $0x28c] ss:$144 sps:$4 sm:$0xff]   ;;  %v16892_v35 = vld [vmem:[%s22363_s1 + $0x1460] ss:$16 sps:$4 sm:$0xff]  }
 0x25c   :  { %9707 = vmatprep.subr.bf16.mxu0 %v16804_v36  ;;  %11741 = vmatprep.subr.bf16.mxu1 %v16807_v37  ;;  %v16895_v36 = vld [vmem:[%s22363_s1 + $0x1468] ss:$16 sps:$4 sm:$0xff]  }
 0x25d   :  { %9652 = vmatprep.mubr.bf16.mxu0 %v16808_v38  ;;  %11686 = vmatprep.mubr.bf16.mxu1 %v16808_v38  ;;  %v16900_v37 = vld [vmem:[%s22364_s0 + $0x288] ss:$144 sps:$4 sm:$0xff]   ;;  %v16903_v38 = vld [vmem:[%s22363_s1 + $0x1484] ss:$16 sps:$4 sm:$0xff]  }
 0x25f   :  { %9708 = vmatpush1.bf16.msra.mxu0 %v16802_v39  ;;  %11742 = vmatpush1.bf16.msra.mxu1 %v16805_v40  ;;  %v16906_v39 = vld [vmem:[%s22363_s1 + $0x148c] ss:$16 sps:$4 sm:$0xff]   ;;  %v16901_v40 = vld [vmem:[%s22363_s1 + $0x1480] ss:$16 sps:$4 sm:$0xff]  }
 0x260   :  { %9709 = vmatprep.subr.bf16.mxu0 %v16813_v42  ;;  %11743 = vmatprep.subr.bf16.mxu1 %v16816_v43  ;;  %v16909_v42 = vld [vmem:[%s22363_s1 + $0x14a4] ss:$16 sps:$4 sm:$0xff]   ;;  %v16912_v43 = vld [vmem:[%s22363_s1 + $0x14ac] ss:$16 sps:$4 sm:$0xff]  }
 0x262   :  { %9653 = vmatmul.mubr.bf16.gmra.mrb[16].mxu0 %v16810_v41  ;;  %11687 = vmatmul.mubr.bf16.gmra.mrb[16].mxu1 %v16810_v41  ;;  %v16904_v41 = vld [vmem:[%s22363_s1 + $0x1488] ss:$16 sps:$4 sm:$0xff]  }
 0x263   :  { %9710 = vmatpush1.bf16.msra.mxu0 %v16811_v44  ;;  %11744 = vmatpush1.bf16.msra.mxu1 %v16814_v45  ;;  %v16913_v44 = vld [vmem:[%s22364_s0 + $0x3ac] ss:$144 sps:$4 sm:$0xff]   ;;  %v16907_v45 = vld [vmem:[%s22363_s1 + $0x14a0] ss:$16 sps:$4 sm:$0xff]  }
 0x264   :  { %9711 = vmatprep.subr.bf16.mxu0 %v16819_v46  ;;  %11745 = vmatprep.subr.bf16.mxu1 %v16822_v47  ;;  %v16910_v46 = vld [vmem:[%s22363_s1 + $0x14a8] ss:$16 sps:$4 sm:$0xff]  }
 0x265   :  { %9662 = vmatprep.mubr.bf16.mxu0 %v16823_v48  ;;  %11696 = vmatprep.mubr.bf16.mxu1 %v16823_v48  ;;  %v16915_v47 = vld [vmem:[%s22364_s0 + $0x3a8] ss:$144 sps:$4 sm:$0xff]   ;;  %v16918_v48 = vld [vmem:[%s22363_s1 + $0x14c4] ss:$16 sps:$4 sm:$0xff]  }
 0x267   :  { %9712 = vmatpush1.bf16.msra.mxu0 %v16817_v49  ;;  %11746 = vmatpush1.bf16.msra.mxu1 %v16820_v50  ;;  %v16921_v49 = vld [vmem:[%s22363_s1 + $0x14cc] ss:$16 sps:$4 sm:$0xff]   ;;  %v16916_v50 = vld [vmem:[%s22363_s1 + $0x14c0] ss:$16 sps:$4 sm:$0xff]  }
 0x268   :  { %9713 = vmatprep.subr.bf16.mxu0 %v16828_v52  ;;  %11747 = vmatprep.subr.bf16.mxu1 %v16831_v53  ;;  %v16924_v52 = vld [vmem:[%s22363_s1 + $0x14e4] ss:$16 sps:$4 sm:$0xff]   ;;  %v16927_v53 = vld [vmem:[%s22363_s1 + $0x14ec] ss:$16 sps:$4 sm:$0xff]  }
 0x26a   :  { %9663 = vmatmul.mubr.bf16.gmra.mrb[20].mxu0 %v16825_v51  ;;  %11697 = vmatmul.mubr.bf16.gmra.mrb[20].mxu1 %v16825_v51  ;;  %v16919_v51 = vld [vmem:[%s22363_s1 + $0x14c8] ss:$16 sps:$4 sm:$0xff]  }
 0x26b   :  { %9714 = vmatpush1.bf16.msra.mxu0 %v16826_v54  ;;  %11748 = vmatpush1.bf16.msra.mxu1 %v16829_v55  ;;  %v16928_v54 = vld [vmem:[%s22364_s0 + $0x4cc] ss:$144 sps:$4 sm:$0xff]   ;;  %v16922_v55 = vld [vmem:[%s22363_s1 + $0x14e0] ss:$16 sps:$4 sm:$0xff]  }
 0x26c   :  { %9715 = vmatprep.subr.bf16.mxu0 %v16834_v56  ;;  %11749 = vmatprep.subr.bf16.mxu1 %v16837_v57  ;;  %v16925_v56 = vld [vmem:[%s22363_s1 + $0x14e8] ss:$16 sps:$4 sm:$0xff]  }
 0x26d   :  { %9672 = vmatprep.mubr.bf16.mxu0 %v16838_v58  ;;  %11706 = vmatprep.mubr.bf16.mxu1 %v16838_v58  ;;  %v16930_v57 = vld [vmem:[%s22364_s0 + $0x4c8] ss:$144 sps:$4 sm:$0xff]   ;;  %v16933_v58 = vld [vmem:[%s22363_s1 + $0x1504] ss:$16 sps:$4 sm:$0xff]  }
 0x26f   :  { %9716 = vmatpush1.bf16.msra.mxu0 %v16832_v59  ;;  %11750 = vmatpush1.bf16.msra.mxu1 %v16835_v60  ;;  %v16936_v59 = vld [vmem:[%s22363_s1 + $0x150c] ss:$16 sps:$4 sm:$0xff]   ;;  %v16931_v60 = vld [vmem:[%s22363_s1 + $0x1500] ss:$16 sps:$4 sm:$0xff]  }
 0x270   :  { %9717 = vmatprep.subr.bf16.mxu0 %v16843_v62  ;;  %11751 = vmatprep.subr.bf16.mxu1 %v16846_v63  ;;  %v16939_v62 = vld [vmem:[%s22363_s1 + $0x1524] ss:$16 sps:$4 sm:$0xff]   ;;  %v16942_v63 = vld [vmem:[%s22363_s1 + $0x152c] ss:$16 sps:$4 sm:$0xff]  }
 0x272   :  { %9673 = vmatmul.mubr.bf16.gmra.mrb[24].mxu0 %v16840_v61  ;;  %11707 = vmatmul.mubr.bf16.gmra.mrb[24].mxu1 %v16840_v61  ;;  %v16934_v61 = vld [vmem:[%s22363_s1 + $0x1508] ss:$16 sps:$4 sm:$0xff]  }
 0x273   :  { %9718 = vmatpush1.bf16.msra.mxu0 %v16841_v0  ;;  %11752 = vmatpush1.bf16.msra.mxu1 %v16844_v1  ;;  %v16943_v0 = vld [vmem:[%s22364_s0 + $0x5ec] ss:$144 sps:$4 sm:$0xff]   ;;  %v16937_v1 = vld [vmem:[%s22363_s1 + $0x1520] ss:$16 sps:$4 sm:$0xff]  }
 0x274   :  { %9719 = vmatprep.subr.bf16.mxu0 %v16849_v2  ;;  %11753 = vmatprep.subr.bf16.mxu1 %v16852_v3  ;;  %v16940_v2 = vld [vmem:[%s22363_s1 + $0x1528] ss:$16 sps:$4 sm:$0xff]  }
 0x275   :  { %9682 = vmatprep.mubr.bf16.mxu0 %v16853_v4  ;;  %11716 = vmatprep.mubr.bf16.mxu1 %v16853_v4  ;;  %v16945_v3 = vld [vmem:[%s22364_s0 + $0x5e8] ss:$144 sps:$4 sm:$0xff]   ;;  %v16948_v4 = vld [vmem:[%s22363_s1 + $0x1544] ss:$16 sps:$4 sm:$0xff]  }
 0x277   :  { %9720 = vmatpush1.bf16.msra.mxu0 %v16847_v5  ;;  %11754 = vmatpush1.bf16.msra.mxu1 %v16850_v6  ;;  %v16951_v5 = vld [vmem:[%s22363_s1 + $0x154c] ss:$16 sps:$4 sm:$0xff]   ;;  %v16946_v6 = vld [vmem:[%s22363_s1 + $0x1540] ss:$16 sps:$4 sm:$0xff]  }
 0x278   :  { %9721 = vmatprep.subr.bf16.mxu0 %v16858_v8  ;;  %11755 = vmatprep.subr.bf16.mxu1 %v16861_v9  ;;  %v16954_v8 = vld [vmem:[%s22363_s1 + $0x1564] ss:$16 sps:$4 sm:$0xff]   ;;  %v16957_v9 = vld [vmem:[%s22363_s1 + $0x156c] ss:$16 sps:$4 sm:$0xff]  }
 0x27a   :  { %9683 = vmatmul.mubr.bf16.gmra.mrb[28].mxu0 %v16855_v7  ;;  %11717 = vmatmul.mubr.bf16.gmra.mrb[28].mxu1 %v16855_v7  ;;  %v16949_v7 = vld [vmem:[%s22363_s1 + $0x1548] ss:$16 sps:$4 sm:$0xff]  }
 0x27b   :  { %9722 = vmatpush1.bf16.msra.mxu0 %v16856_v10  ;;  %11756 = vmatpush1.bf16.msra.mxu1 %v16859_v11  ;;  %v16958_v10 = vld [vmem:[%s22364_s0 + $0x70c] ss:$144 sps:$4 sm:$0xff]   ;;  %v16952_v11 = vld [vmem:[%s22363_s1 + $0x1560] ss:$16 sps:$4 sm:$0xff]  }
 0x27c   :  { %9723 = vmatprep.subr.bf16.mxu0 %v16864_v12  ;;  %11757 = vmatprep.subr.bf16.mxu1 %v16867_v13  ;;  %v16955_v12 = vld [vmem:[%s22363_s1 + $0x1568] ss:$16 sps:$4 sm:$0xff]  }
 0x27d   :  { %9725 = vmatprep.mubr.bf16.mxu0 %v16870_v14  ;;  %11759 = vmatprep.mubr.bf16.mxu1 %v16870_v14  ;;  %v16960_v13 = vld [vmem:[%s22364_s0 + $0x708] ss:$144 sps:$4 sm:$0xff]   ;;  %v16963_v14 = vld [vmem:[%s22363_s1 + $0x1584] ss:$16 sps:$4 sm:$0xff]  }
 0x27f   :  { %9724 = vmatpush1.bf16.msra.mxu0 %v16862_v15  ;;  %11758 = vmatpush1.bf16.msra.mxu1 %v16865_v16  ;;  %v16966_v15 = vld [vmem:[%s22363_s1 + $0x158c] ss:$16 sps:$4 sm:$0xff]   ;;  %v16961_v16 = vld [vmem:[%s22363_s1 + $0x1580] ss:$16 sps:$4 sm:$0xff]  }
 0x280   :  { %9806 = vmatprep.subr.bf16.mxu0 %v16873_v18  ;;  %11840 = vmatprep.subr.bf16.mxu1 %v16876_v19  ;;  %v16969_v18 = vld [vmem:[%s22363_s1 + $0x15a4] ss:$16 sps:$4 sm:$0xff]   ;;  %v16972_v19 = vld [vmem:[%s22363_s1 + $0x15ac] ss:$16 sps:$4 sm:$0xff]  }
 0x282   :  { %9726 = vmatmul.mubr.bf16.vlgmr.msra.gmra.mrb[0].mxu0 %v16868_v17  ;;  %11760 = vmatmul.mubr.bf16.vlgmr.msra.gmra.mrb[0].mxu1 %v16868_v17  ;;  %v16964_v17 = vld [vmem:[%s22363_s1 + $0x1588] ss:$16 sps:$4 sm:$0xff]  }
 0x283   :  { %9807 = vmatpush1.bf16.msra.mxu0 %v16871_v20  ;;  %11841 = vmatpush1.bf16.msra.mxu1 %v16874_v21  ;;  %v16973_v20 = vld [vmem:[%s22364_s0 + $0x82c] ss:$144 sps:$4 sm:$0xff]   ;;  %v16967_v21 = vld [vmem:[%s22363_s1 + $0x15a0] ss:$16 sps:$4 sm:$0xff]  }
 0x284   :  { %9808 = vmatprep.subr.bf16.mxu0 %v16879_v22  ;;  %11842 = vmatprep.subr.bf16.mxu1 %v16882_v23  ;;  %v16970_v22 = vld [vmem:[%s22363_s1 + $0x15a8] ss:$16 sps:$4 sm:$0xff]  }
 0x285   :  { %9735 = vmatprep.mubr.bf16.mxu0 %v16883_v24  ;;  %11769 = vmatprep.mubr.bf16.mxu1 %v16883_v24  ;;  %v16975_v23 = vld [vmem:[%s22364_s0 + $0x828] ss:$144 sps:$4 sm:$0xff]   ;;  %v16978_v24 = vld [vmem:[%s22363_s1 + $0x15c4] ss:$16 sps:$4 sm:$0xff]  }
 0x287   :  { %9809 = vmatpush1.bf16.msra.mxu0 %v16877_v25  ;;  %11843 = vmatpush1.bf16.msra.mxu1 %v16880_v26  ;;  %v16981_v25 = vld [vmem:[%s22363_s1 + $0x15cc] ss:$16 sps:$4 sm:$0xff]   ;;  %v16976_v26 = vld [vmem:[%s22363_s1 + $0x15c0] ss:$16 sps:$4 sm:$0xff]  }
 0x288   :  { %9810 = vmatprep.subr.bf16.mxu0 %v16888_v28  ;;  %11844 = vmatprep.subr.bf16.mxu1 %v16891_v29  ;;  %v16984_v28 = vld [vmem:[%s22363_s1 + $0x15e4] ss:$16 sps:$4 sm:$0xff]   ;;  %v16987_v29 = vld [vmem:[%s22363_s1 + $0x15ec] ss:$16 sps:$4 sm:$0xff]  }
 0x28a   :  { %9736 = vmatmul.mubr.bf16.gmra.mrb[4].mxu0 %v16885_v27  ;;  %11770 = vmatmul.mubr.bf16.gmra.mrb[4].mxu1 %v16885_v27  ;;  %v16979_v27 = vld [vmem:[%s22363_s1 + $0x15c8] ss:$16 sps:$4 sm:$0xff]  }
 0x28b   :  { %9811 = vmatpush1.bf16.msra.mxu0 %v16886_v30  ;;  %11845 = vmatpush1.bf16.msra.mxu1 %v16889_v31  ;;  %v16990_v30 = vld [vmem:[%s22364_s0 + $0x54] ss:$144 sps:$4 sm:$0xff]   ;;  %v16982_v31 = vld [vmem:[%s22363_s1 + $0x15e0] ss:$16 sps:$4 sm:$0xff]  }
 0x28c   :  { %9812 = vmatprep.subr.bf16.mxu0 %v16894_v32  ;;  %11846 = vmatprep.subr.bf16.mxu1 %v16897_v33  ;;  %v16985_v32 = vld [vmem:[%s22363_s1 + $0x15e8] ss:$16 sps:$4 sm:$0xff]   ;;  %v16988_v33 = vld [vmem:[%s22364_s0 + $0x50] ss:$144 sps:$4 sm:$0xff]  }
 0x28d   :  { %9745 = vmatprep.mubr.bf16.mxu0 %v16898_v34  ;;  %11779 = vmatprep.mubr.bf16.mxu1 %v16898_v34  ;;  %v16993_v34 = vld [vmem:[%s22363_s1 + $0x1604] ss:$16 sps:$4 sm:$0xff]  }
 0x28f   :  { %9813 = vmatpush1.bf16.msra.mxu0 %v16892_v35  ;;  %11847 = vmatpush1.bf16.msra.mxu1 %v16895_v36  ;;  %v16996_v35 = vld [vmem:[%s22363_s1 + $0x160c] ss:$16 sps:$4 sm:$0xff]   ;;  %v16991_v36 = vld [vmem:[%s22363_s1 + $0x1600] ss:$16 sps:$4 sm:$0xff]  }
 0x290   :  { %9814 = vmatprep.subr.bf16.mxu0 %v16903_v38  ;;  %11848 = vmatprep.subr.bf16.mxu1 %v16906_v39  ;;  %v16999_v38 = vld [vmem:[%s22363_s1 + $0x1624] ss:$16 sps:$4 sm:$0xff]   ;;  %v17002_v39 = vld [vmem:[%s22363_s1 + $0x162c] ss:$16 sps:$4 sm:$0xff]  }
 0x292   :  { %9746 = vmatmul.mubr.bf16.gmra.mrb[8].mxu0 %v16900_v37  ;;  %11780 = vmatmul.mubr.bf16.gmra.mrb[8].mxu1 %v16900_v37  ;;  %v16994_v37 = vld [vmem:[%s22363_s1 + $0x1608] ss:$16 sps:$4 sm:$0xff]  }
 0x293   :  { %9815 = vmatpush1.bf16.msra.mxu0 %v16901_v40  ;;  %11849 = vmatpush1.bf16.msra.mxu1 %v16904_v41  ;;  %v17003_v40 = vld [vmem:[%s22364_s0 + $0x174] ss:$144 sps:$4 sm:$0xff]   ;;  %v16997_v41 = vld [vmem:[%s22363_s1 + $0x1620] ss:$16 sps:$4 sm:$0xff]  }
 0x294   :  { %9816 = vmatprep.subr.bf16.mxu0 %v16909_v42  ;;  %11850 = vmatprep.subr.bf16.mxu1 %v16912_v43  ;;  %v17000_v42 = vld [vmem:[%s22363_s1 + $0x1628] ss:$16 sps:$4 sm:$0xff]   ;;  %v17005_v43 = vld [vmem:[%s22364_s0 + $0x170] ss:$144 sps:$4 sm:$0xff]  }
 0x295   :  { %9755 = vmatprep.mubr.bf16.mxu0 %v16913_v44  ;;  %11789 = vmatprep.mubr.bf16.mxu1 %v16913_v44  ;;  %v17008_v44 = vld [vmem:[%s22363_s1 + $0x1644] ss:$16 sps:$4 sm:$0xff]  }
 0x297   :  { %9817 = vmatpush1.bf16.msra.mxu0 %v16907_v45  ;;  %11851 = vmatpush1.bf16.msra.mxu1 %v16910_v46  ;;  %v17011_v45 = vld [vmem:[%s22363_s1 + $0x164c] ss:$16 sps:$4 sm:$0xff]   ;;  %v17006_v46 = vld [vmem:[%s22363_s1 + $0x1640] ss:$16 sps:$4 sm:$0xff]  }
 0x298   :  { %9818 = vmatprep.subr.bf16.mxu0 %v16918_v48  ;;  %11852 = vmatprep.subr.bf16.mxu1 %v16921_v49  ;;  %v17014_v48 = vld [vmem:[%s22363_s1 + $0x1664] ss:$16 sps:$4 sm:$0xff]   ;;  %v17017_v49 = vld [vmem:[%s22363_s1 + $0x166c] ss:$16 sps:$4 sm:$0xff]  }
 0x29a   :  { %9756 = vmatmul.mubr.bf16.gmra.mrb[12].mxu0 %v16915_v47  ;;  %11790 = vmatmul.mubr.bf16.gmra.mrb[12].mxu1 %v16915_v47  ;;  %v17009_v47 = vld [vmem:[%s22363_s1 + $0x1648] ss:$16 sps:$4 sm:$0xff]  }
 0x29b   :  { %9819 = vmatpush1.bf16.msra.mxu0 %v16916_v50  ;;  %11853 = vmatpush1.bf16.msra.mxu1 %v16919_v51  ;;  %v17018_v50 = vld [vmem:[%s22364_s0 + $0x294] ss:$144 sps:$4 sm:$0xff]   ;;  %v17012_v51 = vld [vmem:[%s22363_s1 + $0x1660] ss:$16 sps:$4 sm:$0xff]  }
 0x29c   :  { %9820 = vmatprep.subr.bf16.mxu0 %v16924_v52  ;;  %11854 = vmatprep.subr.bf16.mxu1 %v16927_v53  ;;  %v17015_v52 = vld [vmem:[%s22363_s1 + $0x1668] ss:$16 sps:$4 sm:$0xff]   ;;  %v17020_v53 = vld [vmem:[%s22364_s0 + $0x290] ss:$144 sps:$4 sm:$0xff]  }
 0x29d   :  { %9765 = vmatprep.mubr.bf16.mxu0 %v16928_v54  ;;  %11799 = vmatprep.mubr.bf16.mxu1 %v16928_v54  ;;  %v17023_v54 = vld [vmem:[%s22363_s1 + $0x1684] ss:$16 sps:$4 sm:$0xff]  }
 0x29f   :  { %9821 = vmatpush1.bf16.msra.mxu0 %v16922_v55  ;;  %11855 = vmatpush1.bf16.msra.mxu1 %v16925_v56  ;;  %v17026_v55 = vld [vmem:[%s22363_s1 + $0x168c] ss:$16 sps:$4 sm:$0xff]   ;;  %v17021_v56 = vld [vmem:[%s22363_s1 + $0x1680] ss:$16 sps:$4 sm:$0xff]  }
 0x2a0   :  { %9822 = vmatprep.subr.bf16.mxu0 %v16933_v58  ;;  %11856 = vmatprep.subr.bf16.mxu1 %v16936_v59  ;;  %v17029_v58 = vld [vmem:[%s22363_s1 + $0x16a4] ss:$16 sps:$4 sm:$0xff]   ;;  %v17032_v59 = vld [vmem:[%s22363_s1 + $0x16ac] ss:$16 sps:$4 sm:$0xff]  }
 0x2a2   :  { %9766 = vmatmul.mubr.bf16.gmra.mrb[16].mxu0 %v16930_v57  ;;  %11800 = vmatmul.mubr.bf16.gmra.mrb[16].mxu1 %v16930_v57  ;;  %v17024_v57 = vld [vmem:[%s22363_s1 + $0x1688] ss:$16 sps:$4 sm:$0xff]  }
 0x2a3   :  { %9823 = vmatpush1.bf16.msra.mxu0 %v16931_v60  ;;  %11857 = vmatpush1.bf16.msra.mxu1 %v16934_v61  ;;  %v17033_v60 = vld [vmem:[%s22364_s0 + $0x3b4] ss:$144 sps:$4 sm:$0xff]   ;;  %v17027_v61 = vld [vmem:[%s22363_s1 + $0x16a0] ss:$16 sps:$4 sm:$0xff]  }
 0x2a4   :  { %9824 = vmatprep.subr.bf16.mxu0 %v16939_v62  ;;  %11858 = vmatprep.subr.bf16.mxu1 %v16942_v63  ;;  %v17030_v62 = vld [vmem:[%s22363_s1 + $0x16a8] ss:$16 sps:$4 sm:$0xff]   ;;  %v17035_v63 = vld [vmem:[%s22364_s0 + $0x3b0] ss:$144 sps:$4 sm:$0xff]  }
 0x2a5   :  { %9775 = vmatprep.mubr.bf16.mxu0 %v16943_v0  ;;  %11809 = vmatprep.mubr.bf16.mxu1 %v16943_v0  ;;  %v17038_v0 = vld [vmem:[%s22363_s1 + $0x16c4] ss:$16 sps:$4 sm:$0xff]  }
 0x2a7   :  { %9825 = vmatpush1.bf16.msra.mxu0 %v16937_v1  ;;  %11859 = vmatpush1.bf16.msra.mxu1 %v16940_v2  ;;  %v17041_v1 = vld [vmem:[%s22363_s1 + $0x16cc] ss:$16 sps:$4 sm:$0xff]   ;;  %v17036_v2 = vld [vmem:[%s22363_s1 + $0x16c0] ss:$16 sps:$4 sm:$0xff]  }
 0x2a8   :  { %9826 = vmatprep.subr.bf16.mxu0 %v16948_v4  ;;  %11860 = vmatprep.subr.bf16.mxu1 %v16951_v5  ;;  %v17044_v4 = vld [vmem:[%s22363_s1 + $0x16e4] ss:$16 sps:$4 sm:$0xff]   ;;  %v17047_v5 = vld [vmem:[%s22363_s1 + $0x16ec] ss:$16 sps:$4 sm:$0xff]  }
 0x2aa   :  { %9776 = vmatmul.mubr.bf16.gmra.mrb[20].mxu0 %v16945_v3  ;;  %11810 = vmatmul.mubr.bf16.gmra.mrb[20].mxu1 %v16945_v3  ;;  %v17039_v3 = vld [vmem:[%s22363_s1 + $0x16c8] ss:$16 sps:$4 sm:$0xff]  }
 0x2ab   :  { %9827 = vmatpush1.bf16.msra.mxu0 %v16946_v6  ;;  %11861 = vmatpush1.bf16.msra.mxu1 %v16949_v7  ;;  %v17048_v6 = vld [vmem:[%s22364_s0 + $0x4d4] ss:$144 sps:$4 sm:$0xff]   ;;  %v17042_v7 = vld [vmem:[%s22363_s1 + $0x16e0] ss:$16 sps:$4 sm:$0xff]  }
 0x2ac   :  { %9828 = vmatprep.subr.bf16.mxu0 %v16954_v8  ;;  %11862 = vmatprep.subr.bf16.mxu1 %v16957_v9  ;;  %v17045_v8 = vld [vmem:[%s22363_s1 + $0x16e8] ss:$16 sps:$4 sm:$0xff]   ;;  %v17050_v9 = vld [vmem:[%s22364_s0 + $0x4d0] ss:$144 sps:$4 sm:$0xff]  }
 0x2ad   :  { %9785 = vmatprep.mubr.bf16.mxu0 %v16958_v10  ;;  %11819 = vmatprep.mubr.bf16.mxu1 %v16958_v10  ;;  %v17053_v10 = vld [vmem:[%s22363_s1 + $0x1704] ss:$16 sps:$4 sm:$0xff]  }
 0x2af   :  { %9829 = vmatpush1.bf16.msra.mxu0 %v16952_v11  ;;  %11863 = vmatpush1.bf16.msra.mxu1 %v16955_v12  ;;  %v17056_v11 = vld [vmem:[%s22363_s1 + $0x170c] ss:$16 sps:$4 sm:$0xff]   ;;  %v17051_v12 = vld [vmem:[%s22363_s1 + $0x1700] ss:$16 sps:$4 sm:$0xff]  }
 0x2b0   :  { %9830 = vmatprep.subr.bf16.mxu0 %v16963_v14  ;;  %11864 = vmatprep.subr.bf16.mxu1 %v16966_v15  ;;  %v17059_v14 = vld [vmem:[%s22363_s1 + $0x1724] ss:$16 sps:$4 sm:$0xff]   ;;  %v17062_v15 = vld [vmem:[%s22363_s1 + $0x172c] ss:$16 sps:$4 sm:$0xff]  }
 0x2b2   :  { %9786 = vmatmul.mubr.bf16.gmra.mrb[24].mxu0 %v16960_v13  ;;  %11820 = vmatmul.mubr.bf16.gmra.mrb[24].mxu1 %v16960_v13  ;;  %v17054_v13 = vld [vmem:[%s22363_s1 + $0x1708] ss:$16 sps:$4 sm:$0xff]  }
 0x2b3   :  { %9831 = vmatpush1.bf16.msra.mxu0 %v16961_v16  ;;  %11865 = vmatpush1.bf16.msra.mxu1 %v16964_v17  ;;  %v17063_v16 = vld [vmem:[%s22364_s0 + $0x5f4] ss:$144 sps:$4 sm:$0xff]   ;;  %v17057_v17 = vld [vmem:[%s22363_s1 + $0x1720] ss:$16 sps:$4 sm:$0xff]  }
 0x2b4   :  { %9832 = vmatprep.subr.bf16.mxu0 %v16969_v18  ;;  %11866 = vmatprep.subr.bf16.mxu1 %v16972_v19  ;;  %v17060_v18 = vld [vmem:[%s22363_s1 + $0x1728] ss:$16 sps:$4 sm:$0xff]   ;;  %v17065_v19 = vld [vmem:[%s22364_s0 + $0x5f0] ss:$144 sps:$4 sm:$0xff]  }
 0x2b5   :  { %9795 = vmatprep.mubr.bf16.mxu0 %v16973_v20  ;;  %11829 = vmatprep.mubr.bf16.mxu1 %v16973_v20  ;;  %v17068_v20 = vld [vmem:[%s22363_s1 + $0x1744] ss:$16 sps:$4 sm:$0xff]  }
 0x2b7   :  { %9833 = vmatpush1.bf16.msra.mxu0 %v16967_v21  ;;  %11867 = vmatpush1.bf16.msra.mxu1 %v16970_v22  ;;  %v17071_v21 = vld [vmem:[%s22363_s1 + $0x174c] ss:$16 sps:$4 sm:$0xff]   ;;  %v17066_v22 = vld [vmem:[%s22363_s1 + $0x1740] ss:$16 sps:$4 sm:$0xff]  }
 0x2b8   :  { %9834 = vmatprep.subr.bf16.mxu0 %v16978_v24  ;;  %11868 = vmatprep.subr.bf16.mxu1 %v16981_v25  ;;  %v17074_v24 = vld [vmem:[%s22363_s1 + $0x1764] ss:$16 sps:$4 sm:$0xff]   ;;  %v17077_v25 = vld [vmem:[%s22363_s1 + $0x176c] ss:$16 sps:$4 sm:$0xff]  }
 0x2ba   :  { %9796 = vmatmul.mubr.bf16.gmra.mrb[28].mxu0 %v16975_v23  ;;  %11830 = vmatmul.mubr.bf16.gmra.mrb[28].mxu1 %v16975_v23  ;;  %v17069_v23 = vld [vmem:[%s22363_s1 + $0x1748] ss:$16 sps:$4 sm:$0xff]  }
 0x2bb   :  { %9835 = vmatpush1.bf16.msra.mxu0 %v16976_v26  ;;  %11869 = vmatpush1.bf16.msra.mxu1 %v16979_v27  ;;  %v17078_v26 = vld [vmem:[%s22364_s0 + $0x714] ss:$144 sps:$4 sm:$0xff]   ;;  %v17072_v27 = vld [vmem:[%s22363_s1 + $0x1760] ss:$16 sps:$4 sm:$0xff]  }
 0x2bc   :  { %9836 = vmatprep.subr.bf16.mxu0 %v16984_v28  ;;  %11870 = vmatprep.subr.bf16.mxu1 %v16987_v29  ;;  %v17075_v28 = vld [vmem:[%s22363_s1 + $0x1768] ss:$16 sps:$4 sm:$0xff]   ;;  %v17080_v29 = vld [vmem:[%s22364_s0 + $0x710] ss:$144 sps:$4 sm:$0xff]  }
 0x2bd   :  { %9838 = vmatprep.mubr.bf16.mxu0 %v16990_v30  ;;  %11872 = vmatprep.mubr.bf16.mxu1 %v16990_v30  ;;  %v17083_v30 = vld [vmem:[%s22363_s1 + $0x1784] ss:$16 sps:$4 sm:$0xff]  }
 0x2bf   :  { %9837 = vmatpush1.bf16.msra.mxu0 %v16982_v31  ;;  %11871 = vmatpush1.bf16.msra.mxu1 %v16985_v32  ;;  %v17086_v31 = vld [vmem:[%s22363_s1 + $0x178c] ss:$16 sps:$4 sm:$0xff]   ;;  %v17081_v32 = vld [vmem:[%s22363_s1 + $0x1780] ss:$16 sps:$4 sm:$0xff]  }
 0x2c0   :  { %9919 = vmatprep.subr.bf16.mxu0 %v16993_v34  ;;  %11953 = vmatprep.subr.bf16.mxu1 %v16996_v35  ;;  %v17089_v34 = vld [vmem:[%s22363_s1 + $0x17a4] ss:$16 sps:$4 sm:$0xff]   ;;  %v17092_v35 = vld [vmem:[%s22363_s1 + $0x17ac] ss:$16 sps:$4 sm:$0xff]  }
 0x2c2   :  { %9839 = vmatmul.mubr.bf16.vlgmr.msra.gmra.mrb[0].mxu0 %v16988_v33  ;;  %11873 = vmatmul.mubr.bf16.vlgmr.msra.gmra.mrb[0].mxu1 %v16988_v33  ;;  %v17084_v33 = vld [vmem:[%s22363_s1 + $0x1788] ss:$16 sps:$4 sm:$0xff]  }
 0x2c3   :  { %9920 = vmatpush1.bf16.msra.mxu0 %v16991_v36  ;;  %11954 = vmatpush1.bf16.msra.mxu1 %v16994_v37  ;;  %v17093_v36 = vld [vmem:[%s22364_s0 + $0x834] ss:$144 sps:$4 sm:$0xff]   ;;  %v17087_v37 = vld [vmem:[%s22363_s1 + $0x17a0] ss:$16 sps:$4 sm:$0xff]  }
 0x2c4   :  { %9921 = vmatprep.subr.bf16.mxu0 %v16999_v38  ;;  %11955 = vmatprep.subr.bf16.mxu1 %v17002_v39  ;;  %v17090_v38 = vld [vmem:[%s22363_s1 + $0x17a8] ss:$16 sps:$4 sm:$0xff]   ;;  %v17095_v39 = vld [vmem:[%s22364_s0 + $0x830] ss:$144 sps:$4 sm:$0xff]  }
 0x2c5   :  { %9848 = vmatprep.mubr.bf16.mxu0 %v17003_v40  ;;  %11882 = vmatprep.mubr.bf16.mxu1 %v17003_v40  ;;  %v17098_v40 = vld [vmem:[%s22363_s1 + $0x17c4] ss:$16 sps:$4 sm:$0xff]  }
 0x2c7   :  { %9922 = vmatpush1.bf16.msra.mxu0 %v16997_v41  ;;  %11956 = vmatpush1.bf16.msra.mxu1 %v17000_v42  ;;  %v17101_v41 = vld [vmem:[%s22363_s1 + $0x17cc] ss:$16 sps:$4 sm:$0xff]   ;;  %v17096_v42 = vld [vmem:[%s22363_s1 + $0x17c0] ss:$16 sps:$4 sm:$0xff]  }
 0x2c8   :  { %9923 = vmatprep.subr.bf16.mxu0 %v17008_v44  ;;  %11957 = vmatprep.subr.bf16.mxu1 %v17011_v45  ;;  %v17104_v44 = vld [vmem:[%s22363_s1 + $0x17e4] ss:$16 sps:$4 sm:$0xff]   ;;  %v17107_v45 = vld [vmem:[%s22363_s1 + $0x17ec] ss:$16 sps:$4 sm:$0xff]  }
 0x2ca   :  { %9849 = vmatmul.mubr.bf16.gmra.mrb[4].mxu0 %v17005_v43  ;;  %11883 = vmatmul.mubr.bf16.gmra.mrb[4].mxu1 %v17005_v43  ;;  %v17099_v43 = vld [vmem:[%s22363_s1 + $0x17c8] ss:$16 sps:$4 sm:$0xff]  }
 0x2cb   :  { %9924 = vmatpush1.bf16.msra.mxu0 %v17006_v46  ;;  %11958 = vmatpush1.bf16.msra.mxu1 %v17009_v47  ;;  %v17110_v46 = vld [vmem:[%s22364_s0 + $0x5c] ss:$144 sps:$4 sm:$0xff]   ;;  %v17102_v47 = vld [vmem:[%s22363_s1 + $0x17e0] ss:$16 sps:$4 sm:$0xff]  }
 0x2cc   :  { %9925 = vmatprep.subr.bf16.mxu0 %v17014_v48  ;;  %11959 = vmatprep.subr.bf16.mxu1 %v17017_v49  ;;  %v17105_v48 = vld [vmem:[%s22363_s1 + $0x17e8] ss:$16 sps:$4 sm:$0xff]  }
 0x2cd   :  { %9858 = vmatprep.mubr.bf16.mxu0 %v17018_v50  ;;  %11892 = vmatprep.mubr.bf16.mxu1 %v17018_v50  ;;  %v17108_v49 = vld [vmem:[%s22364_s0 + $0x58] ss:$144 sps:$4 sm:$0xff]   ;;  %v17113_v50 = vld [vmem:[%s22363_s1 + $0x1804] ss:$16 sps:$4 sm:$0xff]  }
 0x2cf   :  { %9926 = vmatpush1.bf16.msra.mxu0 %v17012_v51  ;;  %11960 = vmatpush1.bf16.msra.mxu1 %v17015_v52  ;;  %v17116_v51 = vld [vmem:[%s22363_s1 + $0x180c] ss:$16 sps:$4 sm:$0xff]   ;;  %v17111_v52 = vld [vmem:[%s22363_s1 + $0x1800] ss:$16 sps:$4 sm:$0xff]  }
 0x2d0   :  { %9927 = vmatprep.subr.bf16.mxu0 %v17023_v54  ;;  %11961 = vmatprep.subr.bf16.mxu1 %v17026_v55  ;;  %v17119_v54 = vld [vmem:[%s22363_s1 + $0x1824] ss:$16 sps:$4 sm:$0xff]   ;;  %v17122_v55 = vld [vmem:[%s22363_s1 + $0x182c] ss:$16 sps:$4 sm:$0xff]  }
 0x2d2   :  { %9859 = vmatmul.mubr.bf16.gmra.mrb[8].mxu0 %v17020_v53  ;;  %11893 = vmatmul.mubr.bf16.gmra.mrb[8].mxu1 %v17020_v53  ;;  %v17114_v53 = vld [vmem:[%s22363_s1 + $0x1808] ss:$16 sps:$4 sm:$0xff]  }
 0x2d3   :  { %9928 = vmatpush1.bf16.msra.mxu0 %v17021_v56  ;;  %11962 = vmatpush1.bf16.msra.mxu1 %v17024_v57  ;;  %v17123_v56 = vld [vmem:[%s22364_s0 + $0x17c] ss:$144 sps:$4 sm:$0xff]   ;;  %v17117_v57 = vld [vmem:[%s22363_s1 + $0x1820] ss:$16 sps:$4 sm:$0xff]  }
 0x2d4   :  { %9929 = vmatprep.subr.bf16.mxu0 %v17029_v58  ;;  %11963 = vmatprep.subr.bf16.mxu1 %v17032_v59  ;;  %v17120_v58 = vld [vmem:[%s22363_s1 + $0x1828] ss:$16 sps:$4 sm:$0xff]  }
 0x2d5   :  { %9868 = vmatprep.mubr.bf16.mxu0 %v17033_v60  ;;  %11902 = vmatprep.mubr.bf16.mxu1 %v17033_v60  ;;  %v17125_v59 = vld [vmem:[%s22364_s0 + $0x178] ss:$144 sps:$4 sm:$0xff]   ;;  %v17128_v60 = vld [vmem:[%s22363_s1 + $0x1844] ss:$16 sps:$4 sm:$0xff]  }
 0x2d7   :  { %9930 = vmatpush1.bf16.msra.mxu0 %v17027_v61  ;;  %11964 = vmatpush1.bf16.msra.mxu1 %v17030_v62  ;;  %v17131_v61 = vld [vmem:[%s22363_s1 + $0x184c] ss:$16 sps:$4 sm:$0xff]   ;;  %v17126_v62 = vld [vmem:[%s22363_s1 + $0x1840] ss:$16 sps:$4 sm:$0xff]  }
 0x2d8   :  { %9931 = vmatprep.subr.bf16.mxu0 %v17038_v0  ;;  %11965 = vmatprep.subr.bf16.mxu1 %v17041_v1  ;;  %v17134_v0 = vld [vmem:[%s22363_s1 + $0x1864] ss:$16 sps:$4 sm:$0xff]   ;;  %v17137_v1 = vld [vmem:[%s22363_s1 + $0x186c] ss:$16 sps:$4 sm:$0xff]  }
 0x2da   :  { %9869 = vmatmul.mubr.bf16.gmra.mrb[12].mxu0 %v17035_v63  ;;  %11903 = vmatmul.mubr.bf16.gmra.mrb[12].mxu1 %v17035_v63  ;;  %v17129_v63 = vld [vmem:[%s22363_s1 + $0x1848] ss:$16 sps:$4 sm:$0xff]  }
 0x2db   :  { %9932 = vmatpush1.bf16.msra.mxu0 %v17036_v2  ;;  %11966 = vmatpush1.bf16.msra.mxu1 %v17039_v3  ;;  %v17138_v2 = vld [vmem:[%s22364_s0 + $0x29c] ss:$144 sps:$4 sm:$0xff]   ;;  %v17132_v3 = vld [vmem:[%s22363_s1 + $0x1860] ss:$16 sps:$4 sm:$0xff]  }
 0x2dc   :  { %9933 = vmatprep.subr.bf16.mxu0 %v17044_v4  ;;  %11967 = vmatprep.subr.bf16.mxu1 %v17047_v5  ;;  %v17135_v4 = vld [vmem:[%s22363_s1 + $0x1868] ss:$16 sps:$4 sm:$0xff]  }
 0x2dd   :  { %9878 = vmatprep.mubr.bf16.mxu0 %v17048_v6  ;;  %11912 = vmatprep.mubr.bf16.mxu1 %v17048_v6  ;;  %v17140_v5 = vld [vmem:[%s22364_s0 + $0x298] ss:$144 sps:$4 sm:$0xff]   ;;  %v17143_v6 = vld [vmem:[%s22363_s1 + $0x1884] ss:$16 sps:$4 sm:$0xff]  }
 0x2df   :  { %9934 = vmatpush1.bf16.msra.mxu0 %v17042_v7  ;;  %11968 = vmatpush1.bf16.msra.mxu1 %v17045_v8  ;;  %v17146_v7 = vld [vmem:[%s22363_s1 + $0x188c] ss:$16 sps:$4 sm:$0xff]   ;;  %v17141_v8 = vld [vmem:[%s22363_s1 + $0x1880] ss:$16 sps:$4 sm:$0xff]  }
 0x2e0   :  { %9935 = vmatprep.subr.bf16.mxu0 %v17053_v10  ;;  %11969 = vmatprep.subr.bf16.mxu1 %v17056_v11  ;;  %v17149_v10 = vld [vmem:[%s22363_s1 + $0x18a4] ss:$16 sps:$4 sm:$0xff]   ;;  %v17152_v11 = vld [vmem:[%s22363_s1 + $0x18ac] ss:$16 sps:$4 sm:$0xff]  }
 0x2e2   :  { %9879 = vmatmul.mubr.bf16.gmra.mrb[16].mxu0 %v17050_v9  ;;  %11913 = vmatmul.mubr.bf16.gmra.mrb[16].mxu1 %v17050_v9  ;;  %v17144_v9 = vld [vmem:[%s22363_s1 + $0x1888] ss:$16 sps:$4 sm:$0xff]  }
 0x2e3   :  { %9936 = vmatpush1.bf16.msra.mxu0 %v17051_v12  ;;  %11970 = vmatpush1.bf16.msra.mxu1 %v17054_v13  ;;  %v17153_v12 = vld [vmem:[%s22364_s0 + $0x3bc] ss:$144 sps:$4 sm:$0xff]   ;;  %v17147_v13 = vld [vmem:[%s22363_s1 + $0x18a0] ss:$16 sps:$4 sm:$0xff]  }
 0x2e4   :  { %9937 = vmatprep.subr.bf16.mxu0 %v17059_v14  ;;  %11971 = vmatprep.subr.bf16.mxu1 %v17062_v15  ;;  %v17150_v14 = vld [vmem:[%s22363_s1 + $0x18a8] ss:$16 sps:$4 sm:$0xff]  }
 0x2e5   :  { %9888 = vmatprep.mubr.bf16.mxu0 %v17063_v16  ;;  %11922 = vmatprep.mubr.bf16.mxu1 %v17063_v16  ;;  %v17155_v15 = vld [vmem:[%s22364_s0 + $0x3b8] ss:$144 sps:$4 sm:$0xff]   ;;  %v17158_v16 = vld [vmem:[%s22363_s1 + $0x18c4] ss:$16 sps:$4 sm:$0xff]  }
 0x2e7   :  { %9938 = vmatpush1.bf16.msra.mxu0 %v17057_v17  ;;  %11972 = vmatpush1.bf16.msra.mxu1 %v17060_v18  ;;  %v17161_v17 = vld [vmem:[%s22363_s1 + $0x18cc] ss:$16 sps:$4 sm:$0xff]   ;;  %v17156_v18 = vld [vmem:[%s22363_s1 + $0x18c0] ss:$16 sps:$4 sm:$0xff]  }
 0x2e8   :  { %9939 = vmatprep.subr.bf16.mxu0 %v17068_v20  ;;  %11973 = vmatprep.subr.bf16.mxu1 %v17071_v21  ;;  %v17164_v20 = vld [vmem:[%s22363_s1 + $0x18e4] ss:$16 sps:$4 sm:$0xff]   ;;  %v17167_v21 = vld [vmem:[%s22363_s1 + $0x18ec] ss:$16 sps:$4 sm:$0xff]  }
 0x2ea   :  { %9889 = vmatmul.mubr.bf16.gmra.mrb[20].mxu0 %v17065_v19  ;;  %11923 = vmatmul.mubr.bf16.gmra.mrb[20].mxu1 %v17065_v19  ;;  %v17159_v19 = vld [vmem:[%s22363_s1 + $0x18c8] ss:$16 sps:$4 sm:$0xff]  }
 0x2eb   :  { %9940 = vmatpush1.bf16.msra.mxu0 %v17066_v22  ;;  %11974 = vmatpush1.bf16.msra.mxu1 %v17069_v23  ;;  %v17168_v22 = vld [vmem:[%s22364_s0 + $0x4dc] ss:$144 sps:$4 sm:$0xff]   ;;  %v17162_v23 = vld [vmem:[%s22363_s1 + $0x18e0] ss:$16 sps:$4 sm:$0xff]  }
 0x2ec   :  { %9941 = vmatprep.subr.bf16.mxu0 %v17074_v24  ;;  %11975 = vmatprep.subr.bf16.mxu1 %v17077_v25  ;;  %v17165_v24 = vld [vmem:[%s22363_s1 + $0x18e8] ss:$16 sps:$4 sm:$0xff]  }
 0x2ed   :  { %9898 = vmatprep.mubr.bf16.mxu0 %v17078_v26  ;;  %11932 = vmatprep.mubr.bf16.mxu1 %v17078_v26  ;;  %v17170_v25 = vld [vmem:[%s22364_s0 + $0x4d8] ss:$144 sps:$4 sm:$0xff]   ;;  %v17173_v26 = vld [vmem:[%s22363_s1 + $0x1904] ss:$16 sps:$4 sm:$0xff]  }
 0x2ef   :  { %9942 = vmatpush1.bf16.msra.mxu0 %v17072_v27  ;;  %11976 = vmatpush1.bf16.msra.mxu1 %v17075_v28  ;;  %v17176_v27 = vld [vmem:[%s22363_s1 + $0x190c] ss:$16 sps:$4 sm:$0xff]   ;;  %v17171_v28 = vld [vmem:[%s22363_s1 + $0x1900] ss:$16 sps:$4 sm:$0xff]  }
 0x2f0   :  { %9943 = vmatprep.subr.bf16.mxu0 %v17083_v30  ;;  %11977 = vmatprep.subr.bf16.mxu1 %v17086_v31  ;;  %v17179_v30 = vld [vmem:[%s22363_s1 + $0x1924] ss:$16 sps:$4 sm:$0xff]   ;;  %v17182_v31 = vld [vmem:[%s22363_s1 + $0x192c] ss:$16 sps:$4 sm:$0xff]  }
 0x2f2   :  { %9899 = vmatmul.mubr.bf16.gmra.mrb[24].mxu0 %v17080_v29  ;;  %11933 = vmatmul.mubr.bf16.gmra.mrb[24].mxu1 %v17080_v29  ;;  %v17174_v29 = vld [vmem:[%s22363_s1 + $0x1908] ss:$16 sps:$4 sm:$0xff]  }
 0x2f3   :  { %9944 = vmatpush1.bf16.msra.mxu0 %v17081_v32  ;;  %11978 = vmatpush1.bf16.msra.mxu1 %v17084_v33  ;;  %v17183_v32 = vld [vmem:[%s22364_s0 + $0x5fc] ss:$144 sps:$4 sm:$0xff]   ;;  %v17177_v33 = vld [vmem:[%s22363_s1 + $0x1920] ss:$16 sps:$4 sm:$0xff]  }
 0x2f4   :  { %9945 = vmatprep.subr.bf16.mxu0 %v17089_v34  ;;  %11979 = vmatprep.subr.bf16.mxu1 %v17092_v35  ;;  %v17180_v34 = vld [vmem:[%s22363_s1 + $0x1928] ss:$16 sps:$4 sm:$0xff]  }
 0x2f5   :  { %9908 = vmatprep.mubr.bf16.mxu0 %v17093_v36  ;;  %11942 = vmatprep.mubr.bf16.mxu1 %v17093_v36  ;;  %v17185_v35 = vld [vmem:[%s22364_s0 + $0x5f8] ss:$144 sps:$4 sm:$0xff]   ;;  %v17188_v36 = vld [vmem:[%s22363_s1 + $0x1944] ss:$16 sps:$4 sm:$0xff]  }
 0x2f7   :  { %9946 = vmatpush1.bf16.msra.mxu0 %v17087_v37  ;;  %11980 = vmatpush1.bf16.msra.mxu1 %v17090_v38  ;;  %v17191_v37 = vld [vmem:[%s22363_s1 + $0x194c] ss:$16 sps:$4 sm:$0xff]   ;;  %v17186_v38 = vld [vmem:[%s22363_s1 + $0x1940] ss:$16 sps:$4 sm:$0xff]  }
 0x2f8   :  { %9947 = vmatprep.subr.bf16.mxu0 %v17098_v40  ;;  %11981 = vmatprep.subr.bf16.mxu1 %v17101_v41  ;;  %v17194_v40 = vld [vmem:[%s22363_s1 + $0x1964] ss:$16 sps:$4 sm:$0xff]   ;;  %v17197_v41 = vld [vmem:[%s22363_s1 + $0x196c] ss:$16 sps:$4 sm:$0xff]  }
 0x2fa   :  { %9909 = vmatmul.mubr.bf16.gmra.mrb[28].mxu0 %v17095_v39  ;;  %11943 = vmatmul.mubr.bf16.gmra.mrb[28].mxu1 %v17095_v39  ;;  %v17189_v39 = vld [vmem:[%s22363_s1 + $0x1948] ss:$16 sps:$4 sm:$0xff]  }
 0x2fb   :  { %9948 = vmatpush1.bf16.msra.mxu0 %v17096_v42  ;;  %11982 = vmatpush1.bf16.msra.mxu1 %v17099_v43  ;;  %v17198_v42 = vld [vmem:[%s22364_s0 + $0x71c] ss:$144 sps:$4 sm:$0xff]   ;;  %v17192_v43 = vld [vmem:[%s22363_s1 + $0x1960] ss:$16 sps:$4 sm:$0xff]  }
 0x2fc   :  { %9949 = vmatprep.subr.bf16.mxu0 %v17104_v44  ;;  %11983 = vmatprep.subr.bf16.mxu1 %v17107_v45  ;;  %v17195_v44 = vld [vmem:[%s22363_s1 + $0x1968] ss:$16 sps:$4 sm:$0xff]  }
 0x2fd   :  { %9951 = vmatprep.mubr.bf16.mxu0 %v17110_v46  ;;  %11985 = vmatprep.mubr.bf16.mxu1 %v17110_v46  ;;  %v17200_v45 = vld [vmem:[%s22364_s0 + $0x718] ss:$144 sps:$4 sm:$0xff]   ;;  %v17203_v46 = vld [vmem:[%s22363_s1 + $0x1984] ss:$16 sps:$4 sm:$0xff]  }
 0x2ff   :  { %9950 = vmatpush1.bf16.msra.mxu0 %v17102_v47  ;;  %11984 = vmatpush1.bf16.msra.mxu1 %v17105_v48  ;;  %v17206_v47 = vld [vmem:[%s22363_s1 + $0x198c] ss:$16 sps:$4 sm:$0xff]   ;;  %v17201_v48 = vld [vmem:[%s22363_s1 + $0x1980] ss:$16 sps:$4 sm:$0xff]  }
 0x300   :  { %10032 = vmatprep.subr.bf16.mxu0 %v17113_v50  ;;  %12066 = vmatprep.subr.bf16.mxu1 %v17116_v51  ;;  %v17209_v50 = vld [vmem:[%s22363_s1 + $0x19a4] ss:$16 sps:$4 sm:$0xff]   ;;  %v17212_v51 = vld [vmem:[%s22363_s1 + $0x19ac] ss:$16 sps:$4 sm:$0xff]  }
 0x302   :  { %9952 = vmatmul.mubr.bf16.vlgmr.msra.gmra.mrb[0].mxu0 %v17108_v49  ;;  %11986 = vmatmul.mubr.bf16.vlgmr.msra.gmra.mrb[0].mxu1 %v17108_v49  ;;  %v17204_v49 = vld [vmem:[%s22363_s1 + $0x1988] ss:$16 sps:$4 sm:$0xff]  }
 0x303   :  { %10033 = vmatpush1.bf16.msra.mxu0 %v17111_v52  ;;  %12067 = vmatpush1.bf16.msra.mxu1 %v17114_v53  ;;  %v17213_v52 = vld [vmem:[%s22364_s0 + $0x83c] ss:$144 sps:$4 sm:$0xff]   ;;  %v17207_v53 = vld [vmem:[%s22363_s1 + $0x19a0] ss:$16 sps:$4 sm:$0xff]  }
 0x304   :  { %10034 = vmatprep.subr.bf16.mxu0 %v17119_v54  ;;  %12068 = vmatprep.subr.bf16.mxu1 %v17122_v55  ;;  %v17210_v54 = vld [vmem:[%s22363_s1 + $0x19a8] ss:$16 sps:$4 sm:$0xff]  }
 0x305   :  { %9961 = vmatprep.mubr.bf16.mxu0 %v17123_v56  ;;  %11995 = vmatprep.mubr.bf16.mxu1 %v17123_v56  ;;  %v17215_v55 = vld [vmem:[%s22364_s0 + $0x838] ss:$144 sps:$4 sm:$0xff]   ;;  %v17218_v56 = vld [vmem:[%s22363_s1 + $0x19c4] ss:$16 sps:$4 sm:$0xff]  }
 0x307   :  { %10035 = vmatpush1.bf16.msra.mxu0 %v17117_v57  ;;  %12069 = vmatpush1.bf16.msra.mxu1 %v17120_v58  ;;  %v17221_v57 = vld [vmem:[%s22363_s1 + $0x19cc] ss:$16 sps:$4 sm:$0xff]   ;;  %v17216_v58 = vld [vmem:[%s22363_s1 + $0x19c0] ss:$16 sps:$4 sm:$0xff]  }
 0x308   :  { %10036 = vmatprep.subr.bf16.mxu0 %v17128_v60  ;;  %12070 = vmatprep.subr.bf16.mxu1 %v17131_v61  ;;  %v17224_v60 = vld [vmem:[%s22363_s1 + $0x19e4] ss:$16 sps:$4 sm:$0xff]   ;;  %v17227_v61 = vld [vmem:[%s22363_s1 + $0x19ec] ss:$16 sps:$4 sm:$0xff]  }
 0x30a   :  { %9962 = vmatmul.mubr.bf16.gmra.mrb[4].mxu0 %v17125_v59  ;;  %11996 = vmatmul.mubr.bf16.gmra.mrb[4].mxu1 %v17125_v59  ;;  %v17219_v59 = vld [vmem:[%s22363_s1 + $0x19c8] ss:$16 sps:$4 sm:$0xff]  }
 0x30b   :  { %10037 = vmatpush1.bf16.msra.mxu0 %v17126_v62  ;;  %12071 = vmatpush1.bf16.msra.mxu1 %v17129_v63  ;;  %v17230_v62 = vld [vmem:[%s22364_s0 + $0x64] ss:$144 sps:$4 sm:$0xff]   ;;  %v17222_v63 = vld [vmem:[%s22363_s1 + $0x19e0] ss:$16 sps:$4 sm:$0xff]  }
 0x30c   :  { %10038 = vmatprep.subr.bf16.mxu0 %v17134_v0  ;;  %12072 = vmatprep.subr.bf16.mxu1 %v17137_v1  ;;  %v17225_v0 = vld [vmem:[%s22363_s1 + $0x19e8] ss:$16 sps:$4 sm:$0xff]   ;;  %v17228_v1 = vld [vmem:[%s22364_s0 + $0x60] ss:$144 sps:$4 sm:$0xff]  }
 0x30d   :  { %9971 = vmatprep.mubr.bf16.mxu0 %v17138_v2  ;;  %12005 = vmatprep.mubr.bf16.mxu1 %v17138_v2  ;;  %v17233_v2 = vld [vmem:[%s22363_s1 + $0x1a04] ss:$16 sps:$4 sm:$0xff]  }
 0x30f   :  { %10039 = vmatpush1.bf16.msra.mxu0 %v17132_v3  ;;  %12073 = vmatpush1.bf16.msra.mxu1 %v17135_v4  ;;  %v17236_v3 = vld [vmem:[%s22363_s1 + $0x1a0c] ss:$16 sps:$4 sm:$0xff]   ;;  %v17231_v4 = vld [vmem:[%s22363_s1 + $0x1a00] ss:$16 sps:$4 sm:$0xff]  }
 0x310   :  { %10040 = vmatprep.subr.bf16.mxu0 %v17143_v6  ;;  %12074 = vmatprep.subr.bf16.mxu1 %v17146_v7  ;;  %v17239_v6 = vld [vmem:[%s22363_s1 + $0x1a24] ss:$16 sps:$4 sm:$0xff]   ;;  %v17242_v7 = vld [vmem:[%s22363_s1 + $0x1a2c] ss:$16 sps:$4 sm:$0xff]  }
 0x312   :  { %9972 = vmatmul.mubr.bf16.gmra.mrb[8].mxu0 %v17140_v5  ;;  %12006 = vmatmul.mubr.bf16.gmra.mrb[8].mxu1 %v17140_v5  ;;  %v17234_v5 = vld [vmem:[%s22363_s1 + $0x1a08] ss:$16 sps:$4 sm:$0xff]  }
 0x313   :  { %10041 = vmatpush1.bf16.msra.mxu0 %v17141_v8  ;;  %12075 = vmatpush1.bf16.msra.mxu1 %v17144_v9  ;;  %v17243_v8 = vld [vmem:[%s22364_s0 + $0x184] ss:$144 sps:$4 sm:$0xff]   ;;  %v17237_v9 = vld [vmem:[%s22363_s1 + $0x1a20] ss:$16 sps:$4 sm:$0xff]  }
 0x314   :  { %10042 = vmatprep.subr.bf16.mxu0 %v17149_v10  ;;  %12076 = vmatprep.subr.bf16.mxu1 %v17152_v11  ;;  %v17240_v10 = vld [vmem:[%s22363_s1 + $0x1a28] ss:$16 sps:$4 sm:$0xff]   ;;  %v17245_v11 = vld [vmem:[%s22364_s0 + $0x180] ss:$144 sps:$4 sm:$0xff]  }
 0x315   :  { %9981 = vmatprep.mubr.bf16.mxu0 %v17153_v12  ;;  %12015 = vmatprep.mubr.bf16.mxu1 %v17153_v12  ;;  %v17248_v12 = vld [vmem:[%s22363_s1 + $0x1a44] ss:$16 sps:$4 sm:$0xff]  }
 0x317   :  { %10043 = vmatpush1.bf16.msra.mxu0 %v17147_v13  ;;  %12077 = vmatpush1.bf16.msra.mxu1 %v17150_v14  ;;  %v17251_v13 = vld [vmem:[%s22363_s1 + $0x1a4c] ss:$16 sps:$4 sm:$0xff]   ;;  %v17246_v14 = vld [vmem:[%s22363_s1 + $0x1a40] ss:$16 sps:$4 sm:$0xff]  }
 0x318   :  { %10044 = vmatprep.subr.bf16.mxu0 %v17158_v16  ;;  %12078 = vmatprep.subr.bf16.mxu1 %v17161_v17  ;;  %v17254_v16 = vld [vmem:[%s22363_s1 + $0x1a64] ss:$16 sps:$4 sm:$0xff]   ;;  %v17257_v17 = vld [vmem:[%s22363_s1 + $0x1a6c] ss:$16 sps:$4 sm:$0xff]  }
 0x31a   :  { %9982 = vmatmul.mubr.bf16.gmra.mrb[12].mxu0 %v17155_v15  ;;  %12016 = vmatmul.mubr.bf16.gmra.mrb[12].mxu1 %v17155_v15  ;;  %v17249_v15 = vld [vmem:[%s22363_s1 + $0x1a48] ss:$16 sps:$4 sm:$0xff]  }
 0x31b   :  { %10045 = vmatpush1.bf16.msra.mxu0 %v17156_v18  ;;  %12079 = vmatpush1.bf16.msra.mxu1 %v17159_v19  ;;  %v17258_v18 = vld [vmem:[%s22364_s0 + $0x2a4] ss:$144 sps:$4 sm:$0xff]   ;;  %v17252_v19 = vld [vmem:[%s22363_s1 + $0x1a60] ss:$16 sps:$4 sm:$0xff]  }
 0x31c   :  { %10046 = vmatprep.subr.bf16.mxu0 %v17164_v20  ;;  %12080 = vmatprep.subr.bf16.mxu1 %v17167_v21  ;;  %v17255_v20 = vld [vmem:[%s22363_s1 + $0x1a68] ss:$16 sps:$4 sm:$0xff]   ;;  %v17260_v21 = vld [vmem:[%s22364_s0 + $0x2a0] ss:$144 sps:$4 sm:$0xff]  }
 0x31d   :  { %9991 = vmatprep.mubr.bf16.mxu0 %v17168_v22  ;;  %12025 = vmatprep.mubr.bf16.mxu1 %v17168_v22  ;;  %v17263_v22 = vld [vmem:[%s22363_s1 + $0x1a84] ss:$16 sps:$4 sm:$0xff]  }
 0x31f   :  { %10047 = vmatpush1.bf16.msra.mxu0 %v17162_v23  ;;  %12081 = vmatpush1.bf16.msra.mxu1 %v17165_v24  ;;  %v17266_v23 = vld [vmem:[%s22363_s1 + $0x1a8c] ss:$16 sps:$4 sm:$0xff]   ;;  %v17261_v24 = vld [vmem:[%s22363_s1 + $0x1a80] ss:$16 sps:$4 sm:$0xff]  }
 0x320   :  { %10048 = vmatprep.subr.bf16.mxu0 %v17173_v26  ;;  %12082 = vmatprep.subr.bf16.mxu1 %v17176_v27  ;;  %v17269_v26 = vld [vmem:[%s22363_s1 + $0x1aa4] ss:$16 sps:$4 sm:$0xff]   ;;  %v17272_v27 = vld [vmem:[%s22363_s1 + $0x1aac] ss:$16 sps:$4 sm:$0xff]  }
 0x322   :  { %9992 = vmatmul.mubr.bf16.gmra.mrb[16].mxu0 %v17170_v25  ;;  %12026 = vmatmul.mubr.bf16.gmra.mrb[16].mxu1 %v17170_v25  ;;  %v17264_v25 = vld [vmem:[%s22363_s1 + $0x1a88] ss:$16 sps:$4 sm:$0xff]  }
 0x323   :  { %10049 = vmatpush1.bf16.msra.mxu0 %v17171_v28  ;;  %12083 = vmatpush1.bf16.msra.mxu1 %v17174_v29  ;;  %v17273_v28 = vld [vmem:[%s22364_s0 + $0x3c4] ss:$144 sps:$4 sm:$0xff]   ;;  %v17267_v29 = vld [vmem:[%s22363_s1 + $0x1aa0] ss:$16 sps:$4 sm:$0xff]  }
 0x324   :  { %10050 = vmatprep.subr.bf16.mxu0 %v17179_v30  ;;  %12084 = vmatprep.subr.bf16.mxu1 %v17182_v31  ;;  %v17270_v30 = vld [vmem:[%s22363_s1 + $0x1aa8] ss:$16 sps:$4 sm:$0xff]   ;;  %v17275_v31 = vld [vmem:[%s22364_s0 + $0x3c0] ss:$144 sps:$4 sm:$0xff]  }
 0x325   :  { %10001 = vmatprep.mubr.bf16.mxu0 %v17183_v32  ;;  %12035 = vmatprep.mubr.bf16.mxu1 %v17183_v32  ;;  %v17278_v32 = vld [vmem:[%s22363_s1 + $0x1ac4] ss:$16 sps:$4 sm:$0xff]  }
 0x327   :  { %10051 = vmatpush1.bf16.msra.mxu0 %v17177_v33  ;;  %12085 = vmatpush1.bf16.msra.mxu1 %v17180_v34  ;;  %v17281_v33 = vld [vmem:[%s22363_s1 + $0x1acc] ss:$16 sps:$4 sm:$0xff]   ;;  %v17276_v34 = vld [vmem:[%s22363_s1 + $0x1ac0] ss:$16 sps:$4 sm:$0xff]  }
 0x328   :  { %10052 = vmatprep.subr.bf16.mxu0 %v17188_v36  ;;  %12086 = vmatprep.subr.bf16.mxu1 %v17191_v37  ;;  %v17284_v36 = vld [vmem:[%s22363_s1 + $0x1ae4] ss:$16 sps:$4 sm:$0xff]   ;;  %v17287_v37 = vld [vmem:[%s22363_s1 + $0x1aec] ss:$16 sps:$4 sm:$0xff]  }
 0x32a   :  { %10002 = vmatmul.mubr.bf16.gmra.mrb[20].mxu0 %v17185_v35  ;;  %12036 = vmatmul.mubr.bf16.gmra.mrb[20].mxu1 %v17185_v35  ;;  %v17279_v35 = vld [vmem:[%s22363_s1 + $0x1ac8] ss:$16 sps:$4 sm:$0xff]  }
 0x32b   :  { %10053 = vmatpush1.bf16.msra.mxu0 %v17186_v38  ;;  %12087 = vmatpush1.bf16.msra.mxu1 %v17189_v39  ;;  %v17288_v38 = vld [vmem:[%s22364_s0 + $0x4e4] ss:$144 sps:$4 sm:$0xff]   ;;  %v17282_v39 = vld [vmem:[%s22363_s1 + $0x1ae0] ss:$16 sps:$4 sm:$0xff]  }
 0x32c   :  { %10054 = vmatprep.subr.bf16.mxu0 %v17194_v40  ;;  %12088 = vmatprep.subr.bf16.mxu1 %v17197_v41  ;;  %v17285_v40 = vld [vmem:[%s22363_s1 + $0x1ae8] ss:$16 sps:$4 sm:$0xff]   ;;  %v17290_v41 = vld [vmem:[%s22364_s0 + $0x4e0] ss:$144 sps:$4 sm:$0xff]  }
 0x32d   :  { %10011 = vmatprep.mubr.bf16.mxu0 %v17198_v42  ;;  %12045 = vmatprep.mubr.bf16.mxu1 %v17198_v42  ;;  %v17293_v42 = vld [vmem:[%s22363_s1 + $0x1b04] ss:$16 sps:$4 sm:$0xff]  }
 0x32f   :  { %10055 = vmatpush1.bf16.msra.mxu0 %v17192_v43  ;;  %12089 = vmatpush1.bf16.msra.mxu1 %v17195_v44  ;;  %v17296_v43 = vld [vmem:[%s22363_s1 + $0x1b0c] ss:$16 sps:$4 sm:$0xff]   ;;  %v17291_v44 = vld [vmem:[%s22363_s1 + $0x1b00] ss:$16 sps:$4 sm:$0xff]  }
 0x330   :  { %10056 = vmatprep.subr.bf16.mxu0 %v17203_v46  ;;  %12090 = vmatprep.subr.bf16.mxu1 %v17206_v47  ;;  %v17299_v46 = vld [vmem:[%s22363_s1 + $0x1b24] ss:$16 sps:$4 sm:$0xff]   ;;  %v17302_v47 = vld [vmem:[%s22363_s1 + $0x1b2c] ss:$16 sps:$4 sm:$0xff]  }
 0x332   :  { %10012 = vmatmul.mubr.bf16.gmra.mrb[24].mxu0 %v17200_v45  ;;  %12046 = vmatmul.mubr.bf16.gmra.mrb[24].mxu1 %v17200_v45  ;;  %v17294_v45 = vld [vmem:[%s22363_s1 + $0x1b08] ss:$16 sps:$4 sm:$0xff]  }
 0x333   :  { %10057 = vmatpush1.bf16.msra.mxu0 %v17201_v48  ;;  %12091 = vmatpush1.bf16.msra.mxu1 %v17204_v49  ;;  %v17303_v48 = vld [vmem:[%s22364_s0 + $0x604] ss:$144 sps:$4 sm:$0xff]   ;;  %v17297_v49 = vld [vmem:[%s22363_s1 + $0x1b20] ss:$16 sps:$4 sm:$0xff]  }
 0x334   :  { %10058 = vmatprep.subr.bf16.mxu0 %v17209_v50  ;;  %12092 = vmatprep.subr.bf16.mxu1 %v17212_v51  ;;  %v17300_v50 = vld [vmem:[%s22363_s1 + $0x1b28] ss:$16 sps:$4 sm:$0xff]   ;;  %v17305_v51 = vld [vmem:[%s22364_s0 + $0x600] ss:$144 sps:$4 sm:$0xff]  }
 0x335   :  { %10021 = vmatprep.mubr.bf16.mxu0 %v17213_v52  ;;  %12055 = vmatprep.mubr.bf16.mxu1 %v17213_v52  ;;  %v17308_v52 = vld [vmem:[%s22363_s1 + $0x1b44] ss:$16 sps:$4 sm:$0xff]  }
 0x337   :  { %10059 = vmatpush1.bf16.msra.mxu0 %v17207_v53  ;;  %12093 = vmatpush1.bf16.msra.mxu1 %v17210_v54  ;;  %v17311_v53 = vld [vmem:[%s22363_s1 + $0x1b4c] ss:$16 sps:$4 sm:$0xff]   ;;  %v17306_v54 = vld [vmem:[%s22363_s1 + $0x1b40] ss:$16 sps:$4 sm:$0xff]  }
 0x338   :  { %10060 = vmatprep.subr.bf16.mxu0 %v17218_v56  ;;  %12094 = vmatprep.subr.bf16.mxu1 %v17221_v57  ;;  %v17314_v56 = vld [vmem:[%s22363_s1 + $0x1b64] ss:$16 sps:$4 sm:$0xff]   ;;  %v17317_v57 = vld [vmem:[%s22363_s1 + $0x1b6c] ss:$16 sps:$4 sm:$0xff]  }
 0x33a   :  { %10022 = vmatmul.mubr.bf16.gmra.mrb[28].mxu0 %v17215_v55  ;;  %12056 = vmatmul.mubr.bf16.gmra.mrb[28].mxu1 %v17215_v55  ;;  %v17309_v55 = vld [vmem:[%s22363_s1 + $0x1b48] ss:$16 sps:$4 sm:$0xff]  }
 0x33b   :  { %10061 = vmatpush1.bf16.msra.mxu0 %v17216_v58  ;;  %12095 = vmatpush1.bf16.msra.mxu1 %v17219_v59  ;;  %v17318_v58 = vld [vmem:[%s22364_s0 + $0x724] ss:$144 sps:$4 sm:$0xff]   ;;  %v17312_v59 = vld [vmem:[%s22363_s1 + $0x1b60] ss:$16 sps:$4 sm:$0xff]  }
 0x33c   :  { %10062 = vmatprep.subr.bf16.mxu0 %v17224_v60  ;;  %12096 = vmatprep.subr.bf16.mxu1 %v17227_v61  ;;  %v17315_v60 = vld [vmem:[%s22363_s1 + $0x1b68] ss:$16 sps:$4 sm:$0xff]   ;;  %v17320_v61 = vld [vmem:[%s22364_s0 + $0x720] ss:$144 sps:$4 sm:$0xff]  }
 0x33d   :  { %10064 = vmatprep.mubr.bf16.mxu0 %v17230_v62  ;;  %12098 = vmatprep.mubr.bf16.mxu1 %v17230_v62  ;;  %v17323_v62 = vld [vmem:[%s22363_s1 + $0x1b84] ss:$16 sps:$4 sm:$0xff]  }
 0x33f   :  { %10063 = vmatpush1.bf16.msra.mxu0 %v17222_v63  ;;  %12097 = vmatpush1.bf16.msra.mxu1 %v17225_v0  ;;  %v17326_v63 = vld [vmem:[%s22363_s1 + $0x1b8c] ss:$16 sps:$4 sm:$0xff]   ;;  %v17321_v0 = vld [vmem:[%s22363_s1 + $0x1b80] ss:$16 sps:$4 sm:$0xff]  }
 0x340   :  { %10145 = vmatprep.subr.bf16.mxu0 %v17233_v2  ;;  %12179 = vmatprep.subr.bf16.mxu1 %v17236_v3  ;;  %v17329_v2 = vld [vmem:[%s22363_s1 + $0x1ba4] ss:$16 sps:$4 sm:$0xff]   ;;  %v17332_v3 = vld [vmem:[%s22363_s1 + $0x1bac] ss:$16 sps:$4 sm:$0xff]  }
 0x342   :  { %10065 = vmatmul.mubr.bf16.vlgmr.msra.gmra.mrb[0].mxu0 %v17228_v1  ;;  %12099 = vmatmul.mubr.bf16.vlgmr.msra.gmra.mrb[0].mxu1 %v17228_v1  ;;  %v17324_v1 = vld [vmem:[%s22363_s1 + $0x1b88] ss:$16 sps:$4 sm:$0xff]  }
 0x343   :  { %10146 = vmatpush1.bf16.msra.mxu0 %v17231_v4  ;;  %12180 = vmatpush1.bf16.msra.mxu1 %v17234_v5  ;;  %v17333_v4 = vld [vmem:[%s22364_s0 + $0x844] ss:$144 sps:$4 sm:$0xff]   ;;  %v17327_v5 = vld [vmem:[%s22363_s1 + $0x1ba0] ss:$16 sps:$4 sm:$0xff]  }
 0x344   :  { %10147 = vmatprep.subr.bf16.mxu0 %v17239_v6  ;;  %12181 = vmatprep.subr.bf16.mxu1 %v17242_v7  ;;  %v17330_v6 = vld [vmem:[%s22363_s1 + $0x1ba8] ss:$16 sps:$4 sm:$0xff]   ;;  %v17335_v7 = vld [vmem:[%s22364_s0 + $0x840] ss:$144 sps:$4 sm:$0xff]  }
 0x345   :  { %10074 = vmatprep.mubr.bf16.mxu0 %v17243_v8  ;;  %12108 = vmatprep.mubr.bf16.mxu1 %v17243_v8  ;;  %v17338_v8 = vld [vmem:[%s22363_s1 + $0x1bc4] ss:$16 sps:$4 sm:$0xff]  }
 0x347   :  { %10148 = vmatpush1.bf16.msra.mxu0 %v17237_v9  ;;  %12182 = vmatpush1.bf16.msra.mxu1 %v17240_v10  ;;  %v17341_v9 = vld [vmem:[%s22363_s1 + $0x1bcc] ss:$16 sps:$4 sm:$0xff]   ;;  %v17336_v10 = vld [vmem:[%s22363_s1 + $0x1bc0] ss:$16 sps:$4 sm:$0xff]  }
 0x348   :  { %10149 = vmatprep.subr.bf16.mxu0 %v17248_v12  ;;  %12183 = vmatprep.subr.bf16.mxu1 %v17251_v13  ;;  %v17344_v12 = vld [vmem:[%s22363_s1 + $0x1be4] ss:$16 sps:$4 sm:$0xff]   ;;  %v17347_v13 = vld [vmem:[%s22363_s1 + $0x1bec] ss:$16 sps:$4 sm:$0xff]  }
 0x34a   :  { %10075 = vmatmul.mubr.bf16.gmra.mrb[4].mxu0 %v17245_v11  ;;  %12109 = vmatmul.mubr.bf16.gmra.mrb[4].mxu1 %v17245_v11  ;;  %v17339_v11 = vld [vmem:[%s22363_s1 + $0x1bc8] ss:$16 sps:$4 sm:$0xff]  }
 0x34b   :  { %10150 = vmatpush1.bf16.msra.mxu0 %v17246_v14  ;;  %12184 = vmatpush1.bf16.msra.mxu1 %v17249_v15  ;;  %v17350_v14 = vld [vmem:[%s22364_s0 + $0x6c] ss:$144 sps:$4 sm:$0xff]   ;;  %v17342_v15 = vld [vmem:[%s22363_s1 + $0x1be0] ss:$16 sps:$4 sm:$0xff]  }
 0x34c   :  { %10151 = vmatprep.subr.bf16.mxu0 %v17254_v16  ;;  %12185 = vmatprep.subr.bf16.mxu1 %v17257_v17  ;;  %v17345_v16 = vld [vmem:[%s22363_s1 + $0x1be8] ss:$16 sps:$4 sm:$0xff]  }
 0x34d   :  { %10084 = vmatprep.mubr.bf16.mxu0 %v17258_v18  ;;  %12118 = vmatprep.mubr.bf16.mxu1 %v17258_v18  ;;  %v17348_v17 = vld [vmem:[%s22364_s0 + $0x68] ss:$144 sps:$4 sm:$0xff]   ;;  %v17353_v18 = vld [vmem:[%s22363_s1 + $0x1c04] ss:$16 sps:$4 sm:$0xff]  }
 0x34f   :  { %10152 = vmatpush1.bf16.msra.mxu0 %v17252_v19  ;;  %12186 = vmatpush1.bf16.msra.mxu1 %v17255_v20  ;;  %v17356_v19 = vld [vmem:[%s22363_s1 + $0x1c0c] ss:$16 sps:$4 sm:$0xff]   ;;  %v17351_v20 = vld [vmem:[%s22363_s1 + $0x1c00] ss:$16 sps:$4 sm:$0xff]  }
 0x350   :  { %10153 = vmatprep.subr.bf16.mxu0 %v17263_v22  ;;  %12187 = vmatprep.subr.bf16.mxu1 %v17266_v23  ;;  %v17359_v22 = vld [vmem:[%s22363_s1 + $0x1c24] ss:$16 sps:$4 sm:$0xff]   ;;  %v17362_v23 = vld [vmem:[%s22363_s1 + $0x1c2c] ss:$16 sps:$4 sm:$0xff]  }
 0x352   :  { %10085 = vmatmul.mubr.bf16.gmra.mrb[8].mxu0 %v17260_v21  ;;  %12119 = vmatmul.mubr.bf16.gmra.mrb[8].mxu1 %v17260_v21  ;;  %v17354_v21 = vld [vmem:[%s22363_s1 + $0x1c08] ss:$16 sps:$4 sm:$0xff]  }
 0x353   :  { %10154 = vmatpush1.bf16.msra.mxu0 %v17261_v24  ;;  %12188 = vmatpush1.bf16.msra.mxu1 %v17264_v25  ;;  %v17363_v24 = vld [vmem:[%s22364_s0 + $0x18c] ss:$144 sps:$4 sm:$0xff]   ;;  %v17357_v25 = vld [vmem:[%s22363_s1 + $0x1c20] ss:$16 sps:$4 sm:$0xff]  }
 0x354   :  { %10155 = vmatprep.subr.bf16.mxu0 %v17269_v26  ;;  %12189 = vmatprep.subr.bf16.mxu1 %v17272_v27  ;;  %v17360_v26 = vld [vmem:[%s22363_s1 + $0x1c28] ss:$16 sps:$4 sm:$0xff]  }
 0x355   :  { %10094 = vmatprep.mubr.bf16.mxu0 %v17273_v28  ;;  %12128 = vmatprep.mubr.bf16.mxu1 %v17273_v28  ;;  %v17365_v27 = vld [vmem:[%s22364_s0 + $0x188] ss:$144 sps:$4 sm:$0xff]   ;;  %v17368_v28 = vld [vmem:[%s22363_s1 + $0x1c44] ss:$16 sps:$4 sm:$0xff]  }
 0x357   :  { %10156 = vmatpush1.bf16.msra.mxu0 %v17267_v29  ;;  %12190 = vmatpush1.bf16.msra.mxu1 %v17270_v30  ;;  %v17371_v29 = vld [vmem:[%s22363_s1 + $0x1c4c] ss:$16 sps:$4 sm:$0xff]   ;;  %v17366_v30 = vld [vmem:[%s22363_s1 + $0x1c40] ss:$16 sps:$4 sm:$0xff]  }
 0x358   :  { %10157 = vmatprep.subr.bf16.mxu0 %v17278_v32  ;;  %12191 = vmatprep.subr.bf16.mxu1 %v17281_v33  ;;  %v17374_v32 = vld [vmem:[%s22363_s1 + $0x1c64] ss:$16 sps:$4 sm:$0xff]   ;;  %v17377_v33 = vld [vmem:[%s22363_s1 + $0x1c6c] ss:$16 sps:$4 sm:$0xff]  }
 0x35a   :  { %10095 = vmatmul.mubr.bf16.gmra.mrb[12].mxu0 %v17275_v31  ;;  %12129 = vmatmul.mubr.bf16.gmra.mrb[12].mxu1 %v17275_v31  ;;  %v17369_v31 = vld [vmem:[%s22363_s1 + $0x1c48] ss:$16 sps:$4 sm:$0xff]  }
 0x35b   :  { %10158 = vmatpush1.bf16.msra.mxu0 %v17276_v34  ;;  %12192 = vmatpush1.bf16.msra.mxu1 %v17279_v35  ;;  %v17378_v34 = vld [vmem:[%s22364_s0 + $0x2ac] ss:$144 sps:$4 sm:$0xff]   ;;  %v17372_v35 = vld [vmem:[%s22363_s1 + $0x1c60] ss:$16 sps:$4 sm:$0xff]  }
 0x35c   :  { %10159 = vmatprep.subr.bf16.mxu0 %v17284_v36  ;;  %12193 = vmatprep.subr.bf16.mxu1 %v17287_v37  ;;  %v17375_v36 = vld [vmem:[%s22363_s1 + $0x1c68] ss:$16 sps:$4 sm:$0xff]   ;;  %v17383_v37 = vld [vmem:[%s22363_s1 + $0x1c84] ss:$16 sps:$4 sm:$0xff]  }
 0x35d   :  { %10104 = vmatprep.mubr.bf16.mxu0 %v17288_v38  ;;  %12138 = vmatprep.mubr.bf16.mxu1 %v17288_v38  ;;  %v17386_v38 = vld [vmem:[%s22363_s1 + $0x1c8c] ss:$16 sps:$4 sm:$0xff]  }
 0x35f   :  { %10160 = vmatpush1.bf16.msra.mxu0 %v17282_v39  ;;  %12194 = vmatpush1.bf16.msra.mxu1 %v17285_v40  ;;  %v17380_v39 = vld [vmem:[%s22364_s0 + $0x2a8] ss:$144 sps:$4 sm:$0xff]   ;;  %v17381_v40 = vld [vmem:[%s22363_s1 + $0x1c80] ss:$16 sps:$4 sm:$0xff]  }
 0x360   :  { %10161 = vmatprep.subr.bf16.mxu0 %v17293_v42  ;;  %12195 = vmatprep.subr.bf16.mxu1 %v17296_v43  ;;  %v17389_v42 = vld [vmem:[%s22363_s1 + $0x1ca4] ss:$16 sps:$4 sm:$0xff]   ;;  %v17392_v43 = vld [vmem:[%s22363_s1 + $0x1cac] ss:$16 sps:$4 sm:$0xff]  }
 0x362   :  { %10105 = vmatmul.mubr.bf16.gmra.mrb[16].mxu0 %v17290_v41  ;;  %12139 = vmatmul.mubr.bf16.gmra.mrb[16].mxu1 %v17290_v41  ;;  %v17384_v41 = vld [vmem:[%s22363_s1 + $0x1c88] ss:$16 sps:$4 sm:$0xff]  }
 0x363   :  { %10162 = vmatpush1.bf16.msra.mxu0 %v17291_v44  ;;  %12196 = vmatpush1.bf16.msra.mxu1 %v17294_v45  ;;  %v17393_v44 = vld [vmem:[%s22364_s0 + $0x3cc] ss:$144 sps:$4 sm:$0xff]   ;;  %v17387_v45 = vld [vmem:[%s22363_s1 + $0x1ca0] ss:$16 sps:$4 sm:$0xff]  }
 0x364   :  { %10163 = vmatprep.subr.bf16.mxu0 %v17299_v46  ;;  %12197 = vmatprep.subr.bf16.mxu1 %v17302_v47  ;;  %v17390_v46 = vld [vmem:[%s22363_s1 + $0x1ca8] ss:$16 sps:$4 sm:$0xff]   ;;  %v17398_v47 = vld [vmem:[%s22363_s1 + $0x1cc4] ss:$16 sps:$4 sm:$0xff]  }
 0x365   :  { %10114 = vmatprep.mubr.bf16.mxu0 %v17303_v48  ;;  %12148 = vmatprep.mubr.bf16.mxu1 %v17303_v48  ;;  %v17401_v48 = vld [vmem:[%s22363_s1 + $0x1ccc] ss:$16 sps:$4 sm:$0xff]  }
 0x367   :  { %10164 = vmatpush1.bf16.msra.mxu0 %v17297_v49  ;;  %12198 = vmatpush1.bf16.msra.mxu1 %v17300_v50  ;;  %v17395_v49 = vld [vmem:[%s22364_s0 + $0x3c8] ss:$144 sps:$4 sm:$0xff]   ;;  %v17396_v50 = vld [vmem:[%s22363_s1 + $0x1cc0] ss:$16 sps:$4 sm:$0xff]  }
 0x368   :  { %10165 = vmatprep.subr.bf16.mxu0 %v17308_v52  ;;  %12199 = vmatprep.subr.bf16.mxu1 %v17311_v53  ;;  %v17404_v52 = vld [vmem:[%s22363_s1 + $0x1ce4] ss:$16 sps:$4 sm:$0xff]   ;;  %v17407_v53 = vld [vmem:[%s22363_s1 + $0x1cec] ss:$16 sps:$4 sm:$0xff]  }
 0x36a   :  { %10115 = vmatmul.mubr.bf16.gmra.mrb[20].mxu0 %v17305_v51  ;;  %12149 = vmatmul.mubr.bf16.gmra.mrb[20].mxu1 %v17305_v51  ;;  %v17399_v51 = vld [vmem:[%s22363_s1 + $0x1cc8] ss:$16 sps:$4 sm:$0xff]  }
 0x36b   :  { %10166 = vmatpush1.bf16.msra.mxu0 %v17306_v54  ;;  %12200 = vmatpush1.bf16.msra.mxu1 %v17309_v55  ;;  %v17408_v54 = vld [vmem:[%s22364_s0 + $0x4ec] ss:$144 sps:$4 sm:$0xff]   ;;  %v17402_v55 = vld [vmem:[%s22363_s1 + $0x1ce0] ss:$16 sps:$4 sm:$0xff]  }
 0x36c   :  { %10167 = vmatprep.subr.bf16.mxu0 %v17314_v56  ;;  %12201 = vmatprep.subr.bf16.mxu1 %v17317_v57  ;;  %v17405_v56 = vld [vmem:[%s22363_s1 + $0x1ce8] ss:$16 sps:$4 sm:$0xff]   ;;  %v17413_v57 = vld [vmem:[%s22363_s1 + $0x1d04] ss:$16 sps:$4 sm:$0xff]  }
 0x36d   :  { %10124 = vmatprep.mubr.bf16.mxu0 %v17318_v58  ;;  %12158 = vmatprep.mubr.bf16.mxu1 %v17318_v58  ;;  %v17416_v58 = vld [vmem:[%s22363_s1 + $0x1d0c] ss:$16 sps:$4 sm:$0xff]  }
 0x36f   :  { %10168 = vmatpush1.bf16.msra.mxu0 %v17312_v59  ;;  %12202 = vmatpush1.bf16.msra.mxu1 %v17315_v60  ;;  %v17410_v59 = vld [vmem:[%s22364_s0 + $0x4e8] ss:$144 sps:$4 sm:$0xff]   ;;  %v17411_v60 = vld [vmem:[%s22363_s1 + $0x1d00] ss:$16 sps:$4 sm:$0xff]  }
 0x370   :  { %10169 = vmatprep.subr.bf16.mxu0 %v17323_v62  ;;  %12203 = vmatprep.subr.bf16.mxu1 %v17326_v63  ;;  %v17419_v62 = vld [vmem:[%s22363_s1 + $0x1d24] ss:$16 sps:$4 sm:$0xff]   ;;  %v17422_v63 = vld [vmem:[%s22363_s1 + $0x1d2c] ss:$16 sps:$4 sm:$0xff]  }
 0x372   :  { %10125 = vmatmul.mubr.bf16.gmra.mrb[24].mxu0 %v17320_v61  ;;  %12159 = vmatmul.mubr.bf16.gmra.mrb[24].mxu1 %v17320_v61  ;;  %v17414_v61 = vld [vmem:[%s22363_s1 + $0x1d08] ss:$16 sps:$4 sm:$0xff]  }
 0x373   :  { %10170 = vmatpush1.bf16.msra.mxu0 %v17321_v0  ;;  %12204 = vmatpush1.bf16.msra.mxu1 %v17324_v1  ;;  %v17423_v0 = vld [vmem:[%s22364_s0 + $0x60c] ss:$144 sps:$4 sm:$0xff]   ;;  %v17417_v1 = vld [vmem:[%s22363_s1 + $0x1d20] ss:$16 sps:$4 sm:$0xff]  }
 0x374   :  { %10171 = vmatprep.subr.bf16.mxu0 %v17329_v2  ;;  %12205 = vmatprep.subr.bf16.mxu1 %v17332_v3  ;;  %v17420_v2 = vld [vmem:[%s22363_s1 + $0x1d28] ss:$16 sps:$4 sm:$0xff]   ;;  %v17428_v3 = vld [vmem:[%s22363_s1 + $0x1d44] ss:$16 sps:$4 sm:$0xff]  }
 0x375   :  { %10134 = vmatprep.mubr.bf16.mxu0 %v17333_v4  ;;  %12168 = vmatprep.mubr.bf16.mxu1 %v17333_v4  ;;  %v17431_v4 = vld [vmem:[%s22363_s1 + $0x1d4c] ss:$16 sps:$4 sm:$0xff]  }
 0x377   :  { %10172 = vmatpush1.bf16.msra.mxu0 %v17327_v5  ;;  %12206 = vmatpush1.bf16.msra.mxu1 %v17330_v6  ;;  %v17425_v5 = vld [vmem:[%s22364_s0 + $0x608] ss:$144 sps:$4 sm:$0xff]   ;;  %v17426_v6 = vld [vmem:[%s22363_s1 + $0x1d40] ss:$16 sps:$4 sm:$0xff]  }
 0x378   :  { %10173 = vmatprep.subr.bf16.mxu0 %v17338_v8  ;;  %12207 = vmatprep.subr.bf16.mxu1 %v17341_v9  ;;  %v17434_v8 = vld [vmem:[%s22363_s1 + $0x1d64] ss:$16 sps:$4 sm:$0xff]   ;;  %v17437_v9 = vld [vmem:[%s22363_s1 + $0x1d6c] ss:$16 sps:$4 sm:$0xff]  }
 0x37a   :  { %10135 = vmatmul.mubr.bf16.gmra.mrb[28].mxu0 %v17335_v7  ;;  %12169 = vmatmul.mubr.bf16.gmra.mrb[28].mxu1 %v17335_v7  ;;  %v17429_v7 = vld [vmem:[%s22363_s1 + $0x1d48] ss:$16 sps:$4 sm:$0xff]  }
 0x37b   :  { %10174 = vmatpush1.bf16.msra.mxu0 %v17336_v10  ;;  %12208 = vmatpush1.bf16.msra.mxu1 %v17339_v11  ;;  %v17438_v10 = vld [vmem:[%s22364_s0 + $0x72c] ss:$144 sps:$4 sm:$0xff]   ;;  %v17432_v11 = vld [vmem:[%s22363_s1 + $0x1d60] ss:$16 sps:$4 sm:$0xff]  }
 0x37c   :  { %10175 = vmatprep.subr.bf16.mxu0 %v17344_v12  ;;  %12209 = vmatprep.subr.bf16.mxu1 %v17347_v13  ;;  %v17435_v12 = vld [vmem:[%s22363_s1 + $0x1d68] ss:$16 sps:$4 sm:$0xff]   ;;  %v17443_v13 = vld [vmem:[%s22363_s1 + $0x1d84] ss:$16 sps:$4 sm:$0xff]  }
 0x37d   :  { %10177 = vmatprep.mubr.bf16.mxu0 %v17350_v14  ;;  %12211 = vmatprep.mubr.bf16.mxu1 %v17350_v14  ;;  %v17446_v14 = vld [vmem:[%s22363_s1 + $0x1d8c] ss:$16 sps:$4 sm:$0xff]  }
 0x37f   :  { %10176 = vmatpush1.bf16.msra.mxu0 %v17342_v15  ;;  %12210 = vmatpush1.bf16.msra.mxu1 %v17345_v16  ;;  %v17440_v15 = vld [vmem:[%s22364_s0 + $0x728] ss:$144 sps:$4 sm:$0xff]   ;;  %v17441_v16 = vld [vmem:[%s22363_s1 + $0x1d80] ss:$16 sps:$4 sm:$0xff]  }
 0x380   :  { %10258 = vmatprep.subr.bf16.mxu0 %v17353_v18  ;;  %12292 = vmatprep.subr.bf16.mxu1 %v17356_v19  ;;  %v17449_v18 = vld [vmem:[%s22363_s1 + $0x1da4] ss:$16 sps:$4 sm:$0xff]   ;;  %v17452_v19 = vld [vmem:[%s22363_s1 + $0x1dac] ss:$16 sps:$4 sm:$0xff]  }
 0x382   :  { %10178 = vmatmul.mubr.bf16.vlgmr.msra.gmra.mrb[0].mxu0 %v17348_v17  ;;  %12212 = vmatmul.mubr.bf16.vlgmr.msra.gmra.mrb[0].mxu1 %v17348_v17  ;;  %v17444_v17 = vld [vmem:[%s22363_s1 + $0x1d88] ss:$16 sps:$4 sm:$0xff]  }
 0x383   :  { %10259 = vmatpush1.bf16.msra.mxu0 %v17351_v20  ;;  %12293 = vmatpush1.bf16.msra.mxu1 %v17354_v21  ;;  %v17453_v20 = vld [vmem:[%s22364_s0 + $0x84c] ss:$144 sps:$4 sm:$0xff]   ;;  %v17447_v21 = vld [vmem:[%s22363_s1 + $0x1da0] ss:$16 sps:$4 sm:$0xff]  }
 0x384   :  { %10260 = vmatprep.subr.bf16.mxu0 %v17359_v22  ;;  %12294 = vmatprep.subr.bf16.mxu1 %v17362_v23  ;;  %v17450_v22 = vld [vmem:[%s22363_s1 + $0x1da8] ss:$16 sps:$4 sm:$0xff]   ;;  %v17458_v23 = vld [vmem:[%s22363_s1 + $0x1dc4] ss:$16 sps:$4 sm:$0xff]  }
 0x385   :  { %10187 = vmatprep.mubr.bf16.mxu0 %v17363_v24  ;;  %12221 = vmatprep.mubr.bf16.mxu1 %v17363_v24  ;;  %v17461_v24 = vld [vmem:[%s22363_s1 + $0x1dcc] ss:$16 sps:$4 sm:$0xff]  }
 0x387   :  { %10261 = vmatpush1.bf16.msra.mxu0 %v17357_v25  ;;  %12295 = vmatpush1.bf16.msra.mxu1 %v17360_v26  ;;  %v17455_v25 = vld [vmem:[%s22364_s0 + $0x848] ss:$144 sps:$4 sm:$0xff]   ;;  %v17456_v26 = vld [vmem:[%s22363_s1 + $0x1dc0] ss:$16 sps:$4 sm:$0xff]  }
 0x388   :  { %10262 = vmatprep.subr.bf16.mxu0 %v17368_v28  ;;  %12296 = vmatprep.subr.bf16.mxu1 %v17371_v29  ;;  %v17464_v28 = vld [vmem:[%s22363_s1 + $0x1de4] ss:$16 sps:$4 sm:$0xff]   ;;  %v17467_v29 = vld [vmem:[%s22363_s1 + $0x1dec] ss:$16 sps:$4 sm:$0xff]  }
 0x38a   :  { %10188 = vmatmul.mubr.bf16.gmra.mrb[4].mxu0 %v17365_v27  ;;  %12222 = vmatmul.mubr.bf16.gmra.mrb[4].mxu1 %v17365_v27  ;;  %v17459_v27 = vld [vmem:[%s22363_s1 + $0x1dc8] ss:$16 sps:$4 sm:$0xff]  }
 0x38b   :  { %10263 = vmatpush1.bf16.msra.mxu0 %v17366_v30  ;;  %12297 = vmatpush1.bf16.msra.mxu1 %v17369_v31  ;;  %v17470_v30 = vld [vmem:[%s22364_s0 + $0x74] ss:$144 sps:$4 sm:$0xff]   ;;  %v17462_v31 = vld [vmem:[%s22363_s1 + $0x1de0] ss:$16 sps:$4 sm:$0xff]  }
 0x38c   :  { %10264 = vmatprep.subr.bf16.mxu0 %v17374_v32  ;;  %12298 = vmatprep.subr.bf16.mxu1 %v17377_v33  ;;  %v17465_v32 = vld [vmem:[%s22363_s1 + $0x1de8] ss:$16 sps:$4 sm:$0xff]   ;;  %v17473_v33 = vld [vmem:[%s22363_s1 + $0x1e04] ss:$16 sps:$4 sm:$0xff]  }
 0x38d   :  { %10197 = vmatprep.mubr.bf16.mxu0 %v17378_v34  ;;  %12231 = vmatprep.mubr.bf16.mxu1 %v17378_v34  ;;  %v17476_v34 = vld [vmem:[%s22363_s1 + $0x1e0c] ss:$16 sps:$4 sm:$0xff]  }
 0x38f   :  { %10265 = vmatpush1.bf16.msra.mxu0 %v17372_v35  ;;  %12299 = vmatpush1.bf16.msra.mxu1 %v17375_v36  ;;  %v17468_v35 = vld [vmem:[%s22364_s0 + $0x70] ss:$144 sps:$4 sm:$0xff]  }
 0x390   :  { %10266 = vmatprep.subr.bf16.mxu0 %v17383_v37  ;;  %12300 = vmatprep.subr.bf16.mxu1 %v17386_v38  ;;  %v17471_v36 = vld [vmem:[%s22363_s1 + $0x1e00] ss:$16 sps:$4 sm:$0xff]   ;;  %v17474_v37 = vld [vmem:[%s22363_s1 + $0x1e08] ss:$16 sps:$4 sm:$0xff]   ;;  %v17479_v38 = vld [vmem:[%s22363_s1 + $0x1e24] ss:$16 sps:$4 sm:$0xff]  }
 0x392   :  { %10198 = vmatmul.mubr.bf16.gmra.mrb[8].mxu0 %v17380_v39  ;;  %12232 = vmatmul.mubr.bf16.gmra.mrb[8].mxu1 %v17380_v39  ;;  %v17482_v39 = vld [vmem:[%s22363_s1 + $0x1e2c] ss:$16 sps:$4 sm:$0xff]  }
 0x393   :  { %10267 = vmatpush1.bf16.msra.mxu0 %v17381_v40  ;;  %12301 = vmatpush1.bf16.msra.mxu1 %v17384_v41  ;;  %v17483_v40 = vld [vmem:[%s22364_s0 + $0x194] ss:$144 sps:$4 sm:$0xff]   ;;  %v17477_v41 = vld [vmem:[%s22363_s1 + $0x1e20] ss:$16 sps:$4 sm:$0xff]  }
 0x394   :  { %10268 = vmatprep.subr.bf16.mxu0 %v17389_v42  ;;  %12302 = vmatprep.subr.bf16.mxu1 %v17392_v43  ;;  %v17480_v42 = vld [vmem:[%s22363_s1 + $0x1e28] ss:$16 sps:$4 sm:$0xff]   ;;  %v17488_v43 = vld [vmem:[%s22363_s1 + $0x1e44] ss:$16 sps:$4 sm:$0xff]  }
 0x395   :  { %10207 = vmatprep.mubr.bf16.mxu0 %v17393_v44  ;;  %12241 = vmatprep.mubr.bf16.mxu1 %v17393_v44  ;;  %v17491_v44 = vld [vmem:[%s22363_s1 + $0x1e4c] ss:$16 sps:$4 sm:$0xff]  }
 0x397   :  { %10269 = vmatpush1.bf16.msra.mxu0 %v17387_v45  ;;  %12303 = vmatpush1.bf16.msra.mxu1 %v17390_v46  ;;  %v17485_v45 = vld [vmem:[%s22364_s0 + $0x190] ss:$144 sps:$4 sm:$0xff]  }
 0x398   :  { %10270 = vmatprep.subr.bf16.mxu0 %v17398_v47  ;;  %12304 = vmatprep.subr.bf16.mxu1 %v17401_v48  ;;  %v17486_v46 = vld [vmem:[%s22363_s1 + $0x1e40] ss:$16 sps:$4 sm:$0xff]   ;;  %v17489_v47 = vld [vmem:[%s22363_s1 + $0x1e48] ss:$16 sps:$4 sm:$0xff]   ;;  %v17494_v48 = vld [vmem:[%s22363_s1 + $0x1e64] ss:$16 sps:$4 sm:$0xff]  }
 0x39a   :  { %10208 = vmatmul.mubr.bf16.gmra.mrb[12].mxu0 %v17395_v49  ;;  %12242 = vmatmul.mubr.bf16.gmra.mrb[12].mxu1 %v17395_v49  ;;  %v17497_v49 = vld [vmem:[%s22363_s1 + $0x1e6c] ss:$16 sps:$4 sm:$0xff]  }
 0x39b   :  { %10271 = vmatpush1.bf16.msra.mxu0 %v17396_v50  ;;  %12305 = vmatpush1.bf16.msra.mxu1 %v17399_v51  ;;  %v17498_v50 = vld [vmem:[%s22364_s0 + $0x2b4] ss:$144 sps:$4 sm:$0xff]   ;;  %v17492_v51 = vld [vmem:[%s22363_s1 + $0x1e60] ss:$16 sps:$4 sm:$0xff]  }
 0x39c   :  { %10272 = vmatprep.subr.bf16.mxu0 %v17404_v52  ;;  %12306 = vmatprep.subr.bf16.mxu1 %v17407_v53  ;;  %v17495_v52 = vld [vmem:[%s22363_s1 + $0x1e68] ss:$16 sps:$4 sm:$0xff]   ;;  %v17503_v53 = vld [vmem:[%s22363_s1 + $0x1e84] ss:$16 sps:$4 sm:$0xff]  }
 0x39d   :  { %10217 = vmatprep.mubr.bf16.mxu0 %v17408_v54  ;;  %12251 = vmatprep.mubr.bf16.mxu1 %v17408_v54  ;;  %v17506_v54 = vld [vmem:[%s22363_s1 + $0x1e8c] ss:$16 sps:$4 sm:$0xff]  }
 0x39f   :  { %10273 = vmatpush1.bf16.msra.mxu0 %v17402_v55  ;;  %12307 = vmatpush1.bf16.msra.mxu1 %v17405_v56  ;;  %v17500_v55 = vld [vmem:[%s22364_s0 + $0x2b0] ss:$144 sps:$4 sm:$0xff]  }
 0x3a0   :  { %10274 = vmatprep.subr.bf16.mxu0 %v17413_v57  ;;  %12308 = vmatprep.subr.bf16.mxu1 %v17416_v58  ;;  %v17501_v56 = vld [vmem:[%s22363_s1 + $0x1e80] ss:$16 sps:$4 sm:$0xff]   ;;  %v17504_v57 = vld [vmem:[%s22363_s1 + $0x1e88] ss:$16 sps:$4 sm:$0xff]   ;;  %v17509_v58 = vld [vmem:[%s22363_s1 + $0x1ea4] ss:$16 sps:$4 sm:$0xff]  }
 0x3a2   :  { %10218 = vmatmul.mubr.bf16.gmra.mrb[16].mxu0 %v17410_v59  ;;  %12252 = vmatmul.mubr.bf16.gmra.mrb[16].mxu1 %v17410_v59  ;;  %v17512_v59 = vld [vmem:[%s22363_s1 + $0x1eac] ss:$16 sps:$4 sm:$0xff]  }
 0x3a3   :  { %10275 = vmatpush1.bf16.msra.mxu0 %v17411_v60  ;;  %12309 = vmatpush1.bf16.msra.mxu1 %v17414_v61  ;;  %v17513_v60 = vld [vmem:[%s22364_s0 + $0x3d4] ss:$144 sps:$4 sm:$0xff]   ;;  %v17507_v61 = vld [vmem:[%s22363_s1 + $0x1ea0] ss:$16 sps:$4 sm:$0xff]  }
 0x3a4   :  { %10276 = vmatprep.subr.bf16.mxu0 %v17419_v62  ;;  %12310 = vmatprep.subr.bf16.mxu1 %v17422_v63  ;;  %v17510_v62 = vld [vmem:[%s22363_s1 + $0x1ea8] ss:$16 sps:$4 sm:$0xff]   ;;  %v17518_v63 = vld [vmem:[%s22363_s1 + $0x1ec4] ss:$16 sps:$4 sm:$0xff]  }
 0x3a5   :  { %10227 = vmatprep.mubr.bf16.mxu0 %v17423_v0  ;;  %12261 = vmatprep.mubr.bf16.mxu1 %v17423_v0  ;;  %v17521_v0 = vld [vmem:[%s22363_s1 + $0x1ecc] ss:$16 sps:$4 sm:$0xff]  }
 0x3a7   :  { %10277 = vmatpush1.bf16.msra.mxu0 %v17417_v1  ;;  %12311 = vmatpush1.bf16.msra.mxu1 %v17420_v2  ;;  %v17515_v1 = vld [vmem:[%s22364_s0 + $0x3d0] ss:$144 sps:$4 sm:$0xff]  }
 0x3a8   :  { %10278 = vmatprep.subr.bf16.mxu0 %v17428_v3  ;;  %12312 = vmatprep.subr.bf16.mxu1 %v17431_v4  ;;  %v17516_v2 = vld [vmem:[%s22363_s1 + $0x1ec0] ss:$16 sps:$4 sm:$0xff]   ;;  %v17519_v3 = vld [vmem:[%s22363_s1 + $0x1ec8] ss:$16 sps:$4 sm:$0xff]   ;;  %v17524_v4 = vld [vmem:[%s22363_s1 + $0x1ee4] ss:$16 sps:$4 sm:$0xff]  }
 0x3aa   :  { %10228 = vmatmul.mubr.bf16.gmra.mrb[20].mxu0 %v17425_v5  ;;  %12262 = vmatmul.mubr.bf16.gmra.mrb[20].mxu1 %v17425_v5  ;;  %v17527_v5 = vld [vmem:[%s22363_s1 + $0x1eec] ss:$16 sps:$4 sm:$0xff]  }
 0x3ab   :  { %10279 = vmatpush1.bf16.msra.mxu0 %v17426_v6  ;;  %12313 = vmatpush1.bf16.msra.mxu1 %v17429_v7  ;;  %v17528_v6 = vld [vmem:[%s22364_s0 + $0x4f4] ss:$144 sps:$4 sm:$0xff]   ;;  %v17522_v7 = vld [vmem:[%s22363_s1 + $0x1ee0] ss:$16 sps:$4 sm:$0xff]  }
 0x3ac   :  { %10280 = vmatprep.subr.bf16.mxu0 %v17434_v8  ;;  %12314 = vmatprep.subr.bf16.mxu1 %v17437_v9  ;;  %v17525_v8 = vld [vmem:[%s22363_s1 + $0x1ee8] ss:$16 sps:$4 sm:$0xff]   ;;  %v17533_v9 = vld [vmem:[%s22363_s1 + $0x1f04] ss:$16 sps:$4 sm:$0xff]  }
 0x3ad   :  { %10237 = vmatprep.mubr.bf16.mxu0 %v17438_v10  ;;  %12271 = vmatprep.mubr.bf16.mxu1 %v17438_v10  ;;  %v17536_v10 = vld [vmem:[%s22363_s1 + $0x1f0c] ss:$16 sps:$4 sm:$0xff]  }
 0x3af   :  { %10281 = vmatpush1.bf16.msra.mxu0 %v17432_v11  ;;  %12315 = vmatpush1.bf16.msra.mxu1 %v17435_v12  ;;  %v17530_v11 = vld [vmem:[%s22364_s0 + $0x4f0] ss:$144 sps:$4 sm:$0xff]  }
 0x3b0   :  { %10282 = vmatprep.subr.bf16.mxu0 %v17443_v13  ;;  %12316 = vmatprep.subr.bf16.mxu1 %v17446_v14  ;;  %v17531_v12 = vld [vmem:[%s22363_s1 + $0x1f00] ss:$16 sps:$4 sm:$0xff]   ;;  %v17534_v13 = vld [vmem:[%s22363_s1 + $0x1f08] ss:$16 sps:$4 sm:$0xff]   ;;  %v17539_v14 = vld [vmem:[%s22363_s1 + $0x1f24] ss:$16 sps:$4 sm:$0xff]  }
 0x3b2   :  { %10238 = vmatmul.mubr.bf16.gmra.mrb[24].mxu0 %v17440_v15  ;;  %12272 = vmatmul.mubr.bf16.gmra.mrb[24].mxu1 %v17440_v15  ;;  %v17542_v15 = vld [vmem:[%s22363_s1 + $0x1f2c] ss:$16 sps:$4 sm:$0xff]  }
 0x3b3   :  { %10283 = vmatpush1.bf16.msra.mxu0 %v17441_v16  ;;  %12317 = vmatpush1.bf16.msra.mxu1 %v17444_v17  ;;  %v17543_v16 = vld [vmem:[%s22364_s0 + $0x614] ss:$144 sps:$4 sm:$0xff]   ;;  %v17537_v17 = vld [vmem:[%s22363_s1 + $0x1f20] ss:$16 sps:$4 sm:$0xff]  }
 0x3b4   :  { %10284 = vmatprep.subr.bf16.mxu0 %v17449_v18  ;;  %12318 = vmatprep.subr.bf16.mxu1 %v17452_v19  ;;  %v17540_v18 = vld [vmem:[%s22363_s1 + $0x1f28] ss:$16 sps:$4 sm:$0xff]   ;;  %v17548_v19 = vld [vmem:[%s22363_s1 + $0x1f44] ss:$16 sps:$4 sm:$0xff]  }
 0x3b5   :  { %10247 = vmatprep.mubr.bf16.mxu0 %v17453_v20  ;;  %12281 = vmatprep.mubr.bf16.mxu1 %v17453_v20  ;;  %v17551_v20 = vld [vmem:[%s22363_s1 + $0x1f4c] ss:$16 sps:$4 sm:$0xff]  }
 0x3b7   :  { %10285 = vmatpush1.bf16.msra.mxu0 %v17447_v21  ;;  %12319 = vmatpush1.bf16.msra.mxu1 %v17450_v22  ;;  %v17545_v21 = vld [vmem:[%s22364_s0 + $0x610] ss:$144 sps:$4 sm:$0xff]  }
 0x3b8   :  { %10286 = vmatprep.subr.bf16.mxu0 %v17458_v23  ;;  %12320 = vmatprep.subr.bf16.mxu1 %v17461_v24  ;;  %v17546_v22 = vld [vmem:[%s22363_s1 + $0x1f40] ss:$16 sps:$4 sm:$0xff]   ;;  %v17549_v23 = vld [vmem:[%s22363_s1 + $0x1f48] ss:$16 sps:$4 sm:$0xff]   ;;  %v17554_v24 = vld [vmem:[%s22363_s1 + $0x1f64] ss:$16 sps:$4 sm:$0xff]  }
 0x3ba   :  { %10248 = vmatmul.mubr.bf16.gmra.mrb[28].mxu0 %v17455_v25  ;;  %12282 = vmatmul.mubr.bf16.gmra.mrb[28].mxu1 %v17455_v25  ;;  %v17557_v25 = vld [vmem:[%s22363_s1 + $0x1f6c] ss:$16 sps:$4 sm:$0xff]  }
 0x3bb   :  { %10287 = vmatpush1.bf16.msra.mxu0 %v17456_v26  ;;  %12321 = vmatpush1.bf16.msra.mxu1 %v17459_v27  ;;  %v17558_v26 = vld [vmem:[%s22364_s0 + $0x734] ss:$144 sps:$4 sm:$0xff]   ;;  %v17552_v27 = vld [vmem:[%s22363_s1 + $0x1f60] ss:$16 sps:$4 sm:$0xff]  }
 0x3bc   :  { %10288 = vmatprep.subr.bf16.mxu0 %v17464_v28  ;;  %12322 = vmatprep.subr.bf16.mxu1 %v17467_v29  ;;  %v17555_v28 = vld [vmem:[%s22363_s1 + $0x1f68] ss:$16 sps:$4 sm:$0xff]   ;;  %v17563_v29 = vld [vmem:[%s22363_s1 + $0x1f84] ss:$16 sps:$4 sm:$0xff]  }
 0x3bd   :  { %10290 = vmatprep.mubr.bf16.mxu0 %v17470_v30  ;;  %12324 = vmatprep.mubr.bf16.mxu1 %v17470_v30  ;;  %v17566_v30 = vld [vmem:[%s22363_s1 + $0x1f8c] ss:$16 sps:$4 sm:$0xff]  }
 0x3bf   :  { %10289 = vmatpush1.bf16.msra.mxu0 %v17462_v31  ;;  %12323 = vmatpush1.bf16.msra.mxu1 %v17465_v32  ;;  %v17560_v31 = vld [vmem:[%s22364_s0 + $0x730] ss:$144 sps:$4 sm:$0xff]  }
 0x3c0   :  { %10371 = vmatprep.subr.bf16.mxu0 %v17473_v33  ;;  %12405 = vmatprep.subr.bf16.mxu1 %v17476_v34  ;;  %v17561_v32 = vld [vmem:[%s22363_s1 + $0x1f80] ss:$16 sps:$4 sm:$0xff]   ;;  %v17564_v33 = vld [vmem:[%s22363_s1 + $0x1f88] ss:$16 sps:$4 sm:$0xff]   ;;  %v17569_v34 = vld [vmem:[%s22363_s1 + $0x1fa4] ss:$16 sps:$4 sm:$0xff]  }
 0x3c2   :  { %10291 = vmatmul.mubr.bf16.vlgmr.msra.gmra.mrb[0].mxu0 %v17468_v35  ;;  %12325 = vmatmul.mubr.bf16.vlgmr.msra.gmra.mrb[0].mxu1 %v17468_v35  ;;  %v17572_v35 = vld [vmem:[%s22363_s1 + $0x1fac] ss:$16 sps:$4 sm:$0xff]  }
 0x3c3   :  { %10372 = vmatpush1.bf16.msra.mxu0 %v17471_v36  ;;  %12406 = vmatpush1.bf16.msra.mxu1 %v17474_v37  ;;  %v17573_v36 = vld [vmem:[%s22364_s0 + $0x854] ss:$144 sps:$4 sm:$0xff]   ;;  %v17567_v37 = vld [vmem:[%s22363_s1 + $0x1fa0] ss:$16 sps:$4 sm:$0xff]  }
 0x3c4   :  { %10373 = vmatprep.subr.bf16.mxu0 %v17479_v38  ;;  %12407 = vmatprep.subr.bf16.mxu1 %v17482_v39  ;;  %v17570_v38 = vld [vmem:[%s22363_s1 + $0x1fa8] ss:$16 sps:$4 sm:$0xff]   ;;  %v17578_v39 = vld [vmem:[%s22363_s1 + $0x1fc4] ss:$16 sps:$4 sm:$0xff]  }
 0x3c5   :  { %10300 = vmatprep.mubr.bf16.mxu0 %v17483_v40  ;;  %12334 = vmatprep.mubr.bf16.mxu1 %v17483_v40  ;;  %v17581_v40 = vld [vmem:[%s22363_s1 + $0x1fcc] ss:$16 sps:$4 sm:$0xff]  }
 0x3c7   :  { %10374 = vmatpush1.bf16.msra.mxu0 %v17477_v41  ;;  %12408 = vmatpush1.bf16.msra.mxu1 %v17480_v42  ;;  %v17575_v41 = vld [vmem:[%s22364_s0 + $0x850] ss:$144 sps:$4 sm:$0xff]  }
 0x3c8   :  { %10375 = vmatprep.subr.bf16.mxu0 %v17488_v43  ;;  %12409 = vmatprep.subr.bf16.mxu1 %v17491_v44  ;;  %v17576_v42 = vld [vmem:[%s22363_s1 + $0x1fc0] ss:$16 sps:$4 sm:$0xff]   ;;  %v17579_v43 = vld [vmem:[%s22363_s1 + $0x1fc8] ss:$16 sps:$4 sm:$0xff]   ;;  %v17584_v44 = vld [vmem:[%s22363_s1 + $0x1fe4] ss:$16 sps:$4 sm:$0xff]  }
 0x3ca   :  { %10301 = vmatmul.mubr.bf16.gmra.mrb[4].mxu0 %v17485_v45  ;;  %12335 = vmatmul.mubr.bf16.gmra.mrb[4].mxu1 %v17485_v45  ;;  %v17587_v45 = vld [vmem:[%s22363_s1 + $0x1fec] ss:$16 sps:$4 sm:$0xff]  }
 0x3cb   :  { %10376 = vmatpush1.bf16.msra.mxu0 %v17486_v46  ;;  %12410 = vmatpush1.bf16.msra.mxu1 %v17489_v47  ;;  %v17590_v46 = vld [vmem:[%s22364_s0 + $0x7c] ss:$144 sps:$4 sm:$0xff]   ;;  %v17582_v47 = vld [vmem:[%s22363_s1 + $0x1fe0] ss:$16 sps:$4 sm:$0xff]  }
 0x3cc   :  { %10377 = vmatprep.subr.bf16.mxu0 %v17494_v48  ;;  %12411 = vmatprep.subr.bf16.mxu1 %v17497_v49  ;;  %v17585_v48 = vld [vmem:[%s22363_s1 + $0x1fe8] ss:$16 sps:$4 sm:$0xff]   ;;  %v17593_v49 = vld [vmem:[%s22363_s1 + $0x2004] ss:$16 sps:$4 sm:$0xff]  }
 0x3cd   :  { %10310 = vmatprep.mubr.bf16.mxu0 %v17498_v50  ;;  %12344 = vmatprep.mubr.bf16.mxu1 %v17498_v50  ;;  %v17596_v50 = vld [vmem:[%s22363_s1 + $0x200c] ss:$16 sps:$4 sm:$0xff]  }
 0x3cf   :  { %10378 = vmatpush1.bf16.msra.mxu0 %v17492_v51  ;;  %12412 = vmatpush1.bf16.msra.mxu1 %v17495_v52  ;;  %v17588_v51 = vld [vmem:[%s22364_s0 + $0x78] ss:$144 sps:$4 sm:$0xff]   ;;  %v17591_v52 = vld [vmem:[%s22363_s1 + $0x2000] ss:$16 sps:$4 sm:$0xff]  }
 0x3d0   :  { %10379 = vmatprep.subr.bf16.mxu0 %v17503_v53  ;;  %12413 = vmatprep.subr.bf16.mxu1 %v17506_v54  ;;  %v17594_v53 = vld [vmem:[%s22363_s1 + $0x2008] ss:$16 sps:$4 sm:$0xff]   ;;  %v17599_v54 = vld [vmem:[%s22363_s1 + $0x2024] ss:$16 sps:$4 sm:$0xff]  }
 0x3d2   :  { %10311 = vmatmul.mubr.bf16.gmra.mrb[8].mxu0 %v17500_v55  ;;  %12345 = vmatmul.mubr.bf16.gmra.mrb[8].mxu1 %v17500_v55  ;;  %v17602_v55 = vld [vmem:[%s22363_s1 + $0x202c] ss:$16 sps:$4 sm:$0xff]  }
 0x3d3   :  { %10380 = vmatpush1.bf16.msra.mxu0 %v17501_v56  ;;  %12414 = vmatpush1.bf16.msra.mxu1 %v17504_v57  ;;  %v17603_v56 = vld [vmem:[%s22364_s0 + $0x19c] ss:$144 sps:$4 sm:$0xff]   ;;  %v17597_v57 = vld [vmem:[%s22363_s1 + $0x2020] ss:$16 sps:$4 sm:$0xff]  }
 0x3d4   :  { %10381 = vmatprep.subr.bf16.mxu0 %v17509_v58  ;;  %12415 = vmatprep.subr.bf16.mxu1 %v17512_v59  ;;  %v17600_v58 = vld [vmem:[%s22363_s1 + $0x2028] ss:$16 sps:$4 sm:$0xff]   ;;  %v17608_v59 = vld [vmem:[%s22363_s1 + $0x2044] ss:$16 sps:$4 sm:$0xff]  }
 0x3d5   :  { %10320 = vmatprep.mubr.bf16.mxu0 %v17513_v60  ;;  %12354 = vmatprep.mubr.bf16.mxu1 %v17513_v60  ;;  %v17611_v60 = vld [vmem:[%s22363_s1 + $0x204c] ss:$16 sps:$4 sm:$0xff]  }
 0x3d7   :  { %10382 = vmatpush1.bf16.msra.mxu0 %v17507_v61  ;;  %12416 = vmatpush1.bf16.msra.mxu1 %v17510_v62  ;;  %v17605_v61 = vld [vmem:[%s22364_s0 + $0x198] ss:$144 sps:$4 sm:$0xff]   ;;  %v17606_v62 = vld [vmem:[%s22363_s1 + $0x2040] ss:$16 sps:$4 sm:$0xff]  }
 0x3d8   :  { %10383 = vmatprep.subr.bf16.mxu0 %v17518_v63  ;;  %12417 = vmatprep.subr.bf16.mxu1 %v17521_v0  ;;  %v17609_v63 = vld [vmem:[%s22363_s1 + $0x2048] ss:$16 sps:$4 sm:$0xff]   ;;  %v17614_v0 = vld [vmem:[%s22363_s1 + $0x2064] ss:$16 sps:$4 sm:$0xff]  }
 0x3da   :  { %10321 = vmatmul.mubr.bf16.gmra.mrb[12].mxu0 %v17515_v1  ;;  %12355 = vmatmul.mubr.bf16.gmra.mrb[12].mxu1 %v17515_v1  ;;  %v17617_v1 = vld [vmem:[%s22363_s1 + $0x206c] ss:$16 sps:$4 sm:$0xff]  }
 0x3db   :  { %10384 = vmatpush1.bf16.msra.mxu0 %v17516_v2  ;;  %12418 = vmatpush1.bf16.msra.mxu1 %v17519_v3  ;;  %v17618_v2 = vld [vmem:[%s22364_s0 + $0x2bc] ss:$144 sps:$4 sm:$0xff]   ;;  %v17612_v3 = vld [vmem:[%s22363_s1 + $0x2060] ss:$16 sps:$4 sm:$0xff]  }
 0x3dc   :  { %10385 = vmatprep.subr.bf16.mxu0 %v17524_v4  ;;  %12419 = vmatprep.subr.bf16.mxu1 %v17527_v5  ;;  %v17615_v4 = vld [vmem:[%s22363_s1 + $0x2068] ss:$16 sps:$4 sm:$0xff]   ;;  %v17623_v5 = vld [vmem:[%s22363_s1 + $0x2084] ss:$16 sps:$4 sm:$0xff]  }
 0x3dd   :  { %10330 = vmatprep.mubr.bf16.mxu0 %v17528_v6  ;;  %12364 = vmatprep.mubr.bf16.mxu1 %v17528_v6  ;;  %v17626_v6 = vld [vmem:[%s22363_s1 + $0x208c] ss:$16 sps:$4 sm:$0xff]  }
 0x3df   :  { %10386 = vmatpush1.bf16.msra.mxu0 %v17522_v7  ;;  %12420 = vmatpush1.bf16.msra.mxu1 %v17525_v8  ;;  %v17620_v7 = vld [vmem:[%s22364_s0 + $0x2b8] ss:$144 sps:$4 sm:$0xff]   ;;  %v17621_v8 = vld [vmem:[%s22363_s1 + $0x2080] ss:$16 sps:$4 sm:$0xff]  }
 0x3e0   :  { %10387 = vmatprep.subr.bf16.mxu0 %v17533_v9  ;;  %12421 = vmatprep.subr.bf16.mxu1 %v17536_v10  ;;  %v17624_v9 = vld [vmem:[%s22363_s1 + $0x2088] ss:$16 sps:$4 sm:$0xff]   ;;  %v17629_v10 = vld [vmem:[%s22363_s1 + $0x20a4] ss:$16 sps:$4 sm:$0xff]  }
 0x3e2   :  { %10331 = vmatmul.mubr.bf16.gmra.mrb[16].mxu0 %v17530_v11  ;;  %12365 = vmatmul.mubr.bf16.gmra.mrb[16].mxu1 %v17530_v11  ;;  %v17632_v11 = vld [vmem:[%s22363_s1 + $0x20ac] ss:$16 sps:$4 sm:$0xff]  }
 0x3e3   :  { %10388 = vmatpush1.bf16.msra.mxu0 %v17531_v12  ;;  %12422 = vmatpush1.bf16.msra.mxu1 %v17534_v13  ;;  %v17633_v12 = vld [vmem:[%s22364_s0 + $0x3dc] ss:$144 sps:$4 sm:$0xff]   ;;  %v17627_v13 = vld [vmem:[%s22363_s1 + $0x20a0] ss:$16 sps:$4 sm:$0xff]  }
 0x3e4   :  { %10389 = vmatprep.subr.bf16.mxu0 %v17539_v14  ;;  %12423 = vmatprep.subr.bf16.mxu1 %v17542_v15  ;;  %v17630_v14 = vld [vmem:[%s22363_s1 + $0x20a8] ss:$16 sps:$4 sm:$0xff]   ;;  %v17638_v15 = vld [vmem:[%s22363_s1 + $0x20c4] ss:$16 sps:$4 sm:$0xff]  }
 0x3e5   :  { %10340 = vmatprep.mubr.bf16.mxu0 %v17543_v16  ;;  %12374 = vmatprep.mubr.bf16.mxu1 %v17543_v16  ;;  %v17641_v16 = vld [vmem:[%s22363_s1 + $0x20cc] ss:$16 sps:$4 sm:$0xff]  }
 0x3e7   :  { %10390 = vmatpush1.bf16.msra.mxu0 %v17537_v17  ;;  %12424 = vmatpush1.bf16.msra.mxu1 %v17540_v18  ;;  %v17635_v17 = vld [vmem:[%s22364_s0 + $0x3d8] ss:$144 sps:$4 sm:$0xff]   ;;  %v17636_v18 = vld [vmem:[%s22363_s1 + $0x20c0] ss:$16 sps:$4 sm:$0xff]  }
 0x3e8   :  { %10391 = vmatprep.subr.bf16.mxu0 %v17548_v19  ;;  %12425 = vmatprep.subr.bf16.mxu1 %v17551_v20  ;;  %v17639_v19 = vld [vmem:[%s22363_s1 + $0x20c8] ss:$16 sps:$4 sm:$0xff]   ;;  %v17644_v20 = vld [vmem:[%s22363_s1 + $0x20e4] ss:$16 sps:$4 sm:$0xff]  }
 0x3ea   :  { %10341 = vmatmul.mubr.bf16.gmra.mrb[20].mxu0 %v17545_v21  ;;  %12375 = vmatmul.mubr.bf16.gmra.mrb[20].mxu1 %v17545_v21  ;;  %v17647_v21 = vld [vmem:[%s22363_s1 + $0x20ec] ss:$16 sps:$4 sm:$0xff]  }
 0x3eb   :  { %10392 = vmatpush1.bf16.msra.mxu0 %v17546_v22  ;;  %12426 = vmatpush1.bf16.msra.mxu1 %v17549_v23  ;;  %v17648_v22 = vld [vmem:[%s22364_s0 + $0x4fc] ss:$144 sps:$4 sm:$0xff]   ;;  %v17642_v23 = vld [vmem:[%s22363_s1 + $0x20e0] ss:$16 sps:$4 sm:$0xff]  }
 0x3ec   :  { %10393 = vmatprep.subr.bf16.mxu0 %v17554_v24  ;;  %12427 = vmatprep.subr.bf16.mxu1 %v17557_v25  ;;  %v17645_v24 = vld [vmem:[%s22363_s1 + $0x20e8] ss:$16 sps:$4 sm:$0xff]   ;;  %v17653_v25 = vld [vmem:[%s22363_s1 + $0x2104] ss:$16 sps:$4 sm:$0xff]  }
 0x3ed   :  { %10350 = vmatprep.mubr.bf16.mxu0 %v17558_v26  ;;  %12384 = vmatprep.mubr.bf16.mxu1 %v17558_v26  ;;  %v17656_v26 = vld [vmem:[%s22363_s1 + $0x210c] ss:$16 sps:$4 sm:$0xff]  }
 0x3ef   :  { %10394 = vmatpush1.bf16.msra.mxu0 %v17552_v27  ;;  %12428 = vmatpush1.bf16.msra.mxu1 %v17555_v28  ;;  %v17650_v27 = vld [vmem:[%s22364_s0 + $0x4f8] ss:$144 sps:$4 sm:$0xff]   ;;  %v17651_v28 = vld [vmem:[%s22363_s1 + $0x2100] ss:$16 sps:$4 sm:$0xff]  }
 0x3f0   :  { %10395 = vmatprep.subr.bf16.mxu0 %v17563_v29  ;;  %12429 = vmatprep.subr.bf16.mxu1 %v17566_v30  ;;  %v17654_v29 = vld [vmem:[%s22363_s1 + $0x2108] ss:$16 sps:$4 sm:$0xff]   ;;  %v17659_v30 = vld [vmem:[%s22363_s1 + $0x2124] ss:$16 sps:$4 sm:$0xff]  }
 0x3f2   :  { %10351 = vmatmul.mubr.bf16.gmra.mrb[24].mxu0 %v17560_v31  ;;  %12385 = vmatmul.mubr.bf16.gmra.mrb[24].mxu1 %v17560_v31  ;;  %v17662_v31 = vld [vmem:[%s22363_s1 + $0x212c] ss:$16 sps:$4 sm:$0xff]  }
 0x3f3   :  { %10396 = vmatpush1.bf16.msra.mxu0 %v17561_v32  ;;  %12430 = vmatpush1.bf16.msra.mxu1 %v17564_v33  ;;  %v17663_v32 = vld [vmem:[%s22364_s0 + $0x61c] ss:$144 sps:$4 sm:$0xff]   ;;  %v17657_v33 = vld [vmem:[%s22363_s1 + $0x2120] ss:$16 sps:$4 sm:$0xff]  }
 0x3f4   :  { %10397 = vmatprep.subr.bf16.mxu0 %v17569_v34  ;;  %12431 = vmatprep.subr.bf16.mxu1 %v17572_v35  ;;  %v17660_v34 = vld [vmem:[%s22363_s1 + $0x2128] ss:$16 sps:$4 sm:$0xff]   ;;  %v17668_v35 = vld [vmem:[%s22363_s1 + $0x2144] ss:$16 sps:$4 sm:$0xff]  }
 0x3f5   :  { %10360 = vmatprep.mubr.bf16.mxu0 %v17573_v36  ;;  %12394 = vmatprep.mubr.bf16.mxu1 %v17573_v36  ;;  %v17671_v36 = vld [vmem:[%s22363_s1 + $0x214c] ss:$16 sps:$4 sm:$0xff]  }
 0x3f7   :  { %10398 = vmatpush1.bf16.msra.mxu0 %v17567_v37  ;;  %12432 = vmatpush1.bf16.msra.mxu1 %v17570_v38  ;;  %v17665_v37 = vld [vmem:[%s22364_s0 + $0x618] ss:$144 sps:$4 sm:$0xff]   ;;  %v17666_v38 = vld [vmem:[%s22363_s1 + $0x2140] ss:$16 sps:$4 sm:$0xff]  }
 0x3f8   :  { %10399 = vmatprep.subr.bf16.mxu0 %v17578_v39  ;;  %12433 = vmatprep.subr.bf16.mxu1 %v17581_v40  ;;  %v17669_v39 = vld [vmem:[%s22363_s1 + $0x2148] ss:$16 sps:$4 sm:$0xff]   ;;  %v17674_v40 = vld [vmem:[%s22363_s1 + $0x2164] ss:$16 sps:$4 sm:$0xff]  }
 0x3fa   :  { %10361 = vmatmul.mubr.bf16.gmra.mrb[28].mxu0 %v17575_v41  ;;  %12395 = vmatmul.mubr.bf16.gmra.mrb[28].mxu1 %v17575_v41  ;;  %v17677_v41 = vld [vmem:[%s22363_s1 + $0x216c] ss:$16 sps:$4 sm:$0xff]  }
 0x3fb   :  { %10400 = vmatpush1.bf16.msra.mxu0 %v17576_v42  ;;  %12434 = vmatpush1.bf16.msra.mxu1 %v17579_v43  ;;  %v17678_v42 = vld [vmem:[%s22364_s0 + $0x73c] ss:$144 sps:$4 sm:$0xff]   ;;  %v17672_v43 = vld [vmem:[%s22363_s1 + $0x2160] ss:$16 sps:$4 sm:$0xff]  }
 0x3fc   :  { %10401 = vmatprep.subr.bf16.mxu0 %v17584_v44  ;;  %12435 = vmatprep.subr.bf16.mxu1 %v17587_v45  ;;  %v17675_v44 = vld [vmem:[%s22363_s1 + $0x2168] ss:$16 sps:$4 sm:$0xff]   ;;  %v17683_v45 = vld [vmem:[%s22363_s1 + $0x2184] ss:$16 sps:$4 sm:$0xff]  }
 0x3fd   :  { %10403 = vmatprep.mubr.bf16.mxu0 %v17590_v46  ;;  %12437 = vmatprep.mubr.bf16.mxu1 %v17590_v46  ;;  %v17686_v46 = vld [vmem:[%s22363_s1 + $0x218c] ss:$16 sps:$4 sm:$0xff]  }
 0x3ff   :  { %10402 = vmatpush1.bf16.msra.mxu0 %v17582_v47  ;;  %12436 = vmatpush1.bf16.msra.mxu1 %v17585_v48  ;;  %v17680_v47 = vld [vmem:[%s22364_s0 + $0x738] ss:$144 sps:$4 sm:$0xff]   ;;  %v17681_v48 = vld [vmem:[%s22363_s1 + $0x2180] ss:$16 sps:$4 sm:$0xff]  }
 0x400   :  { %10484 = vmatprep.subr.bf16.mxu0 %v17593_v49  ;;  %12518 = vmatprep.subr.bf16.mxu1 %v17596_v50  ;;  %v17684_v49 = vld [vmem:[%s22363_s1 + $0x2188] ss:$16 sps:$4 sm:$0xff]   ;;  %v17689_v50 = vld [vmem:[%s22363_s1 + $0x21a4] ss:$16 sps:$4 sm:$0xff]  }
 0x402   :  { %10404 = vmatmul.mubr.bf16.vlgmr.msra.gmra.mrb[0].mxu0 %v17588_v51  ;;  %12438 = vmatmul.mubr.bf16.vlgmr.msra.gmra.mrb[0].mxu1 %v17588_v51  ;;  %v17692_v51 = vld [vmem:[%s22363_s1 + $0x21ac] ss:$16 sps:$4 sm:$0xff]  }
 0x403   :  { %10485 = vmatpush1.bf16.msra.mxu0 %v17591_v52  ;;  %12519 = vmatpush1.bf16.msra.mxu1 %v17594_v53  ;;  %v17693_v52 = vld [vmem:[%s22364_s0 + $0x85c] ss:$144 sps:$4 sm:$0xff]   ;;  %v17687_v53 = vld [vmem:[%s22363_s1 + $0x21a0] ss:$16 sps:$4 sm:$0xff]  }
 0x404   :  { %10486 = vmatprep.subr.bf16.mxu0 %v17599_v54  ;;  %12520 = vmatprep.subr.bf16.mxu1 %v17602_v55  ;;  %v17690_v54 = vld [vmem:[%s22363_s1 + $0x21a8] ss:$16 sps:$4 sm:$0xff]   ;;  %v17698_v55 = vld [vmem:[%s22363_s1 + $0x21c4] ss:$16 sps:$4 sm:$0xff]  }
 0x405   :  { %10413 = vmatprep.mubr.bf16.mxu0 %v17603_v56  ;;  %12447 = vmatprep.mubr.bf16.mxu1 %v17603_v56  ;;  %v17701_v56 = vld [vmem:[%s22363_s1 + $0x21cc] ss:$16 sps:$4 sm:$0xff]  }
 0x407   :  { %10487 = vmatpush1.bf16.msra.mxu0 %v17597_v57  ;;  %12521 = vmatpush1.bf16.msra.mxu1 %v17600_v58  ;;  %v17695_v57 = vld [vmem:[%s22364_s0 + $0x858] ss:$144 sps:$4 sm:$0xff]   ;;  %v17696_v58 = vld [vmem:[%s22363_s1 + $0x21c0] ss:$16 sps:$4 sm:$0xff]  }
 0x408   :  { %10488 = vmatprep.subr.bf16.mxu0 %v17608_v59  ;;  %12522 = vmatprep.subr.bf16.mxu1 %v17611_v60  ;;  %v17699_v59 = vld [vmem:[%s22363_s1 + $0x21c8] ss:$16 sps:$4 sm:$0xff]   ;;  %v17704_v60 = vld [vmem:[%s22363_s1 + $0x21e4] ss:$16 sps:$4 sm:$0xff]  }
 0x40a   :  { %10414 = vmatmul.mubr.bf16.gmra.mrb[4].mxu0 %v17605_v61  ;;  %12448 = vmatmul.mubr.bf16.gmra.mrb[4].mxu1 %v17605_v61  ;;  %v17707_v61 = vld [vmem:[%s22363_s1 + $0x21ec] ss:$16 sps:$4 sm:$0xff]  }
 0x40b   :  { %10489 = vmatpush1.bf16.msra.mxu0 %v17606_v62  ;;  %12523 = vmatpush1.bf16.msra.mxu1 %v17609_v63  ;;  %v17710_v62 = vld [vmem:[%s22364_s0 + $0x84] ss:$144 sps:$4 sm:$0xff]   ;;  %v17702_v63 = vld [vmem:[%s22363_s1 + $0x21e0] ss:$16 sps:$4 sm:$0xff]  }
 0x40c   :  { %10490 = vmatprep.subr.bf16.mxu0 %v17614_v0  ;;  %12524 = vmatprep.subr.bf16.mxu1 %v17617_v1  ;;  %v17705_v0 = vld [vmem:[%s22363_s1 + $0x21e8] ss:$16 sps:$4 sm:$0xff]   ;;  %v17713_v1 = vld [vmem:[%s22363_s1 + $0x2204] ss:$16 sps:$4 sm:$0xff]  }
 0x40d   :  { %10423 = vmatprep.mubr.bf16.mxu0 %v17618_v2  ;;  %12457 = vmatprep.mubr.bf16.mxu1 %v17618_v2  ;;  %v17716_v2 = vld [vmem:[%s22363_s1 + $0x220c] ss:$16 sps:$4 sm:$0xff]  }
 0x40f   :  { %10491 = vmatpush1.bf16.msra.mxu0 %v17612_v3  ;;  %12525 = vmatpush1.bf16.msra.mxu1 %v17615_v4  ;;  %v17708_v3 = vld [vmem:[%s22364_s0 + $0x80] ss:$144 sps:$4 sm:$0xff]  }
 0x410   :  { %10492 = vmatprep.subr.bf16.mxu0 %v17623_v5  ;;  %12526 = vmatprep.subr.bf16.mxu1 %v17626_v6  ;;  %v17711_v4 = vld [vmem:[%s22363_s1 + $0x2200] ss:$16 sps:$4 sm:$0xff]   ;;  %v17714_v5 = vld [vmem:[%s22363_s1 + $0x2208] ss:$16 sps:$4 sm:$0xff]   ;;  %v17719_v6 = vld [vmem:[%s22363_s1 + $0x2224] ss:$16 sps:$4 sm:$0xff]  }
 0x412   :  { %10424 = vmatmul.mubr.bf16.gmra.mrb[8].mxu0 %v17620_v7  ;;  %12458 = vmatmul.mubr.bf16.gmra.mrb[8].mxu1 %v17620_v7  ;;  %v17722_v7 = vld [vmem:[%s22363_s1 + $0x222c] ss:$16 sps:$4 sm:$0xff]  }
 0x413   :  { %10493 = vmatpush1.bf16.msra.mxu0 %v17621_v8  ;;  %12527 = vmatpush1.bf16.msra.mxu1 %v17624_v9  ;;  %v17723_v8 = vld [vmem:[%s22364_s0 + $0x1a4] ss:$144 sps:$4 sm:$0xff]   ;;  %v17717_v9 = vld [vmem:[%s22363_s1 + $0x2220] ss:$16 sps:$4 sm:$0xff]  }
 0x414   :  { %10494 = vmatprep.subr.bf16.mxu0 %v17629_v10  ;;  %12528 = vmatprep.subr.bf16.mxu1 %v17632_v11  ;;  %v17720_v10 = vld [vmem:[%s22363_s1 + $0x2228] ss:$16 sps:$4 sm:$0xff]   ;;  %v17728_v11 = vld [vmem:[%s22363_s1 + $0x2244] ss:$16 sps:$4 sm:$0xff]  }
 0x415   :  { %10433 = vmatprep.mubr.bf16.mxu0 %v17633_v12  ;;  %12467 = vmatprep.mubr.bf16.mxu1 %v17633_v12  ;;  %v17731_v12 = vld [vmem:[%s22363_s1 + $0x224c] ss:$16 sps:$4 sm:$0xff]  }
 0x417   :  { %10495 = vmatpush1.bf16.msra.mxu0 %v17627_v13  ;;  %12529 = vmatpush1.bf16.msra.mxu1 %v17630_v14  ;;  %v17725_v13 = vld [vmem:[%s22364_s0 + $0x1a0] ss:$144 sps:$4 sm:$0xff]  }
 0x418   :  { %10496 = vmatprep.subr.bf16.mxu0 %v17638_v15  ;;  %12530 = vmatprep.subr.bf16.mxu1 %v17641_v16  ;;  %v17726_v14 = vld [vmem:[%s22363_s1 + $0x2240] ss:$16 sps:$4 sm:$0xff]   ;;  %v17729_v15 = vld [vmem:[%s22363_s1 + $0x2248] ss:$16 sps:$4 sm:$0xff]   ;;  %v17734_v16 = vld [vmem:[%s22363_s1 + $0x2264] ss:$16 sps:$4 sm:$0xff]  }
 0x41a   :  { %10434 = vmatmul.mubr.bf16.gmra.mrb[12].mxu0 %v17635_v17  ;;  %12468 = vmatmul.mubr.bf16.gmra.mrb[12].mxu1 %v17635_v17  ;;  %v17737_v17 = vld [vmem:[%s22363_s1 + $0x226c] ss:$16 sps:$4 sm:$0xff]  }
 0x41b   :  { %10497 = vmatpush1.bf16.msra.mxu0 %v17636_v18  ;;  %12531 = vmatpush1.bf16.msra.mxu1 %v17639_v19  ;;  %v17738_v18 = vld [vmem:[%s22364_s0 + $0x2c4] ss:$144 sps:$4 sm:$0xff]   ;;  %v17732_v19 = vld [vmem:[%s22363_s1 + $0x2260] ss:$16 sps:$4 sm:$0xff]  }
 0x41c   :  { %10498 = vmatprep.subr.bf16.mxu0 %v17644_v20  ;;  %12532 = vmatprep.subr.bf16.mxu1 %v17647_v21  ;;  %v17735_v20 = vld [vmem:[%s22363_s1 + $0x2268] ss:$16 sps:$4 sm:$0xff]   ;;  %v17743_v21 = vld [vmem:[%s22363_s1 + $0x2284] ss:$16 sps:$4 sm:$0xff]  }
 0x41d   :  { %10443 = vmatprep.mubr.bf16.mxu0 %v17648_v22  ;;  %12477 = vmatprep.mubr.bf16.mxu1 %v17648_v22  ;;  %v17746_v22 = vld [vmem:[%s22363_s1 + $0x228c] ss:$16 sps:$4 sm:$0xff]  }
 0x41f   :  { %10499 = vmatpush1.bf16.msra.mxu0 %v17642_v23  ;;  %12533 = vmatpush1.bf16.msra.mxu1 %v17645_v24  ;;  %v17740_v23 = vld [vmem:[%s22364_s0 + $0x2c0] ss:$144 sps:$4 sm:$0xff]  }
 0x420   :  { %10500 = vmatprep.subr.bf16.mxu0 %v17653_v25  ;;  %12534 = vmatprep.subr.bf16.mxu1 %v17656_v26  ;;  %v17741_v24 = vld [vmem:[%s22363_s1 + $0x2280] ss:$16 sps:$4 sm:$0xff]   ;;  %v17744_v25 = vld [vmem:[%s22363_s1 + $0x2288] ss:$16 sps:$4 sm:$0xff]   ;;  %v17749_v26 = vld [vmem:[%s22363_s1 + $0x22a4] ss:$16 sps:$4 sm:$0xff]  }
 0x422   :  { %10444 = vmatmul.mubr.bf16.gmra.mrb[16].mxu0 %v17650_v27  ;;  %12478 = vmatmul.mubr.bf16.gmra.mrb[16].mxu1 %v17650_v27  ;;  %v17752_v27 = vld [vmem:[%s22363_s1 + $0x22ac] ss:$16 sps:$4 sm:$0xff]  }
 0x423   :  { %10501 = vmatpush1.bf16.msra.mxu0 %v17651_v28  ;;  %12535 = vmatpush1.bf16.msra.mxu1 %v17654_v29  ;;  %v17753_v28 = vld [vmem:[%s22364_s0 + $0x3e4] ss:$144 sps:$4 sm:$0xff]   ;;  %v17747_v29 = vld [vmem:[%s22363_s1 + $0x22a0] ss:$16 sps:$4 sm:$0xff]  }
 0x424   :  { %10502 = vmatprep.subr.bf16.mxu0 %v17659_v30  ;;  %12536 = vmatprep.subr.bf16.mxu1 %v17662_v31  ;;  %v17750_v30 = vld [vmem:[%s22363_s1 + $0x22a8] ss:$16 sps:$4 sm:$0xff]   ;;  %v17758_v31 = vld [vmem:[%s22363_s1 + $0x22c4] ss:$16 sps:$4 sm:$0xff]  }
 0x425   :  { %10453 = vmatprep.mubr.bf16.mxu0 %v17663_v32  ;;  %12487 = vmatprep.mubr.bf16.mxu1 %v17663_v32  ;;  %v17761_v32 = vld [vmem:[%s22363_s1 + $0x22cc] ss:$16 sps:$4 sm:$0xff]  }
 0x427   :  { %10503 = vmatpush1.bf16.msra.mxu0 %v17657_v33  ;;  %12537 = vmatpush1.bf16.msra.mxu1 %v17660_v34  ;;  %v17755_v33 = vld [vmem:[%s22364_s0 + $0x3e0] ss:$144 sps:$4 sm:$0xff]  }
 0x428   :  { %10504 = vmatprep.subr.bf16.mxu0 %v17668_v35  ;;  %12538 = vmatprep.subr.bf16.mxu1 %v17671_v36  ;;  %v17756_v34 = vld [vmem:[%s22363_s1 + $0x22c0] ss:$16 sps:$4 sm:$0xff]   ;;  %v17759_v35 = vld [vmem:[%s22363_s1 + $0x22c8] ss:$16 sps:$4 sm:$0xff]   ;;  %v17764_v36 = vld [vmem:[%s22363_s1 + $0x22e4] ss:$16 sps:$4 sm:$0xff]  }
 0x42a   :  { %10454 = vmatmul.mubr.bf16.gmra.mrb[20].mxu0 %v17665_v37  ;;  %12488 = vmatmul.mubr.bf16.gmra.mrb[20].mxu1 %v17665_v37  ;;  %v17767_v37 = vld [vmem:[%s22363_s1 + $0x22ec] ss:$16 sps:$4 sm:$0xff]  }
 0x42b   :  { %10505 = vmatpush1.bf16.msra.mxu0 %v17666_v38  ;;  %12539 = vmatpush1.bf16.msra.mxu1 %v17669_v39  ;;  %v17768_v38 = vld [vmem:[%s22364_s0 + $0x504] ss:$144 sps:$4 sm:$0xff]   ;;  %v17762_v39 = vld [vmem:[%s22363_s1 + $0x22e0] ss:$16 sps:$4 sm:$0xff]  }
 0x42c   :  { %10506 = vmatprep.subr.bf16.mxu0 %v17674_v40  ;;  %12540 = vmatprep.subr.bf16.mxu1 %v17677_v41  ;;  %v17765_v40 = vld [vmem:[%s22363_s1 + $0x22e8] ss:$16 sps:$4 sm:$0xff]   ;;  %v17773_v41 = vld [vmem:[%s22363_s1 + $0x2304] ss:$16 sps:$4 sm:$0xff]  }
 0x42d   :  { %10463 = vmatprep.mubr.bf16.mxu0 %v17678_v42  ;;  %12497 = vmatprep.mubr.bf16.mxu1 %v17678_v42  ;;  %v17776_v42 = vld [vmem:[%s22363_s1 + $0x230c] ss:$16 sps:$4 sm:$0xff]  }
 0x42f   :  { %10507 = vmatpush1.bf16.msra.mxu0 %v17672_v43  ;;  %12541 = vmatpush1.bf16.msra.mxu1 %v17675_v44  ;;  %v17770_v43 = vld [vmem:[%s22364_s0 + $0x500] ss:$144 sps:$4 sm:$0xff]  }
 0x430   :  { %10508 = vmatprep.subr.bf16.mxu0 %v17683_v45  ;;  %12542 = vmatprep.subr.bf16.mxu1 %v17686_v46  ;;  %v17771_v44 = vld [vmem:[%s22363_s1 + $0x2300] ss:$16 sps:$4 sm:$0xff]   ;;  %v17774_v45 = vld [vmem:[%s22363_s1 + $0x2308] ss:$16 sps:$4 sm:$0xff]   ;;  %v17779_v46 = vld [vmem:[%s22363_s1 + $0x2324] ss:$16 sps:$4 sm:$0xff]  }
 0x432   :  { %10464 = vmatmul.mubr.bf16.gmra.mrb[24].mxu0 %v17680_v47  ;;  %12498 = vmatmul.mubr.bf16.gmra.mrb[24].mxu1 %v17680_v47  ;;  %v17782_v47 = vld [vmem:[%s22363_s1 + $0x232c] ss:$16 sps:$4 sm:$0xff]  }
 0x433   :  { %10509 = vmatpush1.bf16.msra.mxu0 %v17681_v48  ;;  %12543 = vmatpush1.bf16.msra.mxu1 %v17684_v49  ;;  %v17783_v48 = vld [vmem:[%s22364_s0 + $0x624] ss:$144 sps:$4 sm:$0xff]   ;;  %v17777_v49 = vld [vmem:[%s22363_s1 + $0x2320] ss:$16 sps:$4 sm:$0xff]  }
 0x434   :  { %10510 = vmatprep.subr.bf16.mxu0 %v17689_v50  ;;  %12544 = vmatprep.subr.bf16.mxu1 %v17692_v51  ;;  %v17780_v50 = vld [vmem:[%s22363_s1 + $0x2328] ss:$16 sps:$4 sm:$0xff]   ;;  %v17788_v51 = vld [vmem:[%s22363_s1 + $0x2344] ss:$16 sps:$4 sm:$0xff]  }
 0x435   :  { %10473 = vmatprep.mubr.bf16.mxu0 %v17693_v52  ;;  %12507 = vmatprep.mubr.bf16.mxu1 %v17693_v52  ;;  %v17791_v52 = vld [vmem:[%s22363_s1 + $0x234c] ss:$16 sps:$4 sm:$0xff]  }
 0x437   :  { %10511 = vmatpush1.bf16.msra.mxu0 %v17687_v53  ;;  %12545 = vmatpush1.bf16.msra.mxu1 %v17690_v54  ;;  %v17785_v53 = vld [vmem:[%s22364_s0 + $0x620] ss:$144 sps:$4 sm:$0xff]  }
 0x438   :  { %10512 = vmatprep.subr.bf16.mxu0 %v17698_v55  ;;  %12546 = vmatprep.subr.bf16.mxu1 %v17701_v56  ;;  %v17786_v54 = vld [vmem:[%s22363_s1 + $0x2340] ss:$16 sps:$4 sm:$0xff]   ;;  %v17789_v55 = vld [vmem:[%s22363_s1 + $0x2348] ss:$16 sps:$4 sm:$0xff]   ;;  %v17794_v56 = vld [vmem:[%s22363_s1 + $0x2364] ss:$16 sps:$4 sm:$0xff]  }
 0x43a   :  { %10474 = vmatmul.mubr.bf16.gmra.mrb[28].mxu0 %v17695_v57  ;;  %12508 = vmatmul.mubr.bf16.gmra.mrb[28].mxu1 %v17695_v57  ;;  %v17797_v57 = vld [vmem:[%s22363_s1 + $0x236c] ss:$16 sps:$4 sm:$0xff]  }
 0x43b   :  { %10513 = vmatpush1.bf16.msra.mxu0 %v17696_v58  ;;  %12547 = vmatpush1.bf16.msra.mxu1 %v17699_v59  ;;  %v17798_v58 = vld [vmem:[%s22364_s0 + $0x744] ss:$144 sps:$4 sm:$0xff]   ;;  %v17792_v59 = vld [vmem:[%s22363_s1 + $0x2360] ss:$16 sps:$4 sm:$0xff]  }
 0x43c   :  { %10514 = vmatprep.subr.bf16.mxu0 %v17704_v60  ;;  %12548 = vmatprep.subr.bf16.mxu1 %v17707_v61  ;;  %v17795_v60 = vld [vmem:[%s22363_s1 + $0x2368] ss:$16 sps:$4 sm:$0xff]   ;;  %v17803_v61 = vld [vmem:[%s22363_s1 + $0x2384] ss:$16 sps:$4 sm:$0xff]  }
 0x43d   :  { %10516 = vmatprep.mubr.bf16.mxu0 %v17710_v62  ;;  %12550 = vmatprep.mubr.bf16.mxu1 %v17710_v62  ;;  %v17806_v62 = vld [vmem:[%s22363_s1 + $0x238c] ss:$16 sps:$4 sm:$0xff]  }
 0x43f   :  { %10515 = vmatpush1.bf16.msra.mxu0 %v17702_v63  ;;  %12549 = vmatpush1.bf16.msra.mxu1 %v17705_v0  ;;  %v17800_v63 = vld [vmem:[%s22364_s0 + $0x740] ss:$144 sps:$4 sm:$0xff]  }
 0x440   :  { %10597 = vmatprep.subr.bf16.mxu0 %v17713_v1  ;;  %12631 = vmatprep.subr.bf16.mxu1 %v17716_v2  ;;  %v17801_v0 = vld [vmem:[%s22363_s1 + $0x2380] ss:$16 sps:$4 sm:$0xff]   ;;  %v17804_v1 = vld [vmem:[%s22363_s1 + $0x2388] ss:$16 sps:$4 sm:$0xff]   ;;  %v17809_v2 = vld [vmem:[%s22363_s1 + $0x23a4] ss:$16 sps:$4 sm:$0xff]  }
 0x442   :  { %10517 = vmatmul.mubr.bf16.vlgmr.msra.gmra.mrb[0].mxu0 %v17708_v3  ;;  %12551 = vmatmul.mubr.bf16.vlgmr.msra.gmra.mrb[0].mxu1 %v17708_v3  ;;  %v17812_v3 = vld [vmem:[%s22363_s1 + $0x23ac] ss:$16 sps:$4 sm:$0xff]  }
 0x443   :  { %10598 = vmatpush1.bf16.msra.mxu0 %v17711_v4  ;;  %12632 = vmatpush1.bf16.msra.mxu1 %v17714_v5  ;;  %v17813_v4 = vld [vmem:[%s22364_s0 + $0x864] ss:$144 sps:$4 sm:$0xff]   ;;  %v17807_v5 = vld [vmem:[%s22363_s1 + $0x23a0] ss:$16 sps:$4 sm:$0xff]  }
 0x444   :  { %10599 = vmatprep.subr.bf16.mxu0 %v17719_v6  ;;  %12633 = vmatprep.subr.bf16.mxu1 %v17722_v7  ;;  %v17810_v6 = vld [vmem:[%s22363_s1 + $0x23a8] ss:$16 sps:$4 sm:$0xff]   ;;  %v17818_v7 = vld [vmem:[%s22363_s1 + $0x23c4] ss:$16 sps:$4 sm:$0xff]  }
 0x445   :  { %10526 = vmatprep.mubr.bf16.mxu0 %v17723_v8  ;;  %12560 = vmatprep.mubr.bf16.mxu1 %v17723_v8  ;;  %v17821_v8 = vld [vmem:[%s22363_s1 + $0x23cc] ss:$16 sps:$4 sm:$0xff]  }
 0x447   :  { %10600 = vmatpush1.bf16.msra.mxu0 %v17717_v9  ;;  %12634 = vmatpush1.bf16.msra.mxu1 %v17720_v10  ;;  %v17815_v9 = vld [vmem:[%s22364_s0 + $0x860] ss:$144 sps:$4 sm:$0xff]  }
 0x448   :  { %10601 = vmatprep.subr.bf16.mxu0 %v17728_v11  ;;  %12635 = vmatprep.subr.bf16.mxu1 %v17731_v12  ;;  %v17816_v10 = vld [vmem:[%s22363_s1 + $0x23c0] ss:$16 sps:$4 sm:$0xff]   ;;  %v17819_v11 = vld [vmem:[%s22363_s1 + $0x23c8] ss:$16 sps:$4 sm:$0xff]   ;;  %v17824_v12 = vld [vmem:[%s22363_s1 + $0x23e4] ss:$16 sps:$4 sm:$0xff]  }
 0x44a   :  { %10527 = vmatmul.mubr.bf16.gmra.mrb[4].mxu0 %v17725_v13  ;;  %12561 = vmatmul.mubr.bf16.gmra.mrb[4].mxu1 %v17725_v13  ;;  %v17827_v13 = vld [vmem:[%s22363_s1 + $0x23ec] ss:$16 sps:$4 sm:$0xff]  }
 0x44b   :  { %10602 = vmatpush1.bf16.msra.mxu0 %v17726_v14  ;;  %12636 = vmatpush1.bf16.msra.mxu1 %v17729_v15  ;;  %v17830_v14 = vld [vmem:[%s22364_s0 + $0x8c] ss:$144 sps:$4 sm:$0xff]   ;;  %v17822_v15 = vld [vmem:[%s22363_s1 + $0x23e0] ss:$16 sps:$4 sm:$0xff]  }
 0x44c   :  { %10603 = vmatprep.subr.bf16.mxu0 %v17734_v16  ;;  %12637 = vmatprep.subr.bf16.mxu1 %v17737_v17  ;;  %v17825_v16 = vld [vmem:[%s22363_s1 + $0x23e8] ss:$16 sps:$4 sm:$0xff]  }
 0x44d   :  { %10536 = vmatprep.mubr.bf16.mxu0 %v17738_v18  ;;  %12570 = vmatprep.mubr.bf16.mxu1 %v17738_v18  ;;  %v17828_v17 = vld [vmem:[%s22364_s0 + $0x88] ss:$144 sps:$4 sm:$0xff]   ;;  %v17831_v18 = vld [vmem:[%s22364_s0 + $0x1ac] ss:$144 sps:$4 sm:$0xff]  }
 0x44f   :  { %10604 = vmatpush1.bf16.msra.mxu0 %v17732_v19  ;;  %12638 = vmatpush1.bf16.msra.mxu1 %v17735_v20  ;;  %v17833_v19 = vld [vmem:[%s22364_s0 + $0x1a8] ss:$144 sps:$4 sm:$0xff]   ;;  %v17834_v20 = vld [vmem:[%s22364_s0 + $0x2cc] ss:$144 sps:$4 sm:$0xff]  }
 0x450   :  { %10605 = vmatprep.subr.bf16.mxu0 %v17743_v21  ;;  %12639 = vmatprep.subr.bf16.mxu1 %v17746_v22  ;;  %v17836_v21 = vld [vmem:[%s22364_s0 + $0x2c8] ss:$144 sps:$4 sm:$0xff]   ;;  %v17837_v22 = vld [vmem:[%s22364_s0 + $0x3ec] ss:$144 sps:$4 sm:$0xff]  }
 0x452   :  { %10537 = vmatmul.mubr.bf16.gmra.mrb[8].mxu0 %v17740_v23  ;;  %12571 = vmatmul.mubr.bf16.gmra.mrb[8].mxu1 %v17740_v23  ;;  %v17839_v23 = vld [vmem:[%s22364_s0 + $0x3e8] ss:$144 sps:$4 sm:$0xff]  }
 0x453   :  { %10606 = vmatpush1.bf16.msra.mxu0 %v17741_v24  ;;  %12640 = vmatpush1.bf16.msra.mxu1 %v17744_v25  ;;  %v17840_v24 = vld [vmem:[%s22364_s0 + $0x50c] ss:$144 sps:$4 sm:$0xff]   ;;  %v17842_v25 = vld [vmem:[%s22364_s0 + $0x508] ss:$144 sps:$4 sm:$0xff]  }
 0x454   :  { %10607 = vmatprep.subr.bf16.mxu0 %v17749_v26  ;;  %12641 = vmatprep.subr.bf16.mxu1 %v17752_v27  ;;  %v17843_v26 = vld [vmem:[%s22364_s0 + $0x62c] ss:$144 sps:$4 sm:$0xff]   ;;  %v17845_v27 = vld [vmem:[%s22364_s0 + $0x628] ss:$144 sps:$4 sm:$0xff]  }
 0x455   :  { %10546 = vmatprep.mubr.bf16.mxu0 %v17753_v28  ;;  %12580 = vmatprep.mubr.bf16.mxu1 %v17753_v28  ;;  %v17846_v28 = vld [vmem:[%s22364_s0 + $0x74c] ss:$144 sps:$4 sm:$0xff]  }
 0x457   :  { %10608 = vmatpush1.bf16.msra.mxu0 %v17747_v29  ;;  %12642 = vmatpush1.bf16.msra.mxu1 %v17750_v30  ;;  %v17848_v29 = vld [vmem:[%s22364_s0 + $0x748] ss:$144 sps:$4 sm:$0xff]   ;;  %v17849_v30 = vld [vmem:[%s22364_s0 + $0x86c] ss:$144 sps:$4 sm:$0xff]  }
 0x458   :  { %10609 = vmatprep.subr.bf16.mxu0 %v17758_v31  ;;  %12643 = vmatprep.subr.bf16.mxu1 %v17761_v32  ;;  %v17851_v31 = vld [vmem:[%s22364_s0 + $0x868] ss:$144 sps:$4 sm:$0xff]   ;;  %v1456_v32 = vlaneseq }
 0x45a   :  { %10547 = vmatmul.mubr.bf16.gmra.mrb[12].mxu0 %v17755_v33  ;;  %12581 = vmatmul.mubr.bf16.gmra.mrb[12].mxu1 %v17755_v33  ;;  %v1457_v33 = vshrl.u32 %v1456_v32, 7 }
 0x45b   :  { %10610 = vmatpush1.bf16.msra.mxu0 %v17756_v34  ;;  %12644 = vmatpush1.bf16.msra.mxu1 %v17759_v35 }
 0x45c   :  { %10611 = vmatprep.subr.bf16.mxu0 %v17764_v36  ;;  %12645 = vmatprep.subr.bf16.mxu1 %v17767_v37  ;;  %v1458_v34 = vsub.s32 0, %v1457_v33  ;;  %v1466_v35 = vsub.s32 2, %v1457_v33  ;;  %v1454_v36 = vld [vmem:[%s22365_s2] sm:$0xf]  ;;  %v1462_v37 = vsub.s32 1, %v1457_v33 }
 0x45d   :  { %10556 = vmatprep.mubr.bf16.mxu0 %v17768_v38  ;;  %12590 = vmatprep.mubr.bf16.mxu1 %v17768_v38  ;;  %v1470_v38 = vsub.s32 3, %v1457_v33 }
 0x45f   :  { %10612 = vmatpush1.bf16.msra.mxu0 %v17762_v39  ;;  %12646 = vmatpush1.bf16.msra.mxu1 %v17765_v40  ;;  %v22195_v39 = vrot.slane %v1454_v36, %v1458_v34  ;;  %v22197_v40 = vrot.slane %v1454_v36, %v1466_v35 }
 0x460   :  { %10613 = vmatprep.subr.bf16.mxu0 %v17773_v41  ;;  %12647 = vmatprep.subr.bf16.mxu1 %v17776_v42  ;;  %v22199_v41 = vrot.slane %v1454_v36, %v1462_v37  ;;  %v22201_v42 = vrot.slane %v1454_v36, %v1470_v38 }
 0x462   :  { %10557 = vmatmul.mubr.bf16.gmra.mrb[16].mxu0 %v17770_v43  ;;  %12591 = vmatmul.mubr.bf16.gmra.mrb[16].mxu1 %v17770_v43 }
 0x463   :  { %10614 = vmatpush1.bf16.msra.mxu0 %v17771_v44  ;;  %12648 = vmatpush1.bf16.msra.mxu1 %v17774_v45 }
 0x464   :  { %10615 = vmatprep.subr.bf16.mxu0 %v17779_v46  ;;  %12649 = vmatprep.subr.bf16.mxu1 %v17782_v47 }
 0x465   :  { %10566 = vmatprep.mubr.bf16.mxu0 %v17783_v48  ;;  %12600 = vmatprep.mubr.bf16.mxu1 %v17783_v48 }
 0x467   :  { %10616 = vmatpush1.bf16.msra.mxu0 %v17777_v49  ;;  %12650 = vmatpush1.bf16.msra.mxu1 %v17780_v50 }
 0x468   :  { %10617 = vmatprep.subr.bf16.mxu0 %v17788_v51  ;;  %12651 = vmatprep.subr.bf16.mxu1 %v17791_v52 }
 0x46a   :  { %10567 = vmatmul.mubr.bf16.gmra.mrb[20].mxu0 %v17785_v53  ;;  %12601 = vmatmul.mubr.bf16.gmra.mrb[20].mxu1 %v17785_v53 }
 0x46b   :  { %10618 = vmatpush1.bf16.msra.mxu0 %v17786_v54  ;;  %12652 = vmatpush1.bf16.msra.mxu1 %v17789_v55 }
 0x46c   :  { %10619 = vmatprep.subr.bf16.mxu0 %v17794_v56  ;;  %12653 = vmatprep.subr.bf16.mxu1 %v17797_v57 }
 0x46d   :  { %10576 = vmatprep.mubr.bf16.mxu0 %v17798_v58  ;;  %12610 = vmatprep.mubr.bf16.mxu1 %v17798_v58 }
 0x46f   :  { %10620 = vmatpush1.bf16.msra.mxu0 %v17792_v59  ;;  %12654 = vmatpush1.bf16.msra.mxu1 %v17795_v60 }
 0x470   :  { %10621 = vmatprep.subr.bf16.mxu0 %v17803_v61  ;;  %12655 = vmatprep.subr.bf16.mxu1 %v17806_v62 }
 0x472   :  { %10577 = vmatmul.mubr.bf16.gmra.mrb[24].mxu0 %v17800_v63  ;;  %12611 = vmatmul.mubr.bf16.gmra.mrb[24].mxu1 %v17800_v63 }
 0x473   :  { %10622 = vmatpush1.bf16.msra.mxu0 %v17801_v0  ;;  %12656 = vmatpush1.bf16.msra.mxu1 %v17804_v1 }
 0x474   :  { %10623 = vmatprep.subr.bf16.mxu0 %v17809_v2  ;;  %12657 = vmatprep.subr.bf16.mxu1 %v17812_v3 }
 0x475   :  { %10586 = vmatprep.mubr.bf16.mxu0 %v17813_v4  ;;  %12620 = vmatprep.mubr.bf16.mxu1 %v17813_v4 }
 0x477   :  { %10624 = vmatpush1.bf16.msra.mxu0 %v17807_v5  ;;  %12658 = vmatpush1.bf16.msra.mxu1 %v17810_v6 }
 0x478   :  { %10625 = vmatprep.subr.bf16.mxu0 %v17818_v7  ;;  %12659 = vmatprep.subr.bf16.mxu1 %v17821_v8 }
 0x47a   :  { %10587 = vmatmul.mubr.bf16.gmra.mrb[28].mxu0 %v17815_v9  ;;  %12621 = vmatmul.mubr.bf16.gmra.mrb[28].mxu1 %v17815_v9 }
 0x47b   :  { %10626 = vmatpush1.bf16.msra.mxu0 %v17816_v10  ;;  %12660 = vmatpush1.bf16.msra.mxu1 %v17819_v11 }
 0x47c   :  { %10627 = vmatprep.subr.bf16.mxu0 %v17824_v12  ;;  %12661 = vmatprep.subr.bf16.mxu1 %v17827_v13 }
 0x47d   :  { %10629 = vmatprep.mubr.bf16.mxu0 %v17830_v14  ;;  %12663 = vmatprep.mubr.bf16.mxu1 %v17830_v14 }
 0x47f   :  { %10628 = vmatpush1.bf16.msra.mxu0 %v17822_v15  ;;  %12662 = vmatpush1.bf16.msra.mxu1 %v17825_v16 }
 0x482   :  { %10630 = vmatmul.mubr.bf16.vlgmr.msra.gmra.mrb[0].mxu0 %v17828_v17  ;;  %12664 = vmatmul.mubr.bf16.vlgmr.msra.gmra.mrb[0].mxu1 %v17828_v17 }
 0x483   :  { %10639 = vmatprep.mubr.bf16.mxu0 %v17831_v18  ;;  %12673 = vmatprep.mubr.bf16.mxu1 %v17831_v18 }
 0x48a   :  { %10640 = vmatmul.mubr.bf16.gmra.mrb[4].mxu0 %v17833_v19  ;;  %12674 = vmatmul.mubr.bf16.gmra.mrb[4].mxu1 %v17833_v19 }
 0x48b   :  { %10649 = vmatprep.mubr.bf16.mxu0 %v17834_v20  ;;  %12683 = vmatprep.mubr.bf16.mxu1 %v17834_v20 }
 0x492   :  { %10650 = vmatmul.mubr.bf16.gmra.mrb[8].mxu0 %v17836_v21  ;;  %12684 = vmatmul.mubr.bf16.gmra.mrb[8].mxu1 %v17836_v21 }
 0x493   :  { %10659 = vmatprep.mubr.bf16.mxu0 %v17837_v22  ;;  %12693 = vmatprep.mubr.bf16.mxu1 %v17837_v22 }
 0x49a   :  { %10660 = vmatmul.mubr.bf16.gmra.mrb[12].mxu0 %v17839_v23  ;;  %12694 = vmatmul.mubr.bf16.gmra.mrb[12].mxu1 %v17839_v23 }
 0x49b   :  { %10669 = vmatprep.mubr.bf16.mxu0 %v17840_v24  ;;  %12703 = vmatprep.mubr.bf16.mxu1 %v17840_v24 }
 0x4a2   :  { %10670 = vmatmul.mubr.bf16.gmra.mrb[16].mxu0 %v17842_v25  ;;  %12704 = vmatmul.mubr.bf16.gmra.mrb[16].mxu1 %v17842_v25 }
 0x4a3   :  { %10679 = vmatprep.mubr.bf16.mxu0 %v17843_v26  ;;  %12713 = vmatprep.mubr.bf16.mxu1 %v17843_v26 }
 0x4aa   :  { %10680 = vmatmul.mubr.bf16.gmra.mrb[20].mxu0 %v17845_v27  ;;  %12714 = vmatmul.mubr.bf16.gmra.mrb[20].mxu1 %v17845_v27 }
 0x4ab   :  { %10689 = vmatprep.mubr.bf16.mxu0 %v17846_v28  ;;  %12723 = vmatprep.mubr.bf16.mxu1 %v17846_v28 }
 0x4b2   :  { %10690 = vmatmul.mubr.bf16.gmra.mrb[24].mxu0 %v17848_v29  ;;  %12724 = vmatmul.mubr.bf16.gmra.mrb[24].mxu1 %v17848_v29 }
 0x4b3   :  { %10699 = vmatprep.mubr.bf16.mxu0 %v17849_v30  ;;  %12733 = vmatprep.mubr.bf16.mxu1 %v17849_v30 }
 0x4ba   :  { %10700 = vmatmul.mubr.bf16.gmra.mrb[28].mxu0 %v17851_v31  ;;  %12734 = vmatmul.mubr.bf16.gmra.mrb[28].mxu1 %v17851_v31 }
 0x555   :  { %v10631_v43 = vpop.f32.mrb[0].mxu0  ;;  %v12665_v44 = vpop.f32.mrb[0].mxu1 }
 0x556   :  { %v14540_v45 = vadd.f32 %v10631_v43, %v22195_v39  ;;  %v14572_v46 = vadd.f32 %v12665_v44, %v22197_v40  ;;  %v10633_v47 = vpop.f32.mrb[1].mxu0  ;;  %v12667_v48 = vpop.f32.mrb[1].mxu1 }
 0x557   :  { %v14541_v49 = vadd.f32 %v10633_v47, %v22199_v41  ;;  %v14573_v50 = vadd.f32 %v12667_v48, %v22201_v42  ;;  %v10635_v51 = vpop.f32.mrb[2].mxu0  ;;  %v12669_v52 = vpop.f32.mrb[2].mxu1 }
 0x558   :  { %v12744_v53 = vmax.f32 %v14540_v45, 0.0  ;;  %v12746_v54 = vmax.f32 %v14572_v46, 0.0  ;;  %v14542_v55 = vadd.f32 %v10635_v51, %v22195_v39  ;;  %v14574_v56 = vadd.f32 %v12669_v52, %v22197_v40  ;;  %v10637_v57 = vpop.f32.mrb[3].mxu0  ;;  %v12671_v58 = vpop.f32.mrb[3].mxu1 }
 0x559   :  { %v12745_v59 = vmax.f32 %v14541_v49, 0.0  ;;  %v12747_v60 = vmax.f32 %v14573_v50, 0.0  ;;  %v14543_v61 = vadd.f32 %v10637_v57, %v22199_v41  ;;  %v14575_v62 = vadd.f32 %v12671_v58, %v22201_v42 }
 0x55a   :  { %v12748_v63 = vmax.f32 %v14542_v55, 0.0  ;;  %v12750_v0 = vmax.f32 %v14574_v56, 0.0 }
 0x55b   :  { %v14508_v1 = vpack.c.bf16 %v12745_v59, %v12744_v53  ;;  %v14509_v2 = vpack.c.bf16 %v12747_v60, %v12746_v54  ;;  %v12749_v3 = vmax.f32 %v14543_v61, 0.0  ;;  %v12751_v4 = vmax.f32 %v14575_v62, 0.0 }
 0x55d   :  { %13000 = vst [vmem:[%s22366_s3] sm:$0xff] %v14508_v1  ;;  %13001 = vst [vmem:[%s22366_s3 + $0x8] sm:$0xff] %v14509_v2  ;;  %v14510_v5 = vpack.c.bf16 %v12749_v3, %v12748_v63  ;;  %v14511_v6 = vpack.c.bf16 %v12751_v4, %v12750_v0  ;;  %v10641_v7 = vpop.f32.mrb[4].mxu0  ;;  %v12675_v8 = vpop.f32.mrb[4].mxu1 }
 0x55e   :  { %v14544_v9 = vadd.f32 %v10641_v7, %v22195_v39  ;;  %v14576_v10 = vadd.f32 %v12675_v8, %v22197_v40  ;;  %v10643_v11 = vpop.f32.mrb[5].mxu0  ;;  %v12677_v12 = vpop.f32.mrb[5].mxu1 }
 0x55f   :  { %13002 = vst [vmem:[%s22366_s3 + $0x10] sm:$0xff] %v14510_v5  ;;  %13003 = vst [vmem:[%s22366_s3 + $0x18] sm:$0xff] %v14511_v6  ;;  %v14545_v13 = vadd.f32 %v10643_v11, %v22199_v41  ;;  %v14577_v14 = vadd.f32 %v12677_v12, %v22201_v42  ;;  %v10645_v15 = vpop.f32.mrb[6].mxu0  ;;  %v12679_v16 = vpop.f32.mrb[6].mxu1 }
 0x560   :  { %v12752_v17 = vmax.f32 %v14544_v9, 0.0  ;;  %v12754_v18 = vmax.f32 %v14576_v10, 0.0  ;;  %v14546_v19 = vadd.f32 %v10645_v15, %v22195_v39  ;;  %v14578_v20 = vadd.f32 %v12679_v16, %v22197_v40  ;;  %v10647_v21 = vpop.f32.mrb[7].mxu0  ;;  %v12681_v22 = vpop.f32.mrb[7].mxu1 }
 0x561   :  { %v12753_v23 = vmax.f32 %v14545_v13, 0.0  ;;  %v12755_v24 = vmax.f32 %v14577_v14, 0.0  ;;  %v14547_v25 = vadd.f32 %v10647_v21, %v22199_v41  ;;  %v14579_v26 = vadd.f32 %v12681_v22, %v22201_v42 }
 0x562   :  { %v12756_v27 = vmax.f32 %v14546_v19, 0.0  ;;  %v12758_v28 = vmax.f32 %v14578_v20, 0.0 }
 0x563   :  { %v14512_v29 = vpack.c.bf16 %v12753_v23, %v12752_v17  ;;  %v14513_v30 = vpack.c.bf16 %v12755_v24, %v12754_v18  ;;  %v12757_v31 = vmax.f32 %v14547_v25, 0.0  ;;  %v12759_v32 = vmax.f32 %v14579_v26, 0.0 }
 0x565   :  { %13004 = vst [vmem:[%s22366_s3 + $0x20] sm:$0xff] %v14512_v29  ;;  %13005 = vst [vmem:[%s22366_s3 + $0x28] sm:$0xff] %v14513_v30  ;;  %v14514_v33 = vpack.c.bf16 %v12757_v31, %v12756_v27  ;;  %v14515_v34 = vpack.c.bf16 %v12759_v32, %v12758_v28  ;;  %v10651_v35 = vpop.f32.mrb[8].mxu0  ;;  %v12685_v36 = vpop.f32.mrb[8].mxu1 }
 0x566   :  { %v14548_v37 = vadd.f32 %v10651_v35, %v22195_v39  ;;  %v14580_v38 = vadd.f32 %v12685_v36, %v22197_v40  ;;  %v10653_v43 = vpop.f32.mrb[9].mxu0  ;;  %v12687_v44 = vpop.f32.mrb[9].mxu1 }
 0x567   :  { %13006 = vst [vmem:[%s22366_s3 + $0x30] sm:$0xff] %v14514_v33  ;;  %13007 = vst [vmem:[%s22366_s3 + $0x38] sm:$0xff] %v14515_v34  ;;  %v14549_v45 = vadd.f32 %v10653_v43, %v22199_v41  ;;  %v14581_v46 = vadd.f32 %v12687_v44, %v22201_v42  ;;  %v10655_v47 = vpop.f32.mrb[10].mxu0  ;;  %v12689_v48 = vpop.f32.mrb[10].mxu1 }
 0x568   :  { %v12760_v49 = vmax.f32 %v14548_v37, 0.0  ;;  %v12762_v50 = vmax.f32 %v14580_v38, 0.0  ;;  %v14550_v51 = vadd.f32 %v10655_v47, %v22195_v39  ;;  %v14582_v52 = vadd.f32 %v12689_v48, %v22197_v40  ;;  %v10657_v53 = vpop.f32.mrb[11].mxu0  ;;  %v12691_v54 = vpop.f32.mrb[11].mxu1 }
 0x569   :  { %v12761_v55 = vmax.f32 %v14549_v45, 0.0  ;;  %v12763_v56 = vmax.f32 %v14581_v46, 0.0  ;;  %v14551_v57 = vadd.f32 %v10657_v53, %v22199_v41  ;;  %v14583_v58 = vadd.f32 %v12691_v54, %v22201_v42 }
 0x56a   :  { %v12764_v59 = vmax.f32 %v14550_v51, 0.0  ;;  %v12766_v60 = vmax.f32 %v14582_v52, 0.0 }
 0x56b   :  { %v14516_v61 = vpack.c.bf16 %v12761_v55, %v12760_v49  ;;  %v14517_v62 = vpack.c.bf16 %v12763_v56, %v12762_v50  ;;  %v12765_v63 = vmax.f32 %v14551_v57, 0.0  ;;  %v12767_v0 = vmax.f32 %v14583_v58, 0.0 }
 0x56d   :  { %13008 = vst [vmem:[%s22366_s3 + $0x40] sm:$0xff] %v14516_v61  ;;  %13009 = vst [vmem:[%s22366_s3 + $0x48] sm:$0xff] %v14517_v62  ;;  %v14518_v1 = vpack.c.bf16 %v12765_v63, %v12764_v59  ;;  %v14519_v2 = vpack.c.bf16 %v12767_v0, %v12766_v60  ;;  %v10661_v3 = vpop.f32.mrb[12].mxu0  ;;  %v12695_v4 = vpop.f32.mrb[12].mxu1 }
 0x56e   :  { %v14552_v5 = vadd.f32 %v10661_v3, %v22195_v39  ;;  %v14584_v6 = vadd.f32 %v12695_v4, %v22197_v40  ;;  %v10663_v7 = vpop.f32.mrb[13].mxu0  ;;  %v12697_v8 = vpop.f32.mrb[13].mxu1 }
 0x56f   :  { %13010 = vst [vmem:[%s22366_s3 + $0x50] sm:$0xff] %v14518_v1  ;;  %13011 = vst [vmem:[%s22366_s3 + $0x58] sm:$0xff] %v14519_v2  ;;  %v14553_v9 = vadd.f32 %v10663_v7, %v22199_v41  ;;  %v14585_v10 = vadd.f32 %v12697_v8, %v22201_v42  ;;  %v10665_v11 = vpop.f32.mrb[14].mxu0  ;;  %v12699_v12 = vpop.f32.mrb[14].mxu1 }
 0x570   :  { %v12768_v13 = vmax.f32 %v14552_v5, 0.0  ;;  %v12770_v14 = vmax.f32 %v14584_v6, 0.0  ;;  %v14554_v15 = vadd.f32 %v10665_v11, %v22195_v39  ;;  %v14586_v16 = vadd.f32 %v12699_v12, %v22197_v40  ;;  %v10667_v17 = vpop.f32.mrb[15].mxu0  ;;  %v12701_v18 = vpop.f32.mrb[15].mxu1 }
 0x571   :  { %v12769_v19 = vmax.f32 %v14553_v9, 0.0  ;;  %v12771_v20 = vmax.f32 %v14585_v10, 0.0  ;;  %v14555_v21 = vadd.f32 %v10667_v17, %v22199_v41  ;;  %v14587_v22 = vadd.f32 %v12701_v18, %v22201_v42 }
 0x572   :  { %v12772_v23 = vmax.f32 %v14554_v15, 0.0  ;;  %v12774_v24 = vmax.f32 %v14586_v16, 0.0 }
 0x573   :  { %v14520_v25 = vpack.c.bf16 %v12769_v19, %v12768_v13  ;;  %v14521_v26 = vpack.c.bf16 %v12771_v20, %v12770_v14  ;;  %v12773_v27 = vmax.f32 %v14555_v21, 0.0  ;;  %v12775_v28 = vmax.f32 %v14587_v22, 0.0 }
 0x575   :  { %13012 = vst [vmem:[%s22366_s3 + $0x60] sm:$0xff] %v14520_v25  ;;  %13013 = vst [vmem:[%s22366_s3 + $0x68] sm:$0xff] %v14521_v26  ;;  %v14522_v29 = vpack.c.bf16 %v12773_v27, %v12772_v23  ;;  %v14523_v30 = vpack.c.bf16 %v12775_v28, %v12774_v24  ;;  %v10671_v31 = vpop.f32.mrb[16].mxu0  ;;  %v12705_v32 = vpop.f32.mrb[16].mxu1 }
 0x576   :  { %v14556_v33 = vadd.f32 %v10671_v31, %v22195_v39  ;;  %v14588_v34 = vadd.f32 %v12705_v32, %v22197_v40  ;;  %v10673_v35 = vpop.f32.mrb[17].mxu0  ;;  %v12707_v36 = vpop.f32.mrb[17].mxu1 }
 0x577   :  { %13014 = vst [vmem:[%s22366_s3 + $0x70] sm:$0xff] %v14522_v29  ;;  %13015 = vst [vmem:[%s22366_s3 + $0x78] sm:$0xff] %v14523_v30  ;;  %v14557_v37 = vadd.f32 %v10673_v35, %v22199_v41  ;;  %v14589_v38 = vadd.f32 %v12707_v36, %v22201_v42  ;;  %v10675_v43 = vpop.f32.mrb[18].mxu0  ;;  %v12709_v44 = vpop.f32.mrb[18].mxu1 }
 0x578   :  { %v12776_v45 = vmax.f32 %v14556_v33, 0.0  ;;  %v12778_v46 = vmax.f32 %v14588_v34, 0.0  ;;  %v14558_v47 = vadd.f32 %v10675_v43, %v22195_v39  ;;  %v14590_v48 = vadd.f32 %v12709_v44, %v22197_v40  ;;  %v10677_v49 = vpop.f32.mrb[19].mxu0  ;;  %v12711_v50 = vpop.f32.mrb[19].mxu1 }
 0x579   :  { %v12777_v51 = vmax.f32 %v14557_v37, 0.0  ;;  %v12779_v52 = vmax.f32 %v14589_v38, 0.0  ;;  %v14559_v53 = vadd.f32 %v10677_v49, %v22199_v41  ;;  %v14591_v54 = vadd.f32 %v12711_v50, %v22201_v42 }
 0x57a   :  { %v12780_v55 = vmax.f32 %v14558_v47, 0.0  ;;  %v12782_v56 = vmax.f32 %v14590_v48, 0.0 }
 0x57b   :  { %v14524_v57 = vpack.c.bf16 %v12777_v51, %v12776_v45  ;;  %v14525_v58 = vpack.c.bf16 %v12779_v52, %v12778_v46  ;;  %v12781_v59 = vmax.f32 %v14559_v53, 0.0  ;;  %v12783_v60 = vmax.f32 %v14591_v54, 0.0 }
 0x57d   :  { %13016 = vst [vmem:[%s22366_s3 + $0x80] sm:$0xff] %v14524_v57  ;;  %13017 = vst [vmem:[%s22366_s3 + $0x88] sm:$0xff] %v14525_v58  ;;  %v14526_v61 = vpack.c.bf16 %v12781_v59, %v12780_v55  ;;  %v14527_v62 = vpack.c.bf16 %v12783_v60, %v12782_v56  ;;  %v10681_v63 = vpop.f32.mrb[20].mxu0  ;;  %v12715_v0 = vpop.f32.mrb[20].mxu1 }
 0x57e   :  { %v14560_v1 = vadd.f32 %v10681_v63, %v22195_v39  ;;  %v14592_v2 = vadd.f32 %v12715_v0, %v22197_v40  ;;  %v10683_v3 = vpop.f32.mrb[21].mxu0  ;;  %v12717_v4 = vpop.f32.mrb[21].mxu1 }
 0x57f   :  { %13018 = vst [vmem:[%s22366_s3 + $0x90] sm:$0xff] %v14526_v61  ;;  %13019 = vst [vmem:[%s22366_s3 + $0x98] sm:$0xff] %v14527_v62  ;;  %v14561_v5 = vadd.f32 %v10683_v3, %v22199_v41  ;;  %v14593_v6 = vadd.f32 %v12717_v4, %v22201_v42  ;;  %v10685_v7 = vpop.f32.mrb[22].mxu0  ;;  %v12719_v8 = vpop.f32.mrb[22].mxu1 }
 0x580   :  { %v12784_v9 = vmax.f32 %v14560_v1, 0.0  ;;  %v12786_v10 = vmax.f32 %v14592_v2, 0.0  ;;  %v14562_v11 = vadd.f32 %v10685_v7, %v22195_v39  ;;  %v14594_v12 = vadd.f32 %v12719_v8, %v22197_v40  ;;  %v10687_v13 = vpop.f32.mrb[23].mxu0  ;;  %v12721_v14 = vpop.f32.mrb[23].mxu1 }
 0x581   :  { %v12785_v15 = vmax.f32 %v14561_v5, 0.0  ;;  %v12787_v16 = vmax.f32 %v14593_v6, 0.0  ;;  %v14563_v17 = vadd.f32 %v10687_v13, %v22199_v41  ;;  %v14595_v18 = vadd.f32 %v12721_v14, %v22201_v42 }
 0x582   :  { %v12788_v19 = vmax.f32 %v14562_v11, 0.0  ;;  %v12790_v20 = vmax.f32 %v14594_v12, 0.0 }
 0x583   :  { %v14528_v21 = vpack.c.bf16 %v12785_v15, %v12784_v9  ;;  %v14529_v22 = vpack.c.bf16 %v12787_v16, %v12786_v10  ;;  %v12789_v23 = vmax.f32 %v14563_v17, 0.0  ;;  %v12791_v24 = vmax.f32 %v14595_v18, 0.0 }
 0x585   :  { %13020 = vst [vmem:[%s22366_s3 + $0xa0] sm:$0xff] %v14528_v21  ;;  %13021 = vst [vmem:[%s22366_s3 + $0xa8] sm:$0xff] %v14529_v22  ;;  %v14530_v25 = vpack.c.bf16 %v12789_v23, %v12788_v19  ;;  %v14531_v26 = vpack.c.bf16 %v12791_v24, %v12790_v20  ;;  %v10691_v27 = vpop.f32.mrb[24].mxu0  ;;  %v12725_v28 = vpop.f32.mrb[24].mxu1 }
 0x586   :  { %v14564_v29 = vadd.f32 %v10691_v27, %v22195_v39  ;;  %v14596_v30 = vadd.f32 %v12725_v28, %v22197_v40  ;;  %v10693_v31 = vpop.f32.mrb[25].mxu0  ;;  %v12727_v32 = vpop.f32.mrb[25].mxu1 }
 0x587   :  { %13022 = vst [vmem:[%s22366_s3 + $0xb0] sm:$0xff] %v14530_v25  ;;  %13023 = vst [vmem:[%s22366_s3 + $0xb8] sm:$0xff] %v14531_v26  ;;  %v14565_v33 = vadd.f32 %v10693_v31, %v22199_v41  ;;  %v14597_v34 = vadd.f32 %v12727_v32, %v22201_v42  ;;  %v10695_v35 = vpop.f32.mrb[26].mxu0  ;;  %v12729_v36 = vpop.f32.mrb[26].mxu1 }
 0x588   :  { %v12792_v37 = vmax.f32 %v14564_v29, 0.0  ;;  %v12794_v38 = vmax.f32 %v14596_v30, 0.0  ;;  %v14566_v43 = vadd.f32 %v10695_v35, %v22195_v39  ;;  %v14598_v44 = vadd.f32 %v12729_v36, %v22197_v40  ;;  %v10697_v45 = vpop.f32.mrb[27].mxu0  ;;  %v12731_v46 = vpop.f32.mrb[27].mxu1 }
 0x589   :  { %v12793_v47 = vmax.f32 %v14565_v33, 0.0  ;;  %v12795_v48 = vmax.f32 %v14597_v34, 0.0  ;;  %v14567_v49 = vadd.f32 %v10697_v45, %v22199_v41  ;;  %v14599_v50 = vadd.f32 %v12731_v46, %v22201_v42 }
 0x58a   :  { %v12796_v51 = vmax.f32 %v14566_v43, 0.0  ;;  %v12798_v52 = vmax.f32 %v14598_v44, 0.0 }
 0x58b   :  { %v14532_v53 = vpack.c.bf16 %v12793_v47, %v12792_v37  ;;  %v14533_v54 = vpack.c.bf16 %v12795_v48, %v12794_v38  ;;  %v12797_v55 = vmax.f32 %v14567_v49, 0.0  ;;  %v12799_v56 = vmax.f32 %v14599_v50, 0.0 }
 0x58d   :  { %13024 = vst [vmem:[%s22366_s3 + $0xc0] sm:$0xff] %v14532_v53  ;;  %13025 = vst [vmem:[%s22366_s3 + $0xc8] sm:$0xff] %v14533_v54  ;;  %v14534_v57 = vpack.c.bf16 %v12797_v55, %v12796_v51  ;;  %v14535_v58 = vpack.c.bf16 %v12799_v56, %v12798_v52  ;;  %v10701_v59 = vpop.f32.mrb[28].mxu0  ;;  %v12735_v60 = vpop.f32.mrb[28].mxu1 }
 0x58e   :  { %v14568_v61 = vadd.f32 %v10701_v59, %v22195_v39  ;;  %v14600_v62 = vadd.f32 %v12735_v60, %v22197_v40  ;;  %v10703_v63 = vpop.f32.mrb[29].mxu0  ;;  %v12737_v0 = vpop.f32.mrb[29].mxu1 }
 0x58f   :  { %13026 = vst [vmem:[%s22366_s3 + $0xd0] sm:$0xff] %v14534_v57  ;;  %13027 = vst [vmem:[%s22366_s3 + $0xd8] sm:$0xff] %v14535_v58  ;;  %v14569_v1 = vadd.f32 %v10703_v63, %v22199_v41  ;;  %v14601_v2 = vadd.f32 %v12737_v0, %v22201_v42  ;;  %v10705_v3 = vpop.f32.mrb[30].mxu0  ;;  %v12739_v4 = vpop.f32.mrb[30].mxu1 }
 0x590   :  { %v12800_v5 = vmax.f32 %v14568_v61, 0.0  ;;  %v12802_v6 = vmax.f32 %v14600_v62, 0.0  ;;  %v14570_v7 = vadd.f32 %v10705_v3, %v22195_v39  ;;  %v14602_v8 = vadd.f32 %v12739_v4, %v22197_v40  ;;  %v10707_v9 = vpop.f32.mrb[31].mxu0  ;;  %v12741_v10 = vpop.f32.mrb[31].mxu1 }
 0x591   :  { %v12801_v11 = vmax.f32 %v14569_v1, 0.0  ;;  %v12803_v12 = vmax.f32 %v14601_v2, 0.0  ;;  %v14571_v13 = vadd.f32 %v10707_v9, %v22199_v41  ;;  %v14603_v14 = vadd.f32 %v12741_v10, %v22201_v42 }
 0x592   :  { %v12804_v15 = vmax.f32 %v14570_v7, 0.0  ;;  %v12806_v16 = vmax.f32 %v14602_v8, 0.0 }
 0x593   :  { %v14536_v17 = vpack.c.bf16 %v12801_v11, %v12800_v5  ;;  %v14537_v18 = vpack.c.bf16 %v12803_v12, %v12802_v6  ;;  %v12805_v19 = vmax.f32 %v14571_v13, 0.0  ;;  %v12807_v20 = vmax.f32 %v14603_v14, 0.0 }
 0x595   :  { %13028 = vst [vmem:[%s22366_s3 + $0xe0] sm:$0xff] %v14536_v17  ;;  %13029 = vst [vmem:[%s22366_s3 + $0xe8] sm:$0xff] %v14537_v18  ;;  %v14538_v39 = vpack.c.bf16 %v12805_v19, %v12804_v15  ;;  %v14539_v40 = vpack.c.bf16 %v12807_v20, %v12806_v16 }
 0x597   :  { %13030 = vst [vmem:[%s22366_s3 + $0xf0] sm:$0xff] %v14538_v39  ;;  %13031 = vst [vmem:[%s22366_s3 + $0xf8] sm:$0xff] %v14539_v40 }

</bundles_post_ra>
